<compile_context>
chip_gen: v6e
topology: v6e:2x2x1
jax: 0.10.0
libtpu: 0.0.40
codegen_flags: <defaults>
</compile_context>

<pallas_src>
import functools

import jax
import jax.numpy as jnp
from jax.experimental import pallas as pl
from jax.experimental.pallas import tpu as pltpu

# ----------------------------------------------------------------------------
# Model configuration (small shapes consistent with the bc_lang actor)
# ----------------------------------------------------------------------------
B = 2            # batch
C_IN = 3         # RGB observation channels
C_PAD = 8        # obs channels zero-padded for a contiguous DMA / clean MXU K
H = 16
W = 16
STATE_DIM = 4    # low-dim robot state
LANG_DIM = 32    # language goal embedding dim
F_SIA = 16       # siamese 1x1 conv features
F_CONV = 16      # 3x3 conv features
FC_HIDDEN = 32   # MLP hidden
ACTION_DIM = 8   # action mean dim
F_PAD = 128      # lane-dense padded width for every matmul output


# ----------------------------------------------------------------------------
# Fused Pallas kernel: whole forward pass (all batch elements) in one step
# ----------------------------------------------------------------------------
def _actor_fused_kernel(obs_ref, rs_ref, lang_ref,
                        w_sia_ref, b_sia_ref,
                        w_conv_ref, b_conv_ref,
                        w_gb_ref, b_gb_ref,
                        w1_ref, b1_ref, w2_ref, b2_ref, w3_ref, b3_ref,
                        mu_ref, hc_ref, cp_ref,
                        *, batch, H, W, f_pad, pad, hpad):
    HW = H * W
    f3 = 3 * f_pad
    bf16 = jnp.bfloat16

    # ---- hoisted invariants (done once, not per image / per tap) -----------
    # Zero the vertical halos of the shifted-copies scratch: any conv read that
    # would fall above/below the image lands on these zero rows.
    cp_ref[0:pad, :] = jnp.zeros((pad, f3), bf16)
    cp_ref[pad + HW:pad + HW + pad, :] = jnp.zeros((pad, f3), bf16)
    # Zero the tiny f32 staging halo (only +-1 row of it is ever read, and it
    # is masked anyway; zeroing avoids any NaN-from-stale-VMEM hazard).
    hc_ref[0:hpad, :] = jnp.zeros((hpad, f_pad), jnp.float32)
    hc_ref[hpad + HW:hpad + HW + hpad, :] = jnp.zeros((hpad, f_pad), jnp.float32)

    # Horizontal-validity masks (one per dx, not per tap; no i = k // W math —
    # vertical validity is handled entirely by the zero halo rows).
    j_idx = jax.lax.broadcasted_iota(jnp.int32, (HW, 1), 0) % W
    m_right = j_idx != (W - 1)       # pixel has a right neighbour (dx=+1)
    m_left = j_idx != 0              # pixel has a left  neighbour (dx=-1)

    pooled = []
    for b in range(batch):           # B folded into one grid step (1 TC chips)
        # --- 1) siamese 1x1 conv (bf16 MXU) + ReLU ---------------------------
        x = obs_ref[b].astype(bf16)                                   # (HW, C_PAD)
        h0 = jnp.dot(x, w_sia_ref[...], preferred_element_type=jnp.float32)
        h0 = jnp.maximum(h0 + b_sia_ref[...], 0.0)                    # (HW, F_PAD)

        # --- 2) robot_state channel-concat (pre-embedded in zero lanes) ------
        h_cat = h0 + rs_ref[b:b + 1, :]                               # (HW, F_PAD)

        # --- 3) 3x3 SAME conv -------------------------------------------------
        # Build 3 pre-shifted, pre-masked bf16 copies (dx = 0, +1, -1) packed
        # into the lane groups of cp_ref; every tap then becomes an aligned
        # slice at a dy*W row offset.
        hc_ref[hpad:hpad + HW, :] = h_cat                             # staging
        cp_ref[pad:pad + HW, 0:f_pad] = h_cat.astype(bf16)            # dx = 0
        sh_r = hc_ref[hpad + 1:hpad + 1 + HW, :]                      # value at (i, j+1)
        sh_l = hc_ref[hpad - 1:hpad - 1 + HW, :]                      # value at (i, j-1)
        cp_ref[pad:pad + HW, f_pad:2 * f_pad] = (
            jnp.where(m_right, sh_r, 0.0).astype(bf16))               # dx = +1
        cp_ref[pad:pad + HW, 2 * f_pad:3 * f_pad] = (
            jnp.where(m_left, sh_l, 0.0).astype(bf16))                # dx = -1

        # 3 dots of K=3*F_PAD (dy = -1, 0, +1), dx folded into the K lanes:
        # cuts the 9 FIFO pops / 8 f32 accumulate adds of the per-tap version.
        acc = b_conv_ref[...]                                         # (1, F_PAD)
        for d in range(3):                                            # dy = d - 1
            off = pad + (d - 1) * W
            acc = acc + jnp.dot(cp_ref[off:off + HW, :], w_conv_ref[d],
                                preferred_element_type=jnp.float32)   # (HW, F_PAD)

        # --- 4) FiLM (fused gamma|beta matmul) + ReLU + spatial max-pool ------
        gb = jnp.dot(lang_ref[b:b + 1, :].astype(bf16), w_gb_ref[...],
                     preferred_element_type=jnp.float32) + b_gb_ref[...]
        y = jnp.maximum(acc * gb[:, :f_pad] + gb[:, f_pad:], 0.0)
        pooled.append(jnp.max(y, axis=0, keepdims=True))              # (1, F_PAD)

    # --- 5) FC head fc1 -> fc2 -> out, batched over all images (M = B) -------
    p = jnp.concatenate(pooled, axis=0)                               # (B, F_PAD)
    z = jnp.maximum(jnp.dot(p.astype(bf16), w1_ref[...],
                            preferred_element_type=jnp.float32) + b1_ref[...], 0.0)
    z = jnp.maximum(jnp.dot(z.astype(bf16), w2_ref[...],
                            preferred_element_type=jnp.float32) + b2_ref[...], 0.0)
    mu_ref[...] = jnp.dot(z.astype(bf16), w3_ref[...],
                          preferred_element_type=jnp.float32) + b3_ref[...]


# ----------------------------------------------------------------------------
# Parameters: dense random weights embedded into zero-padded, lane-dense slots
# ----------------------------------------------------------------------------
def init_params(key):
    ks = jax.random.split(key, 7)
    f32, bf16 = jnp.float32, jnp.bfloat16

    def dense(k, fan_in, shape):
        return jax.random.normal(k, shape, f32) / jnp.sqrt(float(fan_in))

    c_cat = F_SIA + STATE_DIM  # conv input channels = siamese feats | robot state

    # 1x1 siamese conv: (C_PAD, F_PAD), only [:C_IN, :F_SIA] is live.
    w_sia = jnp.zeros((C_PAD, F_PAD), f32)
    w_sia = w_sia.at[:C_IN, :F_SIA].set(dense(ks[0], C_IN, (C_IN, F_SIA)))

    # 3x3 conv, re-laid out for the kernel: index d = dy+1 selects the row
    # group, lanes [g*128, g*128+c_cat) hold the input channels of dx group g
    # with g=0 -> dx=0 (dw=1), g=1 -> dx=+1 (dw=2), g=2 -> dx=-1 (dw=0).
    w_std = dense(ks[1], 9 * c_cat, (3, 3, c_cat, F_CONV))
    w_conv = jnp.zeros((3, 3 * F_PAD, F_PAD), f32)
    for d in range(3):
        for g, dw in ((0, 1), (1, 2), (2, 0)):
            w_conv = w_conv.at[d, g * F_PAD:g * F_PAD + c_cat, :F_CONV].set(w_std[d, dw])

    # FiLM gamma|beta fused projection.
    wg = dense(ks[2], LANG_DIM, (LANG_DIM, F_CONV))
    wb = dense(ks[3], LANG_DIM, (LANG_DIM, F_CONV))
    w_gb = jnp.zeros((LANG_DIM, 2 * F_PAD), f32)
    w_gb = w_gb.at[:, :F_CONV].set(wg).at[:, F_PAD:F_PAD + F_CONV].set(wb)

    def embed(w, shape):
        out = jnp.zeros(shape, f32)
        return out.at[tuple(slice(0, s) for s in w.shape)].set(w)

    w_fc1 = embed(dense(ks[4], F_CONV, (F_CONV, FC_HIDDEN)), (F_PAD, F_PAD))
    w_fc2 = embed(dense(ks[5], FC_HIDDEN, (FC_HIDDEN, FC_HIDDEN)), (F_PAD, F_PAD))
    w_out = embed(dense(ks[6], FC_HIDDEN, (FC_HIDDEN, ACTION_DIM)), (F_PAD, F_PAD))

    return {
        "w_sia": w_sia.astype(bf16), "b_sia": jnp.zeros((1, F_PAD), f32),
        "w_conv": w_conv.astype(bf16), "b_conv": jnp.zeros((1, F_PAD), f32),
        "w_gb": w_gb.astype(bf16), "b_gb": jnp.zeros((1, 2 * F_PAD), f32),
        "w_fc1": w_fc1.astype(bf16), "b_fc1": jnp.zeros((1, F_PAD), f32),
        "w_fc2": w_fc2.astype(bf16), "b_fc2": jnp.zeros((1, F_PAD), f32),
        "w_out": w_out.astype(bf16), "b_out": jnp.zeros((1, F_PAD), f32),
    }


# ----------------------------------------------------------------------------
# Actor.forward — one fused pallas_call, whole batch in a single grid step
# ----------------------------------------------------------------------------
def actor_forward(params, observations, robot_state, lang_goal_emb):
    b, c_in, h, w = observations.shape
    hw = h * w
    s_dim = robot_state.shape[-1]
    l_dim = lang_goal_emb.shape[-1]
    pad = ((w + 15) // 16) * 16     # vertical halo rows for the conv copies (>= W)
    hpad = 8                        # staging halo for the +-1 column shift

    # Tiny glue only: NCHW -> (B, H*W, C_PAD) pixels-major with channels
    # zero-padded to 8 (contiguous DMA rows); robot_state pre-embedded into the
    # zero lanes [F_SIA, F_SIA+S) of the padded siamese feature block (exact
    # channel-concat semantics, no (B,H,W,S) HBM broadcast).
    obs = jnp.transpose(observations, (0, 2, 3, 1)).reshape(b, hw, c_in)
    obs = jnp.pad(obs.astype(jnp.float32), ((0, 0), (0, 0), (0, C_PAD - c_in)))
    rs = jnp.pad(robot_state.astype(jnp.float32),
                 ((0, 0), (F_SIA, F_PAD - F_SIA - s_dim)))
    lang = lang_goal_emb.astype(jnp.float32)

    kernel = functools.partial(_actor_fused_kernel, batch=b, H=h, W=w,
                               f_pad=F_PAD, pad=pad, hpad=hpad)

    mu_pad = pl.pallas_call(
        kernel,
        grid=(1,),
        in_specs=[
            pl.BlockSpec((b, hw, C_PAD), lambda i: (0, 0, 0)),       # obs pixels
            pl.BlockSpec((b, F_PAD), lambda i: (0, 0)),              # robot_state (embedded)
            pl.BlockSpec((b, l_dim), lambda i: (0, 0)),              # lang goal emb
            pl.BlockSpec((C_PAD, F_PAD), lambda i: (0, 0)),          # w_sia (1x1 conv)
            pl.BlockSpec((1, F_PAD), lambda i: (0, 0)),              # b_sia
            pl.BlockSpec((3, 3 * F_PAD, F_PAD), lambda i: (0, 0, 0)),  # w_conv (dy groups)
            pl.BlockSpec((1, F_PAD), lambda i: (0, 0)),              # b_conv
            pl.BlockSpec((l_dim, 2 * F_PAD), lambda i: (0, 0)),      # w_gamma|w_beta fused
            pl.BlockSpec((1, 2 * F_PAD), lambda i: (0, 0)),          # b_gamma|b_beta
            pl.BlockSpec((F_PAD, F_PAD), lambda i: (0, 0)),          # w_fc1
            pl.BlockSpec((1, F_PAD), lambda i: (0, 0)),              # b_fc1
            pl.BlockSpec((F_PAD, F_PAD), lambda i: (0, 0)),          # w_fc2
            pl.BlockSpec((1, F_PAD), lambda i: (0, 0)),              # b_fc2
            pl.BlockSpec((F_PAD, F_PAD), lambda i: (0, 0)),          # w_out
            pl.BlockSpec((1, F_PAD), lambda i: (0, 0)),              # b_out
        ],
        out_specs=pl.BlockSpec((b, F_PAD), lambda i: (0, 0)),        # lane-dense mu
        out_shape=jax.ShapeDtypeStruct((b, F_PAD), jnp.float32),
        scratch_shapes=[
            pltpu.VMEM((hw + 2 * hpad, F_PAD), jnp.float32),         # f32 staging (+-1 shift)
            pltpu.VMEM((hw + 2 * pad, 3 * F_PAD), jnp.bfloat16),     # shifted/masked copies
        ],
        compiler_params=pltpu.CompilerParams(
            dimension_semantics=("arbitrary",),
            vmem_limit_bytes=32 * 1024 * 1024,
        ),
    )(obs, rs, lang,
      params["w_sia"], params["b_sia"], params["w_conv"], params["b_conv"],
      params["w_gb"], params["b_gb"],
      params["w_fc1"], params["b_fc1"], params["w_fc2"], params["b_fc2"],
      params["w_out"], params["b_out"])

    return mu_pad[:, :ACTION_DIM]                                    # drop padded lanes


if __name__ == "__main__":
    key = jax.random.PRNGKey(0)
    k_obs, k_state, k_lang, k_params = jax.random.split(key, 4)

    observations = jax.random.normal(k_obs, (B, C_IN, H, W), jnp.float32)
    robot_state = jax.random.normal(k_state, (B, STATE_DIM), jnp.float32)
    lang_goal_emb = jax.random.normal(k_lang, (B, LANG_DIM), jnp.float32)

    params = init_params(k_params)

    mu = jax.jit(actor_forward)(params, observations, robot_state, lang_goal_emb)
    mu = jax.block_until_ready(mu)
    assert mu.shape == (B, ACTION_DIM) and mu.dtype == jnp.float32
    print("KERNEL_OK")
</pallas_src>

<mosaic_0001>
module attributes {stable_mosaic.version = 11 : i64} {
  func.func @_actor_fused_kernel(%arg0: i32, %arg1: memref<2x256x8xf32, #tpu.memory_space<vmem>>, %arg2: memref<2x128xf32, #tpu.memory_space<vmem>>, %arg3: memref<2x32xf32, #tpu.memory_space<vmem>>, %arg4: memref<8x128xbf16, #tpu.memory_space<vmem>>, %arg5: memref<1x128xf32, #tpu.memory_space<vmem>>, %arg6: memref<3x384x128xbf16, #tpu.memory_space<vmem>>, %arg7: memref<1x128xf32, #tpu.memory_space<vmem>>, %arg8: memref<32x256xbf16, #tpu.memory_space<vmem>>, %arg9: memref<1x256xf32, #tpu.memory_space<vmem>>, %arg10: memref<128x128xbf16, #tpu.memory_space<vmem>>, %arg11: memref<1x128xf32, #tpu.memory_space<vmem>>, %arg12: memref<128x128xbf16, #tpu.memory_space<vmem>>, %arg13: memref<1x128xf32, #tpu.memory_space<vmem>>, %arg14: memref<128x128xbf16, #tpu.memory_space<vmem>>, %arg15: memref<1x128xf32, #tpu.memory_space<vmem>>, %arg16: memref<2x128xf32, #tpu.memory_space<vmem>>, %arg17: memref<272x128xf32, #tpu.memory_space<vmem>>, %arg18: memref<288x384xbf16, #tpu.memory_space<vmem>>) attributes {dimension_semantics = [#tpu.dimension_semantics<arbitrary>], iteration_bounds = array<i64: 1>, scalar_prefetch = 0 : i64, scratch_operands = 2 : i64, tpu.core_type = #tpu.core_type<tc>, window_params = [{pipeline_mode = #tpu.pipeline_mode<synchronous>, transform_indices = @transform_0, window_bounds = array<i64: 2, 256, 8>}, {pipeline_mode = #tpu.pipeline_mode<synchronous>, transform_indices = @transform_1, window_bounds = array<i64: 2, 128>}, {pipeline_mode = #tpu.pipeline_mode<synchronous>, transform_indices = @transform_2, window_bounds = array<i64: 2, 32>}, {pipeline_mode = #tpu.pipeline_mode<synchronous>, transform_indices = @transform_3, window_bounds = array<i64: 8, 128>}, {pipeline_mode = #tpu.pipeline_mode<synchronous>, transform_indices = @transform_4, window_bounds = array<i64: 1, 128>}, {pipeline_mode = #tpu.pipeline_mode<synchronous>, transform_indices = @transform_5, window_bounds = array<i64: 3, 384, 128>}, {pipeline_mode = #tpu.pipeline_mode<synchronous>, transform_indices = @transform_6, window_bounds = array<i64: 1, 128>}, {pipeline_mode = #tpu.pipeline_mode<synchronous>, transform_indices = @transform_7, window_bounds = array<i64: 32, 256>}, {pipeline_mode = #tpu.pipeline_mode<synchronous>, transform_indices = @transform_8, window_bounds = array<i64: 1, 256>}, {pipeline_mode = #tpu.pipeline_mode<synchronous>, transform_indices = @transform_9, window_bounds = array<i64: 128, 128>}, {pipeline_mode = #tpu.pipeline_mode<synchronous>, transform_indices = @transform_10, window_bounds = array<i64: 1, 128>}, {pipeline_mode = #tpu.pipeline_mode<synchronous>, transform_indices = @transform_11, window_bounds = array<i64: 128, 128>}, {pipeline_mode = #tpu.pipeline_mode<synchronous>, transform_indices = @transform_12, window_bounds = array<i64: 1, 128>}, {pipeline_mode = #tpu.pipeline_mode<synchronous>, transform_indices = @transform_13, window_bounds = array<i64: 128, 128>}, {pipeline_mode = #tpu.pipeline_mode<synchronous>, transform_indices = @transform_14, window_bounds = array<i64: 1, 128>}, {pipeline_mode = #tpu.pipeline_mode<synchronous>, transform_indices = @transform_15, window_bounds = array<i64: 2, 128>}]} {
    %cst = arith.constant 0.000000e+00 : bf16
    %0 = vector.broadcast %cst : bf16 to vector<16x384xbf16>
    %c0 = arith.constant 0 : index
    %c0_0 = arith.constant 0 : index
    %1 = vector.load %arg18[%c0, %c0_0] : memref<288x384xbf16, #tpu.memory_space<vmem>>, vector<16x384xbf16>
    tpu.vector_store %arg18[%c0, %c0_0], %0 {strides = array<i32>} : memref<288x384xbf16, #tpu.memory_space<vmem>>, vector<16x384xbf16>,
    %cst_1 = arith.constant 0.000000e+00 : bf16
    %2 = vector.broadcast %cst_1 : bf16 to vector<16x384xbf16>
    %c272 = arith.constant 272 : index
    %c0_2 = arith.constant 0 : index
    %3 = vector.load %arg18[%c272, %c0_2] : memref<288x384xbf16, #tpu.memory_space<vmem>>, vector<16x384xbf16>
    tpu.vector_store %arg18[%c272, %c0_2], %2 {strides = array<i32>} : memref<288x384xbf16, #tpu.memory_space<vmem>>, vector<16x384xbf16>,
    %cst_3 = arith.constant 0.000000e+00 : f32
    %4 = vector.broadcast %cst_3 : f32 to vector<8x128xf32>
    %c0_4 = arith.constant 0 : index
    %c0_5 = arith.constant 0 : index
    %5 = vector.load %arg17[%c0_4, %c0_5] : memref<272x128xf32, #tpu.memory_space<vmem>>, vector<8x128xf32>
    tpu.vector_store %arg17[%c0_4, %c0_5], %4 {strides = array<i32>} : memref<272x128xf32, #tpu.memory_space<vmem>>, vector<8x128xf32>,
    %cst_6 = arith.constant 0.000000e+00 : f32
    %6 = vector.broadcast %cst_6 : f32 to vector<8x128xf32>
    %c264 = arith.constant 264 : index
    %c0_7 = arith.constant 0 : index
    %7 = vector.load %arg17[%c264, %c0_7] : memref<272x128xf32, #tpu.memory_space<vmem>>, vector<8x128xf32>
    tpu.vector_store %arg17[%c264, %c0_7], %6 {strides = array<i32>} : memref<272x128xf32, #tpu.memory_space<vmem>>, vector<8x128xf32>,
    %8 = tpu.iota {dimensions = array<i32: 0>} : vector<256x1xi32>
    %c16_i32 = arith.constant 16 : i32
    %c0_i32 = arith.constant 0 : i32
    %9 = arith.cmpi eq, %c16_i32, %c0_i32 : i32
    %c1_i32 = arith.constant 1 : i32
    %10 = arith.select %9, %c1_i32, %c16_i32 : i32
    %11 = vector.broadcast %10 : i32 to vector<256x1xi32>
    %12 = arith.remsi %8, %11 : vector<256x1xi32>
    %c0_i32_8 = arith.constant 0 : i32
    %13 = vector.broadcast %c0_i32_8 : i32 to vector<256x1xi32>
    %14 = arith.cmpi ne, %12, %13 : vector<256x1xi32>
    %c0_i32_9 = arith.constant 0 : i32
    %15 = vector.broadcast %c0_i32_9 : i32 to vector<256x1xi32>
    %16 = arith.cmpi slt, %12, %15 : vector<256x1xi32>
    %c0_i32_10 = arith.constant 0 : i32
    %17 = arith.cmpi slt, %10, %c0_i32_10 : i32
    %18 = vector.broadcast %17 : i1 to vector<256x1xi1>
    %19 = vector.broadcast %18 : vector<256x1xi1> to vector<256x1xi1>
    %20 = arith.xori %16, %19 : vector<256x1xi1>
    %21 = arith.andi %20, %14 : vector<256x1xi1>
    %22 = vector.broadcast %10 : i32 to vector<256x1xi32>
    %23 = arith.addi %12, %22 : vector<256x1xi32>
    %24 = arith.select %21, %23, %12 : vector<256x1xi1>, vector<256x1xi32>
    %c15_i32 = arith.constant 15 : i32
    %25 = vector.broadcast %c15_i32 : i32 to vector<256x1xi32>
    %26 = arith.cmpi ne, %24, %25 : vector<256x1xi32>
    %c0_i32_11 = arith.constant 0 : i32
    %27 = vector.broadcast %c0_i32_11 : i32 to vector<256x1xi32>
    %28 = arith.cmpi ne, %24, %27 : vector<256x1xi32>
    %c0_12 = arith.constant 0 : index
    %c0_13 = arith.constant 0 : index
    %c0_14 = arith.constant 0 : index
    %29 = vector.load %arg1[%c0_12, %c0_13, %c0_14] : memref<2x256x8xf32, #tpu.memory_space<vmem>>, vector<1x256x8xf32>
    %30 = vector.shape_cast %29 : vector<1x256x8xf32> to vector<256x8xf32>
    %31 = arith.truncf %30 : vector<256x8xf32> to vector<256x8xbf16>
    %c0_15 = arith.constant 0 : index
    %c0_16 = arith.constant 0 : index
    %32 = vector.load %arg4[%c0_15, %c0_16] : memref<8x128xbf16, #tpu.memory_space<vmem>>, vector<8x128xbf16>
    %cst_17 = arith.constant dense<0.000000e+00> : vector<256x128xf32>
    %33 = tpu.matmul %31, %32, %cst_17 {dimension_numbers = #tpu.dot_dimension_numbers<[1], [0], [0], [1], [0, 0, 1, 1], [], []>} : vector<256x8xbf16>, vector<8x128xbf16>, vector<256x128xf32> -> vector<256x128xf32>
    %c0_18 = arith.constant 0 : index
    %c0_19 = arith.constant 0 : index
    %34 = vector.load %arg5[%c0_18, %c0_19] : memref<1x128xf32, #tpu.memory_space<vmem>>, vector<1x128xf32>
    %35 = vector.broadcast %34 : vector<1x128xf32> to vector<256x128xf32>
    %36 = arith.addf %33, %35 : vector<256x128xf32>
    %cst_20 = arith.constant 0.000000e+00 : f32
    %37 = vector.broadcast %cst_20 : f32 to vector<256x128xf32>
    %38 = arith.maximumf %36, %37 : vector<256x128xf32>
    %c0_21 = arith.constant 0 : index
    %c0_22 = arith.constant 0 : index
    %39 = vector.load %arg2[%c0_21, %c0_22] : memref<2x128xf32, #tpu.memory_space<vmem>>, vector<1x128xf32>
    %40 = vector.broadcast %39 : vector<1x128xf32> to vector<256x128xf32>
    %41 = arith.addf %38, %40 : vector<256x128xf32>
    %c8 = arith.constant 8 : index
    %c0_23 = arith.constant 0 : index
    %42 = vector.load %arg17[%c8, %c0_23] : memref<272x128xf32, #tpu.memory_space<vmem>>, vector<256x128xf32>
    tpu.vector_store %arg17[%c8, %c0_23], %41 {strides = array<i32>} : memref<272x128xf32, #tpu.memory_space<vmem>>, vector<256x128xf32>,
    %43 = arith.truncf %41 : vector<256x128xf32> to vector<256x128xbf16>
    %c16 = arith.constant 16 : index
    %c0_24 = arith.constant 0 : index
    %44 = vector.load %arg18[%c16, %c0_24] : memref<288x384xbf16, #tpu.memory_space<vmem>>, vector<256x128xbf16>
    tpu.vector_store %arg18[%c16, %c0_24], %43 {strides = array<i32>} : memref<288x384xbf16, #tpu.memory_space<vmem>>, vector<256x128xbf16>,
    %c9 = arith.constant 9 : index
    %c0_25 = arith.constant 0 : index
    %45 = vector.load %arg17[%c9, %c0_25] : memref<272x128xf32, #tpu.memory_space<vmem>>, vector<256x128xf32>
    %c7 = arith.constant 7 : index
    %c0_26 = arith.constant 0 : index
    %46 = vector.load %arg17[%c7, %c0_26] : memref<272x128xf32, #tpu.memory_space<vmem>>, vector<256x128xf32>
    %cst_27 = arith.constant 0.000000e+00 : f32
    %47 = vector.shape_cast %26 : vector<256x1xi1> to vector<256x1xi1>
    %48 = vector.broadcast %47 : vector<256x1xi1> to vector<256x128xi1>
    %49 = vector.broadcast %cst_27 : f32 to vector<256x128xf32>
    %50 = arith.select %48, %45, %49 : vector<256x128xi1>, vector<256x128xf32>
    %51 = arith.truncf %50 : vector<256x128xf32> to vector<256x128xbf16>
    %c16_28 = arith.constant 16 : index
    %c128 = arith.constant 128 : index
    %52 = vector.load %arg18[%c16_28, %c128] : memref<288x384xbf16, #tpu.memory_space<vmem>>, vector<256x128xbf16>
    tpu.vector_store %arg18[%c16_28, %c128], %51 {strides = array<i32>} : memref<288x384xbf16, #tpu.memory_space<vmem>>, vector<256x128xbf16>,
    %cst_29 = arith.constant 0.000000e+00 : f32
    %53 = vector.shape_cast %28 : vector<256x1xi1> to vector<256x1xi1>
    %54 = vector.broadcast %53 : vector<256x1xi1> to vector<256x128xi1>
    %55 = vector.broadcast %cst_29 : f32 to vector<256x128xf32>
    %56 = arith.select %54, %46, %55 : vector<256x128xi1>, vector<256x128xf32>
    %57 = arith.truncf %56 : vector<256x128xf32> to vector<256x128xbf16>
    %c16_30 = arith.constant 16 : index
    %c256 = arith.constant 256 : index
    %58 = vector.load %arg18[%c16_30, %c256] : memref<288x384xbf16, #tpu.memory_space<vmem>>, vector<256x128xbf16>
    tpu.vector_store %arg18[%c16_30, %c256], %57 {strides = array<i32>} : memref<288x384xbf16, #tpu.memory_space<vmem>>, vector<256x128xbf16>,
    %c0_31 = arith.constant 0 : index
    %c0_32 = arith.constant 0 : index
    %59 = vector.load %arg7[%c0_31, %c0_32] : memref<1x128xf32, #tpu.memory_space<vmem>>, vector<1x128xf32>
    %c0_33 = arith.constant 0 : index
    %c0_34 = arith.constant 0 : index
    %60 = vector.load %arg18[%c0_33, %c0_34] : memref<288x384xbf16, #tpu.memory_space<vmem>>, vector<256x384xbf16>
    %c0_35 = arith.constant 0 : index
    %c0_36 = arith.constant 0 : index
    %c0_37 = arith.constant 0 : index
    %61 = vector.load %arg6[%c0_35, %c0_36, %c0_37] : memref<3x384x128xbf16, #tpu.memory_space<vmem>>, vector<1x384x128xbf16>
    %62 = vector.shape_cast %61 : vector<1x384x128xbf16> to vector<384x128xbf16>
    %cst_38 = arith.constant dense<0.000000e+00> : vector<256x128xf32>
    %63 = tpu.matmul %60, %62, %cst_38 {dimension_numbers = #tpu.dot_dimension_numbers<[1], [0], [0], [1], [0, 0, 1, 1], [], []>} : vector<256x384xbf16>, vector<384x128xbf16>, vector<256x128xf32> -> vector<256x128xf32>
    %64 = vector.broadcast %59 : vector<1x128xf32> to vector<256x128xf32>
    %65 = arith.addf %64, %63 : vector<256x128xf32>
    %c16_39 = arith.constant 16 : index
    %c0_40 = arith.constant 0 : index
    %66 = vector.load %arg18[%c16_39, %c0_40] : memref<288x384xbf16, #tpu.memory_space<vmem>>, vector<256x384xbf16>
    %c1 = arith.constant 1 : index
    %c0_41 = arith.constant 0 : index
    %c0_42 = arith.constant 0 : index
    %67 = vector.load %arg6[%c1, %c0_41, %c0_42] : memref<3x384x128xbf16, #tpu.memory_space<vmem>>, vector<1x384x128xbf16>
    %68 = vector.shape_cast %67 : vector<1x384x128xbf16> to vector<384x128xbf16>
    %cst_43 = arith.constant dense<0.000000e+00> : vector<256x128xf32>
    %69 = tpu.matmul %66, %68, %cst_43 {dimension_numbers = #tpu.dot_dimension_numbers<[1], [0], [0], [1], [0, 0, 1, 1], [], []>} : vector<256x384xbf16>, vector<384x128xbf16>, vector<256x128xf32> -> vector<256x128xf32>
    %70 = arith.addf %65, %69 : vector<256x128xf32>
    %c32 = arith.constant 32 : index
    %c0_44 = arith.constant 0 : index
    %71 = vector.load %arg18[%c32, %c0_44] : memref<288x384xbf16, #tpu.memory_space<vmem>>, vector<256x384xbf16>
    %c2 = arith.constant 2 : index
    %c0_45 = arith.constant 0 : index
    %c0_46 = arith.constant 0 : index
    %72 = vector.load %arg6[%c2, %c0_45, %c0_46] : memref<3x384x128xbf16, #tpu.memory_space<vmem>>, vector<1x384x128xbf16>
    %73 = vector.shape_cast %72 : vector<1x384x128xbf16> to vector<384x128xbf16>
    %cst_47 = arith.constant dense<0.000000e+00> : vector<256x128xf32>
    %74 = tpu.matmul %71, %73, %cst_47 {dimension_numbers = #tpu.dot_dimension_numbers<[1], [0], [0], [1], [0, 0, 1, 1], [], []>} : vector<256x384xbf16>, vector<384x128xbf16>, vector<256x128xf32> -> vector<256x128xf32>
    %75 = arith.addf %70, %74 : vector<256x128xf32>
    %c0_48 = arith.constant 0 : index
    %c0_49 = arith.constant 0 : index
    %76 = vector.load %arg3[%c0_48, %c0_49] : memref<2x32xf32, #tpu.memory_space<vmem>>, vector<1x32xf32>
    %77 = arith.truncf %76 : vector<1x32xf32> to vector<1x32xbf16>
    %c0_50 = arith.constant 0 : index
    %c0_51 = arith.constant 0 : index
    %78 = vector.load %arg8[%c0_50, %c0_51] : memref<32x256xbf16, #tpu.memory_space<vmem>>, vector<32x256xbf16>
    %cst_52 = arith.constant dense<0.000000e+00> : vector<1x256xf32>
    %79 = tpu.matmul %77, %78, %cst_52 {dimension_numbers = #tpu.dot_dimension_numbers<[1], [0], [0], [1], [0, 0, 1, 1], [], []>} : vector<1x32xbf16>, vector<32x256xbf16>, vector<1x256xf32> -> vector<1x256xf32>
    %c0_53 = arith.constant 0 : index
    %c0_54 = arith.constant 0 : index
    %80 = vector.load %arg9[%c0_53, %c0_54] : memref<1x256xf32, #tpu.memory_space<vmem>>, vector<1x256xf32>
    %81 = arith.addf %79, %80 : vector<1x256xf32>
    %82 = vector.extract_strided_slice %81 {offsets = [0, 0], sizes = [1, 128], strides = [1, 1]} : vector<1x256xf32> to vector<1x128xf32>
    %83 = vector.broadcast %82 : vector<1x128xf32> to vector<256x128xf32>
    %84 = arith.mulf %75, %83 : vector<256x128xf32>
    %85 = vector.extract_strided_slice %81 {offsets = [0, 128], sizes = [1, 128], strides = [1, 1]} : vector<1x256xf32> to vector<1x128xf32>
    %86 = vector.broadcast %85 : vector<1x128xf32> to vector<256x128xf32>
    %87 = arith.addf %84, %86 : vector<256x128xf32>
    %cst_55 = arith.constant 0.000000e+00 : f32
    %88 = vector.broadcast %cst_55 : f32 to vector<256x128xf32>
    %89 = arith.maximumf %87, %88 : vector<256x128xf32>
    %cst_56 = arith.constant dense<0xFF800000> : vector<128xf32>
    %90 = vector.multi_reduction <maximumf>, %89, %cst_56 [0] : vector<256x128xf32> to vector<128xf32>
    %91 = vector.shape_cast %90 : vector<128xf32> to vector<1x128xf32>
    %c1_57 = arith.constant 1 : index
    %c0_58 = arith.constant 0 : index
    %c0_59 = arith.constant 0 : index
    %92 = vector.load %arg1[%c1_57, %c0_58, %c0_59] : memref<2x256x8xf32, #tpu.memory_space<vmem>>, vector<1x256x8xf32>
    %93 = vector.shape_cast %92 : vector<1x256x8xf32> to vector<256x8xf32>
    %94 = arith.truncf %93 : vector<256x8xf32> to vector<256x8xbf16>
    %c0_60 = arith.constant 0 : index
    %c0_61 = arith.constant 0 : index
    %95 = vector.load %arg4[%c0_60, %c0_61] : memref<8x128xbf16, #tpu.memory_space<vmem>>, vector<8x128xbf16>
    %cst_62 = arith.constant dense<0.000000e+00> : vector<256x128xf32>
    %96 = tpu.matmul %94, %95, %cst_62 {dimension_numbers = #tpu.dot_dimension_numbers<[1], [0], [0], [1], [0, 0, 1, 1], [], []>} : vector<256x8xbf16>, vector<8x128xbf16>, vector<256x128xf32> -> vector<256x128xf32>
    %c0_63 = arith.constant 0 : index
    %c0_64 = arith.constant 0 : index
    %97 = vector.load %arg5[%c0_63, %c0_64] : memref<1x128xf32, #tpu.memory_space<vmem>>, vector<1x128xf32>
    %98 = vector.broadcast %97 : vector<1x128xf32> to vector<256x128xf32>
    %99 = arith.addf %96, %98 : vector<256x128xf32>
    %cst_65 = arith.constant 0.000000e+00 : f32
    %100 = vector.broadcast %cst_65 : f32 to vector<256x128xf32>
    %101 = arith.maximumf %99, %100 : vector<256x128xf32>
    %c1_66 = arith.constant 1 : index
    %c0_67 = arith.constant 0 : index
    %102 = vector.load %arg2[%c1_66, %c0_67] : memref<2x128xf32, #tpu.memory_space<vmem>>, vector<1x128xf32>
    %103 = vector.broadcast %102 : vector<1x128xf32> to vector<256x128xf32>
    %104 = arith.addf %101, %103 : vector<256x128xf32>
    %c8_68 = arith.constant 8 : index
    %c0_69 = arith.constant 0 : index
    %105 = vector.load %arg17[%c8_68, %c0_69] : memref<272x128xf32, #tpu.memory_space<vmem>>, vector<256x128xf32>
    tpu.vector_store %arg17[%c8_68, %c0_69], %104 {strides = array<i32>} : memref<272x128xf32, #tpu.memory_space<vmem>>, vector<256x128xf32>,
    %106 = arith.truncf %104 : vector<256x128xf32> to vector<256x128xbf16>
    %c16_70 = arith.constant 16 : index
    %c0_71 = arith.constant 0 : index
    %107 = vector.load %arg18[%c16_70, %c0_71] : memref<288x384xbf16, #tpu.memory_space<vmem>>, vector<256x128xbf16>
    tpu.vector_store %arg18[%c16_70, %c0_71], %106 {strides = array<i32>} : memref<288x384xbf16, #tpu.memory_space<vmem>>, vector<256x128xbf16>,
    %c9_72 = arith.constant 9 : index
    %c0_73 = arith.constant 0 : index
    %108 = vector.load %arg17[%c9_72, %c0_73] : memref<272x128xf32, #tpu.memory_space<vmem>>, vector<256x128xf32>
    %c7_74 = arith.constant 7 : index
    %c0_75 = arith.constant 0 : index
    %109 = vector.load %arg17[%c7_74, %c0_75] : memref<272x128xf32, #tpu.memory_space<vmem>>, vector<256x128xf32>
    %cst_76 = arith.constant 0.000000e+00 : f32
    %110 = vector.shape_cast %26 : vector<256x1xi1> to vector<256x1xi1>
    %111 = vector.broadcast %110 : vector<256x1xi1> to vector<256x128xi1>
    %112 = vector.broadcast %cst_76 : f32 to vector<256x128xf32>
    %113 = arith.select %111, %108, %112 : vector<256x128xi1>, vector<256x128xf32>
    %114 = arith.truncf %113 : vector<256x128xf32> to vector<256x128xbf16>
    %c16_77 = arith.constant 16 : index
    %c128_78 = arith.constant 128 : index
    %115 = vector.load %arg18[%c16_77, %c128_78] : memref<288x384xbf16, #tpu.memory_space<vmem>>, vector<256x128xbf16>
    tpu.vector_store %arg18[%c16_77, %c128_78], %114 {strides = array<i32>} : memref<288x384xbf16, #tpu.memory_space<vmem>>, vector<256x128xbf16>,
    %cst_79 = arith.constant 0.000000e+00 : f32
    %116 = vector.shape_cast %28 : vector<256x1xi1> to vector<256x1xi1>
    %117 = vector.broadcast %116 : vector<256x1xi1> to vector<256x128xi1>
    %118 = vector.broadcast %cst_79 : f32 to vector<256x128xf32>
    %119 = arith.select %117, %109, %118 : vector<256x128xi1>, vector<256x128xf32>
    %120 = arith.truncf %119 : vector<256x128xf32> to vector<256x128xbf16>
    %c16_80 = arith.constant 16 : index
    %c256_81 = arith.constant 256 : index
    %121 = vector.load %arg18[%c16_80, %c256_81] : memref<288x384xbf16, #tpu.memory_space<vmem>>, vector<256x128xbf16>
    tpu.vector_store %arg18[%c16_80, %c256_81], %120 {strides = array<i32>} : memref<288x384xbf16, #tpu.memory_space<vmem>>, vector<256x128xbf16>,
    %c0_82 = arith.constant 0 : index
    %c0_83 = arith.constant 0 : index
    %122 = vector.load %arg7[%c0_82, %c0_83] : memref<1x128xf32, #tpu.memory_space<vmem>>, vector<1x128xf32>
    %c0_84 = arith.constant 0 : index
    %c0_85 = arith.constant 0 : index
    %123 = vector.load %arg18[%c0_84, %c0_85] : memref<288x384xbf16, #tpu.memory_space<vmem>>, vector<256x384xbf16>
    %c0_86 = arith.constant 0 : index
    %c0_87 = arith.constant 0 : index
    %c0_88 = arith.constant 0 : index
    %124 = vector.load %arg6[%c0_86, %c0_87, %c0_88] : memref<3x384x128xbf16, #tpu.memory_space<vmem>>, vector<1x384x128xbf16>
    %125 = vector.shape_cast %124 : vector<1x384x128xbf16> to vector<384x128xbf16>
    %cst_89 = arith.constant dense<0.000000e+00> : vector<256x128xf32>
    %126 = tpu.matmul %123, %125, %cst_89 {dimension_numbers = #tpu.dot_dimension_numbers<[1], [0], [0], [1], [0, 0, 1, 1], [], []>} : vector<256x384xbf16>, vector<384x128xbf16>, vector<256x128xf32> -> vector<256x128xf32>
    %127 = vector.broadcast %122 : vector<1x128xf32> to vector<256x128xf32>
    %128 = arith.addf %127, %126 : vector<256x128xf32>
    %c16_90 = arith.constant 16 : index
    %c0_91 = arith.constant 0 : index
    %129 = vector.load %arg18[%c16_90, %c0_91] : memref<288x384xbf16, #tpu.memory_space<vmem>>, vector<256x384xbf16>
    %c1_92 = arith.constant 1 : index
    %c0_93 = arith.constant 0 : index
    %c0_94 = arith.constant 0 : index
    %130 = vector.load %arg6[%c1_92, %c0_93, %c0_94] : memref<3x384x128xbf16, #tpu.memory_space<vmem>>, vector<1x384x128xbf16>
    %131 = vector.shape_cast %130 : vector<1x384x128xbf16> to vector<384x128xbf16>
    %cst_95 = arith.constant dense<0.000000e+00> : vector<256x128xf32>
    %132 = tpu.matmul %129, %131, %cst_95 {dimension_numbers = #tpu.dot_dimension_numbers<[1], [0], [0], [1], [0, 0, 1, 1], [], []>} : vector<256x384xbf16>, vector<384x128xbf16>, vector<256x128xf32> -> vector<256x128xf32>
    %133 = arith.addf %128, %132 : vector<256x128xf32>
    %c32_96 = arith.constant 32 : index
    %c0_97 = arith.constant 0 : index
    %134 = vector.load %arg18[%c32_96, %c0_97] : memref<288x384xbf16, #tpu.memory_space<vmem>>, vector<256x384xbf16>
    %c2_98 = arith.constant 2 : index
    %c0_99 = arith.constant 0 : index
    %c0_100 = arith.constant 0 : index
    %135 = vector.load %arg6[%c2_98, %c0_99, %c0_100] : memref<3x384x128xbf16, #tpu.memory_space<vmem>>, vector<1x384x128xbf16>
    %136 = vector.shape_cast %135 : vector<1x384x128xbf16> to vector<384x128xbf16>
    %cst_101 = arith.constant dense<0.000000e+00> : vector<256x128xf32>
    %137 = tpu.matmul %134, %136, %cst_101 {dimension_numbers = #tpu.dot_dimension_numbers<[1], [0], [0], [1], [0, 0, 1, 1], [], []>} : vector<256x384xbf16>, vector<384x128xbf16>, vector<256x128xf32> -> vector<256x128xf32>
    %138 = arith.addf %133, %137 : vector<256x128xf32>
    %c1_102 = arith.constant 1 : index
    %c0_103 = arith.constant 0 : index
    %139 = vector.load %arg3[%c1_102, %c0_103] : memref<2x32xf32, #tpu.memory_space<vmem>>, vector<1x32xf32>
    %140 = arith.truncf %139 : vector<1x32xf32> to vector<1x32xbf16>
    %c0_104 = arith.constant 0 : index
    %c0_105 = arith.constant 0 : index
    %141 = vector.load %arg8[%c0_104, %c0_105] : memref<32x256xbf16, #tpu.memory_space<vmem>>, vector<32x256xbf16>
    %cst_106 = arith.constant dense<0.000000e+00> : vector<1x256xf32>
    %142 = tpu.matmul %140, %141, %cst_106 {dimension_numbers = #tpu.dot_dimension_numbers<[1], [0], [0], [1], [0, 0, 1, 1], [], []>} : vector<1x32xbf16>, vector<32x256xbf16>, vector<1x256xf32> -> vector<1x256xf32>
    %c0_107 = arith.constant 0 : index
    %c0_108 = arith.constant 0 : index
    %143 = vector.load %arg9[%c0_107, %c0_108] : memref<1x256xf32, #tpu.memory_space<vmem>>, vector<1x256xf32>
    %144 = arith.addf %142, %143 : vector<1x256xf32>
    %145 = vector.extract_strided_slice %144 {offsets = [0, 0], sizes = [1, 128], strides = [1, 1]} : vector<1x256xf32> to vector<1x128xf32>
    %146 = vector.broadcast %145 : vector<1x128xf32> to vector<256x128xf32>
    %147 = arith.mulf %138, %146 : vector<256x128xf32>
    %148 = vector.extract_strided_slice %144 {offsets = [0, 128], sizes = [1, 128], strides = [1, 1]} : vector<1x256xf32> to vector<1x128xf32>
    %149 = vector.broadcast %148 : vector<1x128xf32> to vector<256x128xf32>
    %150 = arith.addf %147, %149 : vector<256x128xf32>
    %cst_109 = arith.constant 0.000000e+00 : f32
    %151 = vector.broadcast %cst_109 : f32 to vector<256x128xf32>
    %152 = arith.maximumf %150, %151 : vector<256x128xf32>
    %cst_110 = arith.constant dense<0xFF800000> : vector<128xf32>
    %153 = vector.multi_reduction <maximumf>, %152, %cst_110 [0] : vector<256x128xf32> to vector<128xf32>
    %154 = vector.shape_cast %153 : vector<128xf32> to vector<1x128xf32>
    %155 = tpu.concatenate %91, %154 in 0 : vector<1x128xf32>, vector<1x128xf32> -> vector<2x128xf32>
    %156 = arith.truncf %155 : vector<2x128xf32> to vector<2x128xbf16>
    %c0_111 = arith.constant 0 : index
    %c0_112 = arith.constant 0 : index
    %157 = vector.load %arg10[%c0_111, %c0_112] : memref<128x128xbf16, #tpu.memory_space<vmem>>, vector<128x128xbf16>
    %cst_113 = arith.constant dense<0.000000e+00> : vector<2x128xf32>
    %158 = tpu.matmul %156, %157, %cst_113 {dimension_numbers = #tpu.dot_dimension_numbers<[1], [0], [0], [1], [0, 0, 1, 1], [], []>} : vector<2x128xbf16>, vector<128x128xbf16>, vector<2x128xf32> -> vector<2x128xf32>
    %c0_114 = arith.constant 0 : index
    %c0_115 = arith.constant 0 : index
    %159 = vector.load %arg11[%c0_114, %c0_115] : memref<1x128xf32, #tpu.memory_space<vmem>>, vector<1x128xf32>
    %160 = vector.broadcast %159 : vector<1x128xf32> to vector<2x128xf32>
    %161 = arith.addf %158, %160 : vector<2x128xf32>
    %cst_116 = arith.constant 0.000000e+00 : f32
    %162 = vector.broadcast %cst_116 : f32 to vector<2x128xf32>
    %163 = arith.maximumf %161, %162 : vector<2x128xf32>
    %164 = arith.truncf %163 : vector<2x128xf32> to vector<2x128xbf16>
    %c0_117 = arith.constant 0 : index
    %c0_118 = arith.constant 0 : index
    %165 = vector.load %arg12[%c0_117, %c0_118] : memref<128x128xbf16, #tpu.memory_space<vmem>>, vector<128x128xbf16>
    %cst_119 = arith.constant dense<0.000000e+00> : vector<2x128xf32>
    %166 = tpu.matmul %164, %165, %cst_119 {dimension_numbers = #tpu.dot_dimension_numbers<[1], [0], [0], [1], [0, 0, 1, 1], [], []>} : vector<2x128xbf16>, vector<128x128xbf16>, vector<2x128xf32> -> vector<2x128xf32>
    %c0_120 = arith.constant 0 : index
    %c0_121 = arith.constant 0 : index
    %167 = vector.load %arg13[%c0_120, %c0_121] : memref<1x128xf32, #tpu.memory_space<vmem>>, vector<1x128xf32>
    %168 = vector.broadcast %167 : vector<1x128xf32> to vector<2x128xf32>
    %169 = arith.addf %166, %168 : vector<2x128xf32>
    %cst_122 = arith.constant 0.000000e+00 : f32
    %170 = vector.broadcast %cst_122 : f32 to vector<2x128xf32>
    %171 = arith.maximumf %169, %170 : vector<2x128xf32>
    %172 = arith.truncf %171 : vector<2x128xf32> to vector<2x128xbf16>
    %c0_123 = arith.constant 0 : index
    %c0_124 = arith.constant 0 : index
    %173 = vector.load %arg14[%c0_123, %c0_124] : memref<128x128xbf16, #tpu.memory_space<vmem>>, vector<128x128xbf16>
    %cst_125 = arith.constant dense<0.000000e+00> : vector<2x128xf32>
    %174 = tpu.matmul %172, %173, %cst_125 {dimension_numbers = #tpu.dot_dimension_numbers<[1], [0], [0], [1], [0, 0, 1, 1], [], []>} : vector<2x128xbf16>, vector<128x128xbf16>, vector<2x128xf32> -> vector<2x128xf32>
    %c0_126 = arith.constant 0 : index
    %c0_127 = arith.constant 0 : index
    %175 = vector.load %arg15[%c0_126, %c0_127] : memref<1x128xf32, #tpu.memory_space<vmem>>, vector<1x128xf32>
    %176 = vector.broadcast %175 : vector<1x128xf32> to vector<2x128xf32>
    %177 = arith.addf %174, %176 : vector<2x128xf32>
    %c0_128 = arith.constant 0 : index
    %c0_129 = arith.constant 0 : index
    %178 = vector.load %arg16[%c0_128, %c0_129] : memref<2x128xf32, #tpu.memory_space<vmem>>, vector<2x128xf32>
    tpu.vector_store %arg16[%c0_128, %c0_129], %177 {strides = array<i32>} : memref<2x128xf32, #tpu.memory_space<vmem>>, vector<2x128xf32>,
    return
  }
  func.func @transform_0(%arg0: i32) -> (i32, i32, i32) {
    %c0_i32 = arith.constant 0 : i32
    %c0_i32_0 = arith.constant 0 : i32
    %c0_i32_1 = arith.constant 0 : i32
    %c0_i32_2 = arith.constant 0 : i32
    return %c0_i32, %c0_i32_0, %c0_i32_1 : i32, i32, i32
  }
  func.func @transform_1(%arg0: i32) -> (i32, i32) {
    %c0_i32 = arith.constant 0 : i32
    %c0_i32_0 = arith.constant 0 : i32
    %c0_i32_1 = arith.constant 0 : i32
    return %c0_i32, %c0_i32_0 : i32, i32
  }
  func.func @transform_2(%arg0: i32) -> (i32, i32) {
    %c0_i32 = arith.constant 0 : i32
    %c0_i32_0 = arith.constant 0 : i32
    %c0_i32_1 = arith.constant 0 : i32
    return %c0_i32, %c0_i32_0 : i32, i32
  }
  func.func @transform_3(%arg0: i32) -> (i32, i32) {
    %c0_i32 = arith.constant 0 : i32
    %c0_i32_0 = arith.constant 0 : i32
    %c0_i32_1 = arith.constant 0 : i32
    return %c0_i32, %c0_i32_0 : i32, i32
  }
  func.func @transform_4(%arg0: i32) -> (i32, i32) {
    %c0_i32 = arith.constant 0 : i32
    %c0_i32_0 = arith.constant 0 : i32
    %c0_i32_1 = arith.constant 0 : i32
    return %c0_i32, %c0_i32_0 : i32, i32
  }
  func.func @transform_5(%arg0: i32) -> (i32, i32, i32) {
    %c0_i32 = arith.constant 0 : i32
    %c0_i32_0 = arith.constant 0 : i32
    %c0_i32_1 = arith.constant 0 : i32
    %c0_i32_2 = arith.constant 0 : i32
    return %c0_i32, %c0_i32_0, %c0_i32_1 : i32, i32, i32
  }
  func.func @transform_6(%arg0: i32) -> (i32, i32) {
    %c0_i32 = arith.constant 0 : i32
    %c0_i32_0 = arith.constant 0 : i32
    %c0_i32_1 = arith.constant 0 : i32
    return %c0_i32, %c0_i32_0 : i32, i32
  }
  func.func @transform_7(%arg0: i32) -> (i32, i32) {
    %c0_i32 = arith.constant 0 : i32
    %c0_i32_0 = arith.constant 0 : i32
    %c0_i32_1 = arith.constant 0 : i32
    return %c0_i32, %c0_i32_0 : i32, i32
  }
  func.func @transform_8(%arg0: i32) -> (i32, i32) {
    %c0_i32 = arith.constant 0 : i32
    %c0_i32_0 = arith.constant 0 : i32
    %c0_i32_1 = arith.constant 0 : i32
    return %c0_i32, %c0_i32_0 : i32, i32
  }
  func.func @transform_9(%arg0: i32) -> (i32, i32) {
    %c0_i32 = arith.constant 0 : i32
    %c0_i32_0 = arith.constant 0 : i32
    %c0_i32_1 = arith.constant 0 : i32
    return %c0_i32, %c0_i32_0 : i32, i32
  }
  func.func @transform_10(%arg0: i32) -> (i32, i32) {
    %c0_i32 = arith.constant 0 : i32
    %c0_i32_0 = arith.constant 0 : i32
    %c0_i32_1 = arith.constant 0 : i32
    return %c0_i32, %c0_i32_0 : i32, i32
  }
  func.func @transform_11(%arg0: i32) -> (i32, i32) {
    %c0_i32 = arith.constant 0 : i32
    %c0_i32_0 = arith.constant 0 : i32
    %c0_i32_1 = arith.constant 0 : i32
    return %c0_i32, %c0_i32_0 : i32, i32
  }
  func.func @transform_12(%arg0: i32) -> (i32, i32) {
    %c0_i32 = arith.constant 0 : i32
    %c0_i32_0 = arith.constant 0 : i32
    %c0_i32_1 = arith.constant 0 : i32
    return %c0_i32, %c0_i32_0 : i32, i32
  }
  func.func @transform_13(%arg0: i32) -> (i32, i32) {
    %c0_i32 = arith.constant 0 : i32
    %c0_i32_0 = arith.constant 0 : i32
    %c0_i32_1 = arith.constant 0 : i32
    return %c0_i32, %c0_i32_0 : i32, i32
  }
  func.func @transform_14(%arg0: i32) -> (i32, i32) {
    %c0_i32 = arith.constant 0 : i32
    %c0_i32_0 = arith.constant 0 : i32
    %c0_i32_1 = arith.constant 0 : i32
    return %c0_i32, %c0_i32_0 : i32, i32
  }
  func.func @transform_15(%arg0: i32) -> (i32, i32) {
    %c0_i32 = arith.constant 0 : i32
    %c0_i32_0 = arith.constant 0 : i32
    %c0_i32_1 = arith.constant 0 : i32
    return %c0_i32, %c0_i32_0 : i32, i32
  }
}

</mosaic_0001>

<bundles_post_ra>
// kernel: actor_forward.1
= control target key start
LH: loop header
LB: loop body
LE: loop exit
PB: predicated region body
PF: predicated region fallthrough
CT: control target
= control target key end

     0   :  { %vm14507_vm0 = vcmask 1043456   ;;  %vm14506_vm1 = vcmask 64512   ;;  %v11542_v63 = vmov 0.0   ;;  %s14490_s0 = inlined_call_operand.vmem [shape: f32[2,256,8], index: 0, kind: input, shape index: {}]   ;;  %s14491_s1 = inlined_call_operand.vmem [shape: f32[2,128], index: 1, kind: input, shape index: {}]   ;;  %s14492_s2 = inlined_call_operand.vmem [shape: f32[2,32], index: 2, kind: input, shape index: {}]   ;;  %s14493_s3 = inlined_call_operand.vmem [shape: bf16[8,128], index: 3, kind: input, shape index: {}]   ;;  %s14494_s4 = inlined_call_operand.vmem [shape: f32[1,128], index: 4, kind: input, shape index: {}]   ;;  %s14495_s5 = inlined_call_operand.vmem [shape: bf16[3,384,128], index: 5, kind: input, shape index: {}]   ;;  %s14496_s6 = inlined_call_operand.vmem [shape: f32[1,128], index: 6, kind: input, shape index: {}]   ;;  %s14497_s7 = inlined_call_operand.vmem [shape: bf16[32,256], index: 7, kind: input, shape index: {}]   ;;  %s14498_s8 = inlined_call_operand.vmem [shape: f32[1,256], index: 8, kind: input, shape index: {}]   ;;  %s14499_s9 = inlined_call_operand.vmem [shape: bf16[128,128], index: 9, kind: input, shape index: {}]   ;;  %s14500_s10 = inlined_call_operand.vmem [shape: f32[1,128], index: 10, kind: input, shape index: {}]   ;;  %s14501_s11 = inlined_call_operand.vmem [shape: bf16[128,128], index: 11, kind: input, shape index: {}]   ;;  %s14502_s12 = inlined_call_operand.vmem [shape: f32[1,128], index: 12, kind: input, shape index: {}]   ;;  %s14503_s13 = inlined_call_operand.vmem [shape: bf16[128,128], index: 13, kind: input, shape index: {}]   ;;  %s14504_s14 = inlined_call_operand.vmem [shape: f32[1,128], index: 14, kind: input, shape index: {}]   ;;  %s14505_s15 = inlined_call_operand.hbm [shape: f32[2,128], index: 15, kind: output, shape index: {}]  }
   0x1   :  { %v591_v0 = vld [vmem:[%s14493_s3] sm:$0xf]  ;;  %v544_v2 = vld [vmem:[%s14490_s0 + $0x8] sm:$0xff]  ;;  %v545_v5 = vld [vmem:[%s14490_s0 + $0x10] sm:$0xff]  ;;  %60 = vst [vmem:[#allocation2] sm:$0xff] %v11542_v63 }
   0x2   :  { %v543_v1 = vld [vmem:[%s14490_s0] sm:$0xff]  ;;  %11050 = vmatprep.subr.msk.bf16.mxu0 %vm14507_vm0, %v591_v0  ;;  %v650_v3 = vsel %vm14507_vm0, %v591_v0, 0  ;;  %v546_v6 = vld [vmem:[%s14490_s0 + $0x18] sm:$0xff]  ;;  %v548_v9 = vld [vmem:[%s14490_s0 + $0x28] sm:$0xff]  ;;  %61 = vst [vmem:[#allocation2 + $0x108] sm:$0xff] %v11542_v63 }
   0x3   :  { %v575_v4 = vpack.c.bf16 %v544_v2, %v543_v1  ;;  %v547_v7 = vld [vmem:[%s14490_s0 + $0x20] sm:$0xff]  ;;  %10635 = vmatpush3.bf16.msra.mxu0 %v650_v3  ;;  %v576_v8 = vpack.c.bf16 %v546_v6, %v545_v5  ;;  %v549_v11 = vld [vmem:[%s14490_s0 + $0x30] sm:$0xff]  ;;  %v550_v12 = vld [vmem:[%s14490_s0 + $0x38] sm:$0xff] }
   0x4   :  { %v577_v10 = vpack.c.bf16 %v548_v9, %v547_v7  ;;  %v551_v13 = vld [vmem:[%s14490_s0 + $0x40] sm:$0xff]  ;;  %v552_v14 = vld [vmem:[%s14490_s0 + $0x48] sm:$0xff]  ;;  %v578_v15 = vpack.c.bf16 %v550_v12, %v549_v11  ;;  %v11056_v17 = vld [vmem:[%s14495_s5 + $0xb8] sm:$0xff]  }
   0x5   :  { %10636 = vmatprep.mubr.msk.bf16.mxu0 %vm14506_vm1, %v575_v4  ;;  %v579_v16 = vpack.c.bf16 %v552_v14, %v551_v13  ;;  %v553_v18 = vld [vmem:[%s14490_s0 + $0x50] sm:$0xff]  ;;  %v554_v19 = vld [vmem:[%s14490_s0 + $0x58] sm:$0xff]  ;;  %v555_v21 = vld [vmem:[%s14490_s0 + $0x60] sm:$0xff]  ;;  %10668 = vmatprep.subr.bf16.mxu0 %v11056_v17 }
   0x6   :  { %10637 = vmatmul.mubr.msk.bf16.vlgmr.msra.gmra.mxu0 %vm14506_vm1, %v576_v8  ;;  %v11057_v20 = vld [vmem:[%s14495_s5 + $0xb0] sm:$0xff]   ;;  %v556_v22 = vld [vmem:[%s14490_s0 + $0x68] sm:$0xff]  ;;  %v11060_v24 = vld [vmem:[%s14495_s5 + $0x78] sm:$0xff]   ;;  %v580_v26 = vpack.c.bf16 %v554_v19, %v553_v18 }
   0x7   :  { %10640 = vmatprep.mubr.msk.bf16.mxu0 %vm14506_vm1, %v577_v10  ;;  %10669 = vmatpush3.bf16.msra.mxu0 %v11056_v17  ;;  %v11058_v23 = vld [vmem:[%s14495_s5 + $0xa8] sm:$0xff]   ;;  %v11061_v25 = vld [vmem:[%s14495_s5 + $0x38] sm:$0xff]   ;;  %v11059_v27 = vld [vmem:[%s14495_s5 + $0xa0] sm:$0xff]   ;;  %v581_v29 = vpack.c.bf16 %v556_v22, %v555_v21  ;;  %v11543_v10 = vmov 0  }
   0x8   :  { %10670 = vmatprep.subr.bf16.mxu0 %v11057_v20  ;;  %9774 = vmatprep.subr.bf16.mxu1 %v11060_v24  ;;  %v11062_v28 = vld [vmem:[%s14495_s5 + $0x70] sm:$0xff]   ;;  %v558_v31 = vld [vmem:[%s14490_s0 + $0x78] sm:$0xff]  ;;  %v559_v32 = vld [vmem:[%s14490_s0 + $0x80] sm:$0xff]  ;;  %52 = vst [vmem:[#allocation3] sm:$0xff] %v11543_v10  ;;  %v8757_v11 = vcombine.high %v11543_v10, %v11543_v10  ;;  %v8756_v12 = vcombine.low %v11543_v10, %v11543_v10 }
   0x9   :  { %9775 = vmatpush3.bf16.msra.mxu1 %v11061_v25  ;;  %v557_v30 = vld [vmem:[%s14490_s0 + $0x70] sm:$0xff]  ;;  %v560_v33 = vld [vmem:[%s14490_s0 + $0x88] sm:$0xff]  ;;  %v562_v37 = vld [vmem:[%s14490_s0 + $0x98] sm:$0xff]  ;;  %53 = vst [vmem:[#allocation3 + $0x8] sm:$0xf] %v11543_v10 }
   0xa   :  { %9776 = vmatprep.subr.bf16.mxu1 %v11062_v28  ;;  %v582_v34 = vpack.c.bf16 %v558_v31, %v557_v30  ;;  %v583_v35 = vpack.c.bf16 %v560_v33, %v559_v32  ;;  %v561_v36 = vld [vmem:[%s14490_s0 + $0x90] sm:$0xff]  ;;  %v563_v38 = vld [vmem:[%s14490_s0 + $0xa0] sm:$0xff]  ;;  %v564_v39 = vld [vmem:[%s14490_s0 + $0xa8] sm:$0xff]  ;;  %55 = vst [vmem:[#allocation3 + $0x14] sm:$0xf] %v11543_v10  ;;  %2195 = vmatprep.mubr.bf16.mxu1 %v8757_v11 }
   0xb   :  { %10671 = vmatpush3.bf16.msra.mxu0 %v11057_v20  ;;  %v584_v40 = vpack.c.bf16 %v562_v37, %v561_v36  ;;  %v585_v41 = vpack.c.bf16 %v564_v39, %v563_v38  ;;  %v565_v42 = vld [vmem:[%s14490_s0 + $0xb0] sm:$0xff]  ;;  %v566_v43 = vld [vmem:[%s14490_s0 + $0xb8] sm:$0xff]  ;;  %v567_v44 = vld [vmem:[%s14490_s0 + $0xc0] sm:$0xff]  ;;  %57 = vst [vmem:[#allocation3 + $0x1a0] sm:$0xf] %v11543_v10 }
   0xc   :  { %10672 = vmatprep.subr.bf16.mxu0 %v11058_v23  ;;  %v568_v45 = vld [vmem:[%s14490_s0 + $0xc8] sm:$0xff]  ;;  %v586_v46 = vpack.c.bf16 %v566_v43, %v565_v42  ;;  %v569_v48 = vld [vmem:[%s14490_s0 + $0xd0] sm:$0xff]  ;;  %v570_v49 = vld [vmem:[%s14490_s0 + $0xd8] sm:$0xff]  ;;  %59 = vst [vmem:[#allocation3 + $0x1ac] sm:$0xf] %v11543_v10 }
   0xd   :  { %v587_v47 = vpack.c.bf16 %v568_v45, %v567_v44  ;;  %v571_v50 = vld [vmem:[%s14490_s0 + $0xe0] sm:$0xff]  ;;  %v572_v51 = vld [vmem:[%s14490_s0 + $0xe8] sm:$0xff]  ;;  %v588_v52 = vpack.c.bf16 %v570_v49, %v569_v48  ;;  %v573_v54 = vld [vmem:[%s14490_s0 + $0xf0] sm:$0xff] }
   0xe   :  { %10641 = vmatmul.mubr.msk.bf16.gmra.mxu0 %vm14506_vm1, %v578_v15  ;;  %v589_v53 = vpack.c.bf16 %v572_v51, %v571_v50  ;;  %v574_v55 = vld [vmem:[%s14490_s0 + $0xf8] sm:$0xff]  ;;  %v11063_v57 = vld [vmem:[%s14495_s5 + $0x30] sm:$0xff]   ;;  %v11065_v58 = vld [vmem:[%s14495_s5 + $0x68] sm:$0xff]  }
   0xf   :  { %10644 = vmatprep.mubr.msk.bf16.mxu0 %vm14506_vm1, %v579_v16  ;;  %10673 = vmatpush3.bf16.msra.mxu0 %v11058_v23  ;;  %v590_v56 = vpack.c.bf16 %v574_v55, %v573_v54  ;;  %v11066_v59 = vld [vmem:[%s14495_s5 + $0x28] sm:$0xff]   ;;  %v11067_v60 = vld [vmem:[%s14495_s5 + $0x60] sm:$0xff]   ;;  %v11064_v62 = vld [vmem:[%s14495_s5 + $0x98] sm:$0xff]  }
  0x10   :  { %10674 = vmatprep.subr.bf16.mxu0 %v11059_v27  ;;  %9777 = vmatpush3.bf16.msra.mxu1 %v11063_v57  ;;  %v11068_v61 = vld [vmem:[%s14495_s5 + $0x20] sm:$0xff]   ;;  %v11070_v0 = vld [vmem:[%s14495_s5 + $0x58] sm:$0xff]   ;;  %v11072_v2 = vld [vmem:[%s14495_s5 + $0x50] sm:$0xff]  }
  0x11   :  { %9778 = vmatprep.subr.bf16.mxu1 %v11065_v58  ;;  %v11071_v1 = vld [vmem:[%s14495_s5 + $0x18] sm:$0xff]   ;;  %v11073_v3 = vld [vmem:[%s14495_s5 + $0x10] sm:$0xff]   ;;  %v11075_v4 = vld [vmem:[%s14495_s5 + $0x48] sm:$0xff]  }
  0x12   :  { %v11076_v5 = vld [vmem:[%s14495_s5 + $0x8] sm:$0xff]   ;;  %v11069_v6 = vld [vmem:[%s14495_s5 + $0x90] sm:$0xff]   ;;  %v11077_v7 = vld [vmem:[%s14495_s5 + $0x40] sm:$0xff]  }
  0x13   :  { %10675 = vmatpush3.bf16.msra.mxu0 %v11059_v27  ;;  %v11078_v8 = vld [vmem:[%s14495_s5] sm:$0xff]   ;;  %v11074_v9 = vld [vmem:[%s14495_s5 + $0x88] sm:$0xff]   ;;  %v11081_v15 = vld [vmem:[%s14495_s5 + $0x138] sm:$0xff]  }
  0x14   :  { %9779 = vmatpush3.bf16.msra.mxu1 %v11066_v59  ;;  %10676 = vmatprep.subr.bf16.mxu0 %v11064_v62  ;;  %v11079_v13 = vld [vmem:[%s14495_s5 + $0x80] sm:$0xff]  }
  0x15   :  { %9780 = vmatprep.subr.bf16.mxu1 %v11067_v60  ;;  %v11080_v14 = vld [vmem:[#allocation3 + $0x8] ss:$12 sps:$4 sm:$0xff]  }
  0x16   :  { %10645 = vmatmul.mubr.msk.bf16.gmra.mxu0 %vm14506_vm1, %v580_v26 }
  0x17   :  { %10648 = vmatprep.mubr.msk.bf16.mxu0 %vm14506_vm1, %v581_v29  ;;  %10677 = vmatpush3.bf16.msra.mxu0 %v11064_v62 }
  0x18   :  { %9781 = vmatpush3.bf16.msra.mxu1 %v11068_v61  ;;  %10678 = vmatprep.subr.bf16.mxu0 %v11069_v6 }
  0x19   :  { %9782 = vmatprep.subr.bf16.mxu1 %v11070_v0 }
  0x1b   :  { %10679 = vmatpush3.bf16.msra.mxu0 %v11069_v6 }
  0x1c   :  { %9783 = vmatpush3.bf16.msra.mxu1 %v11071_v1  ;;  %10680 = vmatprep.subr.bf16.mxu0 %v11074_v9 }
  0x1d   :  { %9784 = vmatprep.subr.bf16.mxu1 %v11072_v2 }
  0x1e   :  { %10649 = vmatmul.mubr.msk.bf16.gmra.mxu0 %vm14506_vm1, %v582_v34 }
  0x1f   :  { %10652 = vmatprep.mubr.msk.bf16.mxu0 %vm14506_vm1, %v583_v35  ;;  %10681 = vmatpush3.bf16.msra.mxu0 %v11074_v9 }
  0x20   :  { %9785 = vmatpush3.bf16.msra.mxu1 %v11073_v3  ;;  %10682 = vmatprep.subr.bf16.mxu0 %v11079_v13 }
  0x21   :  { %9786 = vmatprep.subr.bf16.mxu1 %v11075_v4 }
  0x23   :  { %10683 = vmatpush3.bf16.msra.mxu0 %v11079_v13 }
  0x24   :  { %9787 = vmatpush3.bf16.msra.mxu1 %v11076_v5  ;;  %9910 = vmatprep.subr.bf16.mxu0 %v11081_v15 }
  0x25   :  { %9788 = vmatprep.subr.bf16.mxu1 %v11077_v7 }
  0x26   :  { %10653 = vmatmul.mubr.msk.bf16.gmra.mxu0 %vm14506_vm1, %v584_v40 }
  0x27   :  { %10656 = vmatprep.mubr.msk.bf16.mxu0 %vm14506_vm1, %v585_v41 }
  0x28   :  { %9789 = vmatpush3.bf16.msra.mxu1 %v11078_v8 }
  0x2b   :  { %2196 = vmatmul.mubr.bf16.vlgmr.msra.gmra.mxu1 %v8756_v12 }
  0x2e   :  { %10657 = vmatmul.mubr.msk.bf16.gmra.mxu0 %vm14506_vm1, %v586_v46 }
  0x2f   :  { %10660 = vmatprep.mubr.msk.bf16.mxu0 %vm14506_vm1, %v587_v47 }
  0x36   :  { %10661 = vmatmul.mubr.msk.bf16.gmra.mxu0 %vm14506_vm1, %v588_v52 }
  0x37   :  { %10664 = vmatprep.mubr.msk.bf16.mxu0 %vm14506_vm1, %v589_v53 }
  0x3e   :  { %10665 = vmatmul.mubr.msk.bf16.gmra.mxu0 %vm14506_vm1, %v590_v56 }
  0x3f   :  { %10684 = vmatprep.mubr.bf16.mxu0 %v11080_v14 }
  0x40   :  { %20 = vsyncpa [#allocation5], 0  ;;  %v62_v16 = vlaneseq  ;;  %v11150_v17 = vld [vmem:[%s14495_s5 + $0x178] sm:$0xff]   ;;  %v11153_v18 = vld [vmem:[%s14495_s5 + $0x170] sm:$0xff]   ;;  %v14571_v45 = vmov 0  ;;  %v14574_v0 = vmov 0 }
  0x41   :  { %10716 = vmatprep.subr.bf16.mxu1 %v11150_v17  ;;  %v11827_v19 = vld [vmem:[%s14494_s4] ss:$0 sm:$0xff]  ;;  %v11156_v34 = vld [vmem:[%s14495_s5 + $0x168] sm:$0xff]   ;;  %v11161_v10 = vld [vmem:[%s14495_s5 + $0x158] sm:$0xff]   ;;  %v14577_v14 = vmov 0 }
  0x42   :  { %v11829_v20 = vshrl.u32 %v62_v16, 7  ;;  %10717 = vmatpush3.bf16.msra.mxu1 %v11150_v17  ;;  %v11842_v26 = vld [vmem:[%s14491_s1] ss:$0 sm:$0xff]  ;;  %v11164_v17 = vld [vmem:[%s14495_s5 + $0x150] sm:$0xff]  }
  0x43   :  { %10718 = vmatprep.subr.bf16.mxu1 %v11153_v18  ;;  %v11159_v40 = vld [vmem:[%s14495_s5 + $0x160] sm:$0xff]  }
  0x44   :  { %14570 = vst [vmem:[#allocation7_spill] sm:$0xff] %v11829_v20  ;;  %v64_v22 = vadd.s32 8, %v11829_v20  ;;  %v11833_v23 = vadd.s32 16, %v11829_v20  ;;  %v11837_v25 = vadd.s32 24, %v11829_v20  ;;  %v99_v27 = vand.u32 15, %v11829_v20 }
  0x45   :  { %v11846_v29 = vadd.s32 40, %v11829_v20  ;;  %v11849_v30 = vadd.s32 32, %v11829_v20  ;;  %v11852_v31 = vadd.s32 48, %v11829_v20  ;;  %v11859_v37 = vadd.s32 56, %v11829_v20 }
  0x46   :  { %10719 = vmatpush3.bf16.msra.mxu1 %v11153_v18  ;;  %v106_v36 = vand.u32 15, %v64_v22  ;;  %v113_v38 = vand.u32 15, %v11833_v23  ;;  %v11863_v39 = vadd.s32 64, %v11829_v20  ;;  %v120_v44 = vand.u32 15, %v11837_v25 }
  0x47   :  { %10720 = vmatprep.subr.bf16.mxu1 %v11156_v34  ;;  %vm11871_vm2 = vcmp.ne.s32.totalorder %v99_v27, 0  ;;  %v134_v47 = vand.u32 15, %v11846_v29  ;;  %v11877_v48 = vadd.s32 72, %v11829_v20  ;;  %v127_v49 = vand.u32 15, %v11849_v30 }
  0x48   :  { %v14572_v45 = vsel %vm11871_vm2, 4294967295, %v14571_v45  ;;  %v141_v50 = vand.u32 15, %v11852_v31  ;;  %v148_v56 = vand.u32 15, %v11859_v37  ;;  %v11885_v57 = vadd.s32 88, %v11829_v20 }
  0x49   :  { %14573 = vst [vmem:[#allocation8_spill] sm:$0xff] %v14572_v45  ;;  %v155_v58 = vand.u32 15, %v11863_v39  ;;  %v11889_v59 = vadd.s32 80, %v11829_v20  ;;  %vm11893_vm3 = vcmp.ne.s32.totalorder %v106_v36, 15  ;;  %v162_v2 = vand.u32 15, %v11877_v48 }
  0x4a   :  { %10721 = vmatpush3.bf16.msra.mxu1 %v11156_v34  ;;  %v14575_v0 = vsel %vm11893_vm3, 4294967295, %v14574_v0  ;;  %v11899_v3 = vadd.s32 104, %v11829_v20  ;;  %v11902_v4 = vadd.s32 96, %v11829_v20  ;;  %v11905_v5 = vadd.s32 112, %v11829_v20 }
  0x4b   :  { %10722 = vmatprep.subr.bf16.mxu1 %v11159_v40  ;;  %14576 = vst [vmem:[#allocation9_spill] sm:$0xff] %v14575_v0  ;;  %v176_v12 = vand.u32 15, %v11885_v57  ;;  %v11914_v13 = vadd.s32 120, %v11829_v20  ;;  %vm11916_vm4 = vcmp.ne.s32.totalorder %v113_v38, 0  ;;  %v169_v15 = vand.u32 15, %v11889_v59 }
  0x4c   :  { %v14578_v14 = vsel %vm11916_vm4, 4294967295, %v14577_v14  ;;  %v11922_v16 = vadd.s32 128, %v11829_v20  ;;  %vm11929_vm5 = vcmp.ne.s32.totalorder %v120_v44, 15  ;;  %v190_v27 = vand.u32 15, %v11899_v3 }
  0x4d   :  { %14579 = vst [vmem:[#allocation10_spill] sm:$0xff] %v14578_v14  ;;  %v183_v30 = vand.u32 15, %v11902_v4  ;;  %vm11941_vm6 = vcmp.ne.s32.totalorder %v127_v49, 0  ;;  %v14583_v38 = vmov 0  ;;  %vm11958_vm7 = vcmp.ne.s32.totalorder %v134_v47, 15 }
  0x4e   :  { %10723 = vmatpush3.bf16.msra.mxu1 %v11159_v40  ;;  %v14584_v38 = vsel %vm11941_vm6, 4294967295, %v14583_v38  ;;  %v211_v44 = vand.u32 15, %v11922_v16  ;;  %vm11971_vm8 = vcmp.ne.s32.totalorder %v141_v50, 0  ;;  %v14589_v47 = vmov 0 }
  0x4f   :  { %10724 = vmatprep.subr.bf16.mxu1 %v11161_v10  ;;  %14585 = vst [vmem:[#allocation12_spill] sm:$0xff] %v14584_v38  ;;  %v14590_v47 = vsel %vm11971_vm8, 4294967295, %v14589_v47  ;;  %vm11988_vm9 = vcmp.ne.s32.totalorder %v148_v56, 15  ;;  %vm11999_vm10 = vcmp.ne.s32.totalorder %v155_v58, 0  ;;  %v14595_v56 = vmov 0 }
  0x50   :  { %14591 = vst [vmem:[#allocation14_spill] sm:$0xff] %v14590_v47  ;;  %v14596_v56 = vsel %vm11999_vm10, 4294967295, %v14595_v56  ;;  %vm12013_vm11 = vcmp.ne.s32.totalorder %v162_v2, 15  ;;  %v11083_v2 = vld [vmem:[%s14495_s5 + $0xf8] sm:$0xff]   ;;  %vm12030_vm12 = vcmp.ne.s32.totalorder %v169_v15, 0  ;;  %vm12039_vm13 = vcmp.ne.s32.totalorder %v176_v12, 15 }
  0x51   :  { %14597 = vst [vmem:[#allocation16_spill] sm:$0xff] %v14596_v56  ;;  %vm12058_vm14 = vcmp.ne.s32.totalorder %v183_v30, 0  ;;  %vm12072_vm15 = vcmp.ne.s32.totalorder %v190_v27, 15 }
  0x52   :  { %10725 = vmatpush3.bf16.msra.mxu1 %v11161_v10  ;;  %v11167_v10 = vld [vmem:[%s14495_s5 + $0x148] sm:$0xff]  }
  0x53   :  { %10726 = vmatprep.subr.bf16.mxu1 %v11164_v17 }
  0x56   :  { %10727 = vmatpush3.bf16.msra.mxu1 %v11164_v17 }
  0x57   :  { %10728 = vmatprep.subr.bf16.mxu1 %v11167_v10 }
  0x5a   :  { %10729 = vmatpush3.bf16.msra.mxu1 %v11167_v10 }
  0xc6   :  { %v10638_v21 = vpop.f32.mrf.mxu0 }
  0xc7   :  { %v695_v24 = vadd.f32 %v10638_v21, %v11827_v19 }
  0xc8   :  { %v686_v28 = vpop.f32.mrf.mxu0 }
  0xc9   :  { %v815_v32 = vmax.f32 %v695_v24, 0.0  ;;  %v687_v33 = vadd.f32 %v11827_v19, %v686_v28  ;;  %v14580_v24 = vmov 0  ;;  %v11935_v28 = vadd.s32 136, %v11829_v20 }
  0xca   :  { %v10639_v35 = vpop.f32.mrf.mxu0  ;;  %v14581_v24 = vsel %vm11929_vm5, 4294967295, %v14580_v24 }
  0xcb   :  { %v852_v41 = vadd.f32 %v11842_v26, %v815_v32  ;;  %v813_v42 = vmax.f32 %v687_v33, 0.0  ;;  %v698_v43 = vadd.f32 %v10639_v35, %v11827_v19  ;;  %14582 = vst [vmem:[#allocation11_spill] sm:$0xff] %v14581_v24  ;;  %v197_v32 = vand.u32 15, %v11905_v5 }
  0xcc   :  { %v689_v46 = vpop.f32.mrf.mxu0 }
  0xcd   :  { %884 = vst [vmem:[#allocation2 + $0x18] sm:$0xff] %v852_v41  ;;  %v9567_v51 = vpack.c.bf16 %v852_v41, %v852_v41  ;;  %v850_v52 = vadd.f32 %v11842_v26, %v813_v42  ;;  %v816_v53 = vmax.f32 %v698_v43, 0.0  ;;  %v690_v54 = vadd.f32 %v11827_v19, %v689_v46 }
  0xce   :  { %v10642_v55 = vpop.f32.mrf.mxu0  ;;  %v204_v42 = vand.u32 15, %v11914_v13  ;;  %v11947_v43 = vadd.s32 152, %v11829_v20  ;;  %v11951_v46 = vadd.s32 144, %v11829_v20  ;;  %vm12086_vm1 = vcmp.ne.s32.totalorder %v197_v32, 0 }
  0xcf   :  { %1044 = vst [vmem:[#allocation3 + $0x30] sm:$0xf] %v9567_v51  ;;  %882 = vst [vmem:[#allocation2 + $0x8] sm:$0xff] %v850_v52  ;;  %v9565_v60 = vpack.c.bf16 %v850_v52, %v850_v52  ;;  %v853_v61 = vadd.f32 %v11842_v26, %v816_v53  ;;  %v814_v62 = vmax.f32 %v690_v54, 0.0  ;;  %v711_v63 = vadd.f32 %v10642_v55, %v11827_v19 }
  0xd0   :  { %v702_v1 = vpop.f32.mrf.mxu0  ;;  %vm12106_vm0 = vcmp.ne.s32.totalorder %v204_v42, 15 }
  0xd1   :  { %1042 = vst [vmem:[#allocation3 + $0x18] sm:$0xf] %v9565_v60  ;;  %885 = vst [vmem:[#allocation2 + $0x20] sm:$0xff] %v853_v61  ;;  %v9568_v6 = vpack.c.bf16 %v853_v61, %v853_v61  ;;  %v851_v7 = vadd.f32 %v11842_v26, %v814_v62  ;;  %v819_v8 = vmax.f32 %v711_v63, 0.0  ;;  %v703_v9 = vadd.f32 %v11827_v19, %v702_v1 }
  0xd2   :  { %v10643_v11 = vpop.f32.mrf.mxu0  ;;  %v14586_v61 = vmov 0  ;;  %v218_v1 = vand.u32 15, %v11935_v28 }
  0xd3   :  { %1045 = vst [vmem:[#allocation3 + $0x3c] sm:$0xf] %v9568_v6  ;;  %883 = vst [vmem:[#allocation2 + $0x10] sm:$0xff] %v851_v7  ;;  %v9566_v18 = vpack.c.bf16 %v851_v7, %v851_v7  ;;  %v856_v21 = vadd.f32 %v11842_v26, %v819_v8  ;;  %v817_v22 = vmax.f32 %v703_v9, 0.0  ;;  %v714_v23 = vadd.f32 %v10643_v11, %v11827_v19 }
  0xd4   :  { %v705_v25 = vpop.f32.mrf.mxu0  ;;  %v14587_v61 = vsel %vm11958_vm7, 4294967295, %v14586_v61  ;;  %v11965_v6 = vadd.s32 160, %v11829_v20 }
  0xd5   :  { %1043 = vst [vmem:[#allocation3 + $0x24] sm:$0xf] %v9566_v18  ;;  %888 = vst [vmem:[#allocation2 + $0x38] sm:$0xff] %v856_v21  ;;  %v9571_v33 = vpack.c.bf16 %v856_v21, %v856_v21  ;;  %v854_v34 = vadd.f32 %v11842_v26, %v817_v22  ;;  %v820_v35 = vmax.f32 %v714_v23, 0.0  ;;  %v706_v36 = vadd.f32 %v11827_v19, %v705_v25 }
  0xd6   :  { %v1106_v40 = vld [vmem:[#allocation2 + $0x7] sm:$0xff]  ;;  %v10646_v41 = vpop.f32.mrf.mxu0  ;;  %14588 = vst [vmem:[#allocation13_spill] sm:$0xff] %v14587_v61  ;;  %v232_v25 = vand.u32 15, %v11947_v43 }
  0xd7   :  { %v1458_v51 = vsel %vm11871_vm2, %v1106_v40, 0.0  ;;  %1048 = vst [vmem:[#allocation3 + $0x60] sm:$0xf] %v9571_v33  ;;  %886 = vst [vmem:[#allocation2 + $0x28] sm:$0xff] %v854_v34  ;;  %v9569_v49 = vpack.c.bf16 %v854_v34, %v854_v34  ;;  %v857_v52 = vadd.f32 %v11842_v26, %v820_v35  ;;  %v818_v53 = vmax.f32 %v706_v36, 0.0  ;;  %v11169_v40 = vld [vmem:[%s14495_s5 + $0x140] sm:$0xff]  }
  0xd8   :  { %v9629_v54 = vpack.c.bf16 %v1458_v51, %v1458_v51  ;;  %v1076_v55 = vld [vmem:[#allocation2 + $0x19] sm:$0xff]  ;;  %v727_v62 = vadd.f32 %v10646_v41, %v11827_v19  ;;  %v718_v63 = vpop.f32.mrf.mxu0  ;;  %v225_v33 = vand.u32 15, %v11951_v46  ;;  %v14592_v51 = vmov 0  ;;  %10730 = vmatprep.subr.bf16.mxu1 %v11169_v40 }
  0xd9   :  { %v1109_v60 = vld [vmem:[#allocation2 + $0x1f] sm:$0xff]  ;;  %v9599_v7 = vpack.c.bf16 %v1076_v55, %v1076_v55  ;;  %1046 = vst [vmem:[#allocation3 + $0x48] sm:$0xf] %v9569_v49  ;;  %889 = vst [vmem:[#allocation2 + $0x40] sm:$0xff] %v857_v52  ;;  %v9572_v8 = vpack.c.bf16 %v857_v52, %v857_v52  ;;  %v855_v9 = vadd.f32 %v11842_v26, %v818_v53  ;;  %v14593_v51 = vsel %vm11988_vm9, 4294967295, %v14592_v51 }
  0xda   :  { %v719_v29 = vadd.f32 %v11827_v19, %v718_v63  ;;  %1618 = vst [vmem:[#allocation3 + $0x20] sm:$0xf] %v9629_v54  ;;  %v1074_v11 = vld [vmem:[#allocation2 + $0x9] sm:$0xff]  ;;  %v1075_v17 = vld [vmem:[#allocation2 + $0x11] sm:$0xff]  ;;  %v823_v21 = vmax.f32 %v727_v62, 0.0  ;;  %v10647_v22 = vpop.f32.mrf.mxu0  ;;  %v9632_v23 = vpack.c.bf16 %v1109_v60, %v1109_v60  ;;  %14594 = vst [vmem:[#allocation15_spill] sm:$0xff] %v14593_v51  ;;  %10731 = vmatpush3.bf16.msra.mxu1 %v11169_v40 }
  0xdb   :  { %v1107_v18 = vld [vmem:[#allocation2 + $0xf] sm:$0xff]  ;;  %1364 = vst [vmem:[#allocation3 + $0x34] sm:$0xf] %v9599_v7  ;;  %v1108_v31 = vld [vmem:[#allocation2 + $0x17] sm:$0xff]  ;;  %v1203_v50 = vsel %vm11893_vm3, %v1075_v17, 0.0  ;;  %887 = vst [vmem:[#allocation2 + $0x30] sm:$0xff] %v855_v9  ;;  %v9570_v35 = vpack.c.bf16 %v855_v9, %v855_v9  ;;  %v730_v49 = vadd.f32 %v10647_v22, %v11827_v19  ;;  %v9597_v53 = vpack.c.bf16 %v1074_v11, %v1074_v11 }
  0xdc   :  { %v9630_v34 = vpack.c.bf16 %v1107_v18, %v1107_v18  ;;  %1049 = vst [vmem:[#allocation3 + $0x6c] sm:$0xf] %v9572_v8  ;;  %v821_v36 = vmax.f32 %v719_v29, 0.0  ;;  %v860_v41 = vadd.f32 %v11842_v26, %v823_v21  ;;  %v721_v52 = vpop.f32.mrf.mxu0  ;;  %v9598_v54 = vpack.c.bf16 %v1203_v50, %v1203_v50  ;;  %1621 = vst [vmem:[#allocation3 + $0x44] sm:$0xf] %v9632_v23  ;;  %v11113_v46 = vld [vmem:[%s14495_s5 + $0xd8] sm:$0xff]  }
  0xdd   :  { %1047 = vst [vmem:[#allocation3 + $0x54] sm:$0xf] %v9570_v35  ;;  %v722_v60 = vadd.f32 %v11827_v19, %v721_v52  ;;  %v1460_v37 = vsel %vm11916_vm4, %v1108_v31, 0.0  ;;  %v239_v62 = vand.u32 15, %v11965_v6  ;;  %v824_v9 = vmax.f32 %v730_v49, 0.0 }
  0xde   :  { %1619 = vst [vmem:[#allocation3 + $0x2c] sm:$0xf] %v9630_v34  ;;  %v858_v55 = vadd.f32 %v11842_v26, %v821_v36  ;;  %v1077_v63 = vld [vmem:[#allocation2 + $0x21] sm:$0xff]  ;;  %892 = vst [vmem:[#allocation2 + $0x58] sm:$0xff] %v860_v41  ;;  %v9575_v8 = vpack.c.bf16 %v860_v41, %v860_v41  ;;  %v10650_v29 = vpop.f32.mrf.mxu0  ;;  %v9631_v10 = vpack.c.bf16 %v1460_v37, %v1460_v37  ;;  %v12005_v11 = vadd.s32 168, %v11829_v20 }
  0xdf   :  { %v1110_v7 = vld [vmem:[#allocation2 + $0x27] sm:$0xff]  ;;  %1362 = vst [vmem:[#allocation3 + $0x1c] sm:$0xf] %v9597_v53  ;;  %1363 = vst [vmem:[#allocation3 + $0x28] sm:$0xf] %v9598_v54  ;;  %v1205_v39 = vsel %vm11929_vm5, %v1077_v63, 0.0  ;;  %v743_v18 = vadd.f32 %v10650_v29, %v11827_v19  ;;  %v861_v31 = vadd.f32 %v11842_v26, %v824_v9 }
  0xe0   :  { %890 = vst [vmem:[#allocation2 + $0x48] sm:$0xff] %v858_v55  ;;  %v9573_v58 = vpack.c.bf16 %v858_v55, %v858_v55  ;;  %v822_v17 = vmax.f32 %v722_v60, 0.0  ;;  %v9600_v21 = vpack.c.bf16 %v1205_v39, %v1205_v39  ;;  %v1080_v22 = vld [vmem:[#allocation2 + $0x39] sm:$0xff]  ;;  %1052 = vst [vmem:[#allocation3 + $0x90] sm:$0xf] %v9575_v8  ;;  %v14598_v50 = vmov 0  ;;  %v734_v34 = vpop.f32.mrf.mxu0 }
  0xe1   :  { %v1113_v23 = vld [vmem:[#allocation2 + $0x3f] sm:$0xff]  ;;  %v14599_v50 = vsel %vm12013_vm11, 4294967295, %v14598_v50  ;;  %1620 = vst [vmem:[#allocation3 + $0x38] sm:$0xf] %v9631_v10  ;;  %v1462_v35 = vsel %vm11941_vm6, %v1110_v7, 0.0  ;;  %v12020_v36 = vadd.s32 176, %v11829_v20  ;;  %v9603_v41 = vpack.c.bf16 %v1080_v22, %v1080_v22 }
  0xe2   :  { %14600 = vst [vmem:[#allocation17_spill] sm:$0xff] %v14599_v50  ;;  %1050 = vst [vmem:[#allocation3 + $0x78] sm:$0xf] %v9573_v58  ;;  %v859_v49 = vadd.f32 %v11842_v26, %v822_v17  ;;  %v827_v52 = vmax.f32 %v743_v18, 0.0  ;;  %v735_v48 = vadd.f32 %v11827_v19, %v734_v34  ;;  %v1078_v53 = vld [vmem:[#allocation2 + $0x29] sm:$0xff]  ;;  %v1079_v54 = vld [vmem:[#allocation2 + $0x31] sm:$0xff]  ;;  %v9576_v60 = vpack.c.bf16 %v861_v31, %v861_v31  ;;  %v10651_v37 = vpop.f32.mrf.mxu0 }
  0xe3   :  { %1365 = vst [vmem:[#allocation3 + $0x40] sm:$0xf] %v9600_v21  ;;  %v1111_v55 = vld [vmem:[#allocation2 + $0x2f] sm:$0xff]  ;;  %893 = vst [vmem:[#allocation2 + $0x60] sm:$0xff] %v861_v31  ;;  %v9633_v63 = vpack.c.bf16 %v1462_v35, %v1462_v35  ;;  %v9636_v40 = vpack.c.bf16 %v1113_v23, %v1113_v23  ;;  %v246_v7 = vand.u32 15, %v12005_v11  ;;  %v14601_v8 = vmov 0 }
  0xe4   :  { %v14602_v8 = vsel %vm12030_vm12, 4294967295, %v14601_v8  ;;  %1368 = vst [vmem:[#allocation3 + $0x64] sm:$0xf] %v9603_v41  ;;  %v1112_v9 = vld [vmem:[#allocation2 + $0x37] sm:$0xff]  ;;  %v1207_v29 = vsel %vm11958_vm7, %v1079_v54, 0.0  ;;  %891 = vst [vmem:[#allocation2 + $0x50] sm:$0xff] %v859_v49  ;;  %v9574_v10 = vpack.c.bf16 %v859_v49, %v859_v49  ;;  %v864_v39 = vadd.f32 %v11842_v26, %v827_v52  ;;  %v737_v15 = vpop.f32.mrf.mxu0 }
  0xe5   :  { %14603 = vst [vmem:[#allocation18_spill] sm:$0xff] %v14602_v8  ;;  %v825_v58 = vmax.f32 %v735_v48, 0.0  ;;  %1053 = vst [vmem:[#allocation3 + $0x9c] sm:$0xf] %v9576_v60  ;;  %v14604_v17 = vmov 0  ;;  %v746_v59 = vadd.f32 %v10651_v37, %v11827_v19  ;;  %v11090_v21 = vld [vmem:[%s14495_s5 + $0x130] sm:$0xff]   ;;  %v9634_v22 = vpack.c.bf16 %v1111_v55, %v1111_v55 }
  0xe6   :  { %v14605_v17 = vsel %vm12039_vm13, 4294967295, %v14604_v17  ;;  %v11082_v18 = vld [vmem:[#allocation3 + $0x20] ss:$12 sps:$4 sm:$0xff]   ;;  %1622 = vst [vmem:[#allocation3 + $0x50] sm:$0xf] %v9633_v63  ;;  %v1464_v23 = vsel %vm11971_vm8, %v1112_v9, 0.0  ;;  %v9601_v31 = vpack.c.bf16 %v1078_v53, %v1078_v53  ;;  %v9579_v57 = vpack.c.bf16 %v864_v39, %v864_v39  ;;  %v10654_v55 = vpop.f32.mrf.mxu0 }
  0xe7   :  { %14606 = vst [vmem:[#allocation19_spill] sm:$0xff] %v14605_v17  ;;  %1625 = vst [vmem:[#allocation3 + $0x74] sm:$0xf] %v9636_v40  ;;  %v862_v12 = vadd.f32 %v11842_v26, %v825_v58  ;;  %v738_v34 = vadd.f32 %v11827_v19, %v737_v15  ;;  %v12051_v35 = vld [vmem:[#allocation3 + $0x1c] ss:$12 sps:$4 sm:$0xff]   ;;  %v11092_v41 = vld [vmem:[%s14495_s5 + $0xf0] sm:$0xff]   ;;  %v9635_v49 = vpack.c.bf16 %v1464_v23, %v1464_v23  ;;  %10685 = vmatmul.mubr.bf16.vlgmr.msra.gmra.mxu0 %v11082_v18 }
  0xe8   :  { %1051 = vst [vmem:[#allocation3 + $0x84] sm:$0xf] %v9574_v10  ;;  %896 = vst [vmem:[#allocation2 + $0x78] sm:$0xff] %v864_v39  ;;  %v14607_v52 = vmov 0  ;;  %v1081_v48 = vld [vmem:[#allocation2 + $0x41] sm:$0xff]  ;;  %v828_v54 = vmax.f32 %v746_v59, 0.0  ;;  %v9602_v37 = vpack.c.bf16 %v1207_v29, %v1207_v29  ;;  %v759_v9 = vadd.f32 %v10654_v55, %v11827_v19  ;;  %9911 = vmatpush3.bf16.msra.mxu0 %v11083_v2  ;;  %2203 = vmatprep.mubr.bf16.mxu1 %v12051_v35  ;;  %v750_v59 = vpop.f32.mrf.mxu0 }
  0xe9   :  { %v14608_v52 = vsel %vm12058_vm14, 4294967295, %v14607_v52  ;;  %v1114_v53 = vld [vmem:[#allocation2 + $0x47] sm:$0xff]  ;;  %1623 = vst [vmem:[#allocation3 + $0x5c] sm:$0xf] %v9634_v22  ;;  %1366 = vst [vmem:[#allocation3 + $0x4c] sm:$0xf] %v9601_v31  ;;  %v9577_v4 = vpack.c.bf16 %v862_v12, %v862_v12  ;;  %9912 = vmatprep.subr.bf16.mxu0 %v11090_v21  ;;  %v751_v31 = vadd.f32 %v11827_v19, %v750_v59 }
  0xea   :  { %14609 = vst [vmem:[#allocation20_spill] sm:$0xff] %v14608_v52  ;;  %v11087_v60 = vld [vmem:[#allocation3 + $0x18] ss:$12 sps:$4 sm:$0xff]   ;;  %v12063_v63 = vadd.s32 184, %v11829_v20  ;;  %v1209_v40 = vsel %vm11988_vm9, %v1081_v48, 0.0  ;;  %894 = vst [vmem:[#allocation2 + $0x68] sm:$0xff] %v862_v12  ;;  %v865_v29 = vadd.f32 %v11842_v26, %v828_v54  ;;  %v10655_v54 = vpop.f32.mrf.mxu0 }
  0xeb   :  { %1056 = vst [vmem:[#allocation3 + $0xc0] sm:$0xf] %v9579_v57  ;;  %v826_v30 = vmax.f32 %v738_v34, 0.0  ;;  %v11086_v10 = vld [vmem:[#allocation3 + $0x38] ss:$12 sps:$4 sm:$0xff]   ;;  %v9604_v39 = vpack.c.bf16 %v1209_v40, %v1209_v40  ;;  %v14610_v58 = vmov 0  ;;  %2204 = vmatmul.mubr.bf16.gmra.mxu1 %v11087_v60 }
  0xec   :  { %1624 = vst [vmem:[#allocation3 + $0x68] sm:$0xf] %v9635_v49  ;;  %v14611_v58 = vsel %vm12072_vm15, 4294967295, %v14610_v58  ;;  %1367 = vst [vmem:[#allocation3 + $0x58] sm:$0xf] %v9602_v37  ;;  %v11097_v2 = vld [vmem:[%s14495_s5 + $0x128] sm:$0xff]   ;;  %10688 = vmatprep.mubr.bf16.mxu0 %v11086_v10  ;;  %9913 = vmatpush3.bf16.msra.mxu0 %v11092_v41  ;;  %v753_v59 = vpop.f32.mrf.mxu0 }
  0xed   :  { %14612 = vst [vmem:[#allocation21_spill] sm:$0xff] %v14611_v58  ;;  %v1466_v15 = vsel %vm11999_vm10, %v1114_v53, 0.0  ;;  %v253_v18 = vand.u32 15, %v12020_v36  ;;  %v1084_v22 = vld [vmem:[#allocation2 + $0x59] sm:$0xff]  ;;  %1054 = vst [vmem:[#allocation3 + $0xa8] sm:$0xf] %v9577_v4  ;;  %v863_v3 = vadd.f32 %v11842_v26, %v826_v30  ;;  %v9580_v53 = vpack.c.bf16 %v865_v29, %v865_v29  ;;  %9914 = vmatprep.subr.bf16.mxu0 %v11097_v2 }
  0xee   :  { %v1117_v23 = vld [vmem:[#allocation2 + $0x5f] sm:$0xff]  ;;  %v831_v27 = vmax.f32 %v759_v9, 0.0  ;;  %v9637_v21 = vpack.c.bf16 %v1466_v15, %v1466_v15  ;;  %v14613_v57 = vmov 0  ;;  %1369 = vst [vmem:[#allocation3 + $0x70] sm:$0xf] %v9604_v39  ;;  %v9607_v12 = vpack.c.bf16 %v1084_v22, %v1084_v22  ;;  %v1082_v34 = vld [vmem:[#allocation2 + $0x49] sm:$0xff] }
  0xef   :  { %v14614_v57 = vsel %vm12086_vm1, 4294967295, %v14613_v57  ;;  %v1083_v49 = vld [vmem:[#allocation2 + $0x51] sm:$0xff]  ;;  %897 = vst [vmem:[#allocation2 + $0x80] sm:$0xff] %v865_v29  ;;  %v11099_v55 = vld [vmem:[%s14495_s5 + $0xe8] sm:$0xff]   ;;  %v9640_v60 = vpack.c.bf16 %v1117_v23, %v1117_v23  ;;  %v12094_v37 = vadd.s32 192, %v11829_v20  ;;  %895 = vst [vmem:[#allocation2 + $0x70] sm:$0xff] %v863_v3  ;;  %v9578_v40 = vpack.c.bf16 %v863_v3, %v863_v3 }
  0xf0   :  { %14615 = vst [vmem:[#allocation22_spill] sm:$0xff] %v14614_v57  ;;  %v1115_v48 = vld [vmem:[#allocation2 + $0x4f] sm:$0xff]  ;;  %v1116_v5 = vld [vmem:[#allocation2 + $0x57] sm:$0xff]  ;;  %v1211_v32 = vsel %vm12013_vm11, %v1083_v49, 0.0  ;;  %v868_v4 = vadd.f32 %v11842_v26, %v831_v27  ;;  %v829_v30 = vmax.f32 %v751_v31, 0.0  ;;  %v11104_v10 = vld [vmem:[%s14495_s5 + $0x120] sm:$0xff]   ;;  %v762_v29 = vadd.f32 %v10655_v54, %v11827_v19  ;;  %v10658_v49 = vpop.f32.mrf.mxu0  ;;  %9915 = vmatpush3.bf16.msra.mxu0 %v11099_v55 }
  0xf1   :  { %v12099_v9 = vld [vmem:[#allocation3 + $0x34] ss:$12 sps:$4 sm:$0xff]   ;;  %1626 = vst [vmem:[#allocation3 + $0x80] sm:$0xf] %v9637_v21  ;;  %1372 = vst [vmem:[#allocation3 + $0x94] sm:$0xf] %v9607_v12  ;;  %v9638_v41 = vpack.c.bf16 %v1115_v48, %v1115_v48  ;;  %v9605_v22 = vpack.c.bf16 %v1082_v34, %v1082_v34  ;;  %v9606_v23 = vpack.c.bf16 %v1211_v32, %v1211_v32  ;;  %9916 = vmatprep.subr.bf16.mxu0 %v11104_v10 }
  0xf2   :  { %1057 = vst [vmem:[#allocation3 + $0xcc] sm:$0xf] %v9580_v53  ;;  %v14616_v39 = vmov 0  ;;  %v12111_v15 = vld [vmem:[#allocation3 + $0x30] ss:$12 sps:$4 sm:$0xff]   ;;  %900 = vst [vmem:[#allocation2 + $0x98] sm:$0xff] %v868_v4  ;;  %v9583_v3 = vpack.c.bf16 %v868_v4, %v868_v4  ;;  %v866_v27 = vadd.f32 %v11842_v26, %v829_v30  ;;  %v754_v13 = vadd.f32 %v11827_v19, %v753_v59  ;;  %2211 = vmatprep.mubr.bf16.mxu1 %v12099_v9 }
  0xf3   :  { %v14617_v39 = vsel %vm12106_vm0, 4294967295, %v14616_v39  ;;  %1629 = vst [vmem:[#allocation3 + $0xa4] sm:$0xf] %v9640_v60  ;;  %1055 = vst [vmem:[#allocation3 + $0xb4] sm:$0xf] %v9578_v40  ;;  %v1468_v31 = vsel %vm12030_vm12, %v1116_v5, 0.0  ;;  %v775_v5 = vadd.f32 %v10658_v49, %v11827_v19  ;;  %2212 = vmatmul.mubr.bf16.gmra.mxu1 %v12111_v15 }
  0xf4   :  { %14618 = vst [vmem:[#allocation23_spill] sm:$0xff] %v14617_v39  ;;  %v11091_v42 = vld [vmem:[#allocation3 + $0x50] ss:$12 sps:$4 sm:$0xff]   ;;  %vm12120_vm11 = vcmp.ne.s32.totalorder %v211_v44, 0  ;;  %v14619_v2 = vmov 0  ;;  %v832_v34 = vmax.f32 %v762_v29, 0.0  ;;  %v9639_v53 = vpack.c.bf16 %v1468_v31, %v1468_v31  ;;  %v766_v29 = vpop.f32.mrf.mxu0 }
  0xf5   :  { %v14620_v2 = vsel %vm12120_vm11, 4294967295, %v14619_v2  ;;  %v1085_v21 = vld [vmem:[#allocation2 + $0x61] sm:$0xff]  ;;  %1627 = vst [vmem:[#allocation3 + $0x8c] sm:$0xf] %v9638_v41  ;;  %v260_v48 = vand.u32 15, %v12063_v63  ;;  %898 = vst [vmem:[#allocation2 + $0x88] sm:$0xff] %v866_v27  ;;  %v9581_v44 = vpack.c.bf16 %v866_v27, %v866_v27  ;;  %10689 = vmatmul.mubr.bf16.gmra.mxu0 %v11091_v42 }
  0xf6   :  { %14621 = vst [vmem:[#allocation24_spill] sm:$0xff] %v14620_v2  ;;  %v1118_v12 = vld [vmem:[#allocation2 + $0x67] sm:$0xff]  ;;  %1370 = vst [vmem:[#allocation3 + $0x7c] sm:$0xf] %v9605_v22  ;;  %v1213_v16 = vsel %vm12039_vm13, %v1085_v21, 0.0  ;;  %v830_v60 = vmax.f32 %v754_v13, 0.0  ;;  %v869_v4 = vadd.f32 %v11842_v26, %v832_v34  ;;  %v767_v13 = vadd.f32 %v11827_v19, %v766_v29 }
  0xf7   :  { %v11106_v54 = vld [vmem:[%s14495_s5 + $0xe0] sm:$0xff]   ;;  %1371 = vst [vmem:[#allocation3 + $0x88] sm:$0xf] %v9606_v23  ;;  %1060 = vst [vmem:[#allocation3 + $0xf0] sm:$0xf] %v9583_v3  ;;  %v9608_v40 = vpack.c.bf16 %v1213_v16, %v1213_v16  ;;  %vm12134_vm12 = vcmp.ne.s32.totalorder %v218_v1, 15 }
  0xf8   :  { %v11093_v32 = vld [vmem:[#allocation3 + $0x68] ss:$12 sps:$4 sm:$0xff]   ;;  %v14622_v30 = vmov 0  ;;  %v12139_v59 = vld [vmem:[#allocation3 + $0x4c] ss:$12 sps:$4 sm:$0xff]   ;;  %v1470_v41 = vsel %vm12058_vm14, %v1118_v12, 0.0  ;;  %v867_v3 = vadd.f32 %v11842_v26, %v830_v60  ;;  %v9584_v49 = vpack.c.bf16 %v869_v4, %v869_v4  ;;  %9917 = vmatpush3.bf16.msra.mxu0 %v11106_v54 }
  0xf9   :  { %v14623_v30 = vsel %vm12134_vm12, 4294967295, %v14622_v30  ;;  %1628 = vst [vmem:[#allocation3 + $0x98] sm:$0xf] %v9639_v53  ;;  %v11111_v22 = vld [vmem:[%s14495_s5 + $0x118] sm:$0xff]   ;;  %v267_v28 = vand.u32 15, %v12094_v37  ;;  %v835_v27 = vmax.f32 %v775_v5, 0.0  ;;  %10692 = vmatprep.mubr.bf16.mxu0 %v11093_v32  ;;  %v9641_v55 = vpack.c.bf16 %v1470_v41, %v1470_v41  ;;  %v10659_v53 = vpop.f32.mrf.mxu0  ;;  %2219 = vmatprep.mubr.bf16.mxu1 %v12139_v59 }
  0xfa   :  { %14624 = vst [vmem:[#allocation25_spill] sm:$0xff] %v14623_v30  ;;  %v1088_v1 = vld [vmem:[#allocation2 + $0x79] sm:$0xff]  ;;  %1058 = vst [vmem:[#allocation3 + $0xd8] sm:$0xf] %v9581_v44  ;;  %vm12151_vm13 = vcmp.ne.s32.totalorder %v225_v33, 0  ;;  %v14625_v42 = vmov 0  ;;  %v9582_v60 = vpack.c.bf16 %v867_v3, %v867_v3  ;;  %9918 = vmatprep.subr.bf16.mxu0 %v11111_v22 }
  0xfb   :  { %v1121_v23 = vld [vmem:[#allocation2 + $0x7f] sm:$0xff]  ;;  %v14626_v42 = vsel %vm12151_vm13, 4294967295, %v14625_v42  ;;  %1373 = vst [vmem:[#allocation3 + $0xa0] sm:$0xf] %v9608_v40  ;;  %v9611_v31 = vpack.c.bf16 %v1088_v1, %v1088_v1  ;;  %v1086_v21 = vld [vmem:[#allocation2 + $0x69] sm:$0xff]  ;;  %v1087_v12 = vld [vmem:[#allocation2 + $0x71] sm:$0xff]  ;;  %v872_v5 = vadd.f32 %v11842_v26, %v835_v27  ;;  %v769_v29 = vpop.f32.mrf.mxu0 }
  0xfc   :  { %14627 = vst [vmem:[#allocation26_spill] sm:$0xff] %v14626_v42  ;;  %v1119_v34 = vld [vmem:[#allocation2 + $0x6f] sm:$0xff]  ;;  %901 = vst [vmem:[#allocation2 + $0xa0] sm:$0xff] %v869_v4  ;;  %v12157_v16 = vadd.s32 200, %v11829_v20  ;;  %v9644_v10 = vpack.c.bf16 %v1121_v23, %v1121_v23  ;;  %v1120_v33 = vld [vmem:[#allocation2 + $0x77] sm:$0xff]  ;;  %v1215_v44 = vsel %vm12072_vm15, %v1087_v12, 0.0  ;;  %v778_v4 = vadd.f32 %v10659_v53, %v11827_v19  ;;  %9919 = vmatpush3.bf16.msra.mxu0 %v11113_v46 }
  0xfd   :  { %899 = vst [vmem:[#allocation2 + $0x90] sm:$0xff] %v867_v3  ;;  %v833_v32 = vmax.f32 %v767_v13, 0.0  ;;  %1630 = vst [vmem:[#allocation3 + $0xb0] sm:$0xf] %v9641_v55  ;;  %vm12167_vm14 = vcmp.ne.s32.totalorder %v232_v25, 15  ;;  %v14628_v40 = vmov 0  ;;  %v9642_v1 = vpack.c.bf16 %v1119_v34, %v1119_v34  ;;  %v10662_v53 = vpop.f32.mrf.mxu0 }
  0xfe   :  { %1376 = vst [vmem:[#allocation3 + $0xc4] sm:$0xf] %v9611_v31  ;;  %1061 = vst [vmem:[#allocation3 + $0xfc] sm:$0xf] %v9584_v49  ;;  %v14629_v40 = vsel %vm12167_vm14, 4294967295, %v14628_v40  ;;  %v1472_v23 = vsel %vm12086_vm1, %v1120_v33, 0.0  ;;  %v9609_v43 = vpack.c.bf16 %v1086_v21, %v1086_v21  ;;  %v9587_v25 = vpack.c.bf16 %v872_v5, %v872_v5 }
  0xff   :  { %14630 = vst [vmem:[#allocation27_spill] sm:$0xff] %v14629_v40  ;;  %v12172_v41 = vld [vmem:[#allocation3 + $0x48] ss:$12 sps:$4 sm:$0xff]   ;;  %1633 = vst [vmem:[#allocation3 + $0xd4] sm:$0xf] %v9644_v10  ;;  %v11118_v3 = vld [vmem:[%s14495_s5 + $0x110] sm:$0xff]   ;;  %v870_v27 = vadd.f32 %v11842_v26, %v833_v32  ;;  %v770_v13 = vadd.f32 %v11827_v19, %v769_v29  ;;  %v9643_v54 = vpack.c.bf16 %v1472_v23, %v1472_v23 }
 0x100   :  { %1059 = vst [vmem:[#allocation3 + $0xe4] sm:$0xf] %v9582_v60  ;;  %904 = vst [vmem:[#allocation2 + $0xb8] sm:$0xff] %v872_v5  ;;  %v11098_v55 = vld [vmem:[#allocation3 + $0x80] ss:$12 sps:$4 sm:$0xff]   ;;  %vm12185_vm15 = vcmp.ne.s32.totalorder %v239_v62, 0  ;;  %v9610_v33 = vpack.c.bf16 %v1215_v44, %v1215_v44  ;;  %v791_v5 = vadd.f32 %v10662_v53, %v11827_v19  ;;  %2220 = vmatmul.mubr.bf16.gmra.mxu1 %v12172_v41  ;;  %9920 = vmatprep.subr.bf16.mxu0 %v11118_v3 }
 0x101   :  { %v12181_v31 = vld [vmem:[#allocation3 + $0x64] ss:$12 sps:$4 sm:$0xff]   ;;  %v14631_v12 = vmov 0  ;;  %v1122_v21 = vld [vmem:[#allocation2 + $0x87] sm:$0xff]  ;;  %v836_v49 = vmax.f32 %v778_v4, 0.0  ;;  %v274_v10 = vand.u32 15, %v12157_v16  ;;  %v9585_v6 = vpack.c.bf16 %v870_v27, %v870_v27  ;;  %10693 = vmatmul.mubr.bf16.gmra.mxu0 %v11098_v55 }
 0x102   :  { %v14632_v12 = vsel %vm12185_vm15, 4294967295, %v14631_v12  ;;  %v1089_v34 = vld [vmem:[#allocation2 + $0x81] sm:$0xff]  ;;  %1631 = vst [vmem:[#allocation3 + $0xbc] sm:$0xf] %v9642_v1  ;;  %1374 = vst [vmem:[#allocation3 + $0xac] sm:$0xf] %v9609_v43  ;;  %v782_v1 = vpop.f32.mrf.mxu0  ;;  %2227 = vmatprep.mubr.bf16.mxu1 %v12181_v31 }
 0x103   :  { %14633 = vst [vmem:[#allocation28_spill] sm:$0xff] %v14632_v12  ;;  %v12191_v60 = vadd.s32 208, %v11829_v20  ;;  %v1217_v22 = vsel %vm12106_vm0, %v1089_v34, 0.0  ;;  %1064 = vst [vmem:[#allocation3 + $0x120] sm:$0xf] %v9587_v25  ;;  %v834_v62 = vmax.f32 %v770_v13, 0.0  ;;  %v873_v29 = vadd.f32 %v11842_v26, %v836_v49 }
 0x104   :  { %902 = vst [vmem:[#allocation2 + $0xa8] sm:$0xff] %v870_v27  ;;  %v11100_v32 = vld [vmem:[#allocation3 + $0x98] ss:$12 sps:$4 sm:$0xff]   ;;  %1632 = vst [vmem:[#allocation3 + $0xc8] sm:$0xf] %v9643_v54  ;;  %v9612_v4 = vpack.c.bf16 %v1217_v22, %v1217_v22  ;;  %vm12199_vm1 = vcmp.ne.s32.totalorder %v246_v7, 15  ;;  %v783_v54 = vadd.f32 %v11827_v19, %v782_v1 }
 0x105   :  { %v14634_v44 = vmov 0  ;;  %v12205_v23 = vadd.s32 216, %v11829_v20  ;;  %v1474_v43 = vsel %vm12120_vm11, %v1122_v21, 0.0  ;;  %v11120_v25 = vld [vmem:[%s14495_s5 + $0xd0] sm:$0xff]   ;;  %1375 = vst [vmem:[#allocation3 + $0xb8] sm:$0xf] %v9610_v33  ;;  %v871_v13 = vadd.f32 %v11842_v26, %v834_v62  ;;  %10696 = vmatprep.mubr.bf16.mxu0 %v11100_v32 }
 0x106   :  { %v14635_v44 = vsel %vm12199_vm1, 4294967295, %v14634_v44  ;;  %v11125_v11 = vld [vmem:[%s14495_s5 + $0x108] sm:$0xff]   ;;  %v1092_v7 = vld [vmem:[#allocation2 + $0x99] sm:$0xff]  ;;  %1062 = vst [vmem:[#allocation3 + $0x108] sm:$0xf] %v9585_v6  ;;  %v839_v55 = vmax.f32 %v791_v5, 0.0  ;;  %v9645_v46 = vpack.c.bf16 %v1474_v43, %v1474_v43  ;;  %v9588_v22 = vpack.c.bf16 %v873_v29, %v873_v29  ;;  %v10663_v6 = vpop.f32.mrf.mxu0  ;;  %9921 = vmatpush3.bf16.msra.mxu0 %v11120_v25 }
 0x107   :  { %14636 = vst [vmem:[#allocation29_spill] sm:$0xff] %v14635_v44  ;;  %v1125_v27 = vld [vmem:[#allocation2 + $0x9f] sm:$0xff]  ;;  %vm12220_vm0 = vcmp.ne.s32.totalorder %v253_v18, 0  ;;  %v14637_v34 = vmov 0  ;;  %1377 = vst [vmem:[#allocation3 + $0xd0] sm:$0xf] %v9612_v4  ;;  %v9615_v21 = vpack.c.bf16 %v1092_v7, %v1092_v7  ;;  %v9586_v4 = vpack.c.bf16 %v871_v13, %v871_v13  ;;  %9922 = vmatprep.subr.bf16.mxu0 %v11125_v11 }
 0x108   :  { %v14638_v34 = vsel %vm12220_vm0, 4294967295, %v14637_v34  ;;  %v1090_v49 = vld [vmem:[#allocation2 + $0x89] sm:$0xff]  ;;  %v1091_v53 = vld [vmem:[#allocation2 + $0x91] sm:$0xff]  ;;  %905 = vst [vmem:[#allocation2 + $0xc0] sm:$0xff] %v873_v29  ;;  %v9648_v62 = vpack.c.bf16 %v1125_v27, %v1125_v27  ;;  %903 = vst [vmem:[#allocation2 + $0xb0] sm:$0xff] %v871_v13  ;;  %v876_v1 = vadd.f32 %v11842_v26, %v839_v55  ;;  %v837_v43 = vmax.f32 %v783_v54, 0.0  ;;  %v785_v7 = vpop.f32.mrf.mxu0 }
 0x109   :  { %14639 = vst [vmem:[#allocation30_spill] sm:$0xff] %v14638_v34  ;;  %v1123_v33 = vld [vmem:[#allocation2 + $0x8f] sm:$0xff]  ;;  %v1124_v18 = vld [vmem:[#allocation2 + $0x97] sm:$0xff]  ;;  %v1219_v32 = vsel %vm12134_vm12, %v1091_v53, 0.0  ;;  %1634 = vst [vmem:[#allocation3 + $0xe0] sm:$0xf] %v9645_v46  ;;  %v794_v29 = vadd.f32 %v10663_v6, %v11827_v19 }
 0x10a   :  { %v11127_v5 = vld [vmem:[%s14495_s5 + $0xc8] sm:$0xff]   ;;  %1380 = vst [vmem:[#allocation3 + $0xf4] sm:$0xf] %v9615_v21  ;;  %1065 = vst [vmem:[#allocation3 + $0x12c] sm:$0xf] %v9588_v22  ;;  %vm12233_vm11 = vcmp.ne.s32.totalorder %v260_v48, 15  ;;  %v9646_v53 = vpack.c.bf16 %v1123_v33, %v1123_v33  ;;  %v9613_v48 = vpack.c.bf16 %v1090_v49, %v1090_v49  ;;  %v9591_v54 = vpack.c.bf16 %v876_v1, %v876_v1 }
 0x10b   :  { %v14640_v3 = vmov 0  ;;  %v12238_v27 = vld [vmem:[#allocation3 + $0x60] ss:$12 sps:$4 sm:$0xff]   ;;  %v1476_v13 = vsel %vm12151_vm13, %v1124_v18, 0.0  ;;  %1637 = vst [vmem:[#allocation3 + $0x104] sm:$0xf] %v9648_v62  ;;  %v874_v46 = vadd.f32 %v11842_v26, %v837_v43  ;;  %v786_v21 = vadd.f32 %v11827_v19, %v785_v7  ;;  %v10666_v62 = vpop.f32.mrf.mxu0  ;;  %9923 = vmatpush3.bf16.msra.mxu0 %v11127_v5 }
 0x10c   :  { %v14641_v3 = vsel %vm12233_vm11, 4294967295, %v14640_v3  ;;  %vm12244_vm12 = vcmp.ne.s32.totalorder %v267_v28, 0  ;;  %v14643_v55 = vmov 0  ;;  %v11132_v63 = vld [vmem:[%s14495_s5 + $0x100] sm:$0xff]   ;;  %1063 = vst [vmem:[#allocation3 + $0x114] sm:$0xf] %v9586_v4  ;;  %v9647_v37 = vpack.c.bf16 %v1476_v13, %v1476_v13  ;;  %2228 = vmatmul.mubr.bf16.gmra.mxu1 %v12238_v27 }
 0x10d   :  { %14642 = vst [vmem:[#allocation31_spill] sm:$0xff] %v14641_v3  ;;  %v14644_v55 = vsel %vm12244_vm12, 4294967295, %v14643_v55  ;;  %908 = vst [vmem:[#allocation2 + $0xd8] sm:$0xff] %v876_v1  ;;  %v11105_v33 = vld [vmem:[#allocation3 + $0xb0] ss:$12 sps:$4 sm:$0xff]   ;;  %v840_v6 = vmax.f32 %v794_v29, 0.0  ;;  %v9614_v49 = vpack.c.bf16 %v1219_v32, %v1219_v32  ;;  %v9589_v19 = vpack.c.bf16 %v874_v46, %v874_v46  ;;  %v798_v13 = vpop.f32.mrf.mxu0  ;;  %9924 = vmatprep.subr.bf16.mxu0 %v11132_v63 }
 0x10e   :  { %14645 = vst [vmem:[#allocation32_spill] sm:$0xff] %v14644_v55  ;;  %v12253_v25 = vld [vmem:[#allocation3 + $0x7c] ss:$12 sps:$4 sm:$0xff]   ;;  %v1093_v28 = vld [vmem:[#allocation2 + $0xa1] sm:$0xff]  ;;  %1635 = vst [vmem:[#allocation3 + $0xec] sm:$0xf] %v9646_v53  ;;  %10697 = vmatmul.mubr.bf16.gmra.mxu0 %v11105_v33 }
 0x10f   :  { %v1126_v22 = vld [vmem:[#allocation2 + $0xa7] sm:$0xff]  ;;  %1378 = vst [vmem:[#allocation3 + $0xdc] sm:$0xf] %v9613_v48  ;;  %v1221_v4 = vsel %vm12167_vm14, %v1093_v28, 0.0  ;;  %1068 = vst [vmem:[#allocation3 + $0x150] sm:$0xf] %v9591_v54  ;;  %2235 = vmatprep.mubr.bf16.mxu1 %v12253_v25  ;;  %v10667_v18 = vpop.f32.mrf.mxu0 }
 0x110   :  { %906 = vst [vmem:[#allocation2 + $0xc8] sm:$0xff] %v874_v46  ;;  %v838_v26 = vmax.f32 %v786_v21, 0.0  ;;  %v11511_v11 = vld [vmem:[%s14494_s4] ss:$0 sm:$0xff]  ;;  %v11107_v43 = vld [vmem:[#allocation3 + $0xc8] ss:$12 sps:$4 sm:$0xff]   ;;  %v9616_v29 = vpack.c.bf16 %v1221_v4, %v1221_v4 }
 0x111   :  { %v807_v1 = vadd.f32 %v11511_v11, %v10666_v62  ;;  %1636 = vst [vmem:[#allocation3 + $0xf8] sm:$0xf] %v9647_v37  ;;  %v12264_v32 = vld [vmem:[%s14491_s1] ss:$0 sm:$0xff]  ;;  %vm12269_vm14 = vcmp.ne.s32.totalorder %v274_v10, 15  ;;  %v14646_v53 = vmov 0  ;;  %v799_v5 = vadd.f32 %v11511_v11, %v798_v13  ;;  %10700 = vmatprep.mubr.bf16.mxu0 %v11107_v43 }
 0x112   :  { %v877_v7 = vadd.f32 %v12264_v32, %v840_v6  ;;  %v14647_v53 = vsel %vm12269_vm14, 4294967295, %v14646_v53  ;;  %v1478_v48 = vsel %vm12185_vm15, %v1126_v22, 0.0  ;;  %v12277_v54 = vadd.s32 224, %v11829_v20  ;;  %v11134_v46 = vld [vmem:[%s14495_s5 + $0xc0] sm:$0xff]   ;;  %1379 = vst [vmem:[#allocation3 + $0xe8] sm:$0xf] %v9614_v49 }
 0x113   :  { %14648 = vst [vmem:[#allocation33_spill] sm:$0xff] %v14647_v53  ;;  %v12285_v16 = vld [vmem:[%s14495_s5 + $0x238] sm:$0xff]   ;;  %1066 = vst [vmem:[#allocation3 + $0x138] sm:$0xf] %v9589_v19  ;;  %v875_v33 = vadd.f32 %v12264_v32, %v838_v26  ;;  %v843_v37 = vmax.f32 %v807_v1, 0.0  ;;  %v9649_v28 = vpack.c.bf16 %v1478_v48, %v1478_v48  ;;  %v1094_v6 = vld [vmem:[#allocation2 + $0xa9] sm:$0xff]  ;;  %v810_v48 = vadd.f32 %v11511_v11, %v10667_v18 }
 0x114   :  { %v1096_v10 = vld [vmem:[#allocation2 + $0xb9] sm:$0xff]  ;;  %1381 = vst [vmem:[#allocation3 + $0x100] sm:$0xf] %v9616_v29  ;;  %v1095_v62 = vld [vmem:[#allocation2 + $0xb1] sm:$0xff]  ;;  %909 = vst [vmem:[#allocation2 + $0xe0] sm:$0xff] %v877_v7  ;;  %v9592_v4 = vpack.c.bf16 %v877_v7, %v877_v7  ;;  %v12290_v36 = vadd.s32 248, %v11829_v20  ;;  %v801_v7 = vpop.f32.mrf.mxu0  ;;  %9925 = vmatpush3.bf16.msra.mxu0 %v11134_v46 }
 0x115   :  { %v1129_v21 = vld [vmem:[#allocation2 + $0xbf] sm:$0xff]  ;;  %v9619_v22 = vpack.c.bf16 %v1096_v10, %v1096_v10  ;;  %v1127_v49 = vld [vmem:[#allocation2 + $0xaf] sm:$0xff]  ;;  %v1128_v26 = vld [vmem:[#allocation2 + $0xb7] sm:$0xff]  ;;  %v1223_v1 = vsel %vm12199_vm1, %v1095_v62, 0.0  ;;  %907 = vst [vmem:[#allocation2 + $0xd0] sm:$0xff] %v875_v33  ;;  %v9590_v43 = vpack.c.bf16 %v875_v33, %v875_v33  ;;  %v880_v29 = vadd.f32 %v12264_v32, %v843_v37  ;;  %10764 = vmatprep.subr.bf16.mxu0 %v12285_v16 }
 0x116   :  { %v9652_v19 = vpack.c.bf16 %v1129_v21, %v1129_v21  ;;  %v841_v13 = vmax.f32 %v799_v5, 0.0  ;;  %1638 = vst [vmem:[#allocation3 + $0x110] sm:$0xf] %v9649_v28  ;;  %1069 = vst [vmem:[#allocation3 + $0x15c] sm:$0xf] %v9592_v4  ;;  %v9650_v40 = vpack.c.bf16 %v1127_v49, %v1127_v49  ;;  %v1480_v63 = vsel %vm12220_vm0, %v1128_v26, 0.0 }
 0x117   :  { %1384 = vst [vmem:[#allocation3 + $0x124] sm:$0xf] %v9619_v22  ;;  %v12295_v10 = vld [vmem:[#allocation3 + $0x78] ss:$12 sps:$4 sm:$0xff]   ;;  %v9617_v21 = vpack.c.bf16 %v1094_v6, %v1094_v6  ;;  %v11181_v33 = vld [vmem:[%s14495_s5 + $0x1f8] sm:$0xff]   ;;  %912 = vst [vmem:[#allocation2 + $0xf8] sm:$0xff] %v880_v29  ;;  %v9595_v37 = vpack.c.bf16 %v880_v29, %v880_v29  ;;  %v802_v18 = vadd.f32 %v11511_v11, %v801_v7 }
 0x118   :  { %1641 = vst [vmem:[#allocation3 + $0x134] sm:$0xf] %v9652_v19  ;;  %1067 = vst [vmem:[#allocation3 + $0x144] sm:$0xf] %v9590_v43  ;;  %v878_v5 = vadd.f32 %v12264_v32, %v841_v13  ;;  %v11112_v28 = vld [vmem:[#allocation3 + $0xe0] ss:$12 sps:$4 sm:$0xff]   ;;  %v9651_v62 = vpack.c.bf16 %v1480_v63, %v1480_v63  ;;  %v9618_v19 = vpack.c.bf16 %v1223_v1, %v1223_v1  ;;  %10046 = vmatprep.subr.bf16.mxu1 %v11181_v33 }
 0x119   :  { %v12303_v22 = vld [vmem:[#allocation3 + $0x94] ss:$12 sps:$4 sm:$0xff]   ;;  %v844_v46 = vmax.f32 %v810_v48, 0.0  ;;  %1639 = vst [vmem:[#allocation3 + $0x11c] sm:$0xf] %v9650_v40  ;;  %v295_v6 = vand.u32 15, %v12277_v54  ;;  %10701 = vmatmul.mubr.bf16.gmra.mxu0 %v11112_v28  ;;  %2236 = vmatmul.mubr.bf16.gmra.mxu1 %v12295_v10 }
 0x11a   :  { %v1097_v49 = vld [vmem:[#allocation2 + $0xc1] sm:$0xff]  ;;  %1382 = vst [vmem:[#allocation3 + $0x10c] sm:$0xf] %v9617_v21  ;;  %1072 = vst [vmem:[#allocation3 + $0x180] sm:$0xf] %v9595_v37  ;;  %v9593_v11 = vpack.c.bf16 %v878_v5, %v878_v5  ;;  %v842_v43 = vmax.f32 %v802_v18, 0.0  ;;  %2243 = vmatprep.mubr.bf16.mxu1 %v12303_v22 }
 0x11b   :  { %v1130_v4 = vld [vmem:[#allocation2 + $0xc7] sm:$0xff]  ;;  %v1225_v26 = vsel %vm12233_vm11, %v1097_v49, 0.0  ;;  %910 = vst [vmem:[#allocation2 + $0xe8] sm:$0xff] %v878_v5  ;;  %1640 = vst [vmem:[#allocation3 + $0x128] sm:$0xf] %v9651_v62  ;;  %v881_v40 = vadd.f32 %v12264_v32, %v844_v46  ;;  %v92_v54 = vadd.s32 232, %v11829_v20 }
 0x11c   :  { %v11114_v29 = vld [vmem:[#allocation3 + $0xf8] ss:$12 sps:$4 sm:$0xff]   ;;  %v1482_v13 = vsel %vm12244_vm12, %v1130_v4, 0.0  ;;  %v9620_v48 = vpack.c.bf16 %v1225_v26, %v1225_v26  ;;  %1383 = vst [vmem:[#allocation3 + $0x118] sm:$0xf] %v9618_v19  ;;  %v1100_v7 = vld [vmem:[#allocation2 + $0xd9] sm:$0xff]  ;;  %v879_v37 = vadd.f32 %v12264_v32, %v842_v43 }
 0x11d   :  { %v9653_v1 = vpack.c.bf16 %v1482_v13, %v1482_v13  ;;  %v1133_v63 = vld [vmem:[#allocation2 + $0xdf] sm:$0xff]  ;;  %v14649_v21 = vand.u32 15, %v12205_v23  ;;  %v14650_v33 = vmov 0  ;;  %1070 = vst [vmem:[#allocation3 + $0x168] sm:$0xf] %v9593_v11  ;;  %10704 = vmatprep.mubr.bf16.mxu0 %v11114_v29  ;;  %v14653_v5 = vand.u32 15, %v12191_v60 }
 0x11e   :  { %v14654_v18 = vmov 0  ;;  %v93_v28 = vadd.s32 240, %v11829_v20  ;;  %1385 = vst [vmem:[#allocation3 + $0x130] sm:$0xf] %v9620_v48  ;;  %v9623_v23 = vpack.c.bf16 %v1100_v7, %v1100_v7  ;;  %v1098_v62 = vld [vmem:[#allocation2 + $0xc9] sm:$0xff]  ;;  %v1099_v49 = vld [vmem:[#allocation2 + $0xd1] sm:$0xff]  ;;  %v9596_v32 = vpack.c.bf16 %v881_v40, %v881_v40 }
 0x11f   :  { %vm12316_vm11 = vcmp.ne.s32.totalorder %v14649_v21, 15  ;;  %vm12324_vm1 = vcmp.ne.s32.totalorder %v14653_v5, 0  ;;  %v1131_v4 = vld [vmem:[#allocation2 + $0xcf] sm:$0xff]  ;;  %v316_v46 = vand.u32 15, %v12290_v36  ;;  %913 = vst [vmem:[#allocation2 + $0x100] sm:$0xff] %v881_v40  ;;  %v9656_v19 = vpack.c.bf16 %v1133_v63, %v1133_v63  ;;  %v1132_v26 = vld [vmem:[#allocation2 + $0xd7] sm:$0xff] }
 0x120   :  { %v14651_v33 = vsel %vm12316_vm11, 4294967295, %v14650_v33  ;;  %v14655_v18 = vsel %vm12324_vm1, 4294967295, %v14654_v18  ;;  %1642 = vst [vmem:[#allocation3 + $0x140] sm:$0xf] %v9653_v1  ;;  %v1227_v60 = vsel %vm12269_vm14, %v1099_v49, 0.0  ;;  %911 = vst [vmem:[#allocation2 + $0xf0] sm:$0xff] %v879_v37  ;;  %v9594_v11 = vpack.c.bf16 %v879_v37, %v879_v37 }
 0x121   :  { %14652 = vst [vmem:[#allocation34_spill] sm:$0xff] %v14651_v33  ;;  %14656 = vst [vmem:[#allocation35_spill] sm:$0xff] %v14655_v18  ;;  %v9654_v43 = vpack.c.bf16 %v1131_v4, %v1131_v4  ;;  %v9621_v29 = vpack.c.bf16 %v1098_v62, %v1098_v62  ;;  %v302_v13 = vand.u32 15, %v92_v54  ;;  %v12332_v48 = vld [vmem:[#allocation3 + $0x90] ss:$12 sps:$4 sm:$0xff]   ;;  %v1484_v36 = vsel %vm12324_vm1, %v1132_v26, 0.0 }
 0x122   :  { %1388 = vst [vmem:[#allocation3 + $0x154] sm:$0xf] %v9623_v23  ;;  %1073 = vst [vmem:[#allocation3 + $0x18c] sm:$0xf] %v9596_v32  ;;  %vm12336_vm12 = vcmp.ne.s32.totalorder %v295_v6, 0  ;;  %v14657_v40 = vmov 0  ;;  %v9622_v1 = vpack.c.bf16 %v1227_v60, %v1227_v60  ;;  %v9655_v21 = vpack.c.bf16 %v1484_v36, %v1484_v36  ;;  %2244 = vmatmul.mubr.bf16.gmra.mxu1 %v12332_v48 }
 0x123   :  { %1645 = vst [vmem:[#allocation3 + $0x164] sm:$0xf] %v9656_v19  ;;  %v14658_v40 = vsel %vm12336_vm12, 4294967295, %v14657_v40  ;;  %1071 = vst [vmem:[#allocation3 + $0x174] sm:$0xf] %v9594_v11  ;;  %v309_v37 = vand.u32 15, %v93_v28 }
 0x124   :  { %14659 = vst [vmem:[#allocation36_spill] sm:$0xff] %v14658_v40  ;;  %v11119_v7 = vld [vmem:[#allocation3 + $0x110] ss:$12 sps:$4 sm:$0xff]   ;;  %v12340_v63 = vld [vmem:[#allocation3 + $0xac] ss:$12 sps:$4 sm:$0xff]   ;;  %vm12344_vm14 = vcmp.ne.s32.totalorder %v316_v46, 15 }
 0x125   :  { %1643 = vst [vmem:[#allocation3 + $0x14c] sm:$0xf] %v9654_v43  ;;  %1386 = vst [vmem:[#allocation3 + $0x13c] sm:$0xf] %v9621_v29  ;;  %v1101_v54 = vld [vmem:[#allocation2 + $0xe1] sm:$0xff]  ;;  %v14660_v6 = vmov 0  ;;  %10705 = vmatmul.mubr.bf16.gmra.mxu0 %v11119_v7  ;;  %2251 = vmatprep.mubr.bf16.mxu1 %v12340_v63 }
 0x126   :  { %v1134_v5 = vld [vmem:[#allocation2 + $0xe7] sm:$0xff]  ;;  %1387 = vst [vmem:[#allocation3 + $0x148] sm:$0xf] %v9622_v1  ;;  %v1229_v23 = vsel %vm12316_vm11, %v1101_v54, 0.0  ;;  %v14661_v6 = vsel %vm12344_vm14, 4294967295, %v14660_v6  ;;  %vm12350_vm1 = vcmp.ne.s32.totalorder %v302_v13, 15 }
 0x127   :  { %14662 = vst [vmem:[#allocation37_spill] sm:$0xff] %v14661_v6  ;;  %v11121_v62 = vld [vmem:[#allocation3 + $0x128] ss:$12 sps:$4 sm:$0xff]   ;;  %1644 = vst [vmem:[#allocation3 + $0x158] sm:$0xf] %v9655_v21  ;;  %v1486_v49 = vsel %vm12336_vm12, %v1134_v5, 0.0  ;;  %v9624_v4 = vpack.c.bf16 %v1229_v23, %v1229_v23 }
 0x128   :  { %v14663_v32 = vmov 0  ;;  %v9657_v28 = vpack.c.bf16 %v1486_v49, %v1486_v49  ;;  %v1104_v19 = vld [vmem:[#allocation2 + $0xf9] sm:$0xff]  ;;  %v1105_v26 = vld [vmem:[#allocation2 + $0x101] sm:$0xff]  ;;  %10708 = vmatprep.mubr.bf16.mxu0 %v11121_v62  ;;  %vm12356_vm11 = vcmp.ne.s32.totalorder %v309_v37, 0  ;;  %v14666_v60 = vmov 0  ;;  %v1102_v29 = vld [vmem:[#allocation2 + $0xe9] sm:$0xff] }
 0x129   :  { %v14664_v32 = vsel %vm12350_vm1, 4294967295, %v14663_v32  ;;  %v1137_v46 = vld [vmem:[#allocation2 + $0xff] sm:$0xff]  ;;  %v14667_v60 = vsel %vm12356_vm11, 4294967295, %v14666_v60  ;;  %1389 = vst [vmem:[#allocation3 + $0x160] sm:$0xf] %v9624_v4  ;;  %v1233_v11 = vsel %vm12344_vm14, %v1105_v26, 0.0  ;;  %v9627_v43 = vpack.c.bf16 %v1104_v19, %v1104_v19 }
 0x12a   :  { %14665 = vst [vmem:[#allocation38_spill] sm:$0xff] %v14664_v32  ;;  %14668 = vst [vmem:[#allocation39_spill] sm:$0xff] %v14667_v60  ;;  %v1103_v13 = vld [vmem:[#allocation2 + $0xf1] sm:$0xff]  ;;  %v9660_v1 = vpack.c.bf16 %v1137_v46, %v1137_v46  ;;  %v9628_v7 = vpack.c.bf16 %v1233_v11, %v1233_v11  ;;  %v9625_v37 = vpack.c.bf16 %v1102_v29, %v1102_v29  ;;  %v9790_v29 = vpop.f32.mrf.mxu1  ;;  %v11255_v39 = vld [vmem:[#allocation3 + $0xf0] ss:$12 sps:$4 sm:$0xff]   ;;  %vm14670_vm14 = vcmask 1043456  }
 0x12b   :  { %v1135_v36 = vld [vmem:[#allocation2 + $0xef] sm:$0xff]  ;;  %1646 = vst [vmem:[#allocation3 + $0x170] sm:$0xf] %v9657_v28  ;;  %v1136_v21 = vld [vmem:[#allocation2 + $0xf7] sm:$0xff]  ;;  %v1231_v54 = vsel %vm12350_vm1, %v1103_v13, 0.0  ;;  %vm14671_vm1 = vcmask 64512  }
 0x12c   :  { %v9658_v5 = vpack.c.bf16 %v1135_v36, %v1135_v36  ;;  %1392 = vst [vmem:[#allocation3 + $0x184] sm:$0xf] %v9627_v43  ;;  %v11126_v23 = vld [vmem:[#allocation3 + $0x140] ss:$12 sps:$4 sm:$0xff]   ;;  %v9626_v62 = vpack.c.bf16 %v1231_v54, %v1231_v54  ;;  %v1488_v49 = vsel %vm12356_vm11, %v1136_v21, 0.0  ;;  %v9791_v13 = vpop.f32.mrf.mxu1  ;;  %v11154_v54 = vld [vmem:[%s14495_s5 + $0x228] sm:$0xff]  }
 0x12d   :  { %1649 = vst [vmem:[#allocation3 + $0x194] sm:$0xf] %v9660_v1  ;;  %1393 = vst [vmem:[#allocation3 + $0x190] sm:$0xf] %v9628_v7  ;;  %v12366_v4 = vld [vmem:[#allocation3 + $0xa8] ss:$12 sps:$4 sm:$0xff]   ;;  %v9659_v28 = vpack.c.bf16 %v1488_v49, %v1488_v49  ;;  %10709 = vmatmul.mubr.bf16.gmra.mxu0 %v11126_v23  ;;  %v12379_v36 = vadd.f32 %v9791_v13, %v9790_v29 }
 0x12e   :  { %1647 = vst [vmem:[#allocation3 + $0x17c] sm:$0xf] %v9658_v5  ;;  %1390 = vst [vmem:[#allocation3 + $0x16c] sm:$0xf] %v9625_v37  ;;  %v11128_v19 = vld [vmem:[#allocation3 + $0x158] ss:$12 sps:$4 sm:$0xff]   ;;  %2252 = vmatmul.mubr.bf16.gmra.mxu1 %v12366_v4 }
 0x12f   :  { %1391 = vst [vmem:[#allocation3 + $0x178] sm:$0xf] %v9626_v62  ;;  %v12368_v26 = vld [vmem:[#allocation3 + $0xc4] ss:$12 sps:$4 sm:$0xff]   ;;  %1648 = vst [vmem:[#allocation3 + $0x188] sm:$0xf] %v9659_v28  ;;  %10712 = vmatprep.mubr.bf16.mxu0 %v11128_v19 }
 0x130   :  { %2259 = vmatprep.mubr.bf16.mxu1 %v12368_v26  ;;  %v12372_v11 = vld [vmem:[#allocation3 + $0xc0] ss:$12 sps:$4 sm:$0xff]   ;;  %v12374_v43 = vld [vmem:[#allocation3 + $0xdc] ss:$12 sps:$4 sm:$0xff]   ;;  %v11513_v7 = vld [vmem:[#allocation3 + $0x18] ss:$12 sps:$4 sm:$0xff]  }
 0x131   :  { %v11145_v1 = vld [vmem:[%s14495_s5 + $0x230] sm:$0xff]   ;;  %v11165_v5 = vld [vmem:[%s14495_s5 + $0x220] sm:$0xff]   ;;  %v11172_v37 = vld [vmem:[%s14495_s5 + $0x218] sm:$0xff]   ;;  %vm14669_vm11 = vcmask 1043456  }
 0x132   :  { %v12384_v21 = vld [vmem:[#allocation3 + $0xd8] ss:$12 sps:$4 sm:$0xff]   ;;  %v12430_v49 = vld [vmem:[#allocation3 + $0x13c] ss:$12 sps:$4 sm:$0xff]  }
 0x133   :  { %v12416_v23 = vld [vmem:[#allocation3 + $0x124] ss:$12 sps:$4 sm:$0xff]   ;;  %v11186_v62 = vld [vmem:[%s14495_s5 + $0x208] sm:$0xff]  }
 0x134   :  { %v11215_v28 = vld [vmem:[%s14497_s7 + $0x14] ss:$8 sps:$4 sm:$0xff]   ;;  %v12446_v19 = vld [vmem:[#allocation3 + $0x150] ss:$12 sps:$4 sm:$0xff]  }
 0x135   :  { %v11133_v46 = vld [vmem:[#allocation3 + $0x170] ss:$12 sps:$4 sm:$0xff]   ;;  %v11184_v29 = vld [vmem:[%s14495_s5 + $0x1f0] sm:$0xff]   ;;  %v11256_v34 = vld [vmem:[#allocation3 + $0x10c] ss:$12 sps:$4 sm:$0xff]  }
 0x136   :  { %10713 = vmatmul.mubr.bf16.gmra.mxu0 %v11133_v46  ;;  %2260 = vmatmul.mubr.bf16.gmra.mxu1 %v12372_v11  ;;  %v12449_v46 = vld [vmem:[#allocation3 + $0x16c] ss:$12 sps:$4 sm:$0xff]   ;;  %v11247_v33 = vld [vmem:[#allocation3 + $0xdc] ss:$12 sps:$4 sm:$0xff]   ;;  %v11282_v20 = vld [vmem:[%s14495_s5 + $0x10] sm:$0xff]  }
 0x137   :  { %3068 = vmatprep.mubr.bf16.mxu0 %v12051_v35  ;;  %2267 = vmatprep.mubr.bf16.mxu1 %v12374_v43  ;;  %v12388_v35 = vld [vmem:[#allocation3 + $0xf4] ss:$12 sps:$4 sm:$0xff]   ;;  %v11190_v13 = vld [vmem:[%s14495_s5 + $0x1a8] sm:$0xff]  }
 0x13e   :  { %3069 = vmatmul.mubr.bf16.vlgmr.msra.gmra.mxu0 %v11513_v7  ;;  %2268 = vmatmul.mubr.bf16.gmra.mxu1 %v12384_v21  ;;  %v11174_v7 = vld [vmem:[#allocation3 + $0x80] ss:$12 sps:$4 sm:$0xff]  }
 0x13f   :  { %10765 = vmatpush3.bf16.msra.mxu0 %v12285_v16  ;;  %3076 = vmatprep.mubr.bf16.mxu0 %v12099_v9  ;;  %v12399_v9 = vld [vmem:[#allocation3 + $0xf0] ss:$12 sps:$4 sm:$0xff]   ;;  %v12402_v16 = vld [vmem:[#allocation3 + $0x10c] ss:$12 sps:$4 sm:$0xff]  }
 0x140   :  { %10766 = vmatprep.subr.bf16.mxu0 %v11145_v1  ;;  %2275 = vmatprep.mubr.bf16.mxu1 %v12388_v35 }
 0x143   :  { %10767 = vmatpush3.bf16.msra.mxu0 %v11145_v1  ;;  %v11191_v1 = vld [vmem:[%s14495_s5 + $0x1e0] sm:$0xff]  }
 0x144   :  { %10768 = vmatprep.subr.bf16.mxu0 %v11154_v54 }
 0x146   :  { %3077 = vmatmul.mubr.bf16.gmra.mxu0 %v12111_v15  ;;  %2276 = vmatmul.mubr.bf16.gmra.mxu1 %v12399_v9  ;;  %v11177_v15 = vld [vmem:[%s14495_s5 + $0x210] sm:$0xff]  }
 0x147   :  { %3084 = vmatprep.mubr.bf16.mxu0 %v12139_v59  ;;  %10769 = vmatpush3.bf16.msra.mxu0 %v11154_v54  ;;  %v12413_v59 = vld [vmem:[#allocation3 + $0x108] ss:$12 sps:$4 sm:$0xff]  }
 0x148   :  { %10770 = vmatprep.subr.bf16.mxu0 %v11165_v5  ;;  %2283 = vmatprep.mubr.bf16.mxu1 %v12402_v16  ;;  %v11192_v54 = vld [vmem:[%s14495_s5 + $0x1a0] sm:$0xff]  }
 0x14b   :  { %10771 = vmatpush3.bf16.msra.mxu0 %v11165_v5  ;;  %v11196_v5 = vld [vmem:[%s14495_s5 + $0x198] sm:$0xff]  }
 0x14c   :  { %10772 = vmatprep.subr.bf16.mxu0 %v11172_v37 }
 0x14e   :  { %3085 = vmatmul.mubr.bf16.gmra.mxu0 %v12172_v41  ;;  %2284 = vmatmul.mubr.bf16.gmra.mxu1 %v12413_v59  ;;  %v11199_v41 = vld [vmem:[%s14495_s5 + $0x200] sm:$0xff]  }
 0x14f   :  { %3092 = vmatprep.mubr.bf16.mxu0 %v12181_v31  ;;  %10773 = vmatpush3.bf16.msra.mxu0 %v11172_v37  ;;  %v12427_v31 = vld [vmem:[#allocation3 + $0x120] ss:$12 sps:$4 sm:$0xff]  }
 0x150   :  { %10774 = vmatprep.subr.bf16.mxu0 %v11177_v15  ;;  %2291 = vmatprep.mubr.bf16.mxu1 %v12416_v23  ;;  %v11197_v37 = vld [vmem:[%s14495_s5 + $0x1d0] sm:$0xff]  }
 0x153   :  { %10775 = vmatpush3.bf16.msra.mxu0 %v11177_v15  ;;  %v11176_v15 = vld [vmem:[#allocation3 + $0xb0] ss:$12 sps:$4 sm:$0xff]  }
 0x154   :  { %10776 = vmatprep.subr.bf16.mxu0 %v11186_v62 }
 0x156   :  { %3093 = vmatmul.mubr.bf16.gmra.mxu0 %v12238_v27  ;;  %2292 = vmatmul.mubr.bf16.gmra.mxu1 %v12427_v31  ;;  %v12438_v27 = vld [vmem:[#allocation3 + $0x138] ss:$12 sps:$4 sm:$0xff]  }
 0x157   :  { %3100 = vmatprep.mubr.bf16.mxu0 %v12253_v25  ;;  %10777 = vmatpush3.bf16.msra.mxu0 %v11186_v62  ;;  %v12441_v25 = vld [vmem:[#allocation3 + $0x154] ss:$12 sps:$4 sm:$0xff]  }
 0x158   :  { %10778 = vmatprep.subr.bf16.mxu0 %v11199_v41  ;;  %2299 = vmatprep.mubr.bf16.mxu1 %v12430_v49  ;;  %v11198_v62 = vld [vmem:[%s14495_s5 + $0x190] sm:$0xff]  }
 0x15b   :  { %10779 = vmatpush3.bf16.msra.mxu0 %v11199_v41  ;;  %v11204_v41 = vld [vmem:[%s14495_s5 + $0x188] sm:$0xff]  }
 0x15c   :  { %4311 = vmatprep.subr.bf16.mxu0 %v11215_v28  ;;  %v11207_v28 = vld [vmem:[%s14495_s5 + $0x1c0] sm:$0xff]  }
 0x15e   :  { %3101 = vmatmul.mubr.bf16.gmra.mxu0 %v12295_v10  ;;  %2300 = vmatmul.mubr.bf16.gmra.mxu1 %v12438_v27  ;;  %v12454_v10 = vld [vmem:[#allocation3 + $0x168] ss:$12 sps:$4 sm:$0xff]  }
 0x15f   :  { %3108 = vmatprep.mubr.bf16.mxu0 %v12303_v22  ;;  %2307 = vmatprep.mubr.bf16.mxu1 %v12441_v25  ;;  %v11168_v22 = vld [vmem:[#allocation3 + $0x20] ss:$12 sps:$4 sm:$0xff]  }
 0x166   :  { %3109 = vmatmul.mubr.bf16.gmra.mxu0 %v12332_v48  ;;  %2308 = vmatmul.mubr.bf16.gmra.mxu1 %v12446_v19  ;;  %v11183_v48 = vld [vmem:[%s14495_s5 + $0x1b8] sm:$0xff]  }
 0x167   :  { %3116 = vmatprep.mubr.bf16.mxu0 %v12340_v63  ;;  %2315 = vmatprep.mubr.bf16.mxu1 %v12449_v46  ;;  %v11170_v63 = vld [vmem:[#allocation3 + $0x38] ss:$12 sps:$4 sm:$0xff]  }
 0x16e   :  { %3117 = vmatmul.mubr.bf16.gmra.mxu0 %v12366_v4  ;;  %2316 = vmatmul.mubr.bf16.gmra.mxu1 %v12454_v10  ;;  %v11171_v4 = vld [vmem:[#allocation3 + $0x50] ss:$12 sps:$4 sm:$0xff]  }
 0x16f   :  { %3124 = vmatprep.mubr.bf16.mxu0 %v12368_v26  ;;  %10732 = vmatprep.mubr.bf16.mxu1 %v11168_v22  ;;  %v11185_v26 = vld [vmem:[%s14495_s5 + $0x1b0] sm:$0xff]  }
 0x170   :  { %v11179_v22 = vld [vmem:[#allocation3 + $0xe0] ss:$12 sps:$4 sm:$0xff]  }
 0x176   :  { %3125 = vmatmul.mubr.bf16.gmra.mxu0 %v12372_v11  ;;  %10733 = vmatmul.mubr.bf16.vlgmr.msra.gmra.mxu1 %v11170_v63  ;;  %v11188_v11 = vld [vmem:[%s14495_s5 + $0x1e8] sm:$0xff]  }
 0x177   :  { %3132 = vmatprep.mubr.bf16.mxu0 %v12374_v43  ;;  %10736 = vmatprep.mubr.bf16.mxu1 %v11171_v4  ;;  %v11173_v43 = vld [vmem:[#allocation3 + $0x68] ss:$12 sps:$4 sm:$0xff]   ;;  %v11182_v63 = vld [vmem:[#allocation3 + $0x110] ss:$12 sps:$4 sm:$0xff]   ;;  %v11193_v4 = vld [vmem:[#allocation3 + $0x158] ss:$12 sps:$4 sm:$0xff]  }
 0x178   :  { %10047 = vmatpush3.bf16.msra.mxu1 %v11183_v48  ;;  %v11208_v48 = vld [vmem:[%s14495_s5 + $0x180] sm:$0xff]  }
 0x179   :  { %10048 = vmatprep.subr.bf16.mxu1 %v11184_v29  ;;  %v11189_v29 = vld [vmem:[#allocation3 + $0x140] ss:$12 sps:$4 sm:$0xff]  }
 0x17c   :  { %10049 = vmatpush3.bf16.msra.mxu1 %v11185_v26  ;;  %v11202_v26 = vld [vmem:[#allocation3 + $0x188] ss:$12 sps:$4 sm:$0xff]  }
 0x17d   :  { %10050 = vmatprep.subr.bf16.mxu1 %v11188_v11  ;;  %v2585_v11 = vld [vmem:[#allocation3 + $0x18c] sm:$0xff] }
 0x17e   :  { %3133 = vmatmul.mubr.bf16.gmra.mxu0 %v12384_v21  ;;  %10737 = vmatmul.mubr.bf16.gmra.mxu1 %v11173_v43  ;;  %v11194_v21 = vld [vmem:[%s14495_s5 + $0x1d8] sm:$0xff]  }
 0x17f   :  { %3140 = vmatprep.mubr.bf16.mxu0 %v12388_v35  ;;  %10740 = vmatprep.mubr.bf16.mxu1 %v11174_v7  ;;  %v11175_v35 = vld [vmem:[#allocation3 + $0x98] ss:$12 sps:$4 sm:$0xff]  }
 0x180   :  { %10051 = vmatpush3.bf16.msra.mxu1 %v11190_v13  ;;  %v11211_v43 = vld [vmem:[#allocation3 + $0x4c] ss:$12 sps:$4 sm:$0xff]  }
 0x181   :  { %10052 = vmatprep.subr.bf16.mxu1 %v11191_v1  ;;  %v9793_v1 = vpop.f32.mrf.mxu1 }
 0x183   :  { %v9794_v7 = vpop.f32.mrf.mxu1 }
 0x184   :  { %10053 = vmatpush3.bf16.msra.mxu1 %v11192_v54  ;;  %v11216_v54 = vld [vmem:[#allocation3 + $0x50] ss:$12 sps:$4 sm:$0xff]  }
 0x185   :  { %10054 = vmatprep.subr.bf16.mxu1 %v11194_v21  ;;  %v11238_v21 = vld [vmem:[%s14497_s7 + $0x4] ss:$8 sps:$4 sm:$0xff]  }
 0x186   :  { %3141 = vmatmul.mubr.bf16.gmra.mxu0 %v12399_v9  ;;  %10741 = vmatmul.mubr.bf16.gmra.mxu1 %v11175_v35  ;;  %v11203_v9 = vld [vmem:[%s14495_s5 + $0x1c8] sm:$0xff]   ;;  %v11217_v35 = vld [vmem:[#allocation3 + $0x68] ss:$12 sps:$4 sm:$0xff]  }
 0x187   :  { %3148 = vmatprep.mubr.bf16.mxu0 %v12402_v16  ;;  %10744 = vmatprep.mubr.bf16.mxu1 %v11176_v15  ;;  %v11178_v16 = vld [vmem:[#allocation3 + $0xc8] ss:$12 sps:$4 sm:$0xff]  }
 0x188   :  { %10055 = vmatpush3.bf16.msra.mxu1 %v11196_v5 }
 0x189   :  { %10056 = vmatprep.subr.bf16.mxu1 %v11197_v37  ;;  %v11218_v37 = vld [vmem:[#allocation3 + $0x48] ss:$12 sps:$4 sm:$0xff]  }
 0x18c   :  { %10057 = vmatpush3.bf16.msra.mxu1 %v11198_v62 }
 0x18d   :  { %10058 = vmatprep.subr.bf16.mxu1 %v11203_v9  ;;  %v11219_v9 = vld [vmem:[#allocation3 + $0x64] ss:$12 sps:$4 sm:$0xff]  }
 0x18e   :  { %3149 = vmatmul.mubr.bf16.gmra.mxu0 %v12413_v59  ;;  %10745 = vmatmul.mubr.bf16.gmra.mxu1 %v11178_v16  ;;  %v11180_v59 = vld [vmem:[#allocation3 + $0xf8] ss:$12 sps:$4 sm:$0xff]   ;;  %v9795_v16 = vadd.f32 %v9794_v7, %v9793_v1 }
 0x18f   :  { %3156 = vmatprep.mubr.bf16.mxu0 %v12416_v23  ;;  %10748 = vmatprep.mubr.bf16.mxu1 %v11179_v22  ;;  %v11187_v23 = vld [vmem:[#allocation3 + $0x128] ss:$12 sps:$4 sm:$0xff]  }
 0x190   :  { %10059 = vmatpush3.bf16.msra.mxu1 %v11204_v41  ;;  %v11236_v41 = vld [vmem:[%s14497_s7] ss:$8 sps:$4 sm:$0xff]  }
 0x191   :  { %10060 = vmatprep.subr.bf16.mxu1 %v11207_v28 }
 0x194   :  { %10061 = vmatpush3.bf16.msra.mxu1 %v11208_v48 }
 0x196   :  { %3157 = vmatmul.mubr.bf16.gmra.mxu0 %v12427_v31  ;;  %10749 = vmatmul.mubr.bf16.gmra.mxu1 %v11180_v59  ;;  %v11195_v31 = vld [vmem:[#allocation3 + $0x170] ss:$12 sps:$4 sm:$0xff]  }
 0x197   :  { %3164 = vmatprep.mubr.bf16.mxu0 %v12430_v49  ;;  %10752 = vmatprep.mubr.bf16.mxu1 %v11182_v63  ;;  %v12517_v49 = vld [vmem:[#allocation3 + $0x184] ss:$12 sps:$4 sm:$0xff]  }
 0x198   :  { %v12539_v59 = vld [vmem:[%s14493_s3] sm:$0xf] }
 0x199   :  { %v4587_v42 = vsel %vm14670_vm14, %v12539_v59, 0  ;;  %vm14672_vm14 = vmmov %vm14671_vm1 }
 0x19e   :  { %3165 = vmatmul.mubr.bf16.gmra.mxu0 %v12438_v27  ;;  %10753 = vmatmul.mubr.bf16.gmra.mxu1 %v11187_v23  ;;  %v11205_v27 = vld [vmem:[#allocation3 + $0x34] ss:$12 sps:$4 sm:$0xff]  }
 0x19f   :  { %3172 = vmatprep.mubr.bf16.mxu0 %v12441_v25  ;;  %10756 = vmatprep.mubr.bf16.mxu1 %v11189_v29  ;;  %v2583_v25 = vld [vmem:[#allocation3 + $0x180] sm:$0xff] }
 0x1a0   :  { %v12521_v13 = vcombine.low %v2583_v25, %v2585_v11 }
 0x1a6   :  { %3173 = vmatmul.mubr.bf16.gmra.mxu0 %v12446_v19  ;;  %10757 = vmatmul.mubr.bf16.gmra.mxu1 %v11193_v4  ;;  %v11209_v19 = vld [vmem:[#allocation3 + $0x38] ss:$12 sps:$4 sm:$0xff]  }
 0x1a7   :  { %3180 = vmatprep.mubr.bf16.mxu0 %v12449_v46  ;;  %10760 = vmatprep.mubr.bf16.mxu1 %v11195_v31  ;;  %v11210_v46 = vld [vmem:[#allocation3 + $0x30] ss:$12 sps:$4 sm:$0xff]   ;;  %v10686_v5 = vpop.f32.mrf.mxu0 }
 0x1a9   :  { %v2358_v62 = vpop.f32.mrf.mxu0 }
 0x1aa   :  { %v12534_v28 = vadd.f32 %v12379_v36, %v2358_v62  ;;  %v11221_v36 = vld [vmem:[#allocation3 + $0x80] ss:$12 sps:$4 sm:$0xff]  }
 0x1ab   :  { %v9796_v15 = vpop.f32.mrf.mxu1  ;;  %v10687_v48 = vpop.f32.mrf.mxu0 }
 0x1ad   :  { %v9797_v22 = vpop.f32.mrf.mxu1  ;;  %v2361_v29 = vpop.f32.mrf.mxu0 }
 0x1ae   :  { %3181 = vmatmul.mubr.bf16.gmra.mxu0 %v12454_v10  ;;  %10761 = vmatmul.mubr.bf16.gmra.mxu1 %v11202_v26  ;;  %v11213_v10 = vld [vmem:[%s14497_s7 + $0x10] ss:$8 sps:$4 sm:$0xff]   ;;  %v9798_v63 = vadd.f32 %v9797_v22, %v9796_v15  ;;  %v12543_v31 = vadd.f32 %v9795_v16, %v2361_v29  ;;  %v11226_v15 = vld [vmem:[#allocation3 + $0xb0] ss:$12 sps:$4 sm:$0xff]   ;;  %v11228_v22 = vld [vmem:[#allocation3 + $0x78] ss:$12 sps:$4 sm:$0xff]  }
 0x1af   :  { %3188 = vmatprep.mubr.bf16.mxu0 %v12517_v49  ;;  %3935 = vmatprep.mubr.bf16.mxu1 %v11205_v27  ;;  %v9799_v23 = vpop.f32.mrf.mxu1  ;;  %v11222_v27 = vld [vmem:[#allocation3 + $0x98] ss:$12 sps:$4 sm:$0xff]  }
 0x1b0   :  { %v12541_v4 = vadd.f32 %v10686_v5, %v9798_v63  ;;  %v11229_v63 = vld [vmem:[#allocation3 + $0x94] ss:$12 sps:$4 sm:$0xff]  }
 0x1b1   :  { %v9800_v26 = vpop.f32.mrf.mxu1 }
 0x1b2   :  { %v9801_v25 = vadd.f32 %v9800_v26, %v9799_v23 }
 0x1b4   :  { %v12547_v1 = vadd.f32 %v10687_v48, %v9801_v25 }
 0x1b5   :  { %v10690_v11 = vpop.f32.mrf.mxu0 }
 0x1b6   :  { %3189 = vmatmul.mubr.bf16.gmra.mxu0 %v12521_v13  ;;  %3936 = vmatmul.mubr.bf16.vlgmr.msra.gmra.mxu1 %v11210_v46  ;;  %v9802_v46 = vpop.f32.mrf.mxu1 }
 0x1b7   :  { %10780 = vmatprep.mubr.bf16.mxu0 %v11209_v19  ;;  %3943 = vmatprep.mubr.bf16.mxu1 %v11211_v43  ;;  %v11223_v19 = vld [vmem:[#allocation3 + $0x60] ss:$12 sps:$4 sm:$0xff]   ;;  %v11224_v43 = vld [vmem:[#allocation3 + $0x7c] ss:$12 sps:$4 sm:$0xff]  }
 0x1b8   :  { %v9803_v7 = vpop.f32.mrf.mxu1 }
 0x1ba   :  { %v9805_v5 = vpop.f32.mrf.mxu1 }
 0x1bc   :  { %v9806_v62 = vpop.f32.mrf.mxu1 }
 0x1be   :  { %10781 = vmatmul.mubr.bf16.vlgmr.msra.gmra.mxu0 %v11216_v54  ;;  %3944 = vmatmul.mubr.bf16.gmra.mxu1 %v11218_v37  ;;  %v9804_v54 = vadd.f32 %v9803_v7, %v9802_v46  ;;  %v11232_v7 = vld [vmem:[#allocation3 + $0xf8] ss:$12 sps:$4 sm:$0xff]  }
 0x1bf   :  { %4312 = vmatpush1.bf16.msra.mxu0 %v11213_v10  ;;  %10784 = vmatprep.mubr.bf16.mxu0 %v11217_v35  ;;  %v2374_v10 = vpop.f32.mrf.mxu0 }
 0x1c0   :  { %4313 = vmatprep.subr.bf16.mxu0 %v11238_v21  ;;  %3951 = vmatprep.mubr.bf16.mxu1 %v11219_v9  ;;  %v12549_v35 = vadd.f32 %v9804_v54, %v2374_v10  ;;  %v11227_v9 = vld [vmem:[#allocation3 + $0xc8] ss:$12 sps:$4 sm:$0xff]   ;;  %v9808_v48 = vpop.f32.mrf.mxu1 }
 0x1c1   :  { %v10691_v21 = vpop.f32.mrf.mxu0 }
 0x1c3   :  { %4314 = vmatpush1.bf16.msra.mxu0 %v11236_v41  ;;  %v2377_v37 = vpop.f32.mrf.mxu0  ;;  %v9807_v41 = vadd.f32 %v9806_v62, %v9805_v5  ;;  %v11234_v62 = vld [vmem:[#allocation3 + $0xac] ss:$12 sps:$4 sm:$0xff]  }
 0x1c4   :  { %11051 = vmatprep.subr.msk.bf16.mxu0 %vm14669_vm11, %v12539_v59  ;;  %vm4295_vm11 = vcmask 261120  }
 0x1c5   :  { %v10694_v16 = vpop.f32.mrf.mxu0  ;;  %v12551_v23 = vadd.f32 %v9807_v41, %v2377_v37 }
 0x1c6   :  { %10785 = vmatmul.mubr.bf16.gmra.mxu0 %v11221_v36  ;;  %3952 = vmatmul.mubr.bf16.gmra.mxu1 %v11223_v19  ;;  %v9809_v36 = vpop.f32.mrf.mxu1 }
 0x1c7   :  { %10788 = vmatprep.mubr.bf16.mxu0 %v11222_v27  ;;  %3959 = vmatprep.mubr.bf16.mxu1 %v11224_v43  ;;  %v2390_v29 = vpop.f32.mrf.mxu0  ;;  %v9810_v26 = vadd.f32 %v9809_v36, %v9808_v48  ;;  %v11231_v43 = vld [vmem:[#allocation3 + $0xe0] ss:$12 sps:$4 sm:$0xff]  }
 0x1c8   :  { %v9811_v25 = vpop.f32.mrf.mxu1 }
 0x1c9   :  { %v10695_v27 = vpop.f32.mrf.mxu0  ;;  %v12553_v19 = vadd.f32 %v10690_v11, %v9810_v26 }
 0x1ca   :  { %v9812_v10 = vpop.f32.mrf.mxu1 }
 0x1cb   :  { %v2393_v46 = vpop.f32.mrf.mxu0  ;;  %v9813_v54 = vadd.f32 %v9812_v10, %v9811_v25  ;;  %v11239_v25 = vld [vmem:[#allocation3 + $0x110] ss:$12 sps:$4 sm:$0xff]  }
 0x1cc   :  { %v9814_v37 = vpop.f32.mrf.mxu1 }
 0x1ce   :  { %10789 = vmatmul.mubr.bf16.gmra.mxu0 %v11226_v15  ;;  %3960 = vmatmul.mubr.bf16.gmra.mxu1 %v11228_v22  ;;  %v12555_v5 = vpop.f32.mrf.mxu0  ;;  %v11233_v15 = vld [vmem:[#allocation3 + $0x90] ss:$12 sps:$4 sm:$0xff]   ;;  %v9815_v22 = vpop.f32.mrf.mxu1 }
 0x1cf   :  { %10792 = vmatprep.mubr.bf16.mxu0 %v11227_v9  ;;  %3967 = vmatprep.mubr.bf16.mxu1 %v11229_v63  ;;  %v12557_v9 = vadd.f32 %v10691_v21, %v9813_v54  ;;  %v9816_v11 = vadd.f32 %v9815_v22, %v9814_v37  ;;  %v11241_v21 = vld [vmem:[#allocation3 + $0xa8] ss:$12 sps:$4 sm:$0xff]  }
 0x1d0   :  { %v2406_v41 = vpop.f32.mrf.mxu0  ;;  %v9817_v63 = vpop.f32.mrf.mxu1 }
 0x1d1   :  { %v12561_v36 = vadd.f32 %v9816_v11, %v2390_v29 }
 0x1d2   :  { %v12559_v48 = vpop.f32.mrf.mxu0  ;;  %v9818_v10 = vpop.f32.mrf.mxu1 }
 0x1d3   :  { %v9819_v60 = vadd.f32 %v9818_v10, %v9817_v63  ;;  %v11271_v63 = vld [vmem:[%s14495_s5 + $0x78] sm:$0xff]  }
 0x1d4   :  { %v2409_v26 = vpop.f32.mrf.mxu0  ;;  %10199 = vmatprep.subr.bf16.mxu1 %v11271_v63 }
 0x1d6   :  { %10793 = vmatmul.mubr.bf16.gmra.mxu0 %v11231_v43  ;;  %3968 = vmatmul.mubr.bf16.gmra.mxu1 %v11233_v15  ;;  %v11240_v43 = vld [vmem:[#allocation3 + $0x128] ss:$12 sps:$4 sm:$0xff]   ;;  %v11242_v15 = vld [vmem:[#allocation3 + $0xc4] ss:$12 sps:$4 sm:$0xff]  }
 0x1d7   :  { %10796 = vmatprep.mubr.bf16.mxu0 %v11232_v7  ;;  %3975 = vmatprep.mubr.bf16.mxu1 %v11234_v62  ;;  %v12565_v62 = vadd.f32 %v9819_v60, %v2393_v46  ;;  %v11244_v46 = vld [vmem:[#allocation3 + $0x140] ss:$12 sps:$4 sm:$0xff]  }
 0x1d9   :  { %v12563_v7 = vpop.f32.mrf.mxu0  ;;  %v9820_v54 = vpop.f32.mrf.mxu1 }
 0x1db   :  { %v12567_v37 = vpop.f32.mrf.mxu0  ;;  %v9821_v29 = vpop.f32.mrf.mxu1 }
 0x1dc   :  { %v9822_v22 = vadd.f32 %v9821_v29, %v9820_v54  ;;  %v11246_v29 = vld [vmem:[#allocation3 + $0xc0] ss:$12 sps:$4 sm:$0xff]  }
 0x1dd   :  { %v12569_v11 = vpop.f32.mrf.mxu0  ;;  %v9823_v6 = vpop.f32.mrf.mxu1 }
 0x1de   :  { %10797 = vmatmul.mubr.bf16.gmra.mxu0 %v11239_v25  ;;  %3976 = vmatmul.mubr.bf16.gmra.mxu1 %v11241_v21  ;;  %v11272_v25 = vld [vmem:[%s14495_s5 + $0x38] sm:$0xff]   ;;  %v12577_v10 = vadd.f32 %v10694_v16, %v9822_v22  ;;  %v11245_v21 = vld [vmem:[#allocation3 + $0x158] ss:$12 sps:$4 sm:$0xff]  }
 0x1df   :  { %10800 = vmatprep.mubr.bf16.mxu0 %v11240_v43  ;;  %3983 = vmatprep.mubr.bf16.mxu1 %v11242_v15  ;;  %v12579_v60 = vpop.f32.mrf.mxu0  ;;  %v9824_v43 = vpop.f32.mrf.mxu1 }
 0x1e0   :  { %v9825_v54 = vadd.f32 %v9824_v43, %v9823_v6  ;;  %10200 = vmatpush3.bf16.msra.mxu1 %v11272_v25 }
 0x1e2   :  { %v9826_v32 = vpop.f32.mrf.mxu1  ;;  %v12583_v53 = vadd.f32 %v10695_v27, %v9825_v54  ;;  %v11251_v27 = vld [vmem:[#allocation3 + $0xd8] ss:$12 sps:$4 sm:$0xff]  }
 0x1e4   :  { %v9827_v16 = vpop.f32.mrf.mxu1 }
 0x1e5   :  { %v12581_v15 = vpop.f32.mrf.mxu0  ;;  %v9828_v22 = vadd.f32 %v9827_v16, %v9826_v32  ;;  %v11273_v16 = vld [vmem:[%s14495_s5 + $0x70] sm:$0xff]  }
 0x1e6   :  { %10801 = vmatmul.mubr.bf16.gmra.mxu0 %v11244_v46  ;;  %3984 = vmatmul.mubr.bf16.gmra.mxu1 %v11246_v29  ;;  %v9829_v63 = vpop.f32.mrf.mxu1  ;;  %v11249_v46 = vld [vmem:[#allocation3 + $0x170] ss:$12 sps:$4 sm:$0xff]  }
 0x1e7   :  { %10804 = vmatprep.mubr.bf16.mxu0 %v11245_v21  ;;  %v12585_v3 = vpop.f32.mrf.mxu0  ;;  %3991 = vmatprep.mubr.bf16.mxu1 %v11247_v33  ;;  %v12589_v6 = vadd.f32 %v9828_v22, %v2406_v41  ;;  %v11250_v21 = vld [vmem:[#allocation3 + $0x188] ss:$12 sps:$4 sm:$0xff]   ;;  %v11274_v22 = vld [vmem:[%s14495_s5 + $0x30] sm:$0xff]  }
 0x1e8   :  { %v9830_v25 = vpop.f32.mrf.mxu1  ;;  %v11252_v33 = vld [vmem:[#allocation3 + $0xf4] ss:$12 sps:$4 sm:$0xff]   ;;  %10201 = vmatprep.subr.bf16.mxu1 %v11273_v16 }
 0x1e9   :  { %v12587_v44 = vpop.f32.mrf.mxu0  ;;  %v9831_v40 = vadd.f32 %v9830_v25, %v9829_v63  ;;  %v11254_v25 = vld [vmem:[#allocation3 + $0x1a0] ss:$12 sps:$4 sm:$0xff]   ;;  %10202 = vmatpush3.bf16.msra.mxu1 %v11274_v22  ;;  %v9074_v22 = vld [vmem:[%s14490_s0 + $0x100] sm:$0xff] }
 0x1eb   :  { %v12591_v43 = vpop.f32.mrf.mxu0  ;;  %v12595_v29 = vadd.f32 %v9831_v40, %v2409_v26 }
 0x1ed   :  { %v12593_v30 = vpop.f32.mrf.mxu0 }
 0x1ee   :  { %10805 = vmatmul.mubr.bf16.gmra.mxu0 %v11249_v46  ;;  %v9832_v54 = vpop.f32.mrf.mxu1  ;;  %3992 = vmatmul.mubr.bf16.gmra.mxu1 %v11251_v27 }
 0x1ef   :  { %10808 = vmatprep.mubr.bf16.mxu0 %v11250_v21  ;;  %v12597_v32 = vpop.f32.mrf.mxu0  ;;  %3999 = vmatprep.mubr.bf16.mxu1 %v11252_v33 }
 0x1f0   :  { %v9833_v41 = vpop.f32.mrf.mxu1 }
 0x1f1   :  { %v9834_v63 = vadd.f32 %v9833_v41, %v9832_v54  ;;  %v12605_v46 = vpop.f32.mrf.mxu0  ;;  %v12614_v54 = vld [vmem:[#allocation3] sm:$0xff] }
 0x1f2   :  { %v9835_v21 = vpop.f32.mrf.mxu1 }
 0x1f3   :  { %v12608_v40 = vadd.f32 %v12555_v5, %v9834_v63  ;;  %v12610_v26 = vpop.f32.mrf.mxu0  ;;  %v4257_v5 = vld [vmem:[%s14492_s2] sm:$0x1]  ;;  %v9075_v63 = vld [vmem:[%s14490_s0 + $0x108] sm:$0xff] }
 0x1f4   :  { %v9836_v27 = vpop.f32.mrf.mxu1  ;;  %v4258_v58 = vpack.c.bf16 %v4257_v5, %v4257_v5  ;;  %v9077_v5 = vld [vmem:[%s14490_s0 + $0x118] sm:$0xff] }
 0x1f5   :  { %v9837_v33 = vadd.f32 %v9836_v27, %v9835_v21 }
 0x1f6   :  { %v12612_v18 = vpop.f32.mrf.mxu0  ;;  %10809 = vmatmul.mubr.bf16.gmra.mxu0 %v11254_v25  ;;  %v9838_v55 = vpop.f32.mrf.mxu1  ;;  %4000 = vmatmul.mubr.bf16.gmra.mxu1 %v11255_v39 }
 0x1f7   :  { %4331 = vmatprep.mubr.bf16.mxu0 %v12614_v54  ;;  %v12621_v41 = vadd.f32 %v12559_v48, %v9837_v33  ;;  %4007 = vmatprep.mubr.bf16.mxu1 %v11256_v34  ;;  %v4514_v48 = vpack.c.bf16 %v9075_v63, %v9074_v22  ;;  %v11258_v34 = vld [vmem:[#allocation3 + $0x108] ss:$12 sps:$4 sm:$0xff]  }
 0x1f8   :  { %v12623_v16 = vpop.f32.mrf.mxu0  ;;  %v9839_v25 = vpop.f32.mrf.mxu1 }
 0x1f9   :  { %v9840_v21 = vadd.f32 %v9839_v25, %v9838_v55  ;;  %v11259_v55 = vld [vmem:[#allocation3 + $0x124] ss:$12 sps:$4 sm:$0xff]  }
 0x1fa   :  { %v12631_v27 = vpop.f32.mrf.mxu0  ;;  %v9841_v12 = vpop.f32.mrf.mxu1 }
 0x1fb   :  { %v12634_v33 = vadd.f32 %v9840_v21, %v12567_v37  ;;  %v9076_v37 = vld [vmem:[%s14490_s0 + $0x110] sm:$0xff] }
 0x1fc   :  { %v12636_v39 = vpop.f32.mrf.mxu0  ;;  %v9842_v17 = vpop.f32.mrf.mxu1  ;;  %v4515_v21 = vpack.c.bf16 %v9077_v5, %v9076_v37  ;;  %v11261_v5 = vld [vmem:[#allocation3 + $0x120] ss:$12 sps:$4 sm:$0xff]  }
 0x1fd   :  { %v9843_v2 = vadd.f32 %v9842_v17, %v9841_v12 }
 0x1fe   :  { %v9926_v57 = vpop.f32.mrf.mxu0  ;;  %9073 = vmatmul.mubr.msk.bf16.vlgmr.msra.gmra.mxu0 %vm4295_vm11, %v4258_v58  ;;  %v9844_v17 = vpop.f32.mrf.mxu1  ;;  %4008 = vmatmul.mubr.bf16.gmra.mxu1 %v11258_v34  ;;  %v9078_v58 = vld [vmem:[%s14490_s0 + $0x120] sm:$0xff]  ;;  %v11276_v34 = vld [vmem:[%s14495_s5 + $0x28] sm:$0xff]  }
 0x1ff   :  { %10813 = vmatpush3.bf16.msra.mxu0 %v4587_v42  ;;  %10814 = vmatprep.mubr.msk.bf16.mxu0 %vm14671_vm1, %v4514_v48  ;;  %v12649_v59 = vadd.f32 %v9843_v2, %v12579_v60  ;;  %v9079_v42 = vld [vmem:[%s14490_s0 + $0x128] sm:$0xff] }
 0x200   :  { %v9927_v12 = vpop.f32.mrf.mxu0  ;;  %4015 = vmatprep.mubr.bf16.mxu1 %v11259_v55  ;;  %v9845_v63 = vpop.f32.mrf.mxu1  ;;  %v4516_v2 = vpack.c.bf16 %v9079_v42, %v9078_v58  ;;  %v11275_v60 = vld [vmem:[%s14495_s5 + $0x68] sm:$0xff]   ;;  %v9080_v58 = vld [vmem:[%s14490_s0 + $0x130] sm:$0xff] }
 0x201   :  { %v12657_v22 = vadd.f32 %v9927_v12, %v9926_v57  ;;  %v9846_v48 = vadd.f32 %v9845_v63, %v9844_v17  ;;  %10203 = vmatprep.subr.bf16.mxu1 %v11275_v60  ;;  %v11262_v12 = vld [vmem:[#allocation3 + $0x13c] ss:$12 sps:$4 sm:$0xff]   ;;  %v9082_v63 = vld [vmem:[%s14490_s0 + $0x140] sm:$0xff] }
 0x202   :  { %v9929_v25 = vpop.f32.mrf.mxu0  ;;  %v9847_v50 = vpop.f32.mrf.mxu1  ;;  %10204 = vmatpush3.bf16.msra.mxu1 %v11276_v34 }
 0x203   :  { %v12666_v8 = vadd.f32 %v12563_v7, %v9846_v48 }
 0x204   :  { %v9930_v52 = vpop.f32.mrf.mxu0  ;;  %v9848_v55 = vpop.f32.mrf.mxu1 }
 0x205   :  { %v12668_v57 = vadd.f32 %v9930_v52, %v9929_v25  ;;  %v9849_v17 = vadd.f32 %v9848_v55, %v9847_v50  ;;  %v9081_v52 = vld [vmem:[%s14490_s0 + $0x138] sm:$0xff]  ;;  %v9083_v50 = vld [vmem:[%s14490_s0 + $0x148] sm:$0xff] }
 0x206   :  { %v9932_v37 = vpop.f32.mrf.mxu0  ;;  %10815 = vmatmul.mubr.msk.bf16.vlgmr.msra.gmra.mxu0 %vm14671_vm1, %v4515_v21  ;;  %v9850_v7 = vpop.f32.mrf.mxu1  ;;  %4016 = vmatmul.mubr.bf16.gmra.mxu1 %v11261_v5  ;;  %v4517_v60 = vpack.c.bf16 %v9081_v52, %v9080_v58  ;;  %v4518_v55 = vpack.c.bf16 %v9083_v50, %v9082_v63  ;;  %v9086_v52 = vld [vmem:[%s14490_s0 + $0x160] sm:$0xff] }
 0x207   :  { %10818 = vmatprep.mubr.msk.bf16.mxu0 %vm14672_vm14, %v4516_v2  ;;  %v12685_v25 = vadd.f32 %v12569_v11, %v9849_v17  ;;  %4023 = vmatprep.mubr.bf16.mxu1 %v11262_v12  ;;  %v11264_v11 = vld [vmem:[#allocation3 + $0x138] ss:$12 sps:$4 sm:$0xff]   ;;  %v11265_v17 = vld [vmem:[#allocation3 + $0x154] ss:$12 sps:$4 sm:$0xff]   ;;  %vm14673_vm14 = vmmov %vm14671_vm1 }
 0x208   :  { %v9933_v42 = vpop.f32.mrf.mxu0  ;;  %v9851_v48 = vpop.f32.mrf.mxu1  ;;  %v9084_v12 = vld [vmem:[%s14490_s0 + $0x150] sm:$0xff] }
 0x209   :  { %v12687_v21 = vadd.f32 %v9933_v42, %v9932_v37  ;;  %v9852_v34 = vadd.f32 %v9851_v48, %v9850_v7 }
 0x20a   :  { %v9935_v2 = vpop.f32.mrf.mxu0  ;;  %v9853_v5 = vpop.f32.mrf.mxu1 }
 0x20b   :  { %v12690_v56 = vadd.f32 %v9852_v34, %v12585_v3  ;;  %v9085_v3 = vld [vmem:[%s14490_s0 + $0x158] sm:$0xff]  ;;  %v11277_v34 = vld [vmem:[%s14495_s5 + $0x60] sm:$0xff]  }
 0x20c   :  { %v9936_v51 = vpop.f32.mrf.mxu0  ;;  %v9854_v47 = vpop.f32.mrf.mxu1  ;;  %v4519_v48 = vpack.c.bf16 %v9085_v3, %v9084_v12  ;;  %10205 = vmatprep.subr.bf16.mxu1 %v11277_v34  ;;  %v11267_v12 = vld [vmem:[#allocation3 + $0x150] ss:$12 sps:$4 sm:$0xff]  }
 0x20d   :  { %v12692_v61 = vadd.f32 %v9936_v51, %v9935_v2  ;;  %v9855_v37 = vadd.f32 %v9854_v47, %v9853_v5  ;;  %v9087_v47 = vld [vmem:[%s14490_s0 + $0x168] sm:$0xff] }
 0x20e   :  { %v9938_v38 = vpop.f32.mrf.mxu0  ;;  %10819 = vmatmul.mubr.msk.bf16.gmra.mxu0 %vm14671_vm1, %v4517_v60  ;;  %v9856_v58 = vpop.f32.mrf.mxu1  ;;  %4024 = vmatmul.mubr.bf16.gmra.mxu1 %v11264_v11  ;;  %v4520_v60 = vpack.c.bf16 %v9087_v47, %v9086_v52 }
 0x20f   :  { %10822 = vmatprep.mubr.msk.bf16.mxu0 %vm14673_vm14, %v4518_v55  ;;  %v12709_v7 = vadd.f32 %v9855_v37, %v12591_v43  ;;  %4031 = vmatprep.mubr.bf16.mxu1 %v11265_v17  ;;  %v11278_v55 = vld [vmem:[%s14495_s5 + $0x20] sm:$0xff]   ;;  %vm14674_vm14 = vmmov %vm14671_vm1 }
 0x210   :  { %v9939_v51 = vpop.f32.mrf.mxu0  ;;  %v9857_v63 = vpop.f32.mrf.mxu1  ;;  %10206 = vmatpush3.bf16.msra.mxu1 %v11278_v55 }
 0x211   :  { %v12711_v42 = vadd.f32 %v9939_v51, %v9938_v38  ;;  %v9858_v2 = vadd.f32 %v9857_v63, %v9856_v58  ;;  %v11268_v58 = vld [vmem:[#allocation3 + $0x16c] ss:$12 sps:$4 sm:$0xff]   ;;  %v9088_v51 = vld [vmem:[%s14490_s0 + $0x170] sm:$0xff]  ;;  %v9090_v63 = vld [vmem:[%s14490_s0 + $0x180] sm:$0xff] }
 0x212   :  { %v9941_v50 = vpop.f32.mrf.mxu0  ;;  %v9859_v5 = vpop.f32.mrf.mxu1 }
 0x213   :  { %v12720_v43 = vadd.f32 %v12581_v15, %v9858_v2  ;;  %v9089_v15 = vld [vmem:[%s14490_s0 + $0x178] sm:$0xff] }
 0x214   :  { %v9942_v11 = vpop.f32.mrf.mxu0  ;;  %v9860_v37 = vpop.f32.mrf.mxu1  ;;  %v4521_v55 = vpack.c.bf16 %v9089_v15, %v9088_v51  ;;  %v9094_v15 = vld [vmem:[%s14490_s0 + $0x1a0] sm:$0xff] }
 0x215   :  { %v12722_v38 = vadd.f32 %v9942_v11, %v9941_v50  ;;  %v9861_v3 = vadd.f32 %v9860_v37, %v9859_v5  ;;  %v9091_v50 = vld [vmem:[%s14490_s0 + $0x188] sm:$0xff] }
 0x216   :  { %v9944_v17 = vpop.f32.mrf.mxu0  ;;  %10823 = vmatmul.mubr.msk.bf16.gmra.mxu0 %vm14671_vm1, %v4519_v48  ;;  %v9862_v52 = vpop.f32.mrf.mxu1  ;;  %4032 = vmatmul.mubr.bf16.gmra.mxu1 %v11267_v12  ;;  %v4522_v11 = vpack.c.bf16 %v9091_v50, %v9090_v63 }
 0x217   :  { %10826 = vmatprep.mubr.msk.bf16.mxu0 %vm14674_vm14, %v4520_v60  ;;  %v12739_v48 = vadd.f32 %v12587_v44, %v9861_v3  ;;  %4039 = vmatprep.mubr.bf16.mxu1 %v11268_v58  ;;  %v11270_v44 = vld [vmem:[#allocation3 + $0x168] ss:$12 sps:$4 sm:$0xff]   ;;  %vm14675_vm14 = vmmov %vm14671_vm1  ;;  %v9092_v3 = vld [vmem:[%s14490_s0 + $0x190] sm:$0xff] }
 0x218   :  { %v9945_v47 = vpop.f32.mrf.mxu0  ;;  %v9863_v60 = vpop.f32.mrf.mxu1  ;;  %v9093_v58 = vld [vmem:[%s14490_s0 + $0x198] sm:$0xff] }
 0x219   :  { %v12741_v2 = vadd.f32 %v9945_v47, %v9944_v17  ;;  %v9864_v5 = vadd.f32 %v9863_v60, %v9862_v52  ;;  %v4523_v60 = vpack.c.bf16 %v9093_v58, %v9092_v3  ;;  %v9097_v58 = vld [vmem:[%s14490_s0 + $0x1b8] sm:$0xff] }
 0x21a   :  { %v9947_v34 = vpop.f32.mrf.mxu0  ;;  %v9865_v37 = vpop.f32.mrf.mxu1 }
 0x21b   :  { %v12744_v24 = vadd.f32 %v9864_v5, %v12597_v32  ;;  %v11279_v5 = vld [vmem:[%s14495_s5 + $0x58] sm:$0xff]  }
 0x21c   :  { %v9948_v12 = vpop.f32.mrf.mxu0  ;;  %v9866_v0 = vpop.f32.mrf.mxu1  ;;  %10207 = vmatprep.subr.bf16.mxu1 %v11279_v5 }
 0x21d   :  { %v12746_v14 = vadd.f32 %v9948_v12, %v9947_v34  ;;  %v9867_v17 = vadd.f32 %v9866_v0, %v9865_v37  ;;  %v9095_v0 = vld [vmem:[%s14490_s0 + $0x1a8] sm:$0xff] }
 0x21e   :  { %v9950_v45 = vpop.f32.mrf.mxu0  ;;  %10827 = vmatmul.mubr.msk.bf16.gmra.mxu0 %vm14671_vm1, %v4521_v55  ;;  %v9868_v32 = vpop.f32.mrf.mxu1  ;;  %4040 = vmatmul.mubr.bf16.gmra.mxu1 %v11270_v44  ;;  %v4524_v55 = vpack.c.bf16 %v9095_v0, %v9094_v15  ;;  %v9098_v15 = vld [vmem:[%s14490_s0 + $0x1c0] sm:$0xff]  ;;  %v9099_v0 = vld [vmem:[%s14490_s0 + $0x1c8] sm:$0xff] }
 0x21f   :  { %10830 = vmatprep.mubr.msk.bf16.mxu0 %vm14675_vm14, %v4522_v11  ;;  %v12763_v52 = vadd.f32 %v9867_v17, %v12610_v26  ;;  %4047 = vmatprep.mubr.bf16.mxu1 %v12517_v49  ;;  %v11280_v11 = vld [vmem:[%s14495_s5 + $0x18] sm:$0xff]   ;;  %v12781_v49 = vcombine.high %v12614_v54, %v12614_v54  ;;  %vm14677_vm14 = vmmov %vm14671_vm1  ;;  %v4526_v5 = vpack.c.bf16 %v9099_v0, %v9098_v15 }
 0x220   :  { %v9951_v51 = vpop.f32.mrf.mxu0  ;;  %v9869_v63 = vpop.f32.mrf.mxu1  ;;  %10208 = vmatpush3.bf16.msra.mxu1 %v11280_v11 }
 0x221   :  { %v12765_v47 = vadd.f32 %v9951_v51, %v9950_v45  ;;  %v9870_v34 = vadd.f32 %v9869_v63, %v9868_v32  ;;  %14676 = vst [vmem:[#allocation40_spill] sm:$0xff] %v12781_v49 }
 0x222   :  { %v9953_v50 = vpop.f32.mrf.mxu0  ;;  %v9871_v37 = vpop.f32.mrf.mxu1 }
 0x223   :  { %v12775_v45 = vadd.f32 %v12593_v30, %v9870_v34  ;;  %v9096_v30 = vld [vmem:[%s14490_s0 + $0x1b0] sm:$0xff] }
 0x224   :  { %v9954_v26 = vpop.f32.mrf.mxu0  ;;  %v9872_v44 = vpop.f32.mrf.mxu1 }
 0x225   :  { %v12777_v12 = vadd.f32 %v9954_v26, %v9953_v50  ;;  %v9873_v3 = vadd.f32 %v9872_v44, %v9871_v37  ;;  %v12810_v26 = vcombine.low %v12614_v54, %v12614_v54 }
 0x226   :  { %v9956_v17 = vpop.f32.mrf.mxu0  ;;  %10831 = vmatmul.mubr.msk.bf16.gmra.mxu0 %vm14671_vm1, %v4523_v60  ;;  %v9874_v32 = vpop.f32.mrf.mxu1  ;;  %4048 = vmatmul.mubr.bf16.gmra.mxu1 %v12521_v13 }
 0x227   :  { %10834 = vmatprep.mubr.msk.bf16.mxu0 %vm14677_vm14, %v4524_v55  ;;  %v12799_v63 = vadd.f32 %v12605_v46, %v9873_v3  ;;  %4055 = vmatprep.mubr.bf16.mxu1 %v12781_v49  ;;  %v4525_v55 = vpack.c.bf16 %v9097_v58, %v9096_v30  ;;  %14678 = vst [vmem:[#allocation41_spill] sm:$0xff] %v12810_v26  ;;  %vm14679_vm14 = vmmov %vm14671_vm1  ;;  %v9100_v30 = vld [vmem:[%s14490_s0 + $0x1d0] sm:$0xff]  ;;  %v9101_v58 = vld [vmem:[%s14490_s0 + $0x1d8] sm:$0xff] }
 0x228   :  { %v9957_v51 = vpop.f32.mrf.mxu0  ;;  %v9875_v60 = vpop.f32.mrf.mxu1 }
 0x229   :  { %v12801_v50 = vadd.f32 %v9957_v51, %v9956_v17  ;;  %v9876_v13 = vadd.f32 %v9875_v60, %v9874_v32  ;;  %v9103_v51 = vld [vmem:[%s14490_s0 + $0x1e8] sm:$0xff] }
 0x22a   :  { %v12804_v34 = vpop.f32.mrf.mxu0  ;;  %v9877_v11 = vpop.f32.mrf.mxu1 }
 0x22b   :  { %v12813_v46 = vadd.f32 %v9876_v13, %v12623_v16  ;;  %v9102_v16 = vld [vmem:[%s14490_s0 + $0x1e0] sm:$0xff]  ;;  %v4527_v13 = vpack.c.bf16 %v9101_v58, %v9100_v30  ;;  %v9104_v58 = vld [vmem:[%s14490_s0 + $0x1f0] sm:$0xff] }
 0x22c   :  { %v12806_v37 = vpop.f32.mrf.mxu0  ;;  %v9878_v44 = vpop.f32.mrf.mxu1 }
 0x22d   :  { %v9879_v3 = vadd.f32 %v9878_v44, %v9877_v11  ;;  %v4528_v11 = vpack.c.bf16 %v9103_v51, %v9102_v16  ;;  %v11281_v44 = vld [vmem:[%s14495_s5 + $0x50] sm:$0xff]  }
 0x22e   :  { %v9962_v17 = vpop.f32.mrf.mxu0  ;;  %10835 = vmatmul.mubr.msk.bf16.gmra.mxu0 %vm14671_vm1, %v4525_v55  ;;  %v9880_v54 = vpop.f32.mrf.mxu1  ;;  %4056 = vmatmul.mubr.bf16.gmra.mxu1 %v12810_v26 }
 0x22f   :  { %10838 = vmatprep.mubr.msk.bf16.mxu0 %vm14679_vm14, %v4526_v5  ;;  %v12831_v15 = vadd.f32 %v9879_v3, %v12636_v39  ;;  %10209 = vmatprep.subr.bf16.mxu1 %v11281_v44  ;;  %vm14681_vm14 = vmmov %vm14671_vm1 }
 0x230   :  { %v9963_v32 = vpop.f32.mrf.mxu0  ;;  %v9881_v60 = vpop.f32.mrf.mxu1  ;;  %10210 = vmatpush3.bf16.msra.mxu1 %v11282_v20 }
 0x231   :  { %v12833_v0 = vadd.f32 %v9963_v32, %v9962_v17  ;;  %v9882_v5 = vadd.f32 %v9881_v60, %v9880_v54  ;;  %v9105_v54 = vld [vmem:[%s14490_s0 + $0x1f8] sm:$0xff] }
 0x232   :  { %v12835_v55 = vpop.f32.mrf.mxu0  ;;  %v9883_v26 = vpop.f32.mrf.mxu1 }
 0x233   :  { %v12846_v39 = vadd.f32 %v12612_v18, %v9882_v5  ;;  %v12859_v18 = vld [vmem:[%s14496_s6] ss:$0 sm:$0xff] }
 0x234   :  { %v12843_v49 = vpop.f32.mrf.mxu0  ;;  %v9884_v17 = vpop.f32.mrf.mxu1  ;;  %v2493_v51 = vadd.f32 %v12859_v18, %v12541_v4  ;;  %v2491_v44 = vadd.f32 %v12859_v18, %v12534_v28  ;;  %v2494_v4 = vadd.f32 %v12859_v18, %v12547_v1  ;;  %v2492_v28 = vadd.f32 %v12859_v18, %v12543_v31 }
 0x235   :  { %14680 = vst [vmem:[#allocation42_spill] sm:$0xff] %v12846_v39  ;;  %v9885_v30 = vadd.f32 %v9884_v17, %v9883_v26  ;;  %v2495_v31 = vadd.f32 %v12859_v18, %v12549_v35 }
 0x236   :  { %v9968_v3 = vpop.f32.mrf.mxu0  ;;  %10839 = vmatmul.mubr.msk.bf16.gmra.mxu0 %vm14671_vm1, %v4527_v13  ;;  %v10734_v16 = vpop.f32.mrf.mxu1 }
 0x237   :  { %10842 = vmatprep.mubr.msk.bf16.mxu0 %vm14681_vm14, %v4528_v11  ;;  %v12862_v20 = vadd.f32 %v12631_v27, %v9885_v30  ;;  %v3240_v60 = vadd.f32 %v10734_v16, %v12687_v21  ;;  %v4529_v11 = vpack.c.bf16 %v9105_v54, %v9104_v58 }
 0x238   :  { %v9969_v32 = vpop.f32.mrf.mxu0  ;;  %v3231_v5 = vpop.f32.mrf.mxu1 }
 0x239   :  { %v12864_v26 = vadd.f32 %v9969_v32, %v9968_v3  ;;  %v12873_v17 = vadd.f32 %v3240_v60, %v2493_v51  ;;  %v3232_v39 = vadd.f32 %v12657_v22, %v3231_v5 }
 0x23a   :  { %v12869_v13 = vpop.f32.mrf.mxu0  ;;  %v10735_v3 = vpop.f32.mrf.mxu1 }
 0x23b   :  { %v12878_v30 = vadd.f32 %v3232_v39, %v2491_v44  ;;  %v3243_v21 = vadd.f32 %v10735_v3, %v12692_v61  ;;  %v2497_v61 = vadd.f32 %v12859_v18, %v12553_v19  ;;  %v2498_v19 = vadd.f32 %v12859_v18, %v12557_v9 }
 0x23c   :  { %v12876_v27 = vpop.f32.mrf.mxu0  ;;  %v3234_v16 = vpop.f32.mrf.mxu1 }
 0x23d   :  { %v12886_v58 = vadd.f32 %v3243_v21, %v2494_v4  ;;  %v3235_v22 = vadd.f32 %v12668_v57, %v3234_v16 }
 0x23e   :  { %v9974_v32 = vpop.f32.mrf.mxu0  ;;  %10843 = vmatmul.mubr.msk.bf16.gmra.mxu0 %vm14671_vm1, %v4529_v11  ;;  %v10738_v51 = vpop.f32.mrf.mxu1 }
 0x23f   :  { %v12889_v39 = vadd.f32 %v3235_v22, %v2492_v28  ;;  %v3256_v1 = vadd.f32 %v10738_v51, %v12741_v2  ;;  %v2496_v22 = vadd.f32 %v12859_v18, %v12551_v23  ;;  %v2499_v23 = vadd.f32 %v12859_v18, %v12561_v36 }
 0x240   :  { %v9975_v54 = vpop.f32.mrf.mxu0  ;;  %v3247_v11 = vpop.f32.mrf.mxu1  ;;  %v2500_v36 = vadd.f32 %v12859_v18, %v12565_v62  ;;  %v9973_v62 = vadd.f32 %v12876_v27, %v12869_v13 }
 0x241   :  { %v12891_v60 = vadd.f32 %v9975_v54, %v9974_v32  ;;  %v12898_v44 = vadd.f32 %v3256_v1, %v2497_v61  ;;  %v3248_v57 = vadd.f32 %v12711_v42, %v3247_v11  ;;  %v2501_v1 = vadd.f32 %v12859_v18, %v12577_v10 }
 0x242   :  { %v12896_v5 = vpop.f32.mrf.mxu0  ;;  %v10739_v4 = vpop.f32.mrf.mxu1  ;;  %v2502_v10 = vadd.f32 %v12859_v18, %v12583_v53 }
 0x243   :  { %v12905_v21 = vadd.f32 %v3248_v57, %v2495_v31  ;;  %v3259_v2 = vadd.f32 %v10739_v4, %v12746_v14  ;;  %v9961_v31 = vadd.f32 %v12806_v37, %v12804_v34 }
 0x244   :  { %v12903_v3 = vpop.f32.mrf.mxu0  ;;  %v3250_v16 = vpop.f32.mrf.mxu1 }
 0x245   :  { %v12910_v28 = vadd.f32 %v3259_v2, %v2498_v19  ;;  %v3251_v35 = vadd.f32 %v12722_v38, %v3250_v16 }
 0x246   :  { %v9980_v32 = vpop.f32.mrf.mxu0  ;;  %v10742_v54 = vpop.f32.mrf.mxu1 }
 0x247   :  { %v12915_v51 = vadd.f32 %v3251_v35, %v2496_v22  ;;  %v3272_v9 = vadd.f32 %v10742_v54, %v12801_v50  ;;  %v2505_v54 = vadd.f32 %v12859_v18, %v12608_v40 }
 0x248   :  { %v9981_v42 = vpop.f32.mrf.mxu0  ;;  %v3263_v11 = vpop.f32.mrf.mxu1 }
 0x249   :  { %v9982_v61 = vadd.f32 %v9981_v42, %v9980_v32  ;;  %v12922_v57 = vadd.f32 %v3272_v9, %v2501_v1  ;;  %v3264_v38 = vadd.f32 %v12765_v47, %v3263_v11  ;;  %v11283_v32 = vld [vmem:[%s14495_s5 + $0x48] sm:$0xff]  }
 0x24a   :  { %v9983_v14 = vpop.f32.mrf.mxu0  ;;  %v10743_v19 = vpop.f32.mrf.mxu1  ;;  %10211 = vmatprep.subr.bf16.mxu1 %v11283_v32  ;;  %v11284_v9 = vld [vmem:[%s14495_s5 + $0x8] sm:$0xff]  }
 0x24b   :  { %v12927_v2 = vadd.f32 %v3264_v38, %v2499_v23  ;;  %v3275_v50 = vadd.f32 %v10743_v19, %v9961_v31  ;;  %v2503_v23 = vadd.f32 %v12859_v18, %v12589_v6  ;;  %10212 = vmatpush3.bf16.msra.mxu1 %v11284_v9  ;;  %v2504_v6 = vadd.f32 %v12859_v18, %v12595_v29 }
 0x24c   :  { %v9984_v4 = vpop.f32.mrf.mxu0  ;;  %v3266_v37 = vpop.f32.mrf.mxu1  ;;  %v2507_v9 = vadd.f32 %v12859_v18, %v12634_v33  ;;  %v2508_v33 = vadd.f32 %v12859_v18, %v12649_v59  ;;  %v2511_v59 = vadd.f32 %v12859_v18, %v12690_v56  ;;  %v2512_v56 = vadd.f32 %v12859_v18, %v12709_v7  ;;  %v11289_v7 = vld [vmem:[%s14495_s5] sm:$0xff]  }
 0x24d   :  { %v12934_v16 = vadd.f32 %v3275_v50, %v2502_v10  ;;  %v3267_v47 = vadd.f32 %v12777_v12, %v3266_v37  ;;  %v2506_v50 = vadd.f32 %v12859_v18, %v12621_v41 }
 0x24e   :  { %v9986_v34 = vpop.f32.mrf.mxu0  ;;  %v10746_v35 = vpop.f32.mrf.mxu1 }
 0x24f   :  { %v12939_v42 = vadd.f32 %v3267_v47, %v2500_v36  ;;  %v3288_v1 = vadd.f32 %v10746_v35, %v12864_v26  ;;  %v9967_v26 = vadd.f32 %v12843_v49, %v12835_v55  ;;  %v2509_v49 = vadd.f32 %v12859_v18, %v12666_v8 }
 0x250   :  { %v9987_v22 = vpop.f32.mrf.mxu0  ;;  %v3279_v31 = vpop.f32.mrf.mxu1  ;;  %v2510_v8 = vadd.f32 %v12859_v18, %v12685_v25  ;;  %v11285_v25 = vld [vmem:[%s14495_s5 + $0xb8] sm:$0xff]  }
 0x251   :  { %v9988_v53 = vadd.f32 %v9987_v22, %v9986_v34  ;;  %v12949_v12 = vadd.f32 %v3288_v1, %v2505_v54  ;;  %v3280_v38 = vadd.f32 %v12833_v0, %v3279_v31  ;;  %v9985_v54 = vadd.f32 %v9984_v4, %v9983_v14  ;;  %10846 = vmatprep.subr.bf16.mxu0 %v11285_v25 }
 0x252   :  { %v9989_v11 = vpop.f32.mrf.mxu0  ;;  %v10747_v19 = vpop.f32.mrf.mxu1  ;;  %10847 = vmatpush3.bf16.msra.mxu0 %v11285_v25 }
 0x253   :  { %v12956_v10 = vadd.f32 %v3280_v38, %v2503_v23  ;;  %v3291_v32 = vadd.f32 %v10747_v19, %v9973_v62  ;;  %v9979_v23 = vadd.f32 %v12903_v3, %v12896_v5  ;;  %v2513_v5 = vadd.f32 %v12859_v18, %v12720_v43 }
 0x254   :  { %v9990_v40 = vpop.f32.mrf.mxu0  ;;  %v3282_v27 = vpop.f32.mrf.mxu1 }
 0x255   :  { %v12960_v34 = vadd.f32 %v3291_v32, %v2506_v50  ;;  %v3283_v0 = vadd.f32 %v9967_v26, %v3282_v27 }
 0x256   :  { %v9992_v13 = vpop.f32.mrf.mxu0  ;;  %v10750_v36 = vpop.f32.mrf.mxu1 }
 0x257   :  { %v12964_v47 = vadd.f32 %v3283_v0, %v2504_v6  ;;  %v3304_v55 = vadd.f32 %v10750_v36, %v9982_v61 }
 0x258   :  { %v9993_v37 = vpop.f32.mrf.mxu0  ;;  %v3295_v41 = vpop.f32.mrf.mxu1 }
 0x259   :  { %v9994_v22 = vadd.f32 %v9993_v37, %v9992_v13  ;;  %v12968_v1 = vadd.f32 %v3304_v55, %v2509_v49  ;;  %v3296_v29 = vadd.f32 %v12891_v60, %v3295_v41  ;;  %v9991_v41 = vadd.f32 %v9990_v40, %v9989_v11 }
 0x25a   :  { %v9995_v35 = vpop.f32.mrf.mxu0  ;;  %v10751_v62 = vpop.f32.mrf.mxu1 }
 0x25b   :  { %v12975_v38 = vadd.f32 %v3296_v29, %v2507_v9  ;;  %v3307_v61 = vadd.f32 %v10751_v62, %v9985_v54 }
 0x25c   :  { %v9996_v31 = vpop.f32.mrf.mxu0  ;;  %v3298_v14 = vpop.f32.mrf.mxu1 }
 0x25d   :  { %v12979_v4 = vadd.f32 %v3307_v61, %v2510_v8  ;;  %v3299_v26 = vadd.f32 %v9979_v23, %v3298_v14  ;;  %v9997_v0 = vadd.f32 %v9996_v31, %v9995_v35  ;;  %v11286_v35 = vld [vmem:[%s14495_s5 + $0xb0] sm:$0xff]   ;;  %v11288_v8 = vld [vmem:[%s14495_s5 + $0x40] sm:$0xff]  }
 0x25e   :  { %v9998_v19 = vpop.f32.mrf.mxu0  ;;  %v10754_v50 = vpop.f32.mrf.mxu1  ;;  %10848 = vmatprep.subr.bf16.mxu0 %v11286_v35  ;;  %10213 = vmatprep.subr.bf16.mxu1 %v11288_v8 }
 0x25f   :  { %v12983_v32 = vadd.f32 %v3299_v26, %v2508_v33  ;;  %v3320_v3 = vadd.f32 %v10754_v50, %v9994_v22  ;;  %v2514_v22 = vadd.f32 %v12859_v18, %v12739_v48  ;;  %10849 = vmatpush3.bf16.msra.mxu0 %v11286_v35  ;;  %v11287_v48 = vld [vmem:[%s14495_s5 + $0xa8] sm:$0xff]   ;;  %v2517_v33 = vadd.f32 %v12859_v18, %v12775_v45  ;;  %v11290_v50 = vld [vmem:[%s14495_s5 + $0xa0] sm:$0xff]  }
 0x260   :  { %v9999_v60 = vpop.f32.mrf.mxu0  ;;  %v3311_v6 = vpop.f32.mrf.mxu1  ;;  %10850 = vmatprep.subr.bf16.mxu0 %v11287_v48  ;;  %10214 = vmatpush3.bf16.msra.mxu1 %v11289_v7  ;;  %v14687_v7 = vld [vmem:[#allocation41_spill] sm:$0xff] }
 0x261   :  { %v10000_v13 = vadd.f32 %v9999_v60, %v9998_v19  ;;  %v12990_v37 = vadd.f32 %v3320_v3, %v2513_v5  ;;  %v3312_v36 = vadd.f32 %v9988_v53, %v3311_v6  ;;  %v2515_v19 = vadd.f32 %v12859_v18, %v12744_v24 }
 0x262   :  { %v10001_v27 = vpop.f32.mrf.mxu0  ;;  %v10755_v55 = vpop.f32.mrf.mxu1 }
 0x263   :  { %v12994_v43 = vadd.f32 %v3312_v36, %v2511_v59  ;;  %v3323_v54 = vadd.f32 %v10755_v55, %v9997_v0  ;;  %10851 = vmatpush3.bf16.msra.mxu0 %v11287_v48  ;;  %v2516_v55 = vadd.f32 %v12859_v18, %v12763_v52  ;;  %v11292_v52 = vld [vmem:[%s14495_s5 + $0x90] sm:$0xff]  }
 0x264   :  { %v10002_v49 = vpop.f32.mrf.mxu0  ;;  %v3314_v29 = vpop.f32.mrf.mxu1  ;;  %10852 = vmatprep.subr.bf16.mxu0 %v11290_v50 }
 0x265   :  { %v13001_v31 = vadd.f32 %v3323_v54, %v2514_v22  ;;  %v3315_v53 = vadd.f32 %v9991_v41, %v3314_v29  ;;  %v10003_v25 = vadd.f32 %v10002_v49, %v10001_v27  ;;  %v11291_v27 = vld [vmem:[%s14495_s5 + $0x98] sm:$0xff]  }
 0x266   :  { %v10004_v9 = vpop.f32.mrf.mxu0  ;;  %v10758_v11 = vpop.f32.mrf.mxu1 }
 0x267   :  { %v13005_v40 = vadd.f32 %v3315_v53, %v2512_v56  ;;  %10853 = vmatpush3.bf16.msra.mxu0 %v11290_v50 }
 0x268   :  { %v10005_v62 = vpop.f32.mrf.mxu0  ;;  %v3327_v14 = vpop.f32.mrf.mxu1  ;;  %10854 = vmatprep.subr.bf16.mxu0 %v11291_v27 }
 0x269   :  { %v10006_v23 = vadd.f32 %v10005_v62, %v10004_v9  ;;  %v3328_v60 = vadd.f32 %v10000_v13, %v3327_v14  ;;  %v2518_v13 = vadd.f32 %v12859_v18, %v12799_v63  ;;  %v2519_v63 = vadd.f32 %v12859_v18, %v12813_v46  ;;  %v11293_v46 = vld [vmem:[%s14495_s5 + $0x88] sm:$0xff]  }
 0x26a   :  { %v10007_v61 = vpop.f32.mrf.mxu0  ;;  %v10759_v3 = vpop.f32.mrf.mxu1  ;;  %v2520_v14 = vadd.f32 %v12859_v18, %v12831_v15  ;;  %v11295_v15 = vld [vmem:[%s14495_s5 + $0x80] sm:$0xff]  }
 0x26b   :  { %v3336_v26 = vadd.f32 %v10758_v11, %v10006_v23  ;;  %v13025_v0 = vadd.f32 %v3328_v60, %v2515_v19  ;;  %v14685_v23 = vld [vmem:[#allocation40_spill] sm:$0xff]  ;;  %10855 = vmatpush3.bf16.msra.mxu0 %v11291_v27 }
 0x26c   :  { %v10008_v5 = vpop.f32.mrf.mxu0  ;;  %v3330_v45 = vpop.f32.mrf.mxu1  ;;  %6004 = vmatprep.mubr.bf16.mxu1 %v14685_v23  ;;  %10856 = vmatprep.subr.bf16.mxu0 %v11292_v52 }
 0x26d   :  { %v13023_v6 = vadd.f32 %v3336_v26, %v2517_v33  ;;  %v10009_v24 = vadd.f32 %v10008_v5, %v10007_v61  ;;  %v3331_v41 = vadd.f32 %v10003_v25, %v3330_v45  ;;  %6005 = vmatmul.mubr.bf16.vlgmr.msra.gmra.mxu1 %v14687_v7 }
 0x26e   :  { %v10010_v59 = vpop.f32.mrf.mxu0  ;;  %v10762_v22 = vpop.f32.mrf.mxu1 }
 0x26f   :  { %14682 = vst [vmem:[#allocation43_spill] sm:$0xff] %v13023_v6  ;;  %v3339_v36 = vadd.f32 %v10759_v3, %v10009_v24  ;;  %v13036_v9 = vadd.f32 %v3331_v41, %v2516_v55  ;;  %10857 = vmatpush3.bf16.msra.mxu0 %v11292_v52  ;;  %v11294_v3 = vld [vmem:[%s14495_s5 + $0x178] sm:$0xff]   ;;  %v2522_v52 = vadd.f32 %v12859_v18, %v12862_v20 }
 0x270   :  { %v10011_v49 = vpop.f32.mrf.mxu0  ;;  %v3343_v56 = vpop.f32.mrf.mxu1  ;;  %10858 = vmatprep.subr.bf16.mxu0 %v11293_v46  ;;  %10894 = vmatprep.subr.bf16.mxu1 %v11294_v3 }
 0x271   :  { %v13034_v54 = vadd.f32 %v3339_v36, %v2518_v13  ;;  %14684 = vst [vmem:[#allocation45_spill] sm:$0xff] %v13036_v9  ;;  %v10012_v29 = vadd.f32 %v10011_v49, %v10010_v59  ;;  %v14689_v59 = vld [vmem:[#allocation42_spill] sm:$0xff]  ;;  %10895 = vmatpush3.bf16.msra.mxu1 %v11294_v3 }
 0x272   :  { %v10013_v35 = vpop.f32.mrf.mxu0  ;;  %v10763_v11 = vpop.f32.mrf.mxu1  ;;  %v2521_v45 = vadd.f32 %v12859_v18, %v14689_v59 }
 0x273   :  { %14683 = vst [vmem:[#allocation44_spill] sm:$0xff] %v13034_v54  ;;  %v3344_v53 = vadd.f32 %v10012_v29, %v3343_v56  ;;  %10859 = vmatpush3.bf16.msra.mxu0 %v11293_v46  ;;  %v11296_v56 = vld [vmem:[#allocation3 + $0x8] ss:$12 sps:$4 sm:$0xff]  }
 0x274   :  { %v10014_v62 = vpop.f32.mrf.mxu0  ;;  %v3346_v19 = vpop.f32.mrf.mxu1  ;;  %10860 = vmatprep.subr.bf16.mxu0 %v11295_v15  ;;  %10862 = vmatprep.mubr.bf16.mxu0 %v11296_v56 }
 0x275   :  { %v13044_v48 = vadd.f32 %v3344_v53, %v2519_v63  ;;  %v10015_v8 = vadd.f32 %v10014_v62, %v10013_v35 }
 0x276   :  { %v10016_v61 = vpop.f32.mrf.mxu0  ;;  %v10062_v60 = vpop.f32.mrf.mxu1 }
 0x277   :  { %14686 = vst [vmem:[#allocation40_spill] sm:$0xff] %v13044_v48  ;;  %v3347_v33 = vadd.f32 %v10015_v8, %v3346_v19  ;;  %10861 = vmatpush3.bf16.msra.mxu0 %v11295_v15 }
 0x278   :  { %v10017_v26 = vpop.f32.mrf.mxu0  ;;  %v10063_v24 = vpop.f32.mrf.mxu1 }
 0x279   :  { %v13052_v50 = vadd.f32 %v3347_v33, %v2520_v14  ;;  %v10018_v5 = vadd.f32 %v10017_v26, %v10016_v61  ;;  %v10064_v36 = vadd.f32 %v10063_v24, %v10062_v60 }
 0x27a   :  { %v10019_v25 = vpop.f32.mrf.mxu0  ;;  %v10065_v41 = vpop.f32.mrf.mxu1 }
 0x27b   :  { %14688 = vst [vmem:[#allocation41_spill] sm:$0xff] %v13052_v50  ;;  %v3352_v13 = vadd.f32 %v10762_v22, %v10018_v5 }
 0x27c   :  { %v10020_v55 = vpop.f32.mrf.mxu0  ;;  %v10066_v29 = vpop.f32.mrf.mxu1 }
 0x27d   :  { %v13062_v27 = vadd.f32 %v3352_v13, %v2521_v45  ;;  %v10021_v49 = vadd.f32 %v10020_v55, %v10019_v25  ;;  %v10067_v61 = vadd.f32 %v10066_v29, %v10065_v41 }
 0x27e   :  { %v10782_v35 = vpop.f32.mrf.mxu0  ;;  %v10068_v53 = vpop.f32.mrf.mxu1 }
 0x27f   :  { %14690 = vst [vmem:[#allocation42_spill] sm:$0xff] %v13062_v27  ;;  %v3355_v63 = vadd.f32 %v10763_v11, %v10021_v49 }
 0x280   :  { %v4098_v62 = vpop.f32.mrf.mxu0  ;;  %v10069_v8 = vpop.f32.mrf.mxu1 }
 0x281   :  { %v13066_v22 = vadd.f32 %v3355_v63, %v2522_v52  ;;  %v4099_v23 = vadd.f32 %v10064_v36, %v4098_v62  ;;  %v10070_v14 = vadd.f32 %v10069_v8, %v10068_v53 }
 0x282   :  { %v10783_v7 = vpop.f32.mrf.mxu0  ;;  %v10071_v33 = vpop.f32.mrf.mxu1 }
 0x283   :  { %14691 = vst [vmem:[#allocation46_spill] sm:$0xff] %v13066_v22  ;;  %v13069_v19 = vadd.f32 %v4099_v23, %v12878_v30  ;;  %v4107_v26 = vadd.f32 %v10782_v35, %v10070_v14 }
 0x284   :  { %v4101_v46 = vpop.f32.mrf.mxu0  ;;  %v10072_v18 = vpop.f32.mrf.mxu1 }
 0x285   :  { %v4102_v60 = vadd.f32 %v10067_v61, %v4101_v46  ;;  %v13072_v11 = vadd.f32 %v4107_v26, %v12873_v17  ;;  %v10073_v3 = vadd.f32 %v10072_v18, %v10071_v33  ;;  %v11307_v17 = vld [vmem:[%s14495_s5 + $0x170] sm:$0xff]  }
 0x286   :  { %v10786_v20 = vpop.f32.mrf.mxu0  ;;  %v10074_v25 = vpop.f32.mrf.mxu1  ;;  %10896 = vmatprep.subr.bf16.mxu1 %v11307_v17 }
 0x287   :  { %v13075_v5 = vadd.f32 %v4102_v60, %v12889_v39  ;;  %v4110_v15 = vadd.f32 %v10783_v7, %v10073_v3  ;;  %10897 = vmatpush3.bf16.msra.mxu1 %v11307_v17 }
 0x288   :  { %v4114_v24 = vpop.f32.mrf.mxu0  ;;  %v10075_v59 = vpop.f32.mrf.mxu1 }
 0x289   :  { %v13078_v45 = vadd.f32 %v4110_v15, %v12886_v58  ;;  %v10076_v13 = vadd.f32 %v10075_v59, %v10074_v25 }
 0x28a   :  { %v10787_v30 = vpop.f32.mrf.mxu0  ;;  %v10077_v36 = vpop.f32.mrf.mxu1 }
 0x28b   :  { %v4115_v41 = vadd.f32 %v10076_v13, %v4114_v24 }
 0x28c   :  { %v4117_v55 = vpop.f32.mrf.mxu0  ;;  %v10078_v49 = vpop.f32.mrf.mxu1 }
 0x28d   :  { %v13084_v29 = vadd.f32 %v4115_v41, %v12905_v21  ;;  %v10079_v35 = vadd.f32 %v10078_v49, %v10077_v36 }
 0x28e   :  { %v10790_v39 = vpop.f32.mrf.mxu0  ;;  %v10080_v56 = vpop.f32.mrf.mxu1 }
 0x28f   :  { %v4118_v58 = vadd.f32 %v10079_v35, %v4117_v55 }
 0x290   :  { %v4130_v52 = vpop.f32.mrf.mxu0  ;;  %v10081_v63 = vpop.f32.mrf.mxu1 }
 0x291   :  { %v13087_v62 = vadd.f32 %v4118_v58, %v12915_v51  ;;  %v10082_v23 = vadd.f32 %v10081_v63, %v10080_v56 }
 0x292   :  { %v10791_v53 = vpop.f32.mrf.mxu0  ;;  %v10083_v8 = vpop.f32.mrf.mxu1 }
 0x293   :  { %v4123_v61 = vadd.f32 %v10786_v20, %v10082_v23  ;;  %v11323_v23 = vld [vmem:[%s14495_s5 + $0x138] sm:$0xff]  }
 0x294   :  { %v4133_v7 = vpop.f32.mrf.mxu0  ;;  %v10084_v14 = vpop.f32.mrf.mxu1  ;;  %10335 = vmatprep.subr.bf16.mxu0 %v11323_v23 }
 0x295   :  { %v13090_v21 = vadd.f32 %v4123_v61, %v12898_v44  ;;  %v10085_v46 = vadd.f32 %v10084_v14, %v10083_v8 }
 0x296   :  { %v10794_v33 = vpop.f32.mrf.mxu0  ;;  %v10086_v26 = vpop.f32.mrf.mxu1 }
 0x297   :  { %v4126_v18 = vadd.f32 %v10787_v30, %v10085_v46  ;;  %v11317_v30 = vld [vmem:[%s14495_s5 + $0x168] sm:$0xff]  }
 0x298   :  { %v4146_v60 = vpop.f32.mrf.mxu0  ;;  %v10087_v3 = vpop.f32.mrf.mxu1  ;;  %10898 = vmatprep.subr.bf16.mxu1 %v11317_v30 }
 0x299   :  { %v13095_v24 = vadd.f32 %v4126_v18, %v12910_v28  ;;  %v10088_v51 = vadd.f32 %v10087_v3, %v10086_v26  ;;  %10899 = vmatpush3.bf16.msra.mxu1 %v11317_v30 }
 0x29a   :  { %v13092_v25 = vpop.f32.mrf.mxu0  ;;  %v10089_v15 = vpop.f32.mrf.mxu1 }
 0x29b   :  { %v4131_v13 = vadd.f32 %v10088_v51, %v4130_v52 }
 0x29c   :  { %v4149_v59 = vpop.f32.mrf.mxu0  ;;  %v10090_v20 = vpop.f32.mrf.mxu1 }
 0x29d   :  { %v13100_v44 = vadd.f32 %v4131_v13, %v12927_v2  ;;  %v10091_v55 = vadd.f32 %v10090_v20, %v10089_v15 }
 0x29e   :  { %v13097_v36 = vpop.f32.mrf.mxu0  ;;  %v10092_v41 = vpop.f32.mrf.mxu1 }
 0x29f   :  { %v4134_v49 = vadd.f32 %v10091_v55, %v4133_v7 }
 0x2a0   :  { %v4162_v17 = vpop.f32.mrf.mxu0  ;;  %v10093_v28 = vpop.f32.mrf.mxu1 }
 0x2a1   :  { %v13108_v56 = vadd.f32 %v4134_v49, %v12939_v42  ;;  %v10094_v52 = vadd.f32 %v10093_v28, %v10092_v41 }
 0x2a2   :  { %v13105_v35 = vpop.f32.mrf.mxu0  ;;  %v10095_v58 = vpop.f32.mrf.mxu1 }
 0x2a3   :  { %v4139_v63 = vadd.f32 %v10790_v39, %v10094_v52 }
 0x2a4   :  { %v13110_v2 = vpop.f32.mrf.mxu0  ;;  %v10096_v8 = vpop.f32.mrf.mxu1 }
 0x2a5   :  { %v13118_v7 = vadd.f32 %v4139_v63, %v12922_v57  ;;  %v10097_v14 = vadd.f32 %v10096_v8, %v10095_v58  ;;  %v11334_v57 = vld [vmem:[%s14495_s5 + $0x160] sm:$0xff]  }
 0x2a6   :  { %v13115_v61 = vpop.f32.mrf.mxu0  ;;  %v10098_v46 = vpop.f32.mrf.mxu1  ;;  %10900 = vmatprep.subr.bf16.mxu1 %v11334_v57 }
 0x2a7   :  { %v4142_v26 = vadd.f32 %v10791_v53, %v10097_v14  ;;  %10901 = vmatpush3.bf16.msra.mxu1 %v11334_v57 }
 0x2a8   :  { %v13120_v42 = vpop.f32.mrf.mxu0  ;;  %v10099_v18 = vpop.f32.mrf.mxu1 }
 0x2a9   :  { %v13125_v39 = vadd.f32 %v4142_v26, %v12934_v16  ;;  %v10100_v51 = vadd.f32 %v10099_v18, %v10098_v46 }
 0x2aa   :  { %v13122_v3 = vpop.f32.mrf.mxu0  ;;  %v10101_v15 = vpop.f32.mrf.mxu1 }
 0x2ab   :  { %v4147_v20 = vadd.f32 %v10100_v51, %v4146_v60  ;;  %v14696_v51 = vld [vmem:[#allocation7_spill] sm:$0xff] }
 0x2ac   :  { %v13127_v13 = vpop.f32.mrf.mxu0  ;;  %v10102_v55 = vpop.f32.mrf.mxu1 }
 0x2ad   :  { %v13135_v53 = vadd.f32 %v4147_v20, %v12956_v10  ;;  %v10103_v41 = vadd.f32 %v10102_v55, %v10101_v15  ;;  %v13148_v15 = vsub.s32 0, %v14696_v51 }
 0x2ae   :  { %v13132_v30 = vpop.f32.mrf.mxu0  ;;  %v10104_v49 = vpop.f32.mrf.mxu1 }
 0x2af   :  { %14692 = vst [vmem:[#allocation47_spill] sm:$0xff] %v13132_v30  ;;  %v4150_v28 = vadd.f32 %v10103_v41, %v4149_v59  ;;  %14697 = vst [vmem:[#allocation51_spill] sm:$0xff] %v13148_v15  ;;  %v14564_v41 = vsub.s32 1, %v14696_v51 }
 0x2b0   :  { %v13137_v16 = vpop.f32.mrf.mxu0  ;;  %v10105_v52 = vpop.f32.mrf.mxu1 }
 0x2b1   :  { %v4238_v60 = vadd.f32 %v4150_v28, %v12964_v47  ;;  %v10106_v63 = vadd.f32 %v10105_v52, %v10104_v49  ;;  %v4263_v47 = vld [vmem:[%s14498_s8] sm:$0x3] }
 0x2b2   :  { %v13139_v58 = vpop.f32.mrf.mxu0  ;;  %v10107_v23 = vpop.f32.mrf.mxu1  ;;  %v4288_v28 = vrot.slane %v4263_v47, %v13148_v15  ;;  %v4292_v22 = vrot.slane %v4263_v47, %v14564_v41 }
 0x2b3   :  { %14693 = vst [vmem:[#allocation48_spill] sm:$0xff] %v13139_v58  ;;  %v4155_v14 = vadd.f32 %v10794_v33, %v10106_v63 }
 0x2b4   :  { %v13142_v8 = vpop.f32.mrf.mxu0  ;;  %v10108_v46 = vpop.f32.mrf.mxu1 }
 0x2b5   :  { %14694 = vst [vmem:[#allocation49_spill] sm:$0xff] %v13142_v8  ;;  %v4239_v26 = vadd.f32 %v4155_v14, %v12949_v12  ;;  %v10109_v18 = vadd.f32 %v10108_v46, %v10107_v23 }
 0x2b6   :  { %v13144_v10 = vpop.f32.mrf.mxu0  ;;  %v10110_v59 = vpop.f32.mrf.mxu1 }
 0x2b7   :  { %14695 = vst [vmem:[#allocation50_spill] sm:$0xff] %v13144_v10  ;;  %v4158_v57 = vadd.f32 %v13092_v25, %v10109_v18  ;;  %v11353_v25 = vld [vmem:[%s14495_s5 + $0x158] sm:$0xff]  }
 0x2b8   :  { %v13150_v20 = vpop.f32.mrf.mxu0  ;;  %v10111_v55 = vpop.f32.mrf.mxu1  ;;  %10902 = vmatprep.subr.bf16.mxu1 %v11353_v25 }
 0x2b9   :  { %14698 = vst [vmem:[#allocation52_spill] sm:$0xff] %v13150_v20  ;;  %v4240_v12 = vadd.f32 %v4158_v57, %v12960_v34  ;;  %v10112_v49 = vadd.f32 %v10111_v55, %v10110_v59  ;;  %10903 = vmatpush3.bf16.msra.mxu1 %v11353_v25 }
 0x2ba   :  { %v13156_v33 = vpop.f32.mrf.mxu0  ;;  %v10113_v52 = vpop.f32.mrf.mxu1 }
 0x2bb   :  { %14699 = vst [vmem:[#allocation53_spill] sm:$0xff] %v13156_v33  ;;  %v4163_v23 = vadd.f32 %v10112_v49, %v4162_v17 }
 0x2bc   :  { %v13161_v63 = vpop.f32.mrf.mxu0  ;;  %v10114_v14 = vpop.f32.mrf.mxu1 }
 0x2bd   :  { %14700 = vst [vmem:[#allocation54_spill] sm:$0xff] %v13161_v63  ;;  %v4241_v18 = vadd.f32 %v4163_v23, %v12975_v38  ;;  %v10115_v33 = vadd.f32 %v10114_v14, %v10113_v52 }
 0x2be   :  { %v4333_v46 = vpop.f32.mrf.mxu0  ;;  %v10116_v59 = vpop.f32.mrf.mxu1 }
 0x2bf   :  { %v4334_v34 = vadd.f32 %v4333_v46, %v4288_v28  ;;  %v4166_v55 = vadd.f32 %v10115_v33, %v13110_v2 }
 0x2c0   :  { %v4335_v57 = vpop.f32.mrf.mxu0  ;;  %v10117_v51 = vpop.f32.mrf.mxu1 }
 0x2c1   :  { %v13171_v17 = vrot.slane %v4334_v34, %v13148_v15  ;;  %v4336_v49 = vadd.f32 %v4335_v57, %v4292_v22  ;;  %v4242_v41 = vadd.f32 %v4166_v55, %v12983_v32  ;;  %v10118_v57 = vadd.f32 %v10117_v51, %v10116_v59 }
 0x2c2   :  { %v4337_v47 = vpop.f32.mrf.mxu0  ;;  %v10119_v52 = vpop.f32.mrf.mxu1 }
 0x2c3   :  { %v4344_v27 = vmul.f32 %v13171_v17, %v13069_v19  ;;  %v4345_v38 = vmul.f32 %v13171_v17, %v13075_v5  ;;  %v4346_v28 = vmul.f32 %v13171_v17, %v13072_v11  ;;  %v4347_v2 = vmul.f32 %v13171_v17, %v13078_v45 }
 0x2c4   :  { %v4348_v33 = vmul.f32 %v13171_v17, %v13084_v29  ;;  %v4349_v22 = vmul.f32 %v13171_v17, %v13087_v62  ;;  %v4350_v32 = vmul.f32 %v13171_v17, %v13090_v21  ;;  %v4338_v19 = vpop.f32.mrf.mxu0  ;;  %v4351_v5 = vmul.f32 %v13171_v17, %v13095_v24  ;;  %v13199_v62 = vld [vmem:[%s14494_s4] ss:$0 sm:$0xff]  ;;  %v10120_v14 = vpop.f32.mrf.mxu1 }
 0x2c5   :  { %v4352_v11 = vmul.f32 %v13171_v17, %v13100_v44  ;;  %v4353_v45 = vmul.f32 %v13171_v17, %v13108_v56  ;;  %v4354_v29 = vmul.f32 %v13171_v17, %v13118_v7  ;;  %v4355_v21 = vmul.f32 %v13171_v17, %v13125_v39 }
 0x2c6   :  { %v4356_v24 = vmul.f32 %v13171_v17, %v13135_v53  ;;  %v4357_v23 = vmul.f32 %v13171_v17, %v4238_v60  ;;  %v4358_v44 = vmul.f32 %v13171_v17, %v4239_v26  ;;  %v10816_v56 = vpop.f32.mrf.mxu0  ;;  %v4359_v46 = vmul.f32 %v13171_v17, %v4240_v12  ;;  %v13216_v53 = vpop.f32.mrf.mxu1 }
 0x2c7   :  { %v4360_v7 = vmul.f32 %v13171_v17, %v4241_v18  ;;  %v4361_v25 = vmul.f32 %v13171_v17, %v4242_v41  ;;  %v13211_v34 = vrot.slane %v4336_v49, %v13148_v15  ;;  %v10121_v39 = vadd.f32 %v10120_v14, %v10119_v52 }
 0x2c8   :  { %v13214_v55 = vadd.f32 %v10816_v56, %v13199_v62  ;;  %v4623_v60 = vpop.f32.mrf.mxu0  ;;  %v13226_v52 = vpop.f32.mrf.mxu1 }
 0x2c9   :  { %v4380_v26 = vadd.f32 %v13211_v34, %v4344_v27  ;;  %v4381_v47 = vadd.f32 %v13211_v34, %v4345_v38  ;;  %v4382_v12 = vadd.f32 %v13211_v34, %v4346_v28  ;;  %v4383_v18 = vadd.f32 %v13211_v34, %v4347_v2 }
 0x2ca   :  { %v4384_v41 = vadd.f32 %v13211_v34, %v4348_v33  ;;  %v4385_v49 = vadd.f32 %v13211_v34, %v4349_v22  ;;  %v4386_v51 = vadd.f32 %v13211_v34, %v4350_v32  ;;  %v4387_v59 = vadd.f32 %v13211_v34, %v4351_v5  ;;  %v13228_v19 = vpop.f32.mrf.mxu0  ;;  %v13238_v14 = vpop.f32.mrf.mxu1 }
 0x2cb   :  { %v4388_v27 = vadd.f32 %v13211_v34, %v4352_v11  ;;  %v4389_v38 = vadd.f32 %v13211_v34, %v4353_v45  ;;  %v4390_v28 = vadd.f32 %v13211_v34, %v4354_v29  ;;  %v4391_v2 = vadd.f32 %v13211_v34, %v4355_v21 }
 0x2cc   :  { %v4392_v33 = vadd.f32 %v13211_v34, %v4356_v24  ;;  %v4393_v22 = vadd.f32 %v13211_v34, %v4357_v23  ;;  %v4394_v32 = vadd.f32 %v13211_v34, %v4358_v44  ;;  %v4395_v5 = vadd.f32 %v13211_v34, %v4359_v46  ;;  %v13240_v56 = vpop.f32.mrf.mxu0  ;;  %v13244_v63 = vpop.f32.mrf.mxu1  ;;  %v11362_v44 = vld [vmem:[%s14495_s5 + $0x150] sm:$0xff]  }
 0x2cd   :  { %v4396_v11 = vadd.f32 %v13211_v34, %v4360_v7  ;;  %v4397_v45 = vadd.f32 %v13211_v34, %v4361_v25  ;;  %v4412_v15 = vmax.f32 %v4380_v26, 0.0  ;;  %v4413_v29 = vmax.f32 %v4381_v47, 0.0  ;;  %10904 = vmatprep.subr.bf16.mxu1 %v11362_v44 }
 0x2ce   :  { %v4414_v10 = vmax.f32 %v4382_v12, 0.0  ;;  %v4415_v21 = vmax.f32 %v4383_v18, 0.0  ;;  %v4416_v50 = vmax.f32 %v4384_v41, 0.0  ;;  %v4417_v24 = vmax.f32 %v4385_v49, 0.0  ;;  %v13246_v23 = vpop.f32.mrf.mxu0  ;;  %v13251_v12 = vpop.f32.mrf.mxu1  ;;  %10905 = vmatpush3.bf16.msra.mxu1 %v11362_v44 }
 0x2cf   :  { %v4418_v46 = vmax.f32 %v4386_v51, 0.0  ;;  %v4419_v48 = vmax.f32 %v4387_v59, 0.0  ;;  %v4420_v20 = vmax.f32 %v4388_v27, 0.0  ;;  %v4421_v7 = vmax.f32 %v4389_v38, 0.0  ;;  %v13256_v59 = vld [vmem:[%s14491_s1 + $0x1] ss:$0 sm:$0xff] }
 0x2d0   :  { %v4422_v54 = vmax.f32 %v4390_v28, 0.0  ;;  %v4423_v25 = vmax.f32 %v4391_v2, 0.0  ;;  %v4424_v26 = vmax.f32 %v4392_v33, 0.0  ;;  %v4425_v47 = vmax.f32 %v4393_v22, 0.0  ;;  %v4639_v18 = vpop.f32.mrf.mxu0  ;;  %v13258_v27 = vpop.f32.mrf.mxu1 }
 0x2d1   :  { %v4426_v41 = vmax.f32 %v4394_v32, 0.0  ;;  %v4427_v49 = vmax.f32 %v4395_v5, 0.0  ;;  %v4428_v58 = vmax.f32 %v4396_v11, 0.0  ;;  %v4429_v6 = vmax.f32 %v4397_v45, 0.0 }
 0x2d2   :  { %v4444_v30 = vmax.f32 %v4412_v15, %v4416_v50  ;;  %v4445_v9 = vmax.f32 %v4413_v29, %v4417_v24  ;;  %v4446_v8 = vmax.f32 %v4414_v10, %v4418_v46  ;;  %v4447_v51 = vmax.f32 %v4415_v21, %v4419_v48  ;;  %v13260_v38 = vpop.f32.mrf.mxu0  ;;  %v13266_v32 = vpop.f32.mrf.mxu1 }
 0x2d3   :  { %v4171_v28 = vadd.f32 %v13097_v36, %v10118_v57  ;;  %v4174_v2 = vadd.f32 %v13105_v35, %v10121_v39  ;;  %v4752_v33 = vmax.f32 %v13214_v55, 0.0  ;;  %v4624_v50 = vadd.f32 %v13199_v62, %v4623_v60 }
 0x2d4   :  { %v4450_v15 = vmax.f32 %v4446_v8, %v4422_v54  ;;  %v4448_v10 = vmax.f32 %v4444_v30, %v4420_v20  ;;  %v4449_v48 = vmax.f32 %v4445_v9, %v4421_v7  ;;  %v4451_v22 = vmax.f32 %v4447_v51, %v4423_v25  ;;  %v13268_v5 = vpop.f32.mrf.mxu0  ;;  %v13273_v60 = vpop.f32.mrf.mxu1 }
 0x2d5   :  { %v4243_v11 = vadd.f32 %v4171_v28, %v12968_v1  ;;  %v4244_v45 = vadd.f32 %v4174_v2, %v12979_v4  ;;  %v4789_v36 = vadd.f32 %v13256_v59, %v4752_v33  ;;  %v4750_v57 = vmax.f32 %v4624_v50, 0.0 }
 0x2d6   :  { %v4454_v35 = vmax.f32 %v4450_v15, %v4426_v41  ;;  %v4452_v39 = vmax.f32 %v4448_v10, %v4424_v26  ;;  %v4453_v55 = vmax.f32 %v4449_v48, %v4425_v47  ;;  %v4455_v29 = vmax.f32 %v4451_v22, %v4427_v49  ;;  %v13275_v54 = vpop.f32.mrf.mxu0  ;;  %v13286_v44 = vpop.f32.mrf.mxu1 }
 0x2d7   :  { %v4362_v9 = vmul.f32 %v13171_v17, %v4243_v11  ;;  %v4363_v30 = vmul.f32 %v13171_v17, %v4244_v45  ;;  %4821 = vst [vmem:[#allocation2 + $0x18] sm:$0xff] %v4789_v36  ;;  %v9663_v8 = vpack.c.bf16 %v4789_v36, %v4789_v36  ;;  %v4787_v1 = vadd.f32 %v13256_v59, %v4750_v57  ;;  %v11369_v36 = vld [vmem:[%s14495_s5 + $0x148] sm:$0xff]  }
 0x2d8   :  { %v13280_v4 = vmax.f32 %v4452_v39, %v4428_v58  ;;  %v4457_v20 = vmax.f32 %v4453_v55, %v4429_v6  ;;  %v10124_v21 = vadd.f32 %v13226_v52, %v13216_v53  ;;  %v4635_v24 = vadd.f32 %v13228_v19, %v13199_v62  ;;  %v13288_v46 = vpop.f32.mrf.mxu0  ;;  %v13299_v47 = vpop.f32.mrf.mxu1  ;;  %10906 = vmatprep.subr.bf16.mxu1 %v11369_v36 }
 0x2d9   :  { %v4398_v7 = vadd.f32 %v13211_v34, %v4362_v9  ;;  %v4399_v25 = vadd.f32 %v13211_v34, %v4363_v30  ;;  %4981 = vst [vmem:[#allocation3 + $0x30] sm:$0xf] %v9663_v8  ;;  %4819 = vst [vmem:[#allocation2 + $0x8] sm:$0xff] %v4787_v1  ;;  %v9661_v26 = vpack.c.bf16 %v4787_v1, %v4787_v1  ;;  %10907 = vmatpush3.bf16.msra.mxu1 %v11369_v36 }
 0x2da   :  { %v4627_v6 = vadd.f32 %v13199_v62, %v13240_v56  ;;  %v4179_v58 = vadd.f32 %v10124_v21, %v13120_v42  ;;  %v4753_v53 = vmax.f32 %v4635_v24, 0.0  ;;  %v10127_v52 = vadd.f32 %v13244_v63, %v13238_v14  ;;  %v13301_v41 = vpop.f32.mrf.mxu0  ;;  %v13307_v14 = vpop.f32.mrf.mxu1 }
 0x2db   :  { %v4648_v19 = vadd.f32 %v13246_v23, %v13199_v62  ;;  %v4430_v49 = vmax.f32 %v4398_v7, 0.0  ;;  %v4431_v51 = vmax.f32 %v4399_v25, 0.0  ;;  %4979 = vst [vmem:[#allocation3 + $0x18] sm:$0xf] %v9661_v26  ;;  %v4640_v2 = vadd.f32 %v13199_v62, %v4639_v18 }
 0x2dc   :  { %v4751_v28 = vmax.f32 %v4627_v6, 0.0  ;;  %v4245_v56 = vadd.f32 %v4179_v58, %v12994_v43  ;;  %v4790_v42 = vadd.f32 %v13256_v59, %v4753_v53  ;;  %v4182_v33 = vadd.f32 %v10127_v52, %v13127_v13  ;;  %v13309_v23 = vpop.f32.mrf.mxu0  ;;  %v13315_v45 = vpop.f32.mrf.mxu1 }
 0x2dd   :  { %v4756_v63 = vmax.f32 %v4648_v19, 0.0  ;;  %v4458_v50 = vmax.f32 %v4454_v35, %v4430_v49  ;;  %v4459_v15 = vmax.f32 %v4455_v29, %v4431_v51  ;;  %v4754_v48 = vmax.f32 %v4640_v2, 0.0 }
 0x2de   :  { %v4788_v10 = vadd.f32 %v13256_v59, %v4751_v28  ;;  %v4364_v22 = vmul.f32 %v13171_v17, %v4245_v56  ;;  %4822 = vst [vmem:[#allocation2 + $0x20] sm:$0xff] %v4790_v42  ;;  %v9664_v18 = vpack.c.bf16 %v4790_v42, %v4790_v42  ;;  %v4246_v43 = vadd.f32 %v4182_v33, %v13005_v40  ;;  %v13317_v13 = vpop.f32.mrf.mxu0  ;;  %v13329_v1 = vpop.f32.mrf.mxu1 }
 0x2df   :  { %v4793_v11 = vadd.f32 %v13256_v59, %v4756_v63  ;;  %v4461_v57 = vmax.f32 %v4457_v20, %v4458_v50  ;;  %v4791_v39 = vadd.f32 %v13256_v59, %v4754_v48  ;;  %v10130_v55 = vadd.f32 %v13258_v27, %v13251_v12 }
 0x2e0   :  { %4820 = vst [vmem:[#allocation2 + $0x10] sm:$0xff] %v4788_v10  ;;  %v9662_v35 = vpack.c.bf16 %v4788_v10, %v4788_v10  ;;  %v5043_v29 = vld [vmem:[#allocation2 + $0x7] sm:$0xff]  ;;  %v4400_v40 = vadd.f32 %v13211_v34, %v4364_v22  ;;  %4982 = vst [vmem:[#allocation3 + $0x3c] sm:$0xf] %v9664_v18  ;;  %v4365_v9 = vmul.f32 %v13171_v17, %v4246_v43  ;;  %v13331_v20 = vpop.f32.mrf.mxu0  ;;  %v13337_v58 = vpop.f32.mrf.mxu1 }
 0x2e1   :  { %4825 = vst [vmem:[#allocation2 + $0x38] sm:$0xff] %v4793_v11  ;;  %v9667_v30 = vpack.c.bf16 %v4793_v11, %v4793_v11  ;;  %v4651_v8 = vadd.f32 %v13260_v38, %v13199_v62  ;;  %v4462_v21 = vmax.f32 %v4459_v15, %v4461_v57  ;;  %v5267_v12 = vsel %vm11871_vm2, %v5043_v29, 0.0  ;;  %4823 = vst [vmem:[#allocation2 + $0x28] sm:$0xff] %v4791_v39 }
 0x2e2   :  { %4980 = vst [vmem:[#allocation3 + $0x24] sm:$0xf] %v9662_v35  ;;  %v9665_v27 = vpack.c.bf16 %v4791_v39, %v4791_v39  ;;  %v4187_v7 = vadd.f32 %v13115_v61, %v10130_v55  ;;  %v9725_v25 = vpack.c.bf16 %v5267_v12, %v5267_v12  ;;  %v4432_v26 = vmax.f32 %v4400_v40, 0.0  ;;  %v13339_v53 = vpop.f32.mrf.mxu0  ;;  %v13352_v42 = vpop.f32.mrf.mxu1 }
 0x2e3   :  { %v4401_v6 = vadd.f32 %v13211_v34, %v4365_v9  ;;  %4985 = vst [vmem:[#allocation3 + $0x60] sm:$0xf] %v9667_v30  ;;  %v4757_v38 = vmax.f32 %v4651_v8, 0.0  ;;  %v4643_v19 = vadd.f32 %v13199_v62, %v13268_v5  ;;  %v10133_v61 = vadd.f32 %v13273_v60, %v13266_v32 }
 0x2e4   :  { %4983 = vst [vmem:[#allocation3 + $0x48] sm:$0xf] %v9665_v27  ;;  %v4247_v52 = vadd.f32 %v4187_v7, %v12990_v37  ;;  %v4664_v49 = vadd.f32 %v13275_v54, %v13199_v62  ;;  %5427 = vst [vmem:[#allocation3 + $0x20] sm:$0xf] %v9725_v25  ;;  %v4460_v51 = vmax.f32 %v13280_v4, %v4432_v26  ;;  %v13354_v37 = vpop.f32.mrf.mxu0  ;;  %v13360_v10 = vpop.f32.mrf.mxu1 }
 0x2e5   :  { %v4433_v28 = vmax.f32 %v4401_v6, 0.0  ;;  %v4794_v2 = vadd.f32 %v13256_v59, %v4757_v38  ;;  %v4656_v56 = vadd.f32 %v13199_v62, %v13288_v46  ;;  %v4755_v33 = vmax.f32 %v4643_v19, 0.0  ;;  %v14702_v38 = vld [vmem:[#allocation49_spill] sm:$0xff] }
 0x2e6   :  { %v4366_v5 = vmul.f32 %v13171_v17, %v4247_v52  ;;  %v4190_v32 = vadd.f32 %v13122_v3, %v10133_v61  ;;  %v4760_v60 = vmax.f32 %v4664_v49, 0.0  ;;  %v4463_v54 = vmax.f32 %v4460_v51, %v4462_v21  ;;  %v13362_v46 = vpop.f32.mrf.mxu0 }
 0x2e7   :  { %v5044_v63 = vld [vmem:[#allocation2 + $0xf] sm:$0xff]  ;;  %4826 = vst [vmem:[#allocation2 + $0x40] sm:$0xff] %v4794_v2  ;;  %v9668_v4 = vpack.c.bf16 %v4794_v2, %v4794_v2  ;;  %v4758_v50 = vmax.f32 %v4656_v56, 0.0  ;;  %v10136_v15 = vadd.f32 %v13299_v47, %v13286_v44  ;;  %v4792_v18 = vadd.f32 %v13256_v59, %v4755_v33  ;;  %v13370_v44 = vpop.f32.mrf.mxu1 }
 0x2e8   :  { %v9726_v48 = vpack.c.bf16 %v5044_v63, %v5044_v63  ;;  %v4402_v22 = vadd.f32 %v13211_v34, %v4366_v5  ;;  %v4248_v3 = vadd.f32 %v4190_v32, %v13001_v31  ;;  %v4464_v43 = vmax.f32 %v4433_v28, %v4463_v54  ;;  %v13372_v47 = vpop.f32.mrf.mxu0  ;;  %v14703_v2 = vld [vmem:[#allocation45_spill] sm:$0xff]  ;;  %v14704_v5 = vld [vmem:[#allocation47_spill] sm:$0xff] }
 0x2e9   :  { %4986 = vst [vmem:[#allocation3 + $0x6c] sm:$0xf] %v9668_v4  ;;  %v4797_v11 = vadd.f32 %v13256_v59, %v4760_v60  ;;  %v4795_v36 = vadd.f32 %v13256_v59, %v4758_v50  ;;  %v4195_v57 = vadd.f32 %v10136_v15, %v13137_v16  ;;  %4824 = vst [vmem:[#allocation2 + $0x30] sm:$0xff] %v4792_v18  ;;  %v11328_v15 = vld [vmem:[%s14495_s5 + $0x130] sm:$0xff]  }
 0x2ea   :  { %5428 = vst [vmem:[#allocation3 + $0x2c] sm:$0xf] %v9726_v48  ;;  %v4434_v35 = vmax.f32 %v4402_v22, 0.0  ;;  %v9666_v39 = vpack.c.bf16 %v4792_v18, %v4792_v18  ;;  %v4367_v55 = vmul.f32 %v13171_v17, %v4248_v3  ;;  %v4667_v31 = vadd.f32 %v13301_v41, %v13199_v62  ;;  %v13380_v30 = vpop.f32.mrf.mxu0  ;;  %v13385_v41 = vpop.f32.mrf.mxu1  ;;  %v14705_v22 = vld [vmem:[#allocation43_spill] sm:$0xff] }
 0x2eb   :  { %4829 = vst [vmem:[#allocation2 + $0x58] sm:$0xff] %v4797_v11  ;;  %v9671_v29 = vpack.c.bf16 %v4797_v11, %v4797_v11  ;;  %4827 = vst [vmem:[#allocation2 + $0x48] sm:$0xff] %v4795_v36  ;;  %v9669_v40 = vpack.c.bf16 %v4795_v36, %v4795_v36  ;;  %v4249_v9 = vadd.f32 %v4195_v57, %v13025_v0  ;;  %v5012_v11 = vld [vmem:[#allocation2 + $0x11] sm:$0xff] }
 0x2ec   :  { %v4659_v16 = vadd.f32 %v13199_v62, %v13309_v23  ;;  %v4465_v8 = vmax.f32 %v4434_v35, %v4464_v43  ;;  %4984 = vst [vmem:[#allocation3 + $0x54] sm:$0xf] %v9666_v39  ;;  %v4403_v21 = vadd.f32 %v13211_v34, %v4367_v55  ;;  %v4761_v24 = vmax.f32 %v4667_v31, 0.0  ;;  %v13392_v25 = vpop.f32.mrf.mxu0 }
 0x2ed   :  { %v10139_v12 = vadd.f32 %v13315_v45, %v13307_v14  ;;  %4989 = vst [vmem:[#allocation3 + $0x90] sm:$0xf] %v9671_v29  ;;  %4987 = vst [vmem:[#allocation3 + $0x78] sm:$0xf] %v9669_v40  ;;  %v4368_v27 = vmul.f32 %v13171_v17, %v4249_v9  ;;  %v4680_v23 = vadd.f32 %v13317_v13, %v13199_v62  ;;  %v5011_v40 = vld [vmem:[#allocation2 + $0x9] sm:$0xff] }
 0x2ee   :  { %v4759_v0 = vmax.f32 %v4659_v16, 0.0  ;;  %v4672_v7 = vadd.f32 %v13199_v62, %v13331_v20  ;;  %v4435_v26 = vmax.f32 %v4403_v21, 0.0  ;;  %v4798_v6 = vadd.f32 %v13256_v59, %v4761_v24  ;;  %v13400_v13 = vpop.f32.mrf.mxu0  ;;  %v11376_v20 = vld [vmem:[%s14495_s5 + $0x140] sm:$0xff]   ;;  %v11329_v16 = vld [vmem:[%s14495_s5 + $0xf0] sm:$0xff]  }
 0x2ef   :  { %v4198_v14 = vadd.f32 %v10139_v12, %v14702_v38  ;;  %v10142_v45 = vadd.f32 %v13337_v58, %v13329_v1  ;;  %v4404_v52 = vadd.f32 %v13211_v34, %v4368_v27  ;;  %v4764_v61 = vmax.f32 %v4680_v23, 0.0  ;;  %v13407_v1 = vpop.f32.mrf.mxu1  ;;  %v11324_v58 = vld [vmem:[%s14495_s5 + $0xf8] sm:$0xff]   ;;  %10908 = vmatprep.subr.bf16.mxu1 %v11376_v20  ;;  %v14712_v24 = vld [vmem:[#allocation40_spill] sm:$0xff] }
 0x2f0   :  { %v4796_v19 = vadd.f32 %v13256_v59, %v4759_v0  ;;  %v4762_v49 = vmax.f32 %v4672_v7, 0.0  ;;  %v4466_v51 = vmax.f32 %v4435_v26, %v4465_v8  ;;  %4830 = vst [vmem:[#allocation2 + $0x60] sm:$0xff] %v4798_v6  ;;  %v9672_v28 = vpack.c.bf16 %v4798_v6, %v4798_v6  ;;  %v13414_v50 = vpop.f32.mrf.mxu0  ;;  %10909 = vmatpush3.bf16.msra.mxu1 %v11376_v20  ;;  %v11332_v0 = vld [vmem:[%s14495_s5 + $0x128] sm:$0xff]  }
 0x2f1   :  { %v4250_v56 = vadd.f32 %v4198_v14, %v14703_v2  ;;  %v4203_v33 = vadd.f32 %v14704_v5, %v10142_v45  ;;  %v4436_v32 = vmax.f32 %v4404_v52, 0.0  ;;  %v4801_v54 = vadd.f32 %v13256_v59, %v4764_v61  ;;  %v11297_v4 = vld [vmem:[#allocation3 + $0x20] ss:$12 sps:$4 sm:$0xff]   ;;  %v13431_v9 = vpop.f32.mrf.mxu1 }
 0x2f2   :  { %4828 = vst [vmem:[#allocation2 + $0x50] sm:$0xff] %v4796_v19  ;;  %v9670_v60 = vpack.c.bf16 %v4796_v19, %v4796_v19  ;;  %v4799_v63 = vadd.f32 %v13256_v59, %v4762_v49  ;;  %4990 = vst [vmem:[#allocation3 + $0x9c] sm:$0xf] %v9672_v28  ;;  %v4683_v3 = vadd.f32 %v13339_v53, %v13199_v62  ;;  %10863 = vmatmul.mubr.bf16.vlgmr.msra.gmra.mxu0 %v11297_v4  ;;  %v13427_v55 = vpop.f32.mrf.mxu0  ;;  %v14708_v6 = vld [vmem:[#allocation44_spill] sm:$0xff]  ;;  %v5045_v52 = vld [vmem:[#allocation2 + $0x17] sm:$0xff] }
 0x2f3   :  { %v4369_v48 = vmul.f32 %v13171_v17, %v4250_v56  ;;  %v4251_v18 = vadd.f32 %v4203_v33, %v14705_v22  ;;  %v4675_v43 = vadd.f32 %v13199_v62, %v13354_v37  ;;  %v4467_v36 = vmax.f32 %v4436_v32, %v4466_v51  ;;  %4833 = vst [vmem:[#allocation2 + $0x78] sm:$0xff] %v4801_v54  ;;  %v5046_v19 = vld [vmem:[#allocation2 + $0x1f] sm:$0xff]  ;;  %v13454_v2 = vpop.f32.mrf.mxu1  ;;  %v11333_v56 = vld [vmem:[%s14495_s5 + $0xe8] sm:$0xff]  }
 0x2f4   :  { %4988 = vst [vmem:[#allocation3 + $0x84] sm:$0xf] %v9670_v60  ;;  %v9675_v57 = vpack.c.bf16 %v4801_v54, %v4801_v54  ;;  %4831 = vst [vmem:[#allocation2 + $0x68] sm:$0xff] %v4799_v63  ;;  %v9673_v35 = vpack.c.bf16 %v4799_v63, %v4799_v63  ;;  %v10145_v39 = vadd.f32 %v13360_v10, %v13352_v42  ;;  %v4765_v29 = vmax.f32 %v4683_v3, 0.0  ;;  %v14706_v42 = vld [vmem:[#allocation48_spill] sm:$0xff]  ;;  %v13443_v27 = vpop.f32.mrf.mxu0  ;;  %v5014_v60 = vld [vmem:[#allocation2 + $0x21] sm:$0xff] }
 0x2f5   :  { %v4405_v31 = vadd.f32 %v13211_v34, %v4369_v48  ;;  %v4370_v53 = vmul.f32 %v13171_v17, %v4251_v18  ;;  %v4763_v37 = vmax.f32 %v4675_v43, 0.0  ;;  %10336 = vmatpush3.bf16.msra.mxu0 %v11324_v58  ;;  %v4696_v8 = vadd.f32 %v13362_v46, %v13199_v62  ;;  %v11338_v63 = vld [vmem:[%s14495_s5 + $0x120] sm:$0xff]  }
 0x2f6   :  { %4993 = vst [vmem:[#allocation3 + $0xc0] sm:$0xf] %v9675_v57  ;;  %4991 = vst [vmem:[#allocation3 + $0xa8] sm:$0xf] %v9673_v35  ;;  %v4206_v10 = vadd.f32 %v14706_v42, %v10145_v39  ;;  %v4688_v21 = vadd.f32 %v13199_v62, %v13372_v47  ;;  %v5076_v12 = vsel %vm11893_vm3, %v5012_v11, 0.0  ;;  %10337 = vmatprep.subr.bf16.mxu0 %v11328_v15  ;;  %v13452_v61 = vpop.f32.mrf.mxu0  ;;  %v5269_v48 = vsel %vm11916_vm4, %v5045_v52, 0.0 }
 0x2f7   :  { %v4437_v23 = vmax.f32 %v4405_v31, 0.0  ;;  %v4406_v7 = vadd.f32 %v13211_v34, %v4370_v53  ;;  %v4802_v26 = vadd.f32 %v13256_v59, %v4765_v29  ;;  %v4800_v46 = vadd.f32 %v13256_v59, %v4763_v37  ;;  %v5013_v3 = vld [vmem:[#allocation2 + $0x19] sm:$0xff]  ;;  %v5047_v35 = vld [vmem:[#allocation2 + $0x27] sm:$0xff]  ;;  %v5048_v37 = vld [vmem:[#allocation2 + $0x2f] sm:$0xff] }
 0x2f8   :  { %v4252_v38 = vadd.f32 %v4206_v10, %v14708_v6  ;;  %v4768_v47 = vmax.f32 %v4696_v8, 0.0  ;;  %v4766_v14 = vmax.f32 %v4688_v21, 0.0  ;;  %v9693_v45 = vpack.c.bf16 %v5011_v40, %v5011_v40  ;;  %v13462_v54 = vpop.f32.mrf.mxu0  ;;  %v14710_v39 = vld [vmem:[#allocation52_spill] sm:$0xff]  ;;  %v13479_v40 = vpop.f32.mrf.mxu1  ;;  %v11342_v21 = vld [vmem:[%s14495_s5 + $0x118] sm:$0xff]  }
 0x2f9   :  { %v4468_v49 = vmax.f32 %v4437_v23, %v4467_v36  ;;  %v4438_v20 = vmax.f32 %v4406_v7, 0.0  ;;  %4834 = vst [vmem:[#allocation2 + $0x80] sm:$0xff] %v4802_v26  ;;  %v9676_v51 = vpack.c.bf16 %v4802_v26, %v4802_v26  ;;  %4832 = vst [vmem:[#allocation2 + $0x70] sm:$0xff] %v4800_v46  ;;  %v9674_v28 = vpack.c.bf16 %v4800_v46, %v4800_v46  ;;  %v5049_v26 = vld [vmem:[#allocation2 + $0x37] sm:$0xff] }
 0x2fa   :  { %10338 = vmatpush3.bf16.msra.mxu0 %v11329_v16  ;;  %v4371_v5 = vmul.f32 %v13171_v17, %v4252_v38  ;;  %v4805_v33 = vadd.f32 %v13256_v59, %v4768_v47  ;;  %v4803_v58 = vadd.f32 %v13256_v59, %v4766_v14  ;;  %v9694_v32 = vpack.c.bf16 %v5076_v12, %v5076_v12  ;;  %v11339_v16 = vld [vmem:[%s14495_s5 + $0xe0] sm:$0xff]   ;;  %v13486_v8 = vpop.f32.mrf.mxu0  ;;  %v13520_v15 = vld [vmem:[#allocation3 + $0x18] ss:$12 sps:$4 sm:$0xff]  }
 0x2fb   :  { %5235 = vst [vmem:[#allocation3 + $0x1c] sm:$0xf] %v9693_v45  ;;  %10339 = vmatprep.subr.bf16.mxu0 %v11332_v0  ;;  %v4469_v4 = vmax.f32 %v4438_v20, %v4468_v49  ;;  %4994 = vst [vmem:[#allocation3 + $0xcc] sm:$0xf] %v9676_v51  ;;  %v9728_v22 = vpack.c.bf16 %v5046_v19, %v5046_v19  ;;  %v10148_v18 = vadd.f32 %v13385_v41, %v13370_v44  ;;  %v5050_v49 = vld [vmem:[#allocation2 + $0x3f] sm:$0xff]  ;;  %v14715_v51 = vld [vmem:[#allocation41_spill] sm:$0xff] }
 0x2fc   :  { %4992 = vst [vmem:[#allocation3 + $0xb4] sm:$0xf] %v9674_v28  ;;  %v4407_v43 = vadd.f32 %v13211_v34, %v4371_v5  ;;  %4837 = vst [vmem:[#allocation2 + $0x98] sm:$0xff] %v4805_v33  ;;  %v9679_v11 = vpack.c.bf16 %v4805_v33, %v4805_v33  ;;  %v9677_v36 = vpack.c.bf16 %v4803_v58, %v4803_v58  ;;  %v5078_v41 = vsel %vm11929_vm5, %v5014_v60, 0.0  ;;  %v11343_v20 = vld [vmem:[%s14495_s5 + $0xd8] sm:$0xff]   ;;  %v13512_v60 = vpop.f32.mrf.mxu0 }
 0x2fd   :  { %4835 = vst [vmem:[#allocation2 + $0x88] sm:$0xff] %v4803_v58  ;;  %5236 = vst [vmem:[#allocation3 + $0x28] sm:$0xf] %v9694_v32  ;;  %v9727_v57 = vpack.c.bf16 %v5269_v48, %v5269_v48  ;;  %v4211_v31 = vadd.f32 %v10148_v18, %v14710_v39  ;;  %v4699_v53 = vadd.f32 %v13380_v30, %v13199_v62  ;;  %v5271_v38 = vsel %vm11941_vm6, %v5047_v35, 0.0  ;;  %v5015_v32 = vld [vmem:[#allocation2 + $0x29] sm:$0xff] }
 0x2fe   :  { %5430 = vst [vmem:[#allocation3 + $0x44] sm:$0xf] %v9728_v22  ;;  %v4691_v29 = vadd.f32 %v13199_v62, %v13392_v25  ;;  %10340 = vmatpush3.bf16.msra.mxu0 %v11333_v56  ;;  %v4439_v42 = vmax.f32 %v4407_v43, 0.0  ;;  %4997 = vst [vmem:[#allocation3 + $0xf0] sm:$0xf] %v9679_v11  ;;  %v9695_v10 = vpack.c.bf16 %v5013_v3, %v5013_v3  ;;  %v5273_v58 = vsel %vm11971_vm8, %v5049_v26, 0.0 }
 0x2ff   :  { %4995 = vst [vmem:[#allocation3 + $0xd8] sm:$0xf] %v9677_v36  ;;  %5429 = vst [vmem:[#allocation3 + $0x38] sm:$0xf] %v9727_v57  ;;  %v9696_v30 = vpack.c.bf16 %v5078_v41, %v5078_v41  ;;  %v10151_v25 = vadd.f32 %v13431_v9, %v13407_v1  ;;  %10341 = vmatprep.subr.bf16.mxu0 %v11338_v63  ;;  %v4253_v12 = vadd.f32 %v4211_v31, %v14712_v24  ;;  %v14713_v1 = vld [vmem:[#allocation54_spill] sm:$0xff]  ;;  %v11347_v63 = vld [vmem:[%s14495_s5 + $0x110] sm:$0xff]  }
 0x300   :  { %v4769_v0 = vmax.f32 %v4699_v53, 0.0  ;;  %v4767_v23 = vmax.f32 %v4691_v29, 0.0  ;;  %v4712_v7 = vadd.f32 %v13400_v13, %v13199_v62  ;;  %v13494_v46 = vmax.f32 %v4439_v42, %v4469_v4  ;;  %5237 = vst [vmem:[#allocation3 + $0x34] sm:$0xf] %v9695_v10  ;;  %v13502_v13 = vpop.f32.mrf.mxu1  ;;  %v11382_v4 = vld [vmem:[%s14495_s5 + $0x1f8] sm:$0xff]   ;;  %v11348_v39 = vld [vmem:[%s14495_s5 + $0xd0] sm:$0xff]  }
 0x301   :  { %5238 = vst [vmem:[#allocation3 + $0x40] sm:$0xf] %v9696_v30  ;;  %v4214_v9 = vadd.f32 %v10151_v25, %v14713_v1  ;;  %v9730_v47 = vpack.c.bf16 %v5048_v37, %v5048_v37  ;;  %v4372_v14 = vmul.f32 %v13171_v17, %v4253_v12  ;;  %v9729_v56 = vpack.c.bf16 %v5271_v38, %v5271_v38  ;;  %v5016_v3 = vld [vmem:[#allocation2 + $0x31] sm:$0xff]  ;;  %v5051_v42 = vld [vmem:[#allocation2 + $0x47] sm:$0xff]  ;;  %v14718_v24 = vld [vmem:[#allocation50_spill] sm:$0xff] }
 0x302   :  { %v4806_v45 = vadd.f32 %v13256_v59, %v4769_v0  ;;  %v4804_v52 = vadd.f32 %v13256_v59, %v4767_v23  ;;  %v4772_v19 = vmax.f32 %v4712_v7, 0.0  ;;  %10342 = vmatpush3.bf16.msra.mxu0 %v11339_v16  ;;  %v4704_v5 = vadd.f32 %v13199_v62, %v13414_v50  ;;  %10471 = vmatprep.subr.bf16.mxu1 %v11382_v4  ;;  %v10156_v37 = vpop.f32.mrf.mxu1  ;;  %v11351_v16 = vld [vmem:[%s14495_s5 + $0x108] sm:$0xff]   ;;  %v11357_v4 = vld [vmem:[%s14495_s5 + $0x100] sm:$0xff]  }
 0x303   :  { %v4254_v28 = vadd.f32 %v4214_v9, %v14715_v51  ;;  %5432 = vst [vmem:[#allocation3 + $0x5c] sm:$0xf] %v9730_v47  ;;  %10343 = vmatprep.subr.bf16.mxu0 %v11342_v21  ;;  %v4408_v48 = vadd.f32 %v13211_v34, %v4372_v14  ;;  %5431 = vst [vmem:[#allocation3 + $0x50] sm:$0xf] %v9729_v56  ;;  %v9731_v57 = vpack.c.bf16 %v5273_v58, %v5273_v58  ;;  %v5052_v38 = vld [vmem:[#allocation2 + $0x4f] sm:$0xff]  ;;  %v14719_v47 = vld [vmem:[#allocation42_spill] sm:$0xff] }
 0x304   :  { %4838 = vst [vmem:[#allocation2 + $0xa0] sm:$0xff] %v4806_v45  ;;  %v9680_v50 = vpack.c.bf16 %v4806_v45, %v4806_v45  ;;  %4836 = vst [vmem:[#allocation2 + $0x90] sm:$0xff] %v4804_v52  ;;  %v9678_v22 = vpack.c.bf16 %v4804_v52, %v4804_v52  ;;  %v4809_v18 = vadd.f32 %v13256_v59, %v4772_v19  ;;  %v13524_v43 = vld [vmem:[#allocation3 + $0x1c] ss:$12 sps:$4 sm:$0xff]   ;;  %v4770_v36 = vmax.f32 %v4704_v5, 0.0 }
 0x305   :  { %v4373_v11 = vmul.f32 %v13171_v17, %v4254_v28  ;;  %v9732_v35 = vpack.c.bf16 %v5050_v49, %v5050_v49  ;;  %v4440_v53 = vmax.f32 %v4408_v48, 0.0  ;;  %v10154_v44 = vadd.f32 %v13479_v40, %v13454_v2  ;;  %6012 = vmatprep.mubr.bf16.mxu1 %v13524_v43  ;;  %5433 = vst [vmem:[#allocation3 + $0x68] sm:$0xf] %v9731_v57  ;;  %v5017_v28 = vld [vmem:[#allocation2 + $0x39] sm:$0xff]  ;;  %v5020_v52 = vld [vmem:[#allocation2 + $0x51] sm:$0xff] }
 0x306   :  { %v11301_v31 = vld [vmem:[#allocation3 + $0x38] ss:$12 sps:$4 sm:$0xff]   ;;  %4998 = vst [vmem:[#allocation3 + $0xfc] sm:$0xf] %v9680_v50  ;;  %4996 = vst [vmem:[#allocation3 + $0xe4] sm:$0xf] %v9678_v22  ;;  %v9683_v29 = vpack.c.bf16 %v4809_v18, %v4809_v18  ;;  %v4715_v41 = vadd.f32 %v13427_v55, %v13199_v62  ;;  %10344 = vmatpush3.bf16.msra.mxu0 %v11343_v20  ;;  %v4807_v30 = vadd.f32 %v13256_v59, %v4770_v36  ;;  %v13542_v55 = vpop.f32.mrf.mxu0 }
 0x307   :  { %4841 = vst [vmem:[#allocation2 + $0xb8] sm:$0xff] %v4809_v18  ;;  %v4409_v10 = vadd.f32 %v13211_v34, %v4373_v11  ;;  %5434 = vst [vmem:[#allocation3 + $0x74] sm:$0xf] %v9732_v35  ;;  %v5080_v2 = vsel %vm11958_vm7, %v5016_v3, 0.0  ;;  %v9697_v40 = vpack.c.bf16 %v5015_v32, %v5015_v32  ;;  %10345 = vmatprep.subr.bf16.mxu0 %v11347_v63  ;;  %10866 = vmatprep.mubr.bf16.mxu0 %v11301_v31  ;;  %v14721_v20 = vld [vmem:[#allocation53_spill] sm:$0xff]  ;;  %v14722_v22 = vld [vmem:[#allocation46_spill] sm:$0xff] }
 0x308   :  { %6013 = vmatmul.mubr.bf16.gmra.mxu1 %v13520_v15  ;;  %v4470_v21 = vmax.f32 %v4440_v53, %v13494_v46  ;;  %5001 = vst [vmem:[#allocation3 + $0x120] sm:$0xf] %v9683_v29  ;;  %v4219_v12 = vadd.f32 %v14718_v24, %v10154_v44  ;;  %v4773_v0 = vmax.f32 %v4715_v41, 0.0  ;;  %v9698_v23 = vpack.c.bf16 %v5080_v2, %v5080_v2  ;;  %v13547_v7 = vld [vmem:[#allocation3 + $0x34] ss:$12 sps:$4 sm:$0xff]   ;;  %v13560_v56 = vpop.f32.mrf.mxu0 }
 0x309   :  { %v4441_v26 = vmax.f32 %v4409_v10, 0.0  ;;  %4839 = vst [vmem:[#allocation2 + $0xa8] sm:$0xff] %v4807_v30  ;;  %v9681_v1 = vpack.c.bf16 %v4807_v30, %v4807_v30  ;;  %5239 = vst [vmem:[#allocation3 + $0x4c] sm:$0xf] %v9697_v40  ;;  %v4707_v9 = vadd.f32 %v13199_v62, %v13443_v27  ;;  %v10157_v6 = vadd.f32 %v10156_v37, %v13502_v13  ;;  %v13569_v48 = vld [vmem:[#allocation3 + $0x30] ss:$12 sps:$4 sm:$0xff]  }
 0x30a   :  { %v4255_v14 = vadd.f32 %v4219_v12, %v14719_v47  ;;  %v4810_v46 = vadd.f32 %v13256_v59, %v4773_v0  ;;  %5240 = vst [vmem:[#allocation3 + $0x58] sm:$0xf] %v9698_v23  ;;  %v4728_v45 = vadd.f32 %v13452_v61, %v13199_v62  ;;  %v5275_v19 = vsel %vm11999_vm10, %v5051_v42, 0.0  ;;  %10346 = vmatpush3.bf16.msra.mxu0 %v11348_v39  ;;  %v11352_v61 = vld [vmem:[%s14495_s5 + $0xc8] sm:$0xff]   ;;  %v11358_v57 = vld [vmem:[%s14495_s5 + $0xc0] sm:$0xff]   ;;  %v5053_v37 = vld [vmem:[#allocation2 + $0x57] sm:$0xff]  ;;  %v10845_v42 = vpop.f32.mrf.mxu0 }
 0x30b   :  { %6020 = vmatprep.mubr.bf16.mxu1 %v13547_v7  ;;  %v4471_v49 = vmax.f32 %v4441_v26, %v4470_v21  ;;  %4999 = vst [vmem:[#allocation3 + $0x108] sm:$0xf] %v9681_v1  ;;  %v4771_v27 = vmax.f32 %v4707_v9, 0.0  ;;  %v4222_v13 = vadd.f32 %v14721_v20, %v10157_v6  ;;  %v9733_v51 = vpack.c.bf16 %v5275_v19, %v5275_v19  ;;  %v11305_v5 = vld [vmem:[#allocation3 + $0x50] ss:$12 sps:$4 sm:$0xff]  }
 0x30c   :  { %10347 = vmatprep.subr.bf16.mxu0 %v11351_v16  ;;  %v4374_v33 = vmul.f32 %v13171_v17, %v4255_v14  ;;  %4842 = vst [vmem:[#allocation2 + $0xc0] sm:$0xff] %v4810_v46  ;;  %v9684_v58 = vpack.c.bf16 %v4810_v46, %v4810_v46  ;;  %v4776_v32 = vmax.f32 %v4728_v45, 0.0  ;;  %v9734_v63 = vpack.c.bf16 %v5052_v38, %v5052_v38  ;;  %v5018_v36 = vld [vmem:[#allocation2 + $0x41] sm:$0xff]  ;;  %v5056_v23 = vld [vmem:[#allocation2 + $0x6f] sm:$0xff]  ;;  %v4738_v19 = vpop.f32.mrf.mxu0  ;;  %v11515_v20 = vld [vmem:[%s14494_s4] ss:$0 sm:$0xff] }
 0x30d   :  { %v4808_v50 = vadd.f32 %v13256_v59, %v4771_v27  ;;  %v4256_v18 = vadd.f32 %v4222_v13, %v14722_v22  ;;  %5435 = vst [vmem:[#allocation3 + $0x80] sm:$0xf] %v9733_v51  ;;  %v4720_v3 = vadd.f32 %v13199_v62, %v13462_v54  ;;  %v4731_v11 = vadd.f32 %v13486_v8, %v13199_v62  ;;  %v5054_v16 = vld [vmem:[#allocation2 + $0x5f] sm:$0xff]  ;;  %v5055_v10 = vld [vmem:[#allocation2 + $0x67] sm:$0xff] }
 0x30e   :  { %10867 = vmatmul.mubr.bf16.gmra.mxu0 %v11305_v5  ;;  %v11306_v35 = vld [vmem:[#allocation3 + $0x68] ss:$12 sps:$4 sm:$0xff]   ;;  %v4410_v39 = vadd.f32 %v13211_v34, %v4374_v33  ;;  %5002 = vst [vmem:[#allocation3 + $0x12c] sm:$0xf] %v9684_v58  ;;  %v4813_v31 = vadd.f32 %v13256_v59, %v4776_v32  ;;  %5436 = vst [vmem:[#allocation3 + $0x8c] sm:$0xf] %v9734_v63  ;;  %v9699_v53 = vpack.c.bf16 %v5017_v28, %v5017_v28 }
 0x30f   :  { %v4723_v54 = vadd.f32 %v13199_v62, %v13512_v60  ;;  %4840 = vst [vmem:[#allocation2 + $0xb0] sm:$0xff] %v4808_v50  ;;  %v9682_v29 = vpack.c.bf16 %v4808_v50, %v4808_v50  ;;  %v4375_v8 = vmul.f32 %v13171_v17, %v4256_v18  ;;  %v4774_v44 = vmax.f32 %v4720_v3, 0.0  ;;  %10348 = vmatpush3.bf16.msra.mxu0 %v11352_v61  ;;  %v13591_v17 = vld [vmem:[%s14495_s5 + $0x238] sm:$0xff]   ;;  %v5019_v45 = vld [vmem:[#allocation2 + $0x49] sm:$0xff] }
 0x310   :  { %v4777_v41 = vmax.f32 %v4731_v11, 0.0  ;;  %10870 = vmatprep.mubr.bf16.mxu0 %v11306_v35  ;;  %6021 = vmatmul.mubr.bf16.gmra.mxu1 %v13569_v48  ;;  %v4442_v30 = vmax.f32 %v4410_v39, 0.0  ;;  %4845 = vst [vmem:[#allocation2 + $0xd8] sm:$0xff] %v4813_v31  ;;  %v9687_v25 = vpack.c.bf16 %v4813_v31, %v4813_v31  ;;  %v5082_v62 = vsel %vm11988_vm9, %v5018_v36, 0.0  ;;  %5241 = vst [vmem:[#allocation3 + $0x64] sm:$0xf] %v9699_v53 }
 0x311   :  { %v4775_v60 = vmax.f32 %v4723_v54, 0.0  ;;  %v13593_v40 = vld [vmem:[#allocation3 + $0x4c] ss:$12 sps:$4 sm:$0xff]   ;;  %5000 = vst [vmem:[#allocation3 + $0x114] sm:$0xf] %v9682_v29  ;;  %v4411_v21 = vadd.f32 %v13211_v34, %v4375_v8  ;;  %v4811_v24 = vadd.f32 %v13256_v59, %v4774_v44  ;;  %v9700_v0 = vpack.c.bf16 %v5082_v62, %v5082_v62  ;;  %10349 = vmatprep.subr.bf16.mxu0 %v11357_v4  ;;  %v14729_v18 = vld [vmem:[#allocation17_spill] sm:$0xff] }
 0x312   :  { %v4814_v12 = vadd.f32 %v13256_v59, %v4777_v41  ;;  %v4473_v26 = vmax.f32 %v4442_v30, %v4471_v49  ;;  %5005 = vst [vmem:[#allocation3 + $0x150] sm:$0xf] %v9687_v25  ;;  %v14724_v9 = vld [vmem:[#allocation18_spill] sm:$0xff]  ;;  %v9736_v38 = vpack.c.bf16 %v5054_v16, %v5054_v16  ;;  %6028 = vmatprep.mubr.bf16.mxu1 %v13593_v40  ;;  %v14726_v51 = vld [vmem:[#allocation20_spill] sm:$0xff] }
 0x313   :  { %v4812_v1 = vadd.f32 %v13256_v59, %v4775_v60  ;;  %vm14725_vm2 = vnez %v14724_v9  ;;  %v4443_v47 = vmax.f32 %v4411_v21, 0.0  ;;  %4843 = vst [vmem:[#allocation2 + $0xc8] sm:$0xff] %v4811_v24  ;;  %v9685_v34 = vpack.c.bf16 %v4811_v24, %v4811_v24  ;;  %5242 = vst [vmem:[#allocation3 + $0x70] sm:$0xf] %v9700_v0  ;;  %v5057_v49 = vld [vmem:[#allocation2 + $0x77] sm:$0xff]  ;;  %10350 = vmatpush3.bf16.msra.mxu0 %v11358_v57  ;;  %v5058_v5 = vld [vmem:[#allocation2 + $0x7f] sm:$0xff] }
 0x314   :  { %v5277_v6 = vsel %vm14725_vm2, %v5053_v37, 0.0  ;;  %4846 = vst [vmem:[#allocation2 + $0xe0] sm:$0xff] %v4814_v12  ;;  %v9688_v14 = vpack.c.bf16 %v4814_v12, %v4814_v12  ;;  %5438 = vst [vmem:[#allocation3 + $0xa4] sm:$0xf] %v9736_v38  ;;  %v4744_v13 = vadd.f32 %v11515_v20, %v13542_v55  ;;  %vm14727_vm3 = vnez %v14726_v51  ;;  %10942 = vmatprep.subr.bf16.mxu0 %v13591_v17  ;;  %v5059_v50 = vld [vmem:[#allocation2 + $0x87] sm:$0xff]  ;;  %v5060_v31 = vld [vmem:[#allocation2 + $0x8f] sm:$0xff] }
 0x315   :  { %v9735_v46 = vpack.c.bf16 %v5277_v6, %v5277_v6  ;;  %4844 = vst [vmem:[#allocation2 + $0xd0] sm:$0xff] %v4812_v1  ;;  %v9686_v27 = vpack.c.bf16 %v4812_v1, %v4812_v1  ;;  %v5279_v28 = vsel %vm14727_vm3, %v5055_v10, 0.0  ;;  %v9738_v61 = vpack.c.bf16 %v5056_v23, %v5056_v23  ;;  %v11311_v58 = vld [vmem:[#allocation3 + $0x80] ss:$12 sps:$4 sm:$0xff]   ;;  %5003 = vst [vmem:[#allocation3 + $0x138] sm:$0xf] %v9685_v34 }
 0x316   :  { %v13609_v33 = vmax.f32 %v4443_v47, %v4473_v26  ;;  %5006 = vst [vmem:[#allocation3 + $0x15c] sm:$0xf] %v9688_v14  ;;  %v9737_v32 = vpack.c.bf16 %v5279_v28, %v5279_v28  ;;  %v4736_v63 = vadd.f32 %v11515_v20, %v13560_v56  ;;  %v4747_v4 = vadd.f32 %v11515_v20, %v10845_v42  ;;  %v13612_v22 = vld [vmem:[#allocation3 + $0x48] ss:$12 sps:$4 sm:$0xff]   ;;  %v11516_v16 = vld [vmem:[%s14491_s1 + $0x1] ss:$0 sm:$0xff] }
 0x317   :  { %5437 = vst [vmem:[#allocation3 + $0x98] sm:$0xf] %v9735_v46  ;;  %5004 = vst [vmem:[#allocation3 + $0x144] sm:$0xf] %v9686_v27  ;;  %v4780_v55 = vmax.f32 %v4744_v13, 0.0  ;;  %vm14730_vm4 = vnez %v14729_v18  ;;  %v9701_v11 = vpack.c.bf16 %v5019_v45, %v5019_v45  ;;  %v4739_v36 = vadd.f32 %v11515_v20, %v4738_v19  ;;  %10871 = vmatmul.mubr.bf16.gmra.mxu0 %v11311_v58  ;;  %v5021_v53 = vld [vmem:[#allocation2 + $0x59] sm:$0xff] }
 0x318   :  { %14728 = vst [vmem:[#allocation8_spill] sm:$0xff] %v13609_v33  ;;  %5440 = vst [vmem:[#allocation3 + $0xbc] sm:$0xf] %v9738_v61  ;;  %v5084_v3 = vsel %vm14730_vm4, %v5020_v52, 0.0  ;;  %v4778_v57 = vmax.f32 %v4736_v63, 0.0  ;;  %v4781_v35 = vmax.f32 %v4747_v4, 0.0  ;;  %6029 = vmatmul.mubr.bf16.gmra.mxu1 %v13612_v22  ;;  %v9740_v44 = vpack.c.bf16 %v5058_v5, %v5058_v5 }
 0x319   :  { %5439 = vst [vmem:[#allocation3 + $0xb0] sm:$0xf] %v9737_v32  ;;  %v9702_v39 = vpack.c.bf16 %v5084_v3, %v5084_v3  ;;  %v4817_v56 = vadd.f32 %v13256_v59, %v4780_v55  ;;  %5243 = vst [vmem:[#allocation3 + $0x7c] sm:$0xf] %v9701_v11  ;;  %v4779_v54 = vmax.f32 %v4739_v36, 0.0  ;;  %v14731_v29 = vld [vmem:[#allocation22_spill] sm:$0xff]  ;;  %v9742_v0 = vpack.c.bf16 %v5060_v31, %v5060_v31 }
 0x31a   :  { %vm14732_vm5 = vnez %v14731_v29  ;;  %v5022_v41 = vld [vmem:[#allocation2 + $0x61] sm:$0xff]  ;;  %v4815_v42 = vadd.f32 %v11516_v16, %v4778_v57  ;;  %v4818_v10 = vadd.f32 %v11516_v16, %v4781_v35  ;;  %v5061_v25 = vld [vmem:[#allocation2 + $0x97] sm:$0xff]  ;;  %v5023_v62 = vld [vmem:[#allocation2 + $0x69] sm:$0xff]  ;;  %5442 = vst [vmem:[#allocation3 + $0xd4] sm:$0xf] %v9740_v44 }
 0x31b   :  { %v5281_v8 = vsel %vm14732_vm5, %v5057_v49, 0.0  ;;  %v5063_v37 = vld [vmem:[#allocation2 + $0xa7] sm:$0xff]  ;;  %5244 = vst [vmem:[#allocation3 + $0x88] sm:$0xf] %v9702_v39  ;;  %v5062_v2 = vld [vmem:[#allocation2 + $0x9f] sm:$0xff]  ;;  %v5024_v59 = vld [vmem:[#allocation2 + $0x71] sm:$0xff]  ;;  %v9691_v60 = vpack.c.bf16 %v4817_v56, %v4817_v56  ;;  %v4816_v21 = vadd.f32 %v11516_v16, %v4779_v54  ;;  %v9703_v49 = vpack.c.bf16 %v5021_v53, %v5021_v53 }
 0x31c   :  { %v9739_v30 = vpack.c.bf16 %v5281_v8, %v5281_v8  ;;  %4849 = vst [vmem:[#allocation2 + $0xf8] sm:$0xff] %v4817_v56  ;;  %v14733_v24 = vld [vmem:[#allocation24_spill] sm:$0xff]  ;;  %v5065_v26 = vld [vmem:[#allocation2 + $0xb7] sm:$0xff]  ;;  %4847 = vst [vmem:[#allocation2 + $0xe8] sm:$0xff] %v4815_v42  ;;  %v9689_v6 = vpack.c.bf16 %v4815_v42, %v4815_v42  ;;  %v9692_v38 = vpack.c.bf16 %v4818_v10, %v4818_v10  ;;  %v5285_v20 = vsel %vm12151_vm13, %v5061_v25, 0.0 }
 0x31d   :  { %vm14734_vm6 = vnez %v14733_v24  ;;  %v5064_v23 = vld [vmem:[#allocation2 + $0xaf] sm:$0xff]  ;;  %v5067_v1 = vld [vmem:[#allocation2 + $0xc7] sm:$0xff]  ;;  %4850 = vst [vmem:[#allocation2 + $0x100] sm:$0xff] %v4818_v10  ;;  %v13627_v34 = vld [vmem:[#allocation2 + $0xbf] sm:$0xff]  ;;  %v9690_v45 = vpack.c.bf16 %v4816_v21, %v4816_v21  ;;  %v9743_v61 = vpack.c.bf16 %v5285_v20, %v5285_v20  ;;  %v9744_v5 = vpack.c.bf16 %v5062_v2, %v5062_v2 }
 0x31e   :  { %v5283_v12 = vsel %vm14734_vm6, %v5059_v50, 0.0  ;;  %v13625_v9 = vld [vmem:[#allocation3 + $0x64] ss:$12 sps:$4 sm:$0xff]   ;;  %5441 = vst [vmem:[#allocation3 + $0xc8] sm:$0xf] %v9739_v30  ;;  %4848 = vst [vmem:[#allocation2 + $0xf0] sm:$0xff] %v4816_v21  ;;  %v9746_v18 = vpack.c.bf16 %v5064_v23, %v5064_v23  ;;  %v9705_v36 = vpack.c.bf16 %v5023_v62, %v5023_v62 }
 0x31f   :  { %v9741_v47 = vpack.c.bf16 %v5283_v12, %v5283_v12  ;;  %v13629_v14 = vld [vmem:[#allocation3 + $0x60] ss:$12 sps:$4 sm:$0xff]   ;;  %v11315_v46 = vld [vmem:[#allocation3 + $0x98] ss:$12 sps:$4 sm:$0xff]   ;;  %5009 = vst [vmem:[#allocation3 + $0x180] sm:$0xf] %v9691_v60  ;;  %6036 = vmatprep.mubr.bf16.mxu1 %v13625_v9 }
 0x320   :  { %5444 = vst [vmem:[#allocation3 + $0xec] sm:$0xf] %v9742_v0  ;;  %v14735_v52 = vld [vmem:[#allocation19_spill] sm:$0xff]  ;;  %v13635_v13 = vld [vmem:[#allocation2 + $0x79] sm:$0xff]  ;;  %5007 = vst [vmem:[#allocation3 + $0x168] sm:$0xf] %v9689_v6  ;;  %10874 = vmatprep.mubr.bf16.mxu0 %v11315_v46  ;;  %6037 = vmatmul.mubr.bf16.gmra.mxu1 %v13629_v14 }
 0x321   :  { %vm14736_vm7 = vnez %v14735_v52  ;;  %v5026_v51 = vld [vmem:[#allocation2 + $0x81] sm:$0xff]  ;;  %5010 = vst [vmem:[#allocation3 + $0x18c] sm:$0xf] %v9692_v38  ;;  %5443 = vst [vmem:[#allocation3 + $0xe0] sm:$0xf] %v9741_v47  ;;  %v5068_v58 = vld [vmem:[#allocation2 + $0xcf] sm:$0xff] }
 0x322   :  { %v5086_v19 = vsel %vm14736_vm7, %v5022_v41, 0.0  ;;  %v5069_v32 = vld [vmem:[#allocation2 + $0xd7] sm:$0xff]  ;;  %v11316_v4 = vld [vmem:[#allocation3 + $0xb0] ss:$12 sps:$4 sm:$0xff]   ;;  %5008 = vst [vmem:[#allocation3 + $0x174] sm:$0xf] %v9690_v45  ;;  %v9748_v41 = vpack.c.bf16 %v13627_v34, %v13627_v34  ;;  %v9750_v42 = vpack.c.bf16 %v5068_v58, %v5068_v58 }
 0x323   :  { %v9704_v28 = vpack.c.bf16 %v5086_v19, %v5086_v19  ;;  %v5028_v63 = vld [vmem:[#allocation2 + $0x91] sm:$0xff]  ;;  %5245 = vst [vmem:[#allocation3 + $0x94] sm:$0xf] %v9703_v49  ;;  %v5287_v55 = vsel %vm12185_vm15, %v5063_v37, 0.0  ;;  %v5027_v57 = vld [vmem:[#allocation2 + $0x89] sm:$0xff]  ;;  %v5289_v53 = vsel %vm12220_vm0, %v5065_v26, 0.0  ;;  %10875 = vmatmul.mubr.bf16.gmra.mxu0 %v11316_v4 }
 0x324   :  { %v14739_v3 = vld [vmem:[#allocation21_spill] sm:$0xff]  ;;  %5445 = vst [vmem:[#allocation3 + $0xf8] sm:$0xf] %v9743_v61  ;;  %5446 = vst [vmem:[#allocation3 + $0x104] sm:$0xf] %v9744_v5  ;;  %v9745_v35 = vpack.c.bf16 %v5287_v55, %v5287_v55  ;;  %v5070_v56 = vld [vmem:[#allocation2 + $0xdf] sm:$0xff]  ;;  %v9747_v44 = vpack.c.bf16 %v5289_v53, %v5289_v53  ;;  %v9709_v20 = vpack.c.bf16 %v5027_v57, %v5027_v57 }
 0x325   :  { %vm14740_vm8 = vnez %v14739_v3  ;;  %5246 = vst [vmem:[#allocation3 + $0xa0] sm:$0xf] %v9704_v28  ;;  %v13644_v54 = vld [vmem:[#allocation2 + $0x99] sm:$0xff]  ;;  %v5030_v29 = vld [vmem:[#allocation2 + $0xa1] sm:$0xff]  ;;  %5448 = vst [vmem:[#allocation3 + $0x11c] sm:$0xf] %v9746_v18  ;;  %v9752_v38 = vpack.c.bf16 %v5070_v56, %v5070_v56 }
 0x326   :  { %v5088_v11 = vsel %vm14740_vm8, %v5024_v59, 0.0  ;;  %v13647_v8 = vld [vmem:[#allocation3 + $0x7c] ss:$12 sps:$4 sm:$0xff]   ;;  %5247 = vst [vmem:[#allocation3 + $0xac] sm:$0xf] %v9705_v36  ;;  %v14744_v2 = vld [vmem:[#allocation23_spill] sm:$0xff]  ;;  %v9707_v59 = vpack.c.bf16 %v13635_v13, %v13635_v13 }
 0x327   :  { %v9706_v39 = vpack.c.bf16 %v5088_v11, %v5088_v11  ;;  %v14742_v37 = vld [vmem:[#allocation32_spill] sm:$0xff]  ;;  %5447 = vst [vmem:[#allocation3 + $0x110] sm:$0xf] %v9745_v35  ;;  %vm14745_vm0 = vnez %v14744_v2  ;;  %v14746_v60 = vld [vmem:[#allocation35_spill] sm:$0xff]  ;;  %v5033_v24 = vld [vmem:[#allocation2 + $0xb9] sm:$0xff]  ;;  %6044 = vmatprep.mubr.bf16.mxu1 %v13647_v8  ;;  %vm8287_vm6 = vcmask 1040384  }
 0x328   :  { %vm14743_vm9 = vnez %v14742_v37  ;;  %v5031_v10 = vld [vmem:[#allocation2 + $0xa9] sm:$0xff]  ;;  %v5032_v30 = vld [vmem:[#allocation2 + $0xb1] sm:$0xff]  ;;  %v5090_v62 = vsel %vm14745_vm0, %v5026_v51, 0.0  ;;  %vm14747_vm10 = vnez %v14746_v60  ;;  %v5034_v12 = vld [vmem:[#allocation2 + $0xc1] sm:$0xff]  ;;  %5449 = vst [vmem:[#allocation3 + $0x128] sm:$0xf] %v9747_v44  ;;  %v9715_v53 = vpack.c.bf16 %v5033_v24, %v5033_v24 }
 0x329   :  { %v5291_v16 = vsel %vm14743_vm9, %v5067_v1, 0.0  ;;  %5248 = vst [vmem:[#allocation3 + $0xb8] sm:$0xf] %v9706_v39  ;;  %v5293_v21 = vsel %vm14747_vm10, %v5069_v32, 0.0  ;;  %v5036_v0 = vld [vmem:[#allocation2 + $0xd1] sm:$0xff]  ;;  %v5071_v23 = vld [vmem:[#allocation2 + $0xe7] sm:$0xff]  ;;  %v9708_v1 = vpack.c.bf16 %v5090_v62, %v5090_v62  ;;  %v9713_v3 = vpack.c.bf16 %v5031_v10, %v5031_v10 }
 0x32a   :  { %v9749_v25 = vpack.c.bf16 %v5291_v16, %v5291_v16  ;;  %v5074_v26 = vld [vmem:[#allocation2 + $0xff] sm:$0xff]  ;;  %5450 = vst [vmem:[#allocation3 + $0x134] sm:$0xf] %v9748_v41  ;;  %5452 = vst [vmem:[#allocation3 + $0x14c] sm:$0xf] %v9750_v42  ;;  %v9751_v6 = vpack.c.bf16 %v5293_v21, %v5293_v21  ;;  %v14748_v47 = vld [vmem:[#allocation25_spill] sm:$0xff] }
 0x32b   :  { %vm14749_vm13 = vnez %v14748_v47  ;;  %v5035_v46 = vld [vmem:[#allocation2 + $0xc9] sm:$0xff]  ;;  %v9756_v45 = vpack.c.bf16 %v5074_v26, %v5074_v26  ;;  %v11321_v52 = vld [vmem:[#allocation3 + $0xc8] ss:$12 sps:$4 sm:$0xff]   ;;  %5249 = vst [vmem:[#allocation3 + $0xc4] sm:$0xf] %v9707_v59  ;;  %v5295_v27 = vsel %vm12336_vm12, %v5071_v23, 0.0 }
 0x32c   :  { %v5092_v34 = vsel %vm14749_vm13, %v5028_v63, 0.0  ;;  %5451 = vst [vmem:[#allocation3 + $0x140] sm:$0xf] %v9749_v25  ;;  %v5072_v19 = vld [vmem:[#allocation2 + $0xef] sm:$0xff]  ;;  %5250 = vst [vmem:[#allocation3 + $0xd0] sm:$0xf] %v9708_v1  ;;  %v9753_v61 = vpack.c.bf16 %v5295_v27, %v5295_v27  ;;  %v9711_v63 = vpack.c.bf16 %v13644_v54, %v13644_v54  ;;  %10878 = vmatprep.mubr.bf16.mxu0 %v11321_v52 }
 0x32d   :  { %v9710_v13 = vpack.c.bf16 %v5092_v34, %v5092_v34  ;;  %v13664_v51 = vld [vmem:[#allocation3 + $0x78] ss:$12 sps:$4 sm:$0xff]   ;;  %v11322_v28 = vld [vmem:[#allocation3 + $0xe0] ss:$12 sps:$4 sm:$0xff]   ;;  %5453 = vst [vmem:[#allocation3 + $0x158] sm:$0xf] %v9751_v6  ;;  %v9754_v5 = vpack.c.bf16 %v5072_v19, %v5072_v19  ;;  %v9717_v37 = vpack.c.bf16 %v5035_v46, %v5035_v46 }
 0x32e   :  { %5454 = vst [vmem:[#allocation3 + $0x164] sm:$0xf] %v9752_v38  ;;  %v14751_v58 = vld [vmem:[#allocation27_spill] sm:$0xff]  ;;  %v5037_v4 = vld [vmem:[#allocation2 + $0xd9] sm:$0xff]  ;;  %5458 = vst [vmem:[#allocation3 + $0x194] sm:$0xf] %v9756_v45  ;;  %10879 = vmatmul.mubr.bf16.gmra.mxu0 %v11322_v28  ;;  %6045 = vmatmul.mubr.bf16.gmra.mxu1 %v13664_v51  ;;  %v10215_v38 = vpop.f32.mrf.mxu1 }
 0x32f   :  { %vm14752_vm15 = vnez %v14751_v58  ;;  %5251 = vst [vmem:[#allocation3 + $0xdc] sm:$0xf] %v9709_v20  ;;  %5252 = vst [vmem:[#allocation3 + $0xe8] sm:$0xf] %v9710_v13  ;;  %v14753_v55 = vld [vmem:[#allocation29_spill] sm:$0xff]  ;;  %v14755_v11 = vld [vmem:[#allocation31_spill] sm:$0xff]  ;;  %v9719_v42 = vpack.c.bf16 %v5037_v4, %v5037_v4 }
 0x330   :  { %v5094_v32 = vsel %vm14752_vm15, %v5030_v29, 0.0  ;;  %vm14754_vm12 = vnez %v14753_v55  ;;  %vm14756_vm14 = vnez %v14755_v11  ;;  %v5038_v57 = vld [vmem:[#allocation2 + $0xe1] sm:$0xff]  ;;  %v5039_v35 = vld [vmem:[#allocation2 + $0xe9] sm:$0xff]  ;;  %5455 = vst [vmem:[#allocation3 + $0x170] sm:$0xf] %v9753_v61  ;;  %v14757_v54 = vld [vmem:[#allocation33_spill] sm:$0xff]  ;;  %v10216_v47 = vpop.f32.mrf.mxu1 }
 0x331   :  { %v9712_v50 = vpack.c.bf16 %v5094_v32, %v5094_v32  ;;  %v5096_v18 = vsel %vm14754_vm12, %v5032_v30, 0.0  ;;  %v5098_v36 = vsel %vm14756_vm14, %v5034_v12, 0.0  ;;  %v13674_v39 = vld [vmem:[#allocation3 + $0x94] ss:$12 sps:$4 sm:$0xff]   ;;  %5456 = vst [vmem:[#allocation3 + $0x17c] sm:$0xf] %v9754_v5  ;;  %vm14758_vm1 = vnez %v14757_v54 }
 0x332   :  { %5253 = vst [vmem:[#allocation3 + $0xf4] sm:$0xf] %v9711_v63  ;;  %v9714_v31 = vpack.c.bf16 %v5096_v18, %v5096_v18  ;;  %v9716_v56 = vpack.c.bf16 %v5098_v36, %v5098_v36  ;;  %v5100_v29 = vsel %vm14758_vm1, %v5036_v0, 0.0  ;;  %v5040_v44 = vld [vmem:[#allocation2 + $0xf1] sm:$0xff]  ;;  %5255 = vst [vmem:[#allocation3 + $0x10c] sm:$0xf] %v9713_v3  ;;  %v9721_v10 = vpack.c.bf16 %v5039_v35, %v5039_v35 }
 0x333   :  { %v11330_v41 = vld [vmem:[#allocation3 + $0xf8] ss:$12 sps:$4 sm:$0xff]   ;;  %5254 = vst [vmem:[#allocation3 + $0x100] sm:$0xf] %v9712_v50  ;;  %v9718_v16 = vpack.c.bf16 %v5100_v29, %v5100_v29  ;;  %5257 = vst [vmem:[#allocation3 + $0x124] sm:$0xf] %v9715_v53  ;;  %6052 = vmatprep.mubr.bf16.mxu1 %v13674_v39  ;;  %v13696_v46 = vadd.f32 %v10216_v47, %v10215_v38 }
 0x334   :  { %5256 = vst [vmem:[#allocation3 + $0x118] sm:$0xf] %v9714_v31  ;;  %5258 = vst [vmem:[#allocation3 + $0x130] sm:$0xf] %v9716_v56  ;;  %10882 = vmatprep.mubr.bf16.mxu0 %v11330_v41  ;;  %v14759_v30 = vld [vmem:[#allocation34_spill] sm:$0xff]  ;;  %v11386_v19 = vld [vmem:[%s14495_s5 + $0x230] sm:$0xff]  }
 0x335   :  { %5259 = vst [vmem:[#allocation3 + $0x13c] sm:$0xf] %v9717_v37  ;;  %5260 = vst [vmem:[#allocation3 + $0x148] sm:$0xf] %v9718_v16  ;;  %vm14760_vm2 = vnez %v14759_v30  ;;  %v14761_v2 = vld [vmem:[#allocation38_spill] sm:$0xff]  ;;  %v14763_v5 = vld [vmem:[#allocation37_spill] sm:$0xff] }
 0x336   :  { %v5102_v25 = vsel %vm14760_vm2, %v5038_v57, 0.0  ;;  %5261 = vst [vmem:[#allocation3 + $0x154] sm:$0xf] %v9719_v42  ;;  %vm14762_vm3 = vnez %v14761_v2  ;;  %5263 = vst [vmem:[#allocation3 + $0x16c] sm:$0xf] %v9721_v10  ;;  %v5041_v49 = vld [vmem:[#allocation2 + $0xf9] sm:$0xff]  ;;  %vm14764_vm4 = vnez %v14763_v5 }
 0x337   :  { %v5104_v62 = vsel %vm14762_vm3, %v5040_v44, 0.0  ;;  %v9720_v59 = vpack.c.bf16 %v5102_v25, %v5102_v25  ;;  %v11331_v21 = vld [vmem:[#allocation3 + $0x110] ss:$12 sps:$4 sm:$0xff]   ;;  %v11340_v24 = vld [vmem:[#allocation3 + $0x128] ss:$12 sps:$4 sm:$0xff]   ;;  %v9723_v13 = vpack.c.bf16 %v5041_v49, %v5041_v49  ;;  %v11387_v56 = vld [vmem:[%s14495_s5 + $0x1f0] sm:$0xff]  }
 0x338   :  { %v9722_v60 = vpack.c.bf16 %v5104_v62, %v5104_v62  ;;  %v13684_v12 = vld [vmem:[#allocation3 + $0x90] ss:$12 sps:$4 sm:$0xff]   ;;  %v13686_v0 = vld [vmem:[#allocation3 + $0xac] ss:$12 sps:$4 sm:$0xff]   ;;  %10883 = vmatmul.mubr.bf16.gmra.mxu0 %v11331_v21  ;;  %v13690_v1 = vld [vmem:[#allocation3 + $0xa8] ss:$12 sps:$4 sm:$0xff]  }
 0x339   :  { %5262 = vst [vmem:[#allocation3 + $0x160] sm:$0xf] %v9720_v59  ;;  %6053 = vmatmul.mubr.bf16.gmra.mxu1 %v13684_v12  ;;  %10886 = vmatprep.mubr.bf16.mxu0 %v11340_v24  ;;  %v11341_v23 = vld [vmem:[#allocation3 + $0x140] ss:$12 sps:$4 sm:$0xff]   ;;  %v11349_v26 = vld [vmem:[#allocation3 + $0x158] ss:$12 sps:$4 sm:$0xff]  }
 0x33a   :  { %5264 = vst [vmem:[#allocation3 + $0x178] sm:$0xf] %v9722_v60  ;;  %6060 = vmatprep.mubr.bf16.mxu1 %v13686_v0  ;;  %v13692_v6 = vld [vmem:[#allocation3 + $0xc4] ss:$12 sps:$4 sm:$0xff]   ;;  %v13698_v45 = vld [vmem:[#allocation3 + $0xc0] ss:$12 sps:$4 sm:$0xff]  }
 0x33b   :  { %v11350_v34 = vld [vmem:[#allocation3 + $0x170] ss:$12 sps:$4 sm:$0xff]   ;;  %v13708_v27 = vld [vmem:[#allocation3 + $0xd8] ss:$12 sps:$4 sm:$0xff]   ;;  %v13710_v61 = vld [vmem:[#allocation3 + $0xf4] ss:$12 sps:$4 sm:$0xff]  }
 0x33c   :  { %v13700_v52 = vld [vmem:[#allocation3 + $0xdc] ss:$12 sps:$4 sm:$0xff]   ;;  %v5042_v20 = vld [vmem:[#allocation2 + $0x101] sm:$0xff]  ;;  %5265 = vst [vmem:[#allocation3 + $0x184] sm:$0xf] %v9723_v13  ;;  %v11389_v29 = vld [vmem:[%s14495_s5 + $0x1b0] sm:$0xff]  }
 0x33d   :  { %v5073_v28 = vld [vmem:[#allocation2 + $0xf7] sm:$0xff]  ;;  %v5106_v58 = vsel %vm14764_vm4, %v5042_v20, 0.0  ;;  %v14765_v32 = vld [vmem:[#allocation39_spill] sm:$0xff] }
 0x33e   :  { %vm14766_vm5 = vnez %v14765_v32  ;;  %v9724_v63 = vpack.c.bf16 %v5106_v58, %v5106_v58  ;;  %v11395_v50 = vld [vmem:[%s14495_s5 + $0x228] sm:$0xff]   ;;  %v13738_v18 = vld [vmem:[#allocation3 + $0x108] ss:$12 sps:$4 sm:$0xff]   ;;  %v13740_v3 = vld [vmem:[#allocation3 + $0x124] ss:$12 sps:$4 sm:$0xff]  }
 0x33f   :  { %v13724_v55 = vld [vmem:[#allocation3 + $0xf0] ss:$12 sps:$4 sm:$0xff]   ;;  %v13752_v11 = vld [vmem:[#allocation3 + $0x120] ss:$12 sps:$4 sm:$0xff]   ;;  %v13782_v35 = vld [vmem:[#allocation3 + $0x168] ss:$12 sps:$4 sm:$0xff]  }
 0x340   :  { %10887 = vmatmul.mubr.bf16.gmra.mxu0 %v11341_v23  ;;  %5266 = vst [vmem:[#allocation3 + $0x190] sm:$0xf] %v9724_v63  ;;  %v13754_v36 = vld [vmem:[#allocation3 + $0x13c] ss:$12 sps:$4 sm:$0xff]   ;;  %v13765_v57 = vld [vmem:[#allocation3 + $0x154] ss:$12 sps:$4 sm:$0xff]  }
 0x341   :  { %6061 = vmatmul.mubr.bf16.gmra.mxu1 %v13690_v1  ;;  %10890 = vmatprep.mubr.bf16.mxu0 %v11349_v26  ;;  %v11384_v31 = vld [vmem:[%s14495_s5 + $0x1b8] sm:$0xff]   ;;  %v11383_v53 = vld [vmem:[#allocation3 + $0x38] ss:$12 sps:$4 sm:$0xff]   ;;  %v11385_v54 = vld [vmem:[#allocation3 + $0x50] ss:$12 sps:$4 sm:$0xff]  }
 0x342   :  { %6068 = vmatprep.mubr.bf16.mxu1 %v13692_v6  ;;  %v11391_v44 = vld [vmem:[%s14495_s5 + $0x1e8] sm:$0xff]   ;;  %v11388_v41 = vld [vmem:[#allocation3 + $0x68] ss:$12 sps:$4 sm:$0xff]   ;;  %v11390_v16 = vld [vmem:[#allocation3 + $0x80] ss:$12 sps:$4 sm:$0xff]  }
 0x343   :  { %v11393_v37 = vld [vmem:[%s14495_s5 + $0x1a8] sm:$0xff]   ;;  %v11396_v42 = vld [vmem:[%s14495_s5 + $0x1e0] sm:$0xff]   ;;  %v11400_v30 = vld [vmem:[%s14495_s5 + $0x1d8] sm:$0xff]  }
 0x344   :  { %v11398_v10 = vld [vmem:[%s14495_s5 + $0x1a0] sm:$0xff]   ;;  %v11392_v25 = vld [vmem:[#allocation3 + $0x98] ss:$12 sps:$4 sm:$0xff]   ;;  %v11402_v2 = vld [vmem:[%s14495_s5 + $0x198] sm:$0xff]  }
 0x345   :  { %v11394_v62 = vld [vmem:[#allocation3 + $0xb0] ss:$12 sps:$4 sm:$0xff]   ;;  %v11405_v59 = vld [vmem:[%s14495_s5 + $0x1d0] sm:$0xff]   ;;  %v11397_v24 = vld [vmem:[#allocation3 + $0xc8] ss:$12 sps:$4 sm:$0xff]  }
 0x346   :  { %v11407_v60 = vld [vmem:[%s14495_s5 + $0x190] sm:$0xff]   ;;  %v11409_v21 = vld [vmem:[%s14495_s5 + $0x1c8] sm:$0xff]   ;;  %v11417_v23 = vld [vmem:[%s14495_s5 + $0x1c0] sm:$0xff]  }
 0x347   :  { %v11419_v26 = vld [vmem:[%s14495_s5 + $0x180] sm:$0xff]  }
 0x348   :  { %10891 = vmatmul.mubr.bf16.gmra.mxu0 %v11350_v34  ;;  %v13840_v38 = vld [vmem:[#allocation2] sm:$0xff]  ;;  %v11408_v34 = vld [vmem:[#allocation3 + $0x140] ss:$12 sps:$4 sm:$0xff]  }
 0x349   :  { %6069 = vmatmul.mubr.bf16.gmra.mxu1 %v13698_v45  ;;  %6876 = vmatprep.mubr.bf16.mxu0 %v13524_v43  ;;  %v5297_v43 = vsel %vm14766_vm5, %v5073_v28, 0.0  ;;  %v11406_v47 = vld [vmem:[#allocation3 + $0x128] ss:$12 sps:$4 sm:$0xff]   ;;  %v13849_v20 = vld [vmem:[#allocation3 + $0x184] ss:$12 sps:$4 sm:$0xff]  }
 0x34a   :  { %6076 = vmatprep.mubr.bf16.mxu1 %v13700_v52  ;;  %v9755_v4 = vpack.c.bf16 %v5297_v43, %v5297_v43  ;;  %v11422_v13 = vld [vmem:[#allocation3 + $0x34] ss:$12 sps:$4 sm:$0xff]  }
 0x34c   :  { %5457 = vst [vmem:[#allocation3 + $0x188] sm:$0xf] %v9755_v4  ;;  %v13858_v4 = vld [vmem:[#allocation3 + $0x180] ss:$12 sps:$4 sm:$0xff]  }
 0x350   :  { %6877 = vmatmul.mubr.bf16.vlgmr.msra.gmra.mxu0 %v13520_v15  ;;  %v13726_v15 = vld [vmem:[#allocation3 + $0x10c] ss:$12 sps:$4 sm:$0xff]  }
 0x351   :  { %6077 = vmatmul.mubr.bf16.gmra.mxu1 %v13708_v27  ;;  %6884 = vmatprep.mubr.bf16.mxu0 %v13547_v7  ;;  %v11404_v7 = vld [vmem:[%s14495_s5 + $0x220] sm:$0xff]  }
 0x352   :  { %6084 = vmatprep.mubr.bf16.mxu1 %v13710_v61  ;;  %10943 = vmatpush3.bf16.msra.mxu0 %v13591_v17  ;;  %v11413_v17 = vld [vmem:[%s14495_s5 + $0x218] sm:$0xff]  }
 0x353   :  { %10944 = vmatprep.subr.bf16.mxu0 %v11386_v19 }
 0x356   :  { %10945 = vmatpush3.bf16.msra.mxu0 %v11386_v19  ;;  %v10218_v19 = vpop.f32.mrf.mxu1 }
 0x357   :  { %10946 = vmatprep.subr.bf16.mxu0 %v11395_v50 }
 0x358   :  { %6885 = vmatmul.mubr.bf16.gmra.mxu0 %v13569_v48  ;;  %v11423_v48 = vld [vmem:[%s14495_s5 + $0x210] sm:$0xff]   ;;  %v10219_v28 = vpop.f32.mrf.mxu1 }
 0x359   :  { %6085 = vmatmul.mubr.bf16.gmra.mxu1 %v13724_v55  ;;  %6892 = vmatprep.mubr.bf16.mxu0 %v13593_v40  ;;  %v11424_v40 = vld [vmem:[%s14495_s5 + $0x208] sm:$0xff]   ;;  %v10220_v32 = vadd.f32 %v10219_v28, %v10218_v19  ;;  %v11445_v19 = vld [vmem:[#allocation3 + $0xe0] ss:$12 sps:$4 sm:$0xff]  }
 0x35a   :  { %6092 = vmatprep.mubr.bf16.mxu1 %v13726_v15  ;;  %10947 = vmatpush3.bf16.msra.mxu0 %v11395_v50  ;;  %v11420_v50 = vld [vmem:[#allocation3 + $0x30] ss:$12 sps:$4 sm:$0xff]  }
 0x35b   :  { %10948 = vmatprep.subr.bf16.mxu0 %v11404_v7 }
 0x35e   :  { %10949 = vmatpush3.bf16.msra.mxu0 %v11404_v7  ;;  %v11430_v7 = vld [vmem:[#allocation3 + $0x50] ss:$12 sps:$4 sm:$0xff]  }
 0x35f   :  { %10950 = vmatprep.subr.bf16.mxu0 %v11413_v17 }
 0x360   :  { %6893 = vmatmul.mubr.bf16.gmra.mxu0 %v13612_v22  ;;  %v11429_v22 = vld [vmem:[%s14495_s5 + $0x200] sm:$0xff]  }
 0x361   :  { %6093 = vmatmul.mubr.bf16.gmra.mxu1 %v13738_v18  ;;  %6900 = vmatprep.mubr.bf16.mxu0 %v13625_v9  ;;  %v13763_v9 = vld [vmem:[#allocation3 + $0x138] ss:$12 sps:$4 sm:$0xff]  }
 0x362   :  { %6100 = vmatprep.mubr.bf16.mxu1 %v13740_v3  ;;  %10951 = vmatpush3.bf16.msra.mxu0 %v11413_v17  ;;  %v11460_v17 = vld [vmem:[%s14497_s7 + $0x10] ss:$8 sps:$4 sm:$0xff]  }
 0x363   :  { %10952 = vmatprep.subr.bf16.mxu0 %v11423_v48 }
 0x366   :  { %10953 = vmatpush3.bf16.msra.mxu0 %v11423_v48  ;;  %v11474_v48 = vld [vmem:[%s14497_s7 + $0x4] ss:$8 sps:$4 sm:$0xff]  }
 0x367   :  { %10954 = vmatprep.subr.bf16.mxu0 %v11424_v40 }
 0x368   :  { %6901 = vmatmul.mubr.bf16.gmra.mxu0 %v13629_v14  ;;  %v13771_v14 = vld [vmem:[#allocation3 + $0x150] ss:$12 sps:$4 sm:$0xff]  }
 0x369   :  { %6101 = vmatmul.mubr.bf16.gmra.mxu1 %v13752_v11  ;;  %6908 = vmatprep.mubr.bf16.mxu0 %v13647_v8  ;;  %v13773_v8 = vld [vmem:[#allocation3 + $0x16c] ss:$12 sps:$4 sm:$0xff]  }
 0x36a   :  { %6108 = vmatprep.mubr.bf16.mxu1 %v13754_v36  ;;  %10955 = vmatpush3.bf16.msra.mxu0 %v11424_v40 }
 0x36b   :  { %10956 = vmatprep.subr.bf16.mxu0 %v11429_v22 }
 0x36e   :  { %10957 = vmatpush3.bf16.msra.mxu0 %v11429_v22 }
 0x370   :  { %6909 = vmatmul.mubr.bf16.gmra.mxu0 %v13664_v51  ;;  %v11462_v51 = vld [vmem:[%s14497_s7 + $0x14] ss:$8 sps:$4 sm:$0xff]  }
 0x371   :  { %6109 = vmatmul.mubr.bf16.gmra.mxu1 %v13763_v9  ;;  %6916 = vmatprep.mubr.bf16.mxu0 %v13674_v39  ;;  %v11381_v39 = vld [vmem:[#allocation3 + $0x20] ss:$12 sps:$4 sm:$0xff]  }
 0x372   :  { %6116 = vmatprep.mubr.bf16.mxu1 %v13765_v57  ;;  %8117 = vmatprep.subr.bf16.mxu0 %v11462_v51 }
 0x378   :  { %6917 = vmatmul.mubr.bf16.gmra.mxu0 %v13684_v12  ;;  %v11411_v12 = vld [vmem:[%s14495_s5 + $0x188] sm:$0xff]  }
 0x379   :  { %6117 = vmatmul.mubr.bf16.gmra.mxu1 %v13771_v14  ;;  %6924 = vmatprep.mubr.bf16.mxu0 %v13686_v0  ;;  %v11399_v0 = vld [vmem:[#allocation3 + $0xe0] ss:$12 sps:$4 sm:$0xff]  }
 0x37a   :  { %6124 = vmatprep.mubr.bf16.mxu1 %v13773_v8 }
 0x380   :  { %6925 = vmatmul.mubr.bf16.gmra.mxu0 %v13690_v1  ;;  %v11401_v1 = vld [vmem:[#allocation3 + $0xf8] ss:$12 sps:$4 sm:$0xff]  }
 0x381   :  { %6125 = vmatmul.mubr.bf16.gmra.mxu1 %v13782_v35  ;;  %6932 = vmatprep.mubr.bf16.mxu0 %v13692_v6  ;;  %v11403_v6 = vld [vmem:[#allocation3 + $0x110] ss:$12 sps:$4 sm:$0xff]  }
 0x382   :  { %10910 = vmatprep.mubr.bf16.mxu1 %v11381_v39 }
 0x388   :  { %6933 = vmatmul.mubr.bf16.gmra.mxu0 %v13698_v45  ;;  %v11410_v45 = vld [vmem:[#allocation3 + $0x158] ss:$12 sps:$4 sm:$0xff]  }
 0x389   :  { %10911 = vmatmul.mubr.bf16.vlgmr.msra.gmra.mxu1 %v11383_v53  ;;  %6940 = vmatprep.mubr.bf16.mxu0 %v13700_v52  ;;  %v11412_v52 = vld [vmem:[#allocation3 + $0x170] ss:$12 sps:$4 sm:$0xff]  }
 0x38a   :  { %10472 = vmatpush3.bf16.msra.mxu1 %v11384_v31  ;;  %10914 = vmatprep.mubr.bf16.mxu1 %v11385_v54  ;;  %v11436_v31 = vld [vmem:[#allocation3 + $0x98] ss:$12 sps:$4 sm:$0xff]   ;;  %v11439_v53 = vld [vmem:[#allocation3 + $0x7c] ss:$12 sps:$4 sm:$0xff]  }
 0x38b   :  { %10473 = vmatprep.subr.bf16.mxu1 %v11387_v56 }
 0x38e   :  { %10474 = vmatpush3.bf16.msra.mxu1 %v11389_v29 }
 0x38f   :  { %10475 = vmatprep.subr.bf16.mxu1 %v11391_v44 }
 0x390   :  { %6941 = vmatmul.mubr.bf16.gmra.mxu0 %v13708_v27  ;;  %v11418_v27 = vld [vmem:[#allocation3 + $0x188] ss:$12 sps:$4 sm:$0xff]  }
 0x391   :  { %10915 = vmatmul.mubr.bf16.gmra.mxu1 %v11388_v41  ;;  %6948 = vmatprep.mubr.bf16.mxu0 %v13710_v61 }
 0x392   :  { %10918 = vmatprep.mubr.bf16.mxu1 %v11390_v16  ;;  %10476 = vmatpush3.bf16.msra.mxu1 %v11393_v37 }
 0x393   :  { %10477 = vmatprep.subr.bf16.mxu1 %v11396_v42 }
 0x396   :  { %10478 = vmatpush3.bf16.msra.mxu1 %v11398_v10 }
 0x397   :  { %10479 = vmatprep.subr.bf16.mxu1 %v11400_v30  ;;  %v11437_v30 = vld [vmem:[#allocation3 + $0x78] ss:$12 sps:$4 sm:$0xff]  }
 0x398   :  { %6949 = vmatmul.mubr.bf16.gmra.mxu0 %v13724_v55  ;;  %v11425_v55 = vld [vmem:[#allocation3 + $0x38] ss:$12 sps:$4 sm:$0xff]  }
 0x399   :  { %10919 = vmatmul.mubr.bf16.gmra.mxu1 %v11392_v25  ;;  %6956 = vmatprep.mubr.bf16.mxu0 %v13726_v15  ;;  %v11428_v15 = vld [vmem:[#allocation3 + $0x4c] ss:$12 sps:$4 sm:$0xff]  }
 0x39a   :  { %10922 = vmatprep.mubr.bf16.mxu1 %v11394_v62  ;;  %10480 = vmatpush3.bf16.msra.mxu1 %v11402_v2  ;;  %v11440_v2 = vld [vmem:[#allocation3 + $0xb0] ss:$12 sps:$4 sm:$0xff]  }
 0x39b   :  { %10481 = vmatprep.subr.bf16.mxu1 %v11405_v59 }
 0x39e   :  { %10482 = vmatpush3.bf16.msra.mxu1 %v11407_v60  ;;  %v11441_v60 = vld [vmem:[#allocation3 + $0xc8] ss:$12 sps:$4 sm:$0xff]  }
 0x39f   :  { %10483 = vmatprep.subr.bf16.mxu1 %v11409_v21  ;;  %v11444_v21 = vld [vmem:[#allocation3 + $0x94] ss:$12 sps:$4 sm:$0xff]  }
 0x3a0   :  { %6957 = vmatmul.mubr.bf16.gmra.mxu0 %v13738_v18  ;;  %v11431_v18 = vld [vmem:[#allocation3 + $0x68] ss:$12 sps:$4 sm:$0xff]  }
 0x3a1   :  { %10923 = vmatmul.mubr.bf16.gmra.mxu1 %v11397_v24  ;;  %6964 = vmatprep.mubr.bf16.mxu0 %v13740_v3  ;;  %v11434_v3 = vld [vmem:[#allocation3 + $0x64] ss:$12 sps:$4 sm:$0xff]  }
 0x3a2   :  { %10926 = vmatprep.mubr.bf16.mxu1 %v11399_v0  ;;  %10484 = vmatpush3.bf16.msra.mxu1 %v11411_v12 }
 0x3a3   :  { %10485 = vmatprep.subr.bf16.mxu1 %v11417_v23 }
 0x3a6   :  { %10486 = vmatpush3.bf16.msra.mxu1 %v11419_v26 }
 0x3a7   :  { %10990 = vmatprep.subr.bf16.mxu1 %v13840_v38 }
 0x3a8   :  { %6965 = vmatmul.mubr.bf16.gmra.mxu0 %v13752_v11 }
 0x3a9   :  { %10927 = vmatmul.mubr.bf16.gmra.mxu1 %v11401_v1  ;;  %6972 = vmatprep.mubr.bf16.mxu0 %v13754_v36  ;;  %v11472_v36 = vld [vmem:[%s14497_s7] ss:$8 sps:$4 sm:$0xff]  }
 0x3aa   :  { %10930 = vmatprep.mubr.bf16.mxu1 %v11403_v6 }
 0x3b0   :  { %6973 = vmatmul.mubr.bf16.gmra.mxu0 %v13763_v9 }
 0x3b1   :  { %10931 = vmatmul.mubr.bf16.gmra.mxu1 %v11406_v47  ;;  %6980 = vmatprep.mubr.bf16.mxu0 %v13765_v57 }
 0x3b2   :  { %10934 = vmatprep.mubr.bf16.mxu1 %v11408_v34  ;;  %v10864_v49 = vpop.f32.mrf.mxu0 }
 0x3b4   :  { %v6167_v61 = vpop.f32.mrf.mxu0 }
 0x3b5   :  { %v13853_v5 = vadd.f32 %v13696_v46, %v6167_v61  ;;  %v11426_v46 = vld [vmem:[#allocation3 + $0x48] ss:$12 sps:$4 sm:$0xff]  }
 0x3b6   :  { %v10865_v58 = vpop.f32.mrf.mxu0 }
 0x3b8   :  { %6981 = vmatmul.mubr.bf16.gmra.mxu0 %v13771_v14  ;;  %v6170_v43 = vpop.f32.mrf.mxu0  ;;  %v11432_v14 = vld [vmem:[#allocation3 + $0x60] ss:$12 sps:$4 sm:$0xff]  }
 0x3b9   :  { %10935 = vmatmul.mubr.bf16.gmra.mxu1 %v11410_v45  ;;  %6988 = vmatprep.mubr.bf16.mxu0 %v13773_v8  ;;  %v13856_v63 = vadd.f32 %v10220_v32, %v6170_v43  ;;  %v11442_v45 = vld [vmem:[#allocation3 + $0x90] ss:$12 sps:$4 sm:$0xff]  }
 0x3ba   :  { %10938 = vmatprep.mubr.bf16.mxu1 %v11412_v52 }
 0x3c0   :  { %6989 = vmatmul.mubr.bf16.gmra.mxu0 %v13782_v35  ;;  %v11435_v35 = vld [vmem:[#allocation3 + $0x80] ss:$12 sps:$4 sm:$0xff]  }
 0x3c1   :  { %10939 = vmatmul.mubr.bf16.gmra.mxu1 %v11418_v27  ;;  %6996 = vmatprep.mubr.bf16.mxu0 %v13849_v20  ;;  %v11446_v27 = vld [vmem:[#allocation3 + $0xf8] ss:$12 sps:$4 sm:$0xff]  }
 0x3c2   :  { %7742 = vmatprep.mubr.bf16.mxu1 %v11422_v13  ;;  %v11449_v13 = vld [vmem:[#allocation3 + $0xac] ss:$12 sps:$4 sm:$0xff]  }
 0x3c8   :  { %6997 = vmatmul.mubr.bf16.gmra.mxu0 %v13858_v4  ;;  %v10221_v40 = vpop.f32.mrf.mxu1 }
 0x3c9   :  { %7743 = vmatmul.mubr.bf16.vlgmr.msra.gmra.mxu1 %v11420_v50  ;;  %10958 = vmatprep.mubr.bf16.mxu0 %v11425_v55 }
 0x3ca   :  { %7750 = vmatprep.mubr.bf16.mxu1 %v11428_v15  ;;  %v10222_v11 = vpop.f32.mrf.mxu1 }
 0x3cb   :  { %v10223_v22 = vadd.f32 %v10222_v11, %v10221_v40  ;;  %v11451_v40 = vld [vmem:[#allocation3 + $0x128] ss:$12 sps:$4 sm:$0xff]   ;;  %v11454_v11 = vld [vmem:[#allocation3 + $0xc4] ss:$12 sps:$4 sm:$0xff]  }
 0x3cc   :  { %v10224_v9 = vpop.f32.mrf.mxu1 }
 0x3cd   :  { %v13870_v57 = vadd.f32 %v10864_v49, %v10223_v22 }
 0x3ce   :  { %v10225_v8 = vpop.f32.mrf.mxu1  ;;  %v10868_v51 = vpop.f32.mrf.mxu0 }
 0x3cf   :  { %v10226_v39 = vadd.f32 %v10225_v8, %v10224_v9 }
 0x3d0   :  { %10959 = vmatmul.mubr.bf16.vlgmr.msra.gmra.mxu0 %v11430_v7  ;;  %v10227_v56 = vpop.f32.mrf.mxu1  ;;  %v6183_v54 = vpop.f32.mrf.mxu0  ;;  %v11447_v7 = vld [vmem:[#allocation3 + $0xa8] ss:$12 sps:$4 sm:$0xff]  }
 0x3d1   :  { %7751 = vmatmul.mubr.bf16.gmra.mxu1 %v11426_v46  ;;  %10962 = vmatprep.mubr.bf16.mxu0 %v11431_v18  ;;  %v13873_v29 = vadd.f32 %v10865_v58, %v10226_v39 }
 0x3d2   :  { %7758 = vmatprep.mubr.bf16.mxu1 %v11434_v3  ;;  %8118 = vmatpush1.bf16.msra.mxu0 %v11460_v17  ;;  %v10228_v44 = vpop.f32.mrf.mxu1  ;;  %v10869_v41 = vpop.f32.mrf.mxu0  ;;  %v11450_v3 = vld [vmem:[#allocation3 + $0x110] ss:$12 sps:$4 sm:$0xff]  }
 0x3d3   :  { %8119 = vmatprep.subr.bf16.mxu0 %v11474_v48  ;;  %v10229_v37 = vadd.f32 %v10228_v44, %v10227_v56  ;;  %v11455_v44 = vld [vmem:[#allocation3 + $0x140] ss:$12 sps:$4 sm:$0xff]  }
 0x3d4   :  { %v10230_v16 = vpop.f32.mrf.mxu1  ;;  %v6186_v42 = vpop.f32.mrf.mxu0 }
 0x3d5   :  { %v13875_v10 = vadd.f32 %v10229_v37, %v6183_v54  ;;  %v11456_v37 = vld [vmem:[#allocation3 + $0x158] ss:$12 sps:$4 sm:$0xff]  }
 0x3d6   :  { %8120 = vmatpush1.bf16.msra.mxu0 %v11472_v36  ;;  %v10231_v25 = vpop.f32.mrf.mxu1 }
 0x3d7   :  { %11010 = vmatprep.subr.bf16.mxu0 %v13840_v38  ;;  %v10232_v62 = vadd.f32 %v10231_v25, %v10230_v16  ;;  %v10872_v59 = vpop.f32.mrf.mxu0  ;;  %v11459_v16 = vld [vmem:[#allocation3 + $0xdc] ss:$12 sps:$4 sm:$0xff]  }
 0x3d8   :  { %10963 = vmatmul.mubr.bf16.gmra.mxu0 %v11435_v35  ;;  %v10233_v24 = vpop.f32.mrf.mxu1 }
 0x3d9   :  { %7759 = vmatmul.mubr.bf16.gmra.mxu1 %v11432_v14  ;;  %10966 = vmatprep.mubr.bf16.mxu0 %v11436_v31  ;;  %v13877_v12 = vadd.f32 %v10232_v62, %v6186_v42  ;;  %v6199_v0 = vpop.f32.mrf.mxu0 }
 0x3da   :  { %7766 = vmatprep.mubr.bf16.mxu1 %v11439_v53  ;;  %v10234_v23 = vpop.f32.mrf.mxu1  ;;  %v11452_v53 = vld [vmem:[#allocation3 + $0xc0] ss:$12 sps:$4 sm:$0xff]  }
 0x3db   :  { %v10235_v26 = vadd.f32 %v10234_v23, %v10233_v24  ;;  %v10873_v1 = vpop.f32.mrf.mxu0 }
 0x3dc   :  { %v10236_v6 = vpop.f32.mrf.mxu1 }
 0x3dd   :  { %v13879_v47 = vadd.f32 %v10868_v51, %v10235_v26  ;;  %v6202_v34 = vpop.f32.mrf.mxu0 }
 0x3de   :  { %v10237_v52 = vpop.f32.mrf.mxu1 }
 0x3df   :  { %v10238_v49 = vadd.f32 %v10237_v52, %v10236_v6  ;;  %v11463_v6 = vld [vmem:[#allocation3 + $0x170] ss:$12 sps:$4 sm:$0xff]  }
 0x3e0   :  { %10967 = vmatmul.mubr.bf16.gmra.mxu0 %v11440_v2  ;;  %v10239_v61 = vpop.f32.mrf.mxu1 }
 0x3e1   :  { %7767 = vmatmul.mubr.bf16.gmra.mxu1 %v11437_v30  ;;  %10970 = vmatprep.mubr.bf16.mxu0 %v11441_v60  ;;  %v13883_v58 = vadd.f32 %v10869_v41, %v10238_v49 }
 0x3e2   :  { %7774 = vmatprep.mubr.bf16.mxu1 %v11444_v21  ;;  %v10240_v43 = vpop.f32.mrf.mxu1 }
 0x3e3   :  { %v13881_v28 = vpop.f32.mrf.mxu0  ;;  %v10241_v50 = vadd.f32 %v10240_v43, %v10239_v61 }
 0x3e4   :  { %v10242_v15 = vpop.f32.mrf.mxu1 }
 0x3e5   :  { %v6215_v32 = vpop.f32.mrf.mxu0  ;;  %v13887_v46 = vadd.f32 %v10241_v50, %v6199_v0  ;;  %v11457_v0 = vld [vmem:[#allocation3 + $0xd8] ss:$12 sps:$4 sm:$0xff]   ;;  %v11468_v50 = vld [vmem:[#allocation3 + $0x1a0] ss:$12 sps:$4 sm:$0xff]  }
 0x3e6   :  { %v10243_v18 = vpop.f32.mrf.mxu1 }
 0x3e7   :  { %v13885_v55 = vpop.f32.mrf.mxu0  ;;  %v10244_v48 = vadd.f32 %v10243_v18, %v10242_v15 }
 0x3e8   :  { %10971 = vmatmul.mubr.bf16.gmra.mxu0 %v11445_v19 }
 0x3e9   :  { %7775 = vmatmul.mubr.bf16.gmra.mxu1 %v11442_v45  ;;  %10974 = vmatprep.mubr.bf16.mxu0 %v11446_v27  ;;  %v6218_v17 = vpop.f32.mrf.mxu0  ;;  %v13891_v9 = vadd.f32 %v10244_v48, %v6202_v34  ;;  %v11464_v45 = vld [vmem:[#allocation3 + $0x188] ss:$12 sps:$4 sm:$0xff]  }
 0x3ea   :  { %7782 = vmatprep.mubr.bf16.mxu1 %v11449_v13 }
 0x3ee   :  { %v13889_v36 = vpop.f32.mrf.mxu0  ;;  %v10245_v22 = vpop.f32.mrf.mxu1 }
 0x3f0   :  { %10975 = vmatmul.mubr.bf16.gmra.mxu0 %v11450_v3  ;;  %v13893_v14 = vpop.f32.mrf.mxu0  ;;  %v10246_v8 = vpop.f32.mrf.mxu1 }
 0x3f1   :  { %7783 = vmatmul.mubr.bf16.gmra.mxu1 %v11447_v7  ;;  %10978 = vmatprep.mubr.bf16.mxu0 %v11451_v40  ;;  %v10247_v51 = vadd.f32 %v10246_v8, %v10245_v22  ;;  %v11465_v7 = vld [vmem:[#allocation3 + $0xf0] ss:$12 sps:$4 sm:$0xff]   ;;  %v13931_v8 = vld [vmem:[#allocation3] sm:$0xff] }
 0x3f2   :  { %7790 = vmatprep.mubr.bf16.mxu1 %v11454_v11  ;;  %v13895_v35 = vpop.f32.mrf.mxu0  ;;  %v10248_v39 = vpop.f32.mrf.mxu1 }
 0x3f3   :  { %v13897_v31 = vadd.f32 %v10872_v59, %v10247_v51 }
 0x3f4   :  { %v13899_v56 = vpop.f32.mrf.mxu0  ;;  %v10249_v54 = vpop.f32.mrf.mxu1 }
 0x3f5   :  { %v10250_v41 = vadd.f32 %v10249_v54, %v10248_v39 }
 0x3f7   :  { %v13903_v25 = vadd.f32 %v10873_v1, %v10250_v41  ;;  %v11467_v1 = vld [vmem:[#allocation3 + $0xf4] ss:$12 sps:$4 sm:$0xff]  }
 0x3f8   :  { %v13901_v42 = vpop.f32.mrf.mxu0  ;;  %10979 = vmatmul.mubr.bf16.gmra.mxu0 %v11455_v44 }
 0x3f9   :  { %v10251_v30 = vpop.f32.mrf.mxu1  ;;  %7791 = vmatmul.mubr.bf16.gmra.mxu1 %v11452_v53  ;;  %10982 = vmatprep.mubr.bf16.mxu0 %v11456_v37  ;;  %v11469_v37 = vld [vmem:[#allocation3 + $0x108] ss:$12 sps:$4 sm:$0xff]  }
 0x3fa   :  { %7798 = vmatprep.mubr.bf16.mxu1 %v11459_v16  ;;  %v13905_v2 = vpop.f32.mrf.mxu0 }
 0x3fb   :  { %v10252_v62 = vpop.f32.mrf.mxu1 }
 0x3fc   :  { %v10253_v59 = vadd.f32 %v10252_v62, %v10251_v30  ;;  %v13907_v60 = vpop.f32.mrf.mxu0 }
 0x3fd   :  { %v10254_v21 = vpop.f32.mrf.mxu1 }
 0x3fe   :  { %v13909_v24 = vadd.f32 %v10253_v59, %v6215_v32  ;;  %v13911_v23 = vpop.f32.mrf.mxu0  ;;  %v11477_v59 = vld [vmem:[#allocation3 + $0x124] ss:$12 sps:$4 sm:$0xff]  }
 0x3ff   :  { %v10255_v26 = vpop.f32.mrf.mxu1 }
 0x400   :  { %v10256_v34 = vadd.f32 %v10255_v26, %v10254_v21  ;;  %v13913_v52 = vpop.f32.mrf.mxu0  ;;  %10983 = vmatmul.mubr.bf16.gmra.mxu0 %v11463_v6 }
 0x401   :  { %v10257_v19 = vpop.f32.mrf.mxu1  ;;  %7799 = vmatmul.mubr.bf16.gmra.mxu1 %v11457_v0  ;;  %10986 = vmatprep.mubr.bf16.mxu0 %v11464_v45 }
 0x402   :  { %v13915_v49 = vadd.f32 %v10256_v34, %v6218_v17  ;;  %7806 = vmatprep.mubr.bf16.mxu1 %v11467_v1  ;;  %v13917_v27 = vpop.f32.mrf.mxu0  ;;  %v11471_v17 = vld [vmem:[#allocation3 + $0x10c] ss:$12 sps:$4 sm:$0xff]  }
 0x403   :  { %v10258_v13 = vpop.f32.mrf.mxu1 }
 0x404   :  { %v10259_v61 = vadd.f32 %v10258_v13, %v10257_v19  ;;  %v13919_v32 = vpop.f32.mrf.mxu0 }
 0x405   :  { %v10260_v43 = vpop.f32.mrf.mxu1 }
 0x406   :  { %v13922_v15 = vadd.f32 %v13881_v28, %v10259_v61  ;;  %v13924_v18 = vpop.f32.mrf.mxu0  ;;  %v8064_v28 = vld [vmem:[%s14492_s2 + $0x1] sm:$0x1]  ;;  %v11475_v61 = vld [vmem:[#allocation3 + $0x120] ss:$12 sps:$4 sm:$0xff]  }
 0x407   :  { %v10261_v3 = vpop.f32.mrf.mxu1  ;;  %v8065_v41 = vpack.c.bf16 %v8064_v28, %v8064_v28 }
 0x408   :  { %v10262_v48 = vadd.f32 %v10261_v3, %v10260_v43  ;;  %v13926_v40 = vpop.f32.mrf.mxu0  ;;  %10987 = vmatmul.mubr.bf16.gmra.mxu0 %v11468_v50 }
 0x409   :  { %v10263_v11 = vpop.f32.mrf.mxu1  ;;  %7807 = vmatmul.mubr.bf16.gmra.mxu1 %v11465_v7  ;;  %8137 = vmatprep.mubr.bf16.mxu0 %v13931_v8 }
 0x40a   :  { %v13929_v22 = vadd.f32 %v13885_v55, %v10262_v48  ;;  %7814 = vmatprep.mubr.bf16.mxu1 %v11471_v17  ;;  %v13937_v51 = vpop.f32.mrf.mxu0  ;;  %v11480_v48 = vld [vmem:[#allocation3 + $0x13c] ss:$12 sps:$4 sm:$0xff]  }
 0x40b   :  { %v10264_v39 = vpop.f32.mrf.mxu1 }
 0x40c   :  { %v10265_v53 = vadd.f32 %v10264_v39, %v10263_v11  ;;  %v13939_v54 = vpop.f32.mrf.mxu0 }
 0x40d   :  { %v10266_v44 = vpop.f32.mrf.mxu1 }
 0x40e   :  { %v13942_v55 = vadd.f32 %v10265_v53, %v13893_v14  ;;  %v13944_v16 = vpop.f32.mrf.mxu0 }
 0x40f   :  { %v10267_v30 = vpop.f32.mrf.mxu1 }
 0x410   :  { %v10268_v62 = vadd.f32 %v10267_v30, %v10266_v44  ;;  %v10351_v21 = vpop.f32.mrf.mxu0  ;;  %9537 = vmatmul.mubr.msk.bf16.vlgmr.msra.gmra.mxu0 %vm4295_vm11, %v8065_v41  ;;  %v11478_v30 = vld [vmem:[#allocation3 + $0x138] ss:$12 sps:$4 sm:$0xff]   ;;  %vm11544_vm11 = vmmov 0  }
 0x411   :  { %v10269_v0 = vpop.f32.mrf.mxu1  ;;  %7815 = vmatmul.mubr.bf16.gmra.mxu1 %v11469_v37 }
 0x412   :  { %v13948_v26 = vadd.f32 %v10268_v62, %v13899_v56  ;;  %7822 = vmatprep.mubr.bf16.mxu1 %v11477_v59  ;;  %v10352_v6 = vpop.f32.mrf.mxu0 }
 0x413   :  { %v10270_v34 = vpop.f32.mrf.mxu1  ;;  %v13950_v45 = vadd.f32 %v10352_v6, %v10351_v21 }
 0x414   :  { %v10271_v14 = vadd.f32 %v10270_v34, %v10269_v0  ;;  %v10354_v1 = vpop.f32.mrf.mxu0 }
 0x415   :  { %v10272_v19 = vpop.f32.mrf.mxu1 }
 0x416   :  { %v13953_v13 = vadd.f32 %v13889_v36, %v10271_v14  ;;  %v10355_v43 = vpop.f32.mrf.mxu0 }
 0x417   :  { %v10273_v50 = vpop.f32.mrf.mxu1  ;;  %v13955_v7 = vadd.f32 %v10355_v43, %v10354_v1 }
 0x418   :  { %v10274_v3 = vadd.f32 %v10273_v50, %v10272_v19  ;;  %v10357_v56 = vpop.f32.mrf.mxu0 }
 0x419   :  { %v10275_v17 = vpop.f32.mrf.mxu1  ;;  %7823 = vmatmul.mubr.bf16.gmra.mxu1 %v11475_v61 }
 0x41a   :  { %v13958_v11 = vadd.f32 %v13895_v35, %v10274_v3  ;;  %7830 = vmatprep.mubr.bf16.mxu1 %v11480_v48  ;;  %v10358_v28 = vpop.f32.mrf.mxu0  ;;  %v11483_v35 = vld [vmem:[#allocation3 + $0x154] ss:$12 sps:$4 sm:$0xff]   ;;  %v11481_v3 = vld [vmem:[#allocation3 + $0x150] ss:$12 sps:$4 sm:$0xff]  }
 0x41b   :  { %v10276_v39 = vpop.f32.mrf.mxu1  ;;  %v13960_v53 = vadd.f32 %v10358_v28, %v10357_v56 }
 0x41c   :  { %v10277_v36 = vadd.f32 %v10276_v39, %v10275_v17  ;;  %v10360_v44 = vpop.f32.mrf.mxu0  ;;  %v11486_v39 = vld [vmem:[#allocation3 + $0x16c] ss:$12 sps:$4 sm:$0xff]  }
 0x41d   :  { %v10278_v41 = vpop.f32.mrf.mxu1 }
 0x41e   :  { %v13963_v37 = vadd.f32 %v10277_v36, %v13905_v2  ;;  %v10361_v62 = vpop.f32.mrf.mxu0 }
 0x41f   :  { %v10279_v59 = vpop.f32.mrf.mxu1  ;;  %v13965_v21 = vadd.f32 %v10361_v62, %v10360_v44 }
 0x420   :  { %v13967_v0 = vadd.f32 %v10279_v59, %v10278_v41  ;;  %v10363_v6 = vpop.f32.mrf.mxu0 }
 0x421   :  { %v10281_v34 = vpop.f32.mrf.mxu1  ;;  %7831 = vmatmul.mubr.bf16.gmra.mxu1 %v11478_v30 }
 0x422   :  { %7838 = vmatprep.mubr.bf16.mxu1 %v11483_v35  ;;  %v10364_v14 = vpop.f32.mrf.mxu0  ;;  %v11487_v35 = vld [vmem:[%s14499_s9 + $0x38] sm:$0xff]  }
 0x423   :  { %v10282_v1 = vpop.f32.mrf.mxu1  ;;  %v13969_v19 = vadd.f32 %v10364_v14, %v10363_v6  ;;  %10991 = vmatpush3.bf16.msra.mxu1 %v11487_v35 }
 0x424   :  { %v10283_v61 = vadd.f32 %v10282_v1, %v10281_v34  ;;  %v10366_v43 = vpop.f32.mrf.mxu0  ;;  %v11484_v1 = vld [vmem:[#allocation3 + $0x168] ss:$12 sps:$4 sm:$0xff]   ;;  %10992 = vmatprep.subr.bf16.mxu1 %v13840_v38 }
 0x425   :  { %v10284_v2 = vpop.f32.mrf.mxu1 }
 0x426   :  { %v13972_v50 = vadd.f32 %v13901_v42, %v10283_v61  ;;  %v10367_v48 = vpop.f32.mrf.mxu0 }
 0x427   :  { %v10285_v56 = vpop.f32.mrf.mxu1  ;;  %v13974_v17 = vadd.f32 %v10367_v48, %v10366_v43 }
 0x428   :  { %v10286_v28 = vadd.f32 %v10285_v56, %v10284_v2  ;;  %v10369_v36 = vpop.f32.mrf.mxu0 }
 0x429   :  { %v10287_v44 = vpop.f32.mrf.mxu1  ;;  %7839 = vmatmul.mubr.bf16.gmra.mxu1 %v11481_v3 }
 0x42a   :  { %v13977_v41 = vadd.f32 %v13907_v60, %v10286_v28  ;;  %7846 = vmatprep.mubr.bf16.mxu1 %v11486_v39  ;;  %v10370_v30 = vpop.f32.mrf.mxu0 }
 0x42b   :  { %v10288_v62 = vpop.f32.mrf.mxu1  ;;  %v13979_v59 = vadd.f32 %v10370_v30, %v10369_v36 }
 0x42c   :  { %v10289_v42 = vadd.f32 %v10288_v62, %v10287_v44  ;;  %v10372_v6 = vpop.f32.mrf.mxu0 }
 0x42d   :  { %v10290_v34 = vpop.f32.mrf.mxu1 }
 0x42e   :  { %v13985_v14 = vadd.f32 %v10289_v42, %v13917_v27  ;;  %v10373_v61 = vpop.f32.mrf.mxu0  ;;  %v9507_v42 = vcombine.high %v13931_v8, %v13931_v8 }
 0x42f   :  { %v10291_v60 = vpop.f32.mrf.mxu1  ;;  %v13988_v43 = vadd.f32 %v10373_v61, %v10372_v6 }
 0x430   :  { %v10292_v2 = vadd.f32 %v10291_v60, %v10290_v34  ;;  %v10375_v3 = vpop.f32.mrf.mxu0 }
 0x431   :  { %v10293_v48 = vpop.f32.mrf.mxu1  ;;  %7847 = vmatmul.mubr.bf16.gmra.mxu1 %v11484_v1 }
 0x432   :  { %v13991_v56 = vadd.f32 %v10292_v2, %v13924_v18  ;;  %7854 = vmatprep.mubr.bf16.mxu1 %v13849_v20  ;;  %v10376_v28 = vpop.f32.mrf.mxu0 }
 0x433   :  { %v10294_v27 = vpop.f32.mrf.mxu1  ;;  %v13994_v39 = vadd.f32 %v10376_v28, %v10375_v3 }
 0x434   :  { %v10295_v36 = vadd.f32 %v10294_v27, %v10293_v48  ;;  %v10378_v44 = vpop.f32.mrf.mxu0  ;;  %v11488_v48 = vld [vmem:[%s14499_s9 + $0x30] sm:$0xff]  }
 0x435   :  { %v10296_v30 = vpop.f32.mrf.mxu1  ;;  %10993 = vmatpush3.bf16.msra.mxu1 %v11488_v48 }
 0x436   :  { %v13997_v62 = vadd.f32 %v13913_v52, %v10295_v36  ;;  %v10379_v35 = vpop.f32.mrf.mxu0  ;;  %v9506_v36 = vcombine.low %v13931_v8, %v13931_v8  ;;  %10994 = vmatprep.subr.bf16.mxu1 %v13840_v38 }
 0x437   :  { %v10297_v6 = vpop.f32.mrf.mxu1  ;;  %v14001_v34 = vadd.f32 %v10379_v35, %v10378_v44 }
 0x438   :  { %v10298_v18 = vadd.f32 %v10297_v6, %v10296_v30  ;;  %v10381_v1 = vpop.f32.mrf.mxu0 }
 0x439   :  { %v10299_v20 = vpop.f32.mrf.mxu1  ;;  %7855 = vmatmul.mubr.bf16.gmra.mxu1 %v13858_v4 }
 0x43a   :  { %v14005_v61 = vadd.f32 %v13919_v32, %v10298_v18  ;;  %7862 = vmatprep.mubr.bf16.mxu1 %v9507_v42  ;;  %v10382_v60 = vpop.f32.mrf.mxu0 }
 0x43b   :  { %v10300_v2 = vpop.f32.mrf.mxu1  ;;  %v14007_v52 = vadd.f32 %v10382_v60, %v10381_v1 }
 0x43c   :  { %v10301_v3 = vadd.f32 %v10300_v2, %v10299_v20  ;;  %v10384_v28 = vpop.f32.mrf.mxu0 }
 0x43d   :  { %v10302_v27 = vpop.f32.mrf.mxu1 }
 0x43e   :  { %v14015_v4 = vadd.f32 %v10301_v3, %v13937_v51  ;;  %v10385_v32 = vpop.f32.mrf.mxu0 }
 0x43f   :  { %v10303_v44 = vpop.f32.mrf.mxu1  ;;  %v14018_v30 = vadd.f32 %v10385_v32, %v10384_v28 }
 0x440   :  { %v10304_v42 = vadd.f32 %v10303_v44, %v10302_v27  ;;  %v10387_v35 = vpop.f32.mrf.mxu0 }
 0x441   :  { %v10305_v6 = vpop.f32.mrf.mxu1  ;;  %7863 = vmatmul.mubr.bf16.gmra.mxu1 %v9506_v36 }
 0x442   :  { %v14021_v18 = vadd.f32 %v10304_v42, %v13944_v16  ;;  %v10388_v1 = vpop.f32.mrf.mxu0  ;;  %v14033_v16 = vld [vmem:[%s14496_s6] ss:$0 sm:$0xff] }
 0x443   :  { %v10306_v20 = vpop.f32.mrf.mxu1  ;;  %v14023_v8 = vadd.f32 %v10388_v1, %v10387_v35  ;;  %v6302_v35 = vadd.f32 %v14033_v16, %v13870_v57 }
 0x444   :  { %v10307_v51 = vadd.f32 %v10306_v20, %v10305_v6  ;;  %v10390_v60 = vpop.f32.mrf.mxu0  ;;  %v6300_v20 = vadd.f32 %v14033_v16, %v13853_v5 }
 0x445   :  { %v10308_v2 = vpop.f32.mrf.mxu1 }
 0x446   :  { %v14026_v3 = vadd.f32 %v13926_v40, %v10307_v51  ;;  %v10391_v48 = vpop.f32.mrf.mxu0 }
 0x447   :  { %v10309_v28 = vpop.f32.mrf.mxu1  ;;  %v14028_v32 = vadd.f32 %v10391_v48, %v10390_v60 }
 0x448   :  { %v10310_v27 = vadd.f32 %v10309_v28, %v10308_v2  ;;  %v10393_v36 = vpop.f32.mrf.mxu0 }
 0x449   :  { %v10912_v44 = vpop.f32.mrf.mxu1 }
 0x44a   :  { %v14036_v42 = vadd.f32 %v13939_v54, %v10310_v27  ;;  %v7048_v40 = vadd.f32 %v10912_v44, %v13960_v53  ;;  %v10394_v6 = vpop.f32.mrf.mxu0  ;;  %v11489_v54 = vld [vmem:[%s14499_s9 + $0x28] sm:$0xff]   ;;  %v6303_v53 = vadd.f32 %v14033_v16, %v13873_v29  ;;  %v6306_v29 = vadd.f32 %v14033_v16, %v13879_v47 }
 0x44b   :  { %v7039_v1 = vpop.f32.mrf.mxu1  ;;  %v14043_v51 = vadd.f32 %v10394_v6, %v10393_v36  ;;  %10995 = vmatpush3.bf16.msra.mxu1 %v11489_v54  ;;  %v6307_v47 = vadd.f32 %v14033_v16, %v13883_v58  ;;  %v6310_v58 = vadd.f32 %v14033_v16, %v13897_v31 }
 0x44c   :  { %v14045_v60 = vadd.f32 %v7048_v40, %v6302_v35  ;;  %v7040_v2 = vadd.f32 %v13950_v45, %v7039_v1  ;;  %v10396_v48 = vpop.f32.mrf.mxu0  ;;  %10996 = vmatprep.subr.bf16.mxu1 %v13840_v38  ;;  %v6301_v45 = vadd.f32 %v14033_v16, %v13856_v63  ;;  %v6304_v63 = vadd.f32 %v14033_v16, %v13875_v10 }
 0x44d   :  { %v10913_v28 = vpop.f32.mrf.mxu1  ;;  %v6305_v10 = vadd.f32 %v14033_v16, %v13877_v12 }
 0x44e   :  { %v14051_v57 = vadd.f32 %v7040_v2, %v6300_v20  ;;  %v7051_v27 = vadd.f32 %v10913_v28, %v13965_v21  ;;  %v10397_v5 = vpop.f32.mrf.mxu0 }
 0x44f   :  { %v7042_v36 = vpop.f32.mrf.mxu1  ;;  %v10398_v44 = vadd.f32 %v10397_v5, %v10396_v48 }
 0x450   :  { %v14059_v35 = vadd.f32 %v7051_v27, %v6303_v53  ;;  %v7043_v40 = vadd.f32 %v13955_v7, %v7042_v36  ;;  %v10399_v6 = vpop.f32.mrf.mxu0 }
 0x451   :  { %v10916_v1 = vpop.f32.mrf.mxu1 }
 0x452   :  { %v14062_v20 = vadd.f32 %v7043_v40, %v6301_v45  ;;  %v7064_v21 = vadd.f32 %v10916_v1, %v13979_v59  ;;  %v10400_v2 = vpop.f32.mrf.mxu0 }
 0x453   :  { %v7055_v54 = vpop.f32.mrf.mxu1  ;;  %v14067_v28 = vadd.f32 %v10400_v2, %v10399_v6 }
 0x454   :  { %v14069_v33 = vadd.f32 %v7064_v21, %v6306_v29  ;;  %v7056_v7 = vadd.f32 %v13969_v19, %v7055_v54  ;;  %v10402_v48 = vpop.f32.mrf.mxu0 }
 0x455   :  { %v10917_v53 = vpop.f32.mrf.mxu1 }
 0x456   :  { %v14074_v27 = vadd.f32 %v7056_v7, %v6304_v63  ;;  %v7067_v59 = vadd.f32 %v10917_v53, %v13988_v43  ;;  %v10403_v5 = vpop.f32.mrf.mxu0  ;;  %v6308_v7 = vadd.f32 %v14033_v16, %v13887_v46 }
 0x457   :  { %v7058_v36 = vpop.f32.mrf.mxu1  ;;  %v14079_v45 = vadd.f32 %v10403_v5, %v10402_v48 }
 0x458   :  { %v14081_v40 = vadd.f32 %v7067_v59, %v6307_v47  ;;  %v7059_v19 = vadd.f32 %v13974_v17, %v7058_v36  ;;  %v10405_v6 = vpop.f32.mrf.mxu0  ;;  %v6311_v47 = vadd.f32 %v14033_v16, %v13903_v25 }
 0x459   :  { %v10920_v1 = vpop.f32.mrf.mxu1 }
 0x45a   :  { %v14086_v29 = vadd.f32 %v7059_v19, %v6305_v10  ;;  %v7080_v43 = vadd.f32 %v10920_v1, %v14007_v52  ;;  %v10406_v21 = vpop.f32.mrf.mxu0  ;;  %v6309_v10 = vadd.f32 %v14033_v16, %v13891_v9  ;;  %v6314_v1 = vadd.f32 %v14033_v16, %v13922_v15 }
 0x45b   :  { %v7071_v2 = vpop.f32.mrf.mxu1  ;;  %v10407_v54 = vadd.f32 %v10406_v21, %v10405_v6 }
 0x45c   :  { %v14091_v63 = vadd.f32 %v7080_v43, %v6310_v58  ;;  %v7072_v12 = vadd.f32 %v13994_v39, %v7071_v2  ;;  %v10408_v17 = vpop.f32.mrf.mxu0  ;;  %v6312_v2 = vadd.f32 %v14033_v16, %v13909_v24 }
 0x45d   :  { %v10921_v48 = vpop.f32.mrf.mxu1 }
 0x45e   :  { %v14096_v53 = vadd.f32 %v7072_v12, %v6308_v7  ;;  %v7083_v31 = vadd.f32 %v10921_v48, %v14018_v30  ;;  %v10409_v52 = vpop.f32.mrf.mxu0 }
 0x45f   :  { %v7074_v59 = vpop.f32.mrf.mxu1  ;;  %v10410_v5 = vadd.f32 %v10409_v52, %v10408_v17  ;;  %v6315_v17 = vadd.f32 %v14033_v16, %v13929_v22  ;;  %v6313_v52 = vadd.f32 %v14033_v16, %v13915_v49 }
 0x460   :  { %v14101_v36 = vadd.f32 %v7083_v31, %v6311_v47  ;;  %v7075_v46 = vadd.f32 %v14001_v34, %v7074_v59  ;;  %v10411_v39 = vpop.f32.mrf.mxu0 }
 0x461   :  { %v10924_v19 = vpop.f32.mrf.mxu1 }
 0x462   :  { %v14106_v6 = vadd.f32 %v7075_v46, %v6309_v10  ;;  %v7096_v25 = vadd.f32 %v10924_v19, %v14043_v51  ;;  %v10412_v30 = vpop.f32.mrf.mxu0  ;;  %v6318_v46 = vadd.f32 %v14033_v16, %v13953_v13 }
 0x463   :  { %v7087_v58 = vpop.f32.mrf.mxu1  ;;  %v10413_v43 = vadd.f32 %v10412_v30, %v10411_v39 }
 0x464   :  { %v14111_v21 = vadd.f32 %v7096_v25, %v6314_v1  ;;  %v7088_v9 = vadd.f32 %v14023_v8, %v7087_v58  ;;  %v10414_v34 = vpop.f32.mrf.mxu0  ;;  %v6316_v25 = vadd.f32 %v14033_v16, %v13942_v55 }
 0x465   :  { %v10925_v7 = vpop.f32.mrf.mxu1 }
 0x466   :  { %v14116_v12 = vadd.f32 %v7088_v9, %v6312_v2  ;;  %v7099_v15 = vadd.f32 %v10925_v7, %v10398_v44  ;;  %v10415_v48 = vpop.f32.mrf.mxu0  ;;  %v6319_v2 = vadd.f32 %v14033_v16, %v13958_v11  ;;  %v6322_v11 = vadd.f32 %v14033_v16, %v13972_v50 }
 0x467   :  { %v7090_v51 = vpop.f32.mrf.mxu1  ;;  %v10416_v47 = vadd.f32 %v10415_v48, %v10414_v34  ;;  %v11490_v48 = vld [vmem:[%s14499_s9 + $0x20] sm:$0xff]   ;;  %v6323_v50 = vadd.f32 %v14033_v16, %v13977_v41 }
 0x468   :  { %v14120_v31 = vadd.f32 %v7099_v15, %v6315_v17  ;;  %v7091_v24 = vadd.f32 %v14028_v32, %v7090_v51  ;;  %v10417_v59 = vpop.f32.mrf.mxu0  ;;  %v6317_v17 = vadd.f32 %v14033_v16, %v13948_v26  ;;  %10997 = vmatpush3.bf16.msra.mxu1 %v11490_v48  ;;  %v6251_v26 = vadd.f32 %v13967_v0, %v13911_v23  ;;  %v11491_v23 = vld [vmem:[%s14499_s9 + $0x18] sm:$0xff]  }
 0x469   :  { %v10928_v8 = vpop.f32.mrf.mxu1  ;;  %10998 = vmatprep.subr.bf16.mxu1 %v13840_v38 }
 0x46a   :  { %v14125_v10 = vadd.f32 %v7091_v24, %v6313_v52  ;;  %v7112_v39 = vadd.f32 %v10928_v8, %v10407_v54  ;;  %v10418_v22 = vpop.f32.mrf.mxu0  ;;  %v6320_v24 = vadd.f32 %v14033_v16, %v13963_v37 }
 0x46b   :  { %v7103_v44 = vpop.f32.mrf.mxu1  ;;  %v10419_v19 = vadd.f32 %v10418_v22, %v10417_v59 }
 0x46c   :  { %v14129_v1 = vadd.f32 %v7112_v39, %v6318_v46  ;;  %v7104_v49 = vadd.f32 %v14067_v28, %v7103_v44  ;;  %v10420_v30 = vpop.f32.mrf.mxu0  ;;  %10999 = vmatpush3.bf16.msra.mxu1 %v11491_v23 }
 0x46d   :  { %v10929_v32 = vpop.f32.mrf.mxu1  ;;  %11000 = vmatprep.subr.bf16.mxu1 %v13840_v38 }
 0x46e   :  { %v14134_v58 = vadd.f32 %v7104_v49, %v6316_v25  ;;  %v7115_v9 = vadd.f32 %v10929_v32, %v10410_v5  ;;  %v10421_v13 = vpop.f32.mrf.mxu0 }
 0x46f   :  { %v7106_v54 = vpop.f32.mrf.mxu1  ;;  %v10422_v34 = vadd.f32 %v10421_v13, %v10420_v30 }
 0x470   :  { %v14138_v7 = vadd.f32 %v7115_v9, %v6319_v2  ;;  %v7107_v55 = vadd.f32 %v14079_v45, %v7106_v54  ;;  %v10423_v15 = vpop.f32.mrf.mxu0 }
 0x471   :  { %v10932_v28 = vpop.f32.mrf.mxu1 }
 0x472   :  { %v14146_v51 = vadd.f32 %v7107_v55, %v6317_v17  ;;  %v7128_v5 = vadd.f32 %v10932_v28, %v10419_v19  ;;  %v10424_v52 = vpop.f32.mrf.mxu0  ;;  %v6326_v28 = vadd.f32 %v14033_v16, %v13997_v62 }
 0x473   :  { %v7119_v59 = vpop.f32.mrf.mxu1  ;;  %v10425_v45 = vadd.f32 %v10424_v52, %v10423_v15 }
 0x474   :  { %v14154_v8 = vadd.f32 %v7128_v5, %v6322_v11  ;;  %v7120_v46 = vadd.f32 %v10413_v43, %v7119_v59  ;;  %v10426_v39 = vpop.f32.mrf.mxu0  ;;  %v6321_v43 = vadd.f32 %v14033_v16, %v6251_v26  ;;  %v6325_v59 = vadd.f32 %v14033_v16, %v13991_v56 }
 0x475   :  { %v10933_v22 = vpop.f32.mrf.mxu1 }
 0x476   :  { %v14157_v44 = vadd.f32 %v7120_v46, %v6320_v24  ;;  %v7131_v19 = vadd.f32 %v10933_v22, %v10422_v34  ;;  %v10427_v37 = vpop.f32.mrf.mxu0  ;;  %v6324_v34 = vadd.f32 %v14033_v16, %v13985_v14 }
 0x477   :  { %v7122_v25 = vpop.f32.mrf.mxu1  ;;  %v10428_v0 = vadd.f32 %v10427_v37, %v10426_v39 }
 0x478   :  { %v14164_v49 = vadd.f32 %v7131_v19, %v6323_v50  ;;  %v7123_v30 = vadd.f32 %v10416_v47, %v7122_v25  ;;  %v10429_v32 = vpop.f32.mrf.mxu0  ;;  %v11492_v25 = vld [vmem:[%s14499_s9 + $0x10] sm:$0xff]  }
 0x479   :  { %v10936_v2 = vpop.f32.mrf.mxu1  ;;  %11001 = vmatpush3.bf16.msra.mxu1 %v11492_v25 }
 0x47a   :  { %v14167_v9 = vadd.f32 %v7123_v30, %v6321_v43  ;;  %v10430_v41 = vpop.f32.mrf.mxu0  ;;  %11002 = vmatprep.subr.bf16.mxu1 %v13840_v38  ;;  %v6330_v38 = vadd.f32 %v14033_v16, %v14026_v3 }
 0x47b   :  { %v7135_v13 = vpop.f32.mrf.mxu1  ;;  %v10431_v54 = vadd.f32 %v10430_v41, %v10429_v32 }
 0x47c   :  { %v7136_v17 = vadd.f32 %v10425_v45, %v7135_v13  ;;  %v10432_v55 = vpop.f32.mrf.mxu0  ;;  %v6327_v45 = vadd.f32 %v14033_v16, %v14005_v61 }
 0x47d   :  { %v10937_v15 = vpop.f32.mrf.mxu1  ;;  %v7144_v47 = vadd.f32 %v10936_v2, %v10431_v54  ;;  %v6329_v54 = vadd.f32 %v14033_v16, %v14021_v18 }
 0x47e   :  { %v14174_v48 = vadd.f32 %v7136_v17, %v6324_v34  ;;  %v10433_v11 = vpop.f32.mrf.mxu0 }
 0x47f   :  { %v7138_v5 = vpop.f32.mrf.mxu1  ;;  %v14176_v52 = vadd.f32 %v7144_v47, %v6326_v28  ;;  %v10434_v24 = vadd.f32 %v10433_v11, %v10432_v55 }
 0x480   :  { %v7139_v26 = vadd.f32 %v10428_v0, %v7138_v5  ;;  %v10435_v46 = vpop.f32.mrf.mxu0  ;;  %v6328_v0 = vadd.f32 %v14033_v16, %v14015_v4 }
 0x481   :  { %v10940_v14 = vpop.f32.mrf.mxu1  ;;  %v7147_v39 = vadd.f32 %v10937_v15, %v10434_v24 }
 0x482   :  { %v14182_v22 = vadd.f32 %v7139_v26, %v6325_v59  ;;  %v10436_v62 = vpop.f32.mrf.mxu0 }
 0x483   :  { %v7151_v50 = vpop.f32.mrf.mxu1  ;;  %v14184_v19 = vadd.f32 %v7147_v39, %v6327_v45  ;;  %v10437_v37 = vadd.f32 %v10436_v62, %v10435_v46  ;;  %v6331_v62 = vadd.f32 %v14033_v16, %v14036_v42 }
 0x484   :  { %v10438_v23 = vpop.f32.mrf.mxu0 }
 0x485   :  { %v10941_v56 = vpop.f32.mrf.mxu1  ;;  %v7152_v43 = vadd.f32 %v10437_v37, %v7151_v50 }
 0x486   :  { %v10439_v61 = vpop.f32.mrf.mxu0 }
 0x487   :  { %v7154_v30 = vpop.f32.mrf.mxu1  ;;  %v14192_v32 = vadd.f32 %v7152_v43, %v6328_v0  ;;  %v10440_v2 = vadd.f32 %v10439_v61, %v10438_v23 }
 0x488   :  { %v10441_v41 = vpop.f32.mrf.mxu0 }
 0x489   :  { %14767 = vst [vmem:[#allocation49_spill] sm:$0xff] %v14192_v32  ;;  %v10487_v13 = vpop.f32.mrf.mxu1  ;;  %v7155_v34 = vadd.f32 %v10440_v2, %v7154_v30 }
 0x48a   :  { %v10442_v17 = vpop.f32.mrf.mxu0 }
 0x48b   :  { %v10488_v55 = vpop.f32.mrf.mxu1  ;;  %v14196_v15 = vadd.f32 %v7155_v34, %v6329_v54  ;;  %v10443_v4 = vadd.f32 %v10442_v17, %v10441_v41 }
 0x48c   :  { %v10489_v28 = vadd.f32 %v10488_v55, %v10487_v13  ;;  %v10444_v47 = vpop.f32.mrf.mxu0 }
 0x48d   :  { %14768 = vst [vmem:[#allocation45_spill] sm:$0xff] %v14196_v15  ;;  %v10490_v11 = vpop.f32.mrf.mxu1  ;;  %v7160_v5 = vadd.f32 %v10940_v14, %v10443_v4 }
 0x48e   :  { %v10445_v24 = vpop.f32.mrf.mxu0 }
 0x48f   :  { %v10491_v59 = vpop.f32.mrf.mxu1  ;;  %v14200_v26 = vadd.f32 %v7160_v5, %v6330_v38  ;;  %v10446_v46 = vadd.f32 %v10445_v24, %v10444_v47 }
 0x490   :  { %v10492_v45 = vadd.f32 %v10491_v59, %v10490_v11  ;;  %v10960_v18 = vpop.f32.mrf.mxu0 }
 0x491   :  { %14769 = vst [vmem:[#allocation47_spill] sm:$0xff] %v14200_v26  ;;  %v10493_v39 = vpop.f32.mrf.mxu1  ;;  %v7163_v50 = vadd.f32 %v10941_v56, %v10446_v46  ;;  %v14777_v26 = vld [vmem:[#allocation7_spill] sm:$0xff] }
 0x492   :  { %v7905_v37 = vpop.f32.mrf.mxu0 }
 0x493   :  { %v10494_v25 = vpop.f32.mrf.mxu1  ;;  %v14204_v23 = vadd.f32 %v7163_v50, %v6331_v62  ;;  %v7906_v0 = vadd.f32 %v10489_v28, %v7905_v37  ;;  %v11493_v50 = vld [vmem:[%s14499_s9 + $0x8] sm:$0xff]  }
 0x494   :  { %v10495_v43 = vadd.f32 %v10494_v25, %v10493_v39  ;;  %v10961_v3 = vpop.f32.mrf.mxu0  ;;  %11003 = vmatpush3.bf16.msra.mxu1 %v11493_v50 }
 0x495   :  { %14770 = vst [vmem:[#allocation43_spill] sm:$0xff] %v14204_v23  ;;  %v10496_v14 = vpop.f32.mrf.mxu1  ;;  %v14207_v61 = vadd.f32 %v7906_v0, %v14051_v57  ;;  %v14227_v0 = vld [vmem:[#allocation2] sm:$0xff] }
 0x496   :  { %v7914_v30 = vadd.f32 %v10960_v18, %v10495_v43  ;;  %v7908_v2 = vpop.f32.mrf.mxu0  ;;  %14771 = vst [vmem:[#allocation48_spill] sm:$0xff] %v14227_v0  ;;  %11006 = vmatprep.mubr.msk.bf16.mxu1 %vm11544_vm11, %v14227_v0  ;;  %11026 = vmatprep.mubr.msk.bf16.mxu0 %vm11544_vm11, %v14227_v0 }
 0x497   :  { %v10497_v41 = vpop.f32.mrf.mxu1  ;;  %v7909_v54 = vadd.f32 %v10492_v45, %v7908_v2  ;;  %11004 = vmatprep.subr.bf16.mxu1 %v14227_v0 }
 0x498   :  { %v14210_v13 = vadd.f32 %v7914_v30, %v14045_v60  ;;  %v10498_v16 = vadd.f32 %v10497_v41, %v10496_v14  ;;  %v10964_v42 = vpop.f32.mrf.mxu0 }
 0x499   :  { %v10499_v56 = vpop.f32.mrf.mxu1  ;;  %v14213_v34 = vadd.f32 %v7909_v54, %v14062_v20  ;;  %v11495_v54 = vld [vmem:[%s14501_s11 + $0x38] sm:$0xff]  }
 0x49a   :  { %v7917_v17 = vadd.f32 %v10961_v3, %v10498_v16  ;;  %v7921_v55 = vpop.f32.mrf.mxu0  ;;  %11011 = vmatpush3.bf16.msra.mxu0 %v11495_v54 }
 0x49b   :  { %v10500_v4 = vpop.f32.mrf.mxu1  ;;  %11012 = vmatprep.subr.bf16.mxu0 %v14227_v0 }
 0x49c   :  { %v14216_v28 = vadd.f32 %v7917_v17, %v14059_v35  ;;  %v10501_v57 = vadd.f32 %v10500_v4, %v10499_v56  ;;  %v10965_v47 = vpop.f32.mrf.mxu0  ;;  %v11496_v17 = vld [vmem:[%s14501_s11 + $0x30] sm:$0xff]  }
 0x49d   :  { %v10502_v11 = vpop.f32.mrf.mxu1 }
 0x49e   :  { %v7922_v38 = vadd.f32 %v10501_v57, %v7921_v55  ;;  %v7924_v5 = vpop.f32.mrf.mxu0  ;;  %11013 = vmatpush3.bf16.msra.mxu0 %v11496_v17 }
 0x49f   :  { %v10503_v60 = vpop.f32.mrf.mxu1  ;;  %11014 = vmatprep.subr.bf16.mxu0 %v14227_v0 }
 0x4a0   :  { %v14219_v24 = vadd.f32 %v7922_v38, %v14074_v27  ;;  %v10504_v59 = vadd.f32 %v10503_v60, %v10502_v11  ;;  %v10968_v46 = vpop.f32.mrf.mxu0 }
 0x4a1   :  { %v10505_v45 = vpop.f32.mrf.mxu1 }
 0x4a2   :  { %v7925_v20 = vadd.f32 %v10504_v59, %v7924_v5  ;;  %v7937_v18 = vpop.f32.mrf.mxu0  ;;  %v11497_v5 = vld [vmem:[%s14501_s11 + $0x28] sm:$0xff]  }
 0x4a3   :  { %v10506_v39 = vpop.f32.mrf.mxu1  ;;  %11015 = vmatpush3.bf16.msra.mxu0 %v11497_v5 }
 0x4a4   :  { %v14222_v62 = vadd.f32 %v7925_v20, %v14086_v29  ;;  %v10507_v35 = vadd.f32 %v10506_v39, %v10505_v45  ;;  %v10969_v37 = vpop.f32.mrf.mxu0  ;;  %v11494_v29 = vld [vmem:[%s14499_s9] sm:$0xff]   ;;  %11016 = vmatprep.subr.bf16.mxu0 %v14227_v0 }
 0x4a5   :  { %v10508_v25 = vpop.f32.mrf.mxu1  ;;  %11005 = vmatpush3.bf16.msra.mxu1 %v11494_v29 }
 0x4a6   :  { %v7930_v27 = vadd.f32 %v10964_v42, %v10507_v35  ;;  %v7940_v43 = vpop.f32.mrf.mxu0  ;;  %11030 = vmatprep.subr.bf16.mxu1 %v14227_v0 }
 0x4a7   :  { %v10509_v3 = vpop.f32.mrf.mxu1 }
 0x4a8   :  { %v14238_v14 = vadd.f32 %v7930_v27, %v14069_v33  ;;  %v10510_v30 = vadd.f32 %v10509_v3, %v10508_v25  ;;  %v14240_v2 = vpop.f32.mrf.mxu0 }
 0x4a9   :  { %v10511_v41 = vpop.f32.mrf.mxu1 }
 0x4aa   :  { %v7933_v16 = vadd.f32 %v10965_v47, %v10510_v30  ;;  %v7953_v42 = vpop.f32.mrf.mxu0 }
 0x4ab   :  { %v10512_v56 = vpop.f32.mrf.mxu1 }
 0x4ac   :  { %v14250_v33 = vadd.f32 %v7933_v16, %v14081_v40  ;;  %v10513_v55 = vadd.f32 %v10512_v56, %v10511_v41  ;;  %v14253_v4 = vpop.f32.mrf.mxu0 }
 0x4ad   :  { %v10514_v57 = vpop.f32.mrf.mxu1 }
 0x4ae   :  { %v7938_v47 = vadd.f32 %v10513_v55, %v7937_v18  ;;  %v7956_v11 = vpop.f32.mrf.mxu0  ;;  %v11498_v18 = vld [vmem:[%s14501_s11 + $0x20] sm:$0xff]   ;;  %v11500_v55 = vld [vmem:[%s14501_s11 + $0x10] sm:$0xff]  }
 0x4af   :  { %v10515_v38 = vpop.f32.mrf.mxu1  ;;  %11017 = vmatpush3.bf16.msra.mxu0 %v11498_v18 }
 0x4b0   :  { %v14259_v60 = vadd.f32 %v7938_v47, %v14096_v53  ;;  %v10516_v59 = vadd.f32 %v10515_v38, %v10514_v57  ;;  %v14262_v40 = vpop.f32.mrf.mxu0  ;;  %11018 = vmatprep.subr.bf16.mxu0 %v14227_v0 }
 0x4b1   :  { %v10517_v45 = vpop.f32.mrf.mxu1 }
 0x4b2   :  { %v7941_v20 = vadd.f32 %v10516_v59, %v7940_v43  ;;  %v7969_v39 = vpop.f32.mrf.mxu0  ;;  %v11499_v43 = vld [vmem:[%s14501_s11 + $0x18] sm:$0xff]  }
 0x4b3   :  { %v10518_v35 = vpop.f32.mrf.mxu1  ;;  %11019 = vmatpush3.bf16.msra.mxu0 %v11499_v43 }
 0x4b4   :  { %v14268_v50 = vadd.f32 %v7941_v20, %v14106_v6  ;;  %v10519_v25 = vadd.f32 %v10518_v35, %v10517_v45  ;;  %v14271_v53 = vpop.f32.mrf.mxu0  ;;  %11020 = vmatprep.subr.bf16.mxu0 %v14227_v0 }
 0x4b5   :  { %v10520_v27 = vpop.f32.mrf.mxu1 }
 0x4b6   :  { %v7946_v29 = vadd.f32 %v10968_v46, %v10519_v25  ;;  %v7972_v3 = vpop.f32.mrf.mxu0 }
 0x4b7   :  { %v10521_v30 = vpop.f32.mrf.mxu1  ;;  %11021 = vmatpush3.bf16.msra.mxu0 %v11500_v55 }
 0x4b8   :  { %v14277_v41 = vadd.f32 %v7946_v29, %v14091_v63  ;;  %v10522_v54 = vadd.f32 %v10521_v30, %v10520_v27  ;;  %v14280_v6 = vpop.f32.mrf.mxu0  ;;  %11022 = vmatprep.subr.bf16.mxu0 %v14227_v0 }
 0x4b9   :  { %v10523_v16 = vpop.f32.mrf.mxu1 }
 0x4ba   :  { %v7949_v56 = vadd.f32 %v10969_v37, %v10522_v54  ;;  %v14282_v17 = vpop.f32.mrf.mxu0 }
 0x4bb   :  { %v10524_v46 = vpop.f32.mrf.mxu1 }
 0x4bc   :  { %v14288_v57 = vadd.f32 %v7949_v56, %v14101_v36  ;;  %v10525_v63 = vadd.f32 %v10524_v46, %v10523_v16  ;;  %v14291_v47 = vpop.f32.mrf.mxu0 }
 0x4bd   :  { %v10526_v38 = vpop.f32.mrf.mxu1 }
 0x4be   :  { %v7954_v5 = vadd.f32 %v10525_v63, %v7953_v42  ;;  %v14293_v59 = vpop.f32.mrf.mxu0 }
 0x4bf   :  { %v10527_v37 = vpop.f32.mrf.mxu1 }
 0x4c0   :  { %v8044_v45 = vadd.f32 %v7954_v5, %v14116_v12  ;;  %v10528_v20 = vadd.f32 %v10527_v37, %v10526_v38  ;;  %v14297_v35 = vpop.f32.mrf.mxu0  ;;  %v8070_v5 = vld [vmem:[%s14498_s8] sm:$0x3] }
 0x4c1   :  { %v10529_v36 = vpop.f32.mrf.mxu1 }
 0x4c2   :  { %v7957_v18 = vadd.f32 %v10528_v20, %v7956_v11  ;;  %v14299_v25 = vpop.f32.mrf.mxu0 }
 0x4c3   :  { %v10530_v27 = vpop.f32.mrf.mxu1 }
 0x4c4   :  { %v8045_v29 = vadd.f32 %v7957_v18, %v14125_v10  ;;  %v10531_v30 = vadd.f32 %v10530_v27, %v10529_v36  ;;  %v14302_v42 = vpop.f32.mrf.mxu0  ;;  %v14775_v18 = vld [vmem:[#allocation51_spill] sm:$0xff] }
 0x4c5   :  { %v10532_v43 = vpop.f32.mrf.mxu1  ;;  %v8095_v27 = vrot.slane %v8070_v5, %v14775_v18 }
 0x4c6   :  { %v7962_v54 = vadd.f32 %v14240_v2, %v10531_v30  ;;  %v14305_v16 = vpop.f32.mrf.mxu0 }
 0x4c7   :  { %v10533_v12 = vpop.f32.mrf.mxu1 }
 0x4c8   :  { %v8046_v56 = vadd.f32 %v7962_v54, %v14111_v21  ;;  %v10534_v46 = vadd.f32 %v10533_v12, %v10532_v43  ;;  %v14308_v55 = vpop.f32.mrf.mxu0 }
 0x4c9   :  { %14772 = vst [vmem:[#allocation9_spill] sm:$0xff] %v14308_v55  ;;  %v10535_v11 = vpop.f32.mrf.mxu1  ;;  %v14778_v55 = vsub.s32 1, %v14777_v26 }
 0x4ca   :  { %v7965_v63 = vadd.f32 %v14253_v4, %v10534_v46  ;;  %v14311_v38 = vpop.f32.mrf.mxu0 }
 0x4cb   :  { %14773 = vst [vmem:[#allocation44_spill] sm:$0xff] %v14311_v38  ;;  %v10536_v10 = vpop.f32.mrf.mxu1 }
 0x4cc   :  { %v8047_v2 = vadd.f32 %v7965_v63, %v14120_v31  ;;  %v10537_v37 = vadd.f32 %v10536_v10, %v10535_v11  ;;  %v14317_v20 = vpop.f32.mrf.mxu0  ;;  %v8099_v31 = vrot.slane %v8070_v5, %v14778_v55 }
 0x4cd   :  { %14774 = vst [vmem:[#allocation10_spill] sm:$0xff] %v14317_v20  ;;  %v10538_v36 = vpop.f32.mrf.mxu1 }
 0x4ce   :  { %v7970_v21 = vadd.f32 %v10537_v37, %v7969_v39  ;;  %v14320_v30 = vpop.f32.mrf.mxu0 }
 0x4cf   :  { %14776 = vst [vmem:[#allocation52_spill] sm:$0xff] %v14320_v30  ;;  %v10539_v43 = vpop.f32.mrf.mxu1 }
 0x4d0   :  { %v8048_v4 = vadd.f32 %v7970_v21, %v14134_v58  ;;  %v10540_v54 = vadd.f32 %v10539_v43, %v10538_v36  ;;  %v8139_v12 = vpop.f32.mrf.mxu0 }
 0x4d1   :  { %v10541_v46 = vpop.f32.mrf.mxu1  ;;  %v8140_v23 = vadd.f32 %v8139_v12, %v8095_v27 }
 0x4d2   :  { %v7973_v0 = vadd.f32 %v10540_v54, %v7972_v3  ;;  %v8141_v11 = vpop.f32.mrf.mxu0 }
 0x4d3   :  { %v10542_v63 = vpop.f32.mrf.mxu1  ;;  %v14327_v39 = vrot.slane %v8140_v23, %v14775_v18  ;;  %v8142_v36 = vadd.f32 %v8141_v11, %v8099_v31 }
 0x4d4   :  { %v8049_v10 = vadd.f32 %v7973_v0, %v14146_v51  ;;  %v8143_v20 = vpop.f32.mrf.mxu0  ;;  %v10543_v21 = vadd.f32 %v10542_v63, %v10541_v46 }
 0x4d5   :  { %v10544_v37 = vpop.f32.mrf.mxu1  ;;  %v8150_v58 = vmul.f32 %v14327_v39, %v14207_v61  ;;  %v8151_v3 = vmul.f32 %v14327_v39, %v14213_v34  ;;  %v8152_v26 = vmul.f32 %v14327_v39, %v14210_v13  ;;  %v8153_v55 = vmul.f32 %v14327_v39, %v14216_v28 }
 0x4d6   :  { %v8154_v51 = vmul.f32 %v14327_v39, %v14219_v24  ;;  %v8144_v0 = vpop.f32.mrf.mxu0  ;;  %v8155_v5 = vmul.f32 %v14327_v39, %v14222_v62  ;;  %v8156_v61 = vmul.f32 %v14327_v39, %v14238_v14  ;;  %v8157_v34 = vmul.f32 %v14327_v39, %v14250_v33 }
 0x4d7   :  { %v10545_v23 = vpop.f32.mrf.mxu1  ;;  %v8158_v13 = vmul.f32 %v14327_v39, %v14259_v60  ;;  %v8159_v28 = vmul.f32 %v14327_v39, %v14268_v50  ;;  %v8160_v24 = vmul.f32 %v14327_v39, %v14277_v41  ;;  %v8161_v20 = vmul.f32 %v14327_v39, %v14288_v57 }
 0x4d8   :  { %v8162_v62 = vmul.f32 %v14327_v39, %v8044_v45  ;;  %v8163_v14 = vmul.f32 %v14327_v39, %v8045_v29  ;;  %v8164_v43 = vmul.f32 %v14327_v39, %v8046_v56  ;;  %v8165_v33 = vmul.f32 %v14327_v39, %v8047_v2 }
 0x4d9   :  { %v10547_v27 = vpop.f32.mrf.mxu1  ;;  %v14358_v60 = vrot.slane %v8142_v36, %v14775_v18  ;;  %v8166_v50 = vmul.f32 %v14327_v39, %v8048_v4  ;;  %v8167_v54 = vmul.f32 %v14327_v39, %v8049_v10  ;;  %v7978_v41 = vadd.f32 %v14262_v40, %v10543_v21 }
 0x4da   :  { %v10546_v12 = vadd.f32 %v10545_v23, %v10544_v37 }
 0x4db   :  { %v10548_v57 = vpop.f32.mrf.mxu1  ;;  %v8186_v45 = vadd.f32 %v14358_v60, %v8150_v58  ;;  %v8187_v46 = vadd.f32 %v14358_v60, %v8151_v3  ;;  %v8188_v29 = vadd.f32 %v14358_v60, %v8152_v26  ;;  %v8189_v56 = vadd.f32 %v14358_v60, %v8153_v55 }
 0x4dc   :  { %v8190_v2 = vadd.f32 %v14358_v60, %v8154_v51  ;;  %v8191_v18 = vadd.f32 %v14358_v60, %v8155_v5  ;;  %v8192_v4 = vadd.f32 %v14358_v60, %v8156_v61  ;;  %v8193_v31 = vadd.f32 %v14358_v60, %v8157_v34 }
 0x4dd   :  { %v10550_v11 = vpop.f32.mrf.mxu1  ;;  %v8194_v40 = vadd.f32 %v14358_v60, %v8158_v13  ;;  %v8195_v63 = vadd.f32 %v14358_v60, %v8159_v28  ;;  %v8196_v10 = vadd.f32 %v14358_v60, %v8160_v24  ;;  %v8197_v37 = vadd.f32 %v14358_v60, %v8161_v20 }
 0x4de   :  { %v8198_v58 = vadd.f32 %v14358_v60, %v8162_v62  ;;  %v8199_v36 = vadd.f32 %v14358_v60, %v8163_v14  ;;  %v8200_v21 = vadd.f32 %v14358_v60, %v8164_v43  ;;  %v8201_v3 = vadd.f32 %v14358_v60, %v8165_v33 }
 0x4df   :  { %v10551_v26 = vpop.f32.mrf.mxu1  ;;  %v8202_v55 = vadd.f32 %v14358_v60, %v8166_v50  ;;  %v8203_v51 = vadd.f32 %v14358_v60, %v8167_v54  ;;  %v8050_v23 = vadd.f32 %v7978_v41, %v14129_v1  ;;  %v8220_v0 = vmax.f32 %v8188_v29, 0.0 }
 0x4e0   :  { %v8224_v5 = vmax.f32 %v8192_v4, 0.0  ;;  %v8228_v61 = vmax.f32 %v8196_v10, 0.0  ;;  %v8232_v34 = vmax.f32 %v8200_v21, 0.0  ;;  %v8218_v13 = vmax.f32 %v8186_v45, 0.0 }
 0x4e1   :  { %v10553_v28 = vpop.f32.mrf.mxu1  ;;  %v8168_v24 = vmul.f32 %v14327_v39, %v8050_v23  ;;  %v8219_v20 = vmax.f32 %v8187_v46, 0.0  ;;  %v8221_v62 = vmax.f32 %v8189_v56, 0.0  ;;  %v8222_v14 = vmax.f32 %v8190_v2, 0.0 }
 0x4e2   :  { %v8252_v43 = vmax.f32 %v8220_v0, %v8224_v5  ;;  %v8223_v33 = vmax.f32 %v8191_v18, 0.0  ;;  %v8225_v15 = vmax.f32 %v8193_v31, 0.0  ;;  %v8226_v30 = vmax.f32 %v8194_v40, 0.0 }
 0x4e3   :  { %v10554_v50 = vpop.f32.mrf.mxu1  ;;  %v8204_v54 = vadd.f32 %v14358_v60, %v8168_v24  ;;  %v8227_v32 = vmax.f32 %v8195_v63, 0.0  ;;  %v8229_v1 = vmax.f32 %v8197_v37, 0.0  ;;  %v8230_v41 = vmax.f32 %v8198_v58, 0.0 }
 0x4e4   :  { %v8256_v29 = vmax.f32 %v8252_v43, %v8228_v61  ;;  %v8231_v4 = vmax.f32 %v8199_v36, 0.0  ;;  %v8233_v10 = vmax.f32 %v8201_v3, 0.0  ;;  %v8234_v45 = vmax.f32 %v8202_v55, 0.0 }
 0x4e5   :  { %v10556_v21 = vpop.f32.mrf.mxu1  ;;  %v8236_v38 = vmax.f32 %v8204_v54, 0.0  ;;  %v8235_v23 = vmax.f32 %v8203_v51, 0.0  ;;  %v8250_v46 = vmax.f32 %v8218_v13, %v8222_v14  ;;  %v8251_v56 = vmax.f32 %v8219_v20, %v8223_v33 }
 0x4e6   :  { %v8260_v2 = vmax.f32 %v8256_v29, %v8232_v34  ;;  %v8253_v0 = vmax.f32 %v8221_v62, %v8225_v15  ;;  %v7981_v18 = vadd.f32 %v14271_v53, %v10546_v12  ;;  %v10549_v31 = vadd.f32 %v10548_v57, %v10547_v27 }
 0x4e7   :  { %v10557_v40 = vpop.f32.mrf.mxu1  ;;  %v8254_v5 = vmax.f32 %v8250_v46, %v8226_v30  ;;  %v8255_v24 = vmax.f32 %v8251_v56, %v8227_v32  ;;  %v10552_v63 = vadd.f32 %v10551_v26, %v10550_v11  ;;  %v10555_v37 = vadd.f32 %v10554_v50, %v10553_v28 }
 0x4e8   :  { %v8264_v58 = vmax.f32 %v8260_v2, %v8236_v38  ;;  %v8051_v36 = vadd.f32 %v7981_v18, %v14138_v7  ;;  %v8257_v3 = vmax.f32 %v8253_v0, %v8229_v1  ;;  %v7986_v55 = vadd.f32 %v10549_v31, %v14282_v17 }
 0x4e9   :  { %v10559_v61 = vpop.f32.mrf.mxu1  ;;  %v8258_v51 = vmax.f32 %v8254_v5, %v8230_v41  ;;  %v8259_v13 = vmax.f32 %v8255_v24, %v8231_v4  ;;  %v7989_v34 = vadd.f32 %v10552_v63, %v14293_v59  ;;  %v7994_v15 = vadd.f32 %v14280_v6, %v10555_v37 }
 0x4ea   :  { %v8169_v53 = vmul.f32 %v14327_v39, %v8051_v36  ;;  %v8261_v27 = vmax.f32 %v8257_v3, %v8233_v10  ;;  %v8052_v32 = vadd.f32 %v7986_v55, %v14157_v44  ;;  %v10558_v30 = vadd.f32 %v10557_v40, %v10556_v21 }
 0x4eb   :  { %v10560_v12 = vpop.f32.mrf.mxu1  ;;  %v8262_v38 = vmax.f32 %v8258_v51, %v8234_v45  ;;  %v8263_v57 = vmax.f32 %v8259_v13, %v8235_v23  ;;  %v8053_v7 = vadd.f32 %v7989_v34, %v14167_v9  ;;  %v8054_v17 = vadd.f32 %v7994_v15, %v14154_v8 }
 0x4ec   :  { %v8205_v11 = vadd.f32 %v14358_v60, %v8169_v53  ;;  %v8170_v26 = vmul.f32 %v14327_v39, %v8052_v32  ;;  %v7997_v59 = vadd.f32 %v14291_v47, %v10558_v30  ;;  %v10561_v6 = vadd.f32 %v10560_v12, %v10559_v61 }
 0x4ed   :  { %v10562_v28 = vpop.f32.mrf.mxu1  ;;  %v8171_v20 = vmul.f32 %v14327_v39, %v8053_v7  ;;  %v8172_v44 = vmul.f32 %v14327_v39, %v8054_v17 }
 0x4ee   :  { %v8237_v62 = vmax.f32 %v8205_v11, 0.0  ;;  %v8206_v14 = vadd.f32 %v14358_v60, %v8170_v26  ;;  %v8055_v43 = vadd.f32 %v7997_v59, %v14164_v49  ;;  %v8002_v9 = vadd.f32 %v10561_v6, %v14299_v25  ;;  %v14780_v11 = vld [vmem:[#allocation49_spill] sm:$0xff] }
 0x4ef   :  { %v10563_v8 = vpop.f32.mrf.mxu1  ;;  %v8207_v33 = vadd.f32 %v14358_v60, %v8171_v20  ;;  %v8208_v50 = vadd.f32 %v14358_v60, %v8172_v44  ;;  %v14781_v20 = vld [vmem:[#allocation52_spill] sm:$0xff] }
 0x4f0   :  { %v10564_v54 = vadd.f32 %v10563_v8, %v10562_v28  ;;  %v8265_v47 = vmax.f32 %v8261_v27, %v8237_v62  ;;  %v8238_v1 = vmax.f32 %v8206_v14, 0.0  ;;  %v8173_v41 = vmul.f32 %v14327_v39, %v8055_v43  ;;  %v14782_v43 = vld [vmem:[#allocation45_spill] sm:$0xff] }
 0x4f1   :  { %v8056_v29 = vadd.f32 %v8002_v9, %v14174_v48  ;;  %v10565_v4 = vpop.f32.mrf.mxu1  ;;  %v8239_v10 = vmax.f32 %v8207_v33, 0.0  ;;  %v8240_v45 = vmax.f32 %v8208_v50, 0.0 }
 0x4f2   :  { %v8005_v21 = vadd.f32 %v10564_v54, %v14305_v16  ;;  %v8266_v49 = vmax.f32 %v8262_v38, %v8238_v1  ;;  %v8209_v25 = vadd.f32 %v14358_v60, %v8173_v41 }
 0x4f3   :  { %v8174_v23 = vmul.f32 %v14327_v39, %v8056_v29  ;;  %v10566_v46 = vpop.f32.mrf.mxu1  ;;  %v8267_v56 = vmax.f32 %v8263_v57, %v8239_v10  ;;  %v8268_v2 = vmax.f32 %v8264_v58, %v8240_v45  ;;  %v14784_v10 = vld [vmem:[#allocation47_spill] sm:$0xff] }
 0x4f4   :  { %v8057_v0 = vadd.f32 %v8005_v21, %v14182_v22  ;;  %v10567_v18 = vadd.f32 %v10566_v46, %v10565_v4  ;;  %v8241_v31 = vmax.f32 %v8209_v25, 0.0 }
 0x4f5   :  { %v8210_v40 = vadd.f32 %v14358_v60, %v8174_v23  ;;  %v10568_v48 = vpop.f32.mrf.mxu1  ;;  %v14785_v23 = vld [vmem:[#allocation10_spill] sm:$0xff] }
 0x4f6   :  { %v8175_v5 = vmul.f32 %v14327_v39, %v8057_v0  ;;  %v8010_v24 = vadd.f32 %v14297_v35, %v10567_v18  ;;  %v8269_v16 = vmax.f32 %v8265_v47, %v8241_v31  ;;  %v14783_v47 = vld [vmem:[#allocation9_spill] sm:$0xff]  ;;  %v14786_v0 = vld [vmem:[#allocation43_spill] sm:$0xff] }
 0x4f7   :  { %v8242_v63 = vmax.f32 %v8210_v40, 0.0  ;;  %v10569_v37 = vpop.f32.mrf.mxu1 }
 0x4f8   :  { %v8211_v36 = vadd.f32 %v14358_v60, %v8175_v5  ;;  %v8058_v3 = vadd.f32 %v8010_v24, %v14176_v52  ;;  %v10570_v55 = vadd.f32 %v10569_v37, %v10568_v48  ;;  %v14779_v52 = vld [vmem:[#allocation44_spill] sm:$0xff] }
 0x4f9   :  { %v8270_v58 = vmax.f32 %v8266_v49, %v8242_v63  ;;  %v10571_v61 = vpop.f32.mrf.mxu1  ;;  %v14787_v5 = vld [vmem:[#allocation8_spill] sm:$0xff] }
 0x4fa   :  { %v8243_v22 = vmax.f32 %v8211_v36, 0.0  ;;  %v8176_v51 = vmul.f32 %v14327_v39, %v8058_v3  ;;  %v8013_v13 = vadd.f32 %v14302_v42, %v10570_v55  ;;  %v4475_v24 = vrot.slane %v14787_v5, 4 }
 0x4fb   :  { %v10572_v34 = vpop.f32.mrf.mxu1 }
 0x4fc   :  { %v8271_v15 = vmax.f32 %v8267_v56, %v8243_v22  ;;  %v8212_v53 = vadd.f32 %v14358_v60, %v8176_v51  ;;  %v8059_v35 = vadd.f32 %v8013_v13, %v14184_v19  ;;  %v10573_v27 = vadd.f32 %v10572_v34, %v10571_v61 }
 0x4fd   :  { %v10574_v32 = vpop.f32.mrf.mxu1  ;;  %v4476_v36 = vmax.f32 %v14787_v5, %v4475_v24 }
 0x4fe   :  { %v8244_v30 = vmax.f32 %v8212_v53, 0.0  ;;  %v8177_v12 = vmul.f32 %v14327_v39, %v8059_v35  ;;  %v8018_v38 = vadd.f32 %v10573_v27, %v14779_v52  ;;  %v11502_v52 = vld [vmem:[%s14501_s11] sm:$0xff]  }
 0x4ff   :  { %v10575_v57 = vpop.f32.mrf.mxu1 }
 0x500   :  { %v8272_v7 = vmax.f32 %v8268_v2, %v8244_v30  ;;  %v8213_v17 = vadd.f32 %v14358_v60, %v8177_v12  ;;  %v8060_v26 = vadd.f32 %v8018_v38, %v14780_v11  ;;  %v10576_v42 = vadd.f32 %v10575_v57, %v10574_v32  ;;  %v11501_v12 = vld [vmem:[%s14501_s11 + $0x8] sm:$0xff]   ;;  %v11503_v38 = vld [vmem:[%s14503_s13 + $0x38] sm:$0xff]   ;;  %v11504_v57 = vld [vmem:[%s14503_s13 + $0x30] sm:$0xff]  }
 0x501   :  { %v10577_v59 = vpop.f32.mrf.mxu1  ;;  %11023 = vmatpush3.bf16.msra.mxu0 %v11501_v12  ;;  %v11507_v11 = vld [vmem:[%s14503_s13 + $0x18] sm:$0xff]  }
 0x502   :  { %v8245_v6 = vmax.f32 %v8213_v17, 0.0  ;;  %v8178_v28 = vmul.f32 %v14327_v39, %v8060_v26  ;;  %v8021_v19 = vadd.f32 %v10576_v42, %v14781_v20  ;;  %v11506_v17 = vld [vmem:[%s14503_s13 + $0x20] sm:$0xff]   ;;  %v11508_v26 = vld [vmem:[%s14503_s13 + $0x10] sm:$0xff]  }
 0x503   :  { %v10578_v44 = vpop.f32.mrf.mxu1  ;;  %v9538_v42 = vld [vmem:[%s14500_s10] ss:$0 sm:$0xff] }
 0x504   :  { %v8273_v62 = vmax.f32 %v8269_v16, %v8245_v6  ;;  %v8214_v14 = vadd.f32 %v14358_v60, %v8178_v28  ;;  %v8061_v9 = vadd.f32 %v8021_v19, %v14782_v43  ;;  %v10579_v8 = vadd.f32 %v10578_v44, %v10577_v59  ;;  %v11510_v43 = vld [vmem:[%s14503_s13] sm:$0xff]  }
 0x505   :  { %v10580_v33 = vpop.f32.mrf.mxu1 }
 0x506   :  { %v8246_v50 = vmax.f32 %v8214_v14, 0.0  ;;  %v8179_v54 = vmul.f32 %v14327_v39, %v8061_v9  ;;  %v8026_v1 = vadd.f32 %v14783_v47, %v10579_v8  ;;  %v11509_v14 = vld [vmem:[%s14503_s13 + $0x8] sm:$0xff]   ;;  %v9547_v9 = vld [vmem:[%s14502_s12] ss:$0 sm:$0xff] }
 0x507   :  { %v10581_v41 = vpop.f32.mrf.mxu1 }
 0x508   :  { %v8274_v29 = vmax.f32 %v8270_v58, %v8246_v50  ;;  %v8215_v4 = vadd.f32 %v14358_v60, %v8179_v54  ;;  %v8062_v45 = vadd.f32 %v8026_v1, %v14784_v10  ;;  %v10582_v21 = vadd.f32 %v10581_v41, %v10580_v33 }
 0x509   :  { %v4477_v58 = vrot.slane %v4476_v36, 2 }
 0x50a   :  { %v8247_v49 = vmax.f32 %v8215_v4, 0.0  ;;  %v8180_v25 = vmul.f32 %v14327_v39, %v8062_v45  ;;  %v8029_v46 = vadd.f32 %v14785_v23, %v10582_v21 }
 0x50b   :  { %v4478_v51 = vmax.f32 %v4476_v36, %v4477_v58 }
 0x50c   :  { %v8275_v56 = vmax.f32 %v8271_v15, %v8247_v49  ;;  %v8216_v2 = vadd.f32 %v14358_v60, %v8180_v25  ;;  %v8063_v18 = vadd.f32 %v8029_v46, %v14786_v0 }
 0x50d   :  { %v4479_v15 = vrot.slane %v4478_v51, 1 }
 0x50e   :  { %v8278_v31 = vmax.f32 %v8274_v29, %v8275_v56  ;;  %v8248_v40 = vmax.f32 %v8216_v2, 0.0  ;;  %v8181_v48 = vmul.f32 %v14327_v39, %v8063_v18  ;;  %v9556_v29 = vld [vmem:[%s14504_s14] ss:$0 sm:$0xff] }
 0x50f   :  { %v4480_v27 = vmax.f32 %v4478_v51, %v4479_v15 }
 0x510   :  { %v8276_v16 = vmax.f32 %v8272_v7, %v8248_v40  ;;  %v8217_v63 = vadd.f32 %v14358_v60, %v8181_v48  ;;  %v14788_v60 = vld [vmem:[#allocation48_spill] sm:$0xff] }
 0x511   :  { %11024 = vmatprep.subr.bf16.mxu0 %v14788_v60  ;;  %v11505_v7 = vld [vmem:[%s14503_s13 + $0x28] sm:$0xff]   ;;  %s11545_s13 = smov [#allocation4]  }
 0x512   :  { %v8249_v37 = vmax.f32 %v8217_v63, 0.0  ;;  %11025 = vmatpush3.bf16.msra.mxu0 %v11502_v52  ;;  %s8634_s1 = sshll.u32 %s11545_s13, 4  ;;  %s8635_s1 = int_to_ptr.vmem [resolvable:$true] %s8634_s1 }
 0x513   :  { %s11520_s12 = scalar_lea.vmem %s8635_s1, 32  ;;  %p11525_p1 = scmp.lt.s32.totalorder %s8635_s1, %s8635_s1 }
 0x514   :  { %v8277_v3 = vmax.f32 %v8273_v62, %v8249_v37  ;;  %p11521_p0 = scmp.ne.s32.totalorder %s8635_s1, %s11520_s12  ;;  %p11526_p2 = scmp.lt.s32.totalorder %s11520_s12, %s11520_s12 }
 0x516   :  { %v8279_v55 = vmax.f32 %v8276_v16, %v8277_v3  ;;  %p11527_p3 = por %p11526_p2, %p11525_p1 }
 0x518   :  { %v8280_v61 = vmax.f32 %v8278_v31, %v8279_v55  ;;  %p11528_p4 = pnand %p11527_p3, %p11521_p0 }
 0x51a   :  { %v8281_v22 = vrot.slane %v8280_v61, 4 }
 0x51c   :  { %v8282_v13 = vmax.f32 %v8280_v61, %v8281_v22 }
 0x51e   :  { %v8283_v34 = vrot.slane %v8282_v13, 2 }
 0x520   :  { %v8284_v53 = vmax.f32 %v8282_v13, %v8283_v34 }
 0x522   :  { %v8285_v35 = vrot.slane %v8284_v53, 1 }
 0x524   :  { %v8286_v39 = vmax.f32 %v8284_v53, %v8285_v35 }
 0x526   :  { %v8288_v32 = vsel %vm8287_vm6, %v4480_v27, %v8286_v39 }
 0x527   :  { %v8289_v30 = vpack.c.bf16 %v8288_v32, %v8288_v32 }
 0x529   :  { %11007 = vmatmul.mubr.bf16.vlgmr.msra.gmra.mxu1 %v8289_v30 }
 0x52a   :  { %11046 = vmatprep.mubr.msk.bf16.mxu1 %vm11544_vm11, %v14788_v60  ;;  %11031 = vmatpush3.bf16.msra.mxu1 %v11503_v38 }
 0x52b   :  { %11032 = vmatprep.subr.bf16.mxu1 %v14788_v60 }
 0x52e   :  { %11033 = vmatpush3.bf16.msra.mxu1 %v11504_v57 }
 0x52f   :  { %11034 = vmatprep.subr.bf16.mxu1 %v14788_v60 }
 0x532   :  { %11035 = vmatpush3.bf16.msra.mxu1 %v11505_v7 }
 0x533   :  { %11036 = vmatprep.subr.bf16.mxu1 %v14788_v60 }
 0x536   :  { %11037 = vmatpush3.bf16.msra.mxu1 %v11506_v17 }
 0x537   :  { %11038 = vmatprep.subr.bf16.mxu1 %v14788_v60 }
 0x53a   :  { %11039 = vmatpush3.bf16.msra.mxu1 %v11507_v11 }
 0x53b   :  { %11040 = vmatprep.subr.bf16.mxu1 %v14788_v60 }
 0x53e   :  { %11041 = vmatpush3.bf16.msra.mxu1 %v11508_v26 }
 0x53f   :  { %11042 = vmatprep.subr.bf16.mxu1 %v14788_v60 }
 0x542   :  { %11043 = vmatpush3.bf16.msra.mxu1 %v11509_v14 }
 0x543   :  { %11044 = vmatprep.subr.bf16.mxu1 %v14788_v60 }
 0x546   :  { %11045 = vmatpush3.bf16.msra.mxu1 %v11510_v43 }
 0x5e9   :  { %v8395_v59 = vpop.f32.mrf.mxu1 }
 0x5ea   :  { %v8396_v6 = vadd.f32 %v9538_v42, %v8395_v59 }
 0x5eb   :  { %v11008_v28 = vpop.f32.mrf.mxu1 }
 0x5ec   :  { %v8401_v20 = vmax.f32 %v8396_v6, 0.0 }
 0x5ed   :  { %v8398_v19 = vpop.f32.mrf.mxu1 }
 0x5ee   :  { %v8402_v44 = vpack.c.bf16 %v8401_v20, %v8401_v20 }
 0x5ef   :  { %v11009_v62 = vpop.f32.mrf.mxu1 }
 0x5f0   :  { %11027 = vmatmul.mubr.bf16.vlgmr.msra.gmra.mxu0 %v8402_v44 }
 0x6b0   :  { %v8508_v8 = vpop.f32.mrf.mxu0 }
 0x6b1   :  { %v8509_v33 = vadd.f32 %v9547_v9, %v8508_v8 }
 0x6b2   :  { %v11028_v50 = vpop.f32.mrf.mxu0 }
 0x6b3   :  { %v8514_v54 = vmax.f32 %v8509_v33, 0.0 }
 0x6b4   :  { %v8511_v47 = vpop.f32.mrf.mxu0 }
 0x6b5   :  { %v8515_v1 = vpack.c.bf16 %v8514_v54, %v8514_v54 }
 0x6b6   :  { %v11029_v41 = vpop.f32.mrf.mxu0 }
 0x6b7   :  { %11047 = vmatmul.mubr.bf16.vlgmr.msra.gmra.mxu1 %v8515_v1 }
 0x777   :  { %v8621_v4 = vpop.f32.mrf.mxu1 }
 0x778   :  { %v8622_v10 = vadd.f32 %v9556_v29, %v8621_v4 }
 0x779   :  { %v11048_v45 = vpop.f32.mrf.mxu1 }
 0x77a   :  { %8627 = vst [vmem:[#allocation4] sm:$0x3] %v8622_v10 }
 0x77b   :  { %v8624_v21 = vpop.f32.mrf.mxu1 }
 0x77c   :  { %11531 = shalt.err (!%p11528_p4)
}
 0x77d   :  { %8637 = dma.vmem_to_hbm [thread:$0]  %s8635_s1, 32, %s14505_s15, [#allocation5]   ;;  %v11049_v49 = vpop.f32.mrf.mxu1 }
 0x77e   :  { %11540 = dma.done.wait [#allocation5], 32  }
 0x77f   :  { %11541 = vsyncadd [#allocation5], 4294967264 }
 0x780   :  { %8641 = vsyncpa [#allocation5], 1 }

</bundles_post_ra>
